<compile_context>
chip_gen: v5e
topology: v5e:2x2
jax: 0.10.0
libtpu: 0.0.40
codegen_flags: <defaults>
</compile_context>

<pallas_src>
import functools

import jax
import jax.numpy as jnp
from jax.experimental import pallas as pl
from jax.experimental.pallas import tpu as pltpu


# ------------------------------ fused kernel -------------------------------


def _value_net_kernel(
    x_ref,
    w_in_ref, b_in_ref, w_out_ref, b_out_ref,
    ln1_g_ref, ln1_b_ref,
    w_ff1_ref, b_ff1_ref, w_ff2_ref, b_ff2_ref,
    ln2_g_ref, ln2_b_ref,
    head_w1_ref, head_b1_ref, head_w2_ref, head_b2_ref,
    o_ref,
    *, num_layers, num_heads,
):
    # x_ref block: [Bt, S, D] (bf16), one batch block per grid step.
    Bt, S, D = x_ref.shape
    Dh = D // num_heads
    M = Bt * S

    # Residual stream, f32, flattened to [Bt*S, D] so every dense GEMM sees
    # M = Bt*S rows on the MXU instead of M = S.
    x = x_ref[...].astype(jnp.float32).reshape(M, D)

    def layer_norm(v, g, b):
        mu = jnp.mean(v, axis=-1, keepdims=True)
        var = jnp.mean(jnp.square(v - mu), axis=-1, keepdims=True)
        return (v - mu) * jax.lax.rsqrt(var + 1e-5) * g + b

    # num_layers is tiny (2 here): static unroll is correct and cheapest.
    # (If layers grow, switch to lax.fori_loop over the stacked weight refs.)
    for li in range(num_layers):
        # ---- fused QKV projection (scale already folded into q weights) ----
        qkv = jnp.dot(x.astype(jnp.bfloat16), w_in_ref[li],
                      preferred_element_type=jnp.float32) + b_in_ref[li]      # [M, 3D]

        # ---- per-head attention, batched over the Bt samples in this block ----
        w_out_l = w_out_ref[li]                                               # [H, Dh, D]
        attn_acc = jnp.zeros((M, D), jnp.float32)
        for h in range(num_heads):
            q = qkv[:, h * Dh:(h + 1) * Dh].reshape(Bt, S, Dh).astype(jnp.bfloat16)
            k = qkv[:, D + h * Dh:D + (h + 1) * Dh].reshape(Bt, S, Dh).astype(jnp.bfloat16)
            v = qkv[:, 2 * D + h * Dh:2 * D + (h + 1) * Dh].reshape(Bt, S, Dh).astype(jnp.bfloat16)

            s = jax.lax.dot_general(q, k, (((2,), (2,)), ((0,), (0,))),
                                    preferred_element_type=jnp.float32)       # [Bt, S, S]
            s = s - jnp.max(s, axis=-1, keepdims=True)
            p = jnp.exp(s)
            inv_l = pl.reciprocal(jnp.sum(p, axis=-1, keepdims=True), approx=True)
            o = jax.lax.dot_general(p.astype(jnp.bfloat16), v,
                                    (((2,), (1,)), ((0,), (0,))),
                                    preferred_element_type=jnp.float32) * inv_l  # [Bt, S, Dh]

            # fold out_proj per head: no lane concatenate of 32-wide head outputs
            attn_acc += jnp.dot(o.reshape(M, Dh).astype(jnp.bfloat16), w_out_l[h],
                                preferred_element_type=jnp.float32)           # [M, D]

        # ---- out_proj bias + residual + LayerNorm1 ----
        x = layer_norm(x + attn_acc + b_out_ref[li], ln1_g_ref[li], ln1_b_ref[li])

        # ---- FFN (ReLU) + residual + LayerNorm2 ----
        ff = jnp.dot(x.astype(jnp.bfloat16), w_ff1_ref[li],
                     preferred_element_type=jnp.float32) + b_ff1_ref[li]      # [M, 4D]
        ff = jnp.maximum(ff, 0.0)
        ff2 = jnp.dot(ff.astype(jnp.bfloat16), w_ff2_ref[li],
                      preferred_element_type=jnp.float32) + b_ff2_ref[li]     # [M, D]
        x = layer_norm(x + ff2, ln2_g_ref[li], ln2_b_ref[li])

    # ---- mean pool over the sequence axis ----
    pooled = jnp.mean(x.reshape(Bt, S, D), axis=1)                            # [Bt, D]

    # ---- all value heads at once: stacked Linear+ReLU, block-diagonal (lane-
    # dense, zero-padded to 128 output columns) second layer ----
    hid = jnp.dot(pooled.astype(jnp.bfloat16), head_w1_ref[...],
                  preferred_element_type=jnp.float32) + head_b1_ref[...]      # [Bt, (1+F)*Dh2]
    hid = jnp.maximum(hid, 0.0)
    vals = jnp.dot(hid.astype(jnp.bfloat16), head_w2_ref[...],
                   preferred_element_type=jnp.float32) + head_b2_ref[...]     # [Bt, 128]
    o_ref[...] = vals.astype(o_ref.dtype)

    # TODO(synk): dropout (p=0.1) is stochastic/train-only; forward implemented in eval mode.


# ------------------------------ parameters ---------------------------------


def init_params(key, D, H, n_layers, n_frameworks):
    """PyTorch-layout parameters (weights are [out, in])."""
    Dff = 4 * D
    Dh2 = D // 2

    def nrm(k, shape, scale=0.02):
        return scale * jax.random.normal(k, shape, dtype=jnp.float32)

    params = {"layers": [], "heads": {}}
    keys = jax.random.split(key, n_layers + n_frameworks + 1)
    for li in range(n_layers):
        lk = jax.random.split(keys[li], 6)
        params["layers"].append(
            dict(
                in_proj_w=nrm(lk[0], (3 * D, D)),
                in_proj_b=jnp.zeros((3 * D,), jnp.float32),
                out_proj_w=nrm(lk[1], (D, D)),
                out_proj_b=jnp.zeros((D,), jnp.float32),
                ln1_g=jnp.ones((D,), jnp.float32),
                ln1_b=jnp.zeros((D,), jnp.float32),
                ff1_w=nrm(lk[2], (Dff, D)),
                ff1_b=jnp.zeros((Dff,), jnp.float32),
                ff2_w=nrm(lk[3], (D, Dff)),
                ff2_b=jnp.zeros((D,), jnp.float32),
                ln2_g=jnp.ones((D,), jnp.float32),
                ln2_b=jnp.zeros((D,), jnp.float32),
            )
        )

    def head_params(k):
        hk = jax.random.split(k, 2)
        return dict(
            w1=nrm(hk[0], (Dh2, D)),
            b1=jnp.zeros((Dh2,), jnp.float32),
            w2=nrm(hk[1], (1, Dh2)),
            b2=jnp.zeros((1,), jnp.float32),
        )

    params["global_head"] = head_params(keys[n_layers])
    for i in range(n_frameworks):
        params["heads"][f"framework_{i}"] = head_params(keys[n_layers + 1 + i])
    return params


def prep_params(params, num_heads):
    """Reformat PyTorch-layout params for the fused kernel:
    transpose weights to [K, N], fold the attention scale into q, split
    out_proj per head, cast matmul weights to bf16, stack across layers, batch
    all value heads and zero-pad the final head matmul to 128 lane-dense
    output columns."""
    D = params["layers"][0]["out_proj_w"].shape[0]
    Dh = D // num_heads
    scale = 1.0 / (Dh ** 0.5)
    LANES = 128

    def stack(fn):
        return jnp.stack([fn(p) for p in params["layers"]], axis=0)

    def in_proj_w(p):
        w = p["in_proj_w"].T                      # [D, 3D]
        w = w.at[:, :D].multiply(scale)           # fold 1/sqrt(Dh) into q cols
        return w.astype(jnp.bfloat16)

    def in_proj_b(p):
        b = p["in_proj_b"].at[:D].multiply(scale)
        return b.reshape(1, 3 * D)

    def out_proj_w(p):
        # W_out^T split into per-head row blocks: [H, Dh, D]
        return p["out_proj_w"].T.reshape(num_heads, Dh, D).astype(jnp.bfloat16)

    prepped = dict(
        w_in=stack(in_proj_w),                               # [L, D, 3D]  bf16
        b_in=stack(in_proj_b),                               # [L, 1, 3D]  f32
        w_out=stack(out_proj_w),                             # [L, H, Dh, D] bf16
        b_out=stack(lambda p: p["out_proj_b"].reshape(1, D)),
        ln1_g=stack(lambda p: p["ln1_g"].reshape(1, D)),
        ln1_b=stack(lambda p: p["ln1_b"].reshape(1, D)),
        w_ff1=stack(lambda p: p["ff1_w"].T.astype(jnp.bfloat16)),
        b_ff1=stack(lambda p: p["ff1_b"].reshape(1, -1)),
        w_ff2=stack(lambda p: p["ff2_w"].T.astype(jnp.bfloat16)),
        b_ff2=stack(lambda p: p["ff2_b"].reshape(1, D)),
        ln2_g=stack(lambda p: p["ln2_g"].reshape(1, D)),
        ln2_b=stack(lambda p: p["ln2_b"].reshape(1, D)),
    )

    # value heads, order: [global, framework_0, ..., framework_{F-1}]
    n_frameworks = len(params["heads"])
    heads = [params["global_head"]] + [
        params["heads"][f"framework_{i}"] for i in range(n_frameworks)]
    n_total = len(heads)
    Dh2 = heads[0]["w1"].shape[0]
    n_out = ((n_total + LANES - 1) // LANES) * LANES          # lane-dense pad

    head_w1 = jnp.concatenate([h["w1"].T for h in heads], axis=1)   # [D, n_total*Dh2]
    head_b1 = jnp.concatenate([h["b1"] for h in heads], axis=0).reshape(1, -1)
    w2_blk = jnp.zeros((n_total * Dh2, n_out), jnp.float32)
    for i, h in enumerate(heads):
        w2_blk = w2_blk.at[i * Dh2:(i + 1) * Dh2, i].set(h["w2"][0])
    b2 = jnp.zeros((1, n_out), jnp.float32)
    b2 = b2.at[0, :n_total].set(jnp.concatenate([h["b2"] for h in heads], axis=0))

    prepped.update(
        head_w1=head_w1.astype(jnp.bfloat16),
        head_b1=head_b1,
        head_w2=w2_blk.astype(jnp.bfloat16),
        head_b2=b2,
        n_value_heads=n_total,        # python int, consumed by the wrapper only
    )
    return prepped


# ----------------------------- forward wrapper -----------------------------

_WEIGHT_KEYS = (
    "w_in", "b_in", "w_out", "b_out", "ln1_g", "ln1_b",
    "w_ff1", "b_ff1", "w_ff2", "b_ff2", "ln2_g", "ln2_b",
    "head_w1", "head_b1", "head_w2", "head_b2",
)


def value_network_forward(hidden_states, prepped, num_heads,
                          active_frameworks=None, num_batch_blocks=2):
    B, S, D = hidden_states.shape
    num_layers = prepped["w_in"].shape[0]
    n_total = prepped["n_value_heads"]             # 1 + num_frameworks
    n_out = prepped["head_b2"].shape[-1]           # lane-padded output width

    # exactly `num_batch_blocks` grid steps (2 -> one per v7x TensorCore);
    # pad B up so the batch block divides evenly.
    n_blocks = max(1, min(num_batch_blocks, B))
    Bt = -(-B // n_blocks)                         # cdiv
    B_pad = Bt * n_blocks
    x = hidden_states.astype(jnp.bfloat16)         # halve input DMA
    if B_pad != B:
        x = jnp.pad(x, ((0, B_pad - B), (0, 0), (0, 0)))

    def weight_spec(shape):
        n = len(shape)
        return pl.BlockSpec(shape, lambda b, _n=n: (0,) * _n)   # grid-invariant

    in_specs = [pl.BlockSpec((Bt, S, D), lambda b: (b, 0, 0))]
    args = [x]
    for key in _WEIGHT_KEYS:
        arr = prepped[key]
        in_specs.append(weight_spec(arr.shape))
        args.append(arr)

    out = pl.pallas_call(
        functools.partial(_value_net_kernel,
                          num_layers=num_layers, num_heads=num_heads),
        out_shape=jax.ShapeDtypeStruct((B_pad, n_out), jnp.float32),
        grid=(n_blocks,),
        in_specs=in_specs,
        out_specs=pl.BlockSpec((Bt, n_out), lambda b: (b, 0)),
        compiler_params=pltpu.CompilerParams(
            dimension_semantics=("parallel",),
            vmem_limit_bytes=32 * 1024 * 1024),
    )(*args)

    vals = out[:B, :n_total]
    result = {"global_value": vals[:, 0:1], "framework_values": {}}
    if active_frameworks:
        for fw in active_frameworks:
            if 0 <= fw < n_total - 1:              # head exists
                result["framework_values"][f"framework_{fw}"] = vals[:, 1 + fw:2 + fw]
    return result


# ------------------------ pure-JAX f32 reference ----------------------------


def _reference_forward(hidden_states, params, num_heads):
    x = hidden_states.astype(jnp.float32)
    B, S, D = x.shape
    Dh = D // num_heads

    def ln(v, g, b):
        mu = v.mean(-1, keepdims=True)
        var = ((v - mu) ** 2).mean(-1, keepdims=True)
        return (v - mu) * jax.lax.rsqrt(var + 1e-5) * g + b

    for p in params["layers"]:
        qkv = jnp.einsum('bsd,ed->bse', x, p["in_proj_w"]) + p["in_proj_b"]
        q, k, v = qkv[..., :D], qkv[..., D:2 * D], qkv[..., 2 * D:]
        split = lambda t: t.reshape(B, S, num_heads, Dh).transpose(0, 2, 1, 3)
        q, k, v = split(q), split(k), split(v)
        s = jnp.einsum('bhqd,bhkd->bhqk', q, k) / (Dh ** 0.5)
        a = jax.nn.softmax(s, axis=-1)
        o = jnp.einsum('bhqk,bhkd->bhqd', a, v).transpose(0, 2, 1, 3).reshape(B, S, D)
        o = jnp.einsum('bsd,ed->bse', o, p["out_proj_w"]) + p["out_proj_b"]
        x = ln(x + o, p["ln1_g"], p["ln1_b"])
        ff = jnp.maximum(jnp.einsum('bsd,fd->bsf', x, p["ff1_w"]) + p["ff1_b"], 0.0)
        ff2 = jnp.einsum('bsf,df->bsd', ff, p["ff2_w"]) + p["ff2_b"]
        x = ln(x + ff2, p["ln2_g"], p["ln2_b"])

    pooled = x.mean(axis=1)

    def head(hp):
        h = jnp.maximum(pooled @ hp["w1"].T + hp["b1"], 0.0)
        return h @ hp["w2"].T + hp["b2"]

    return head(params["global_head"]), {n: head(hp) for n, hp in params["heads"].items()}


# ----------------------------------- main -----------------------------------

if __name__ == "__main__":
    # small config consistent with GRPOConfig: model_dim=128, num_heads=4,
    # num_layers=4 -> backbone has 2 encoder layers, num_frameworks=3.
    # B=16 so each of the 2 batch blocks feeds Bt*S = 64 rows to the MXU.
    B, S, D, H = 16, 8, 128, 4
    NUM_LAYERS = 4
    NUM_FRAMEWORKS = 3

    key = jax.random.PRNGKey(0)
    k_param, k_x = jax.random.split(key)
    params = init_params(k_param, D, H, NUM_LAYERS // 2, NUM_FRAMEWORKS)
    prepped = prep_params(params, H)
    hidden_states = jax.random.normal(k_x, (B, S, D), dtype=jnp.float32)

    out = value_network_forward(hidden_states, prepped, H, active_frameworks=[0, 2])

    jax.block_until_ready(out["global_value"])
    for v in out["framework_values"].values():
        jax.block_until_ready(v)

    assert out["global_value"].shape == (B, 1)
    assert set(out["framework_values"]) == {"framework_0", "framework_2"}
    assert all(v.shape == (B, 1) for v in out["framework_values"].values())

    # correctness vs pure-JAX f32 eval-mode reference (bf16 MXU tolerance)
    ref_g, ref_fw = _reference_forward(hidden_states, params, H)
    assert jnp.allclose(out["global_value"], ref_g, atol=3e-2, rtol=3e-2)
    for name, v in out["framework_values"].items():
        assert jnp.allclose(v, ref_fw[name], atol=3e-2, rtol=3e-2)

    print("KERNEL_OK")
</pallas_src>

<mosaic_0001>
module attributes {stable_mosaic.version = 11 : i64} {
  func.func @_value_net_kernel(%arg0: i32, %arg1: memref<8x8x128xbf16, #tpu.memory_space<vmem>>, %arg2: memref<2x128x384xbf16, #tpu.memory_space<vmem>>, %arg3: memref<2x1x384xf32, #tpu.memory_space<vmem>>, %arg4: memref<2x4x32x128xbf16, #tpu.memory_space<vmem>>, %arg5: memref<2x1x128xf32, #tpu.memory_space<vmem>>, %arg6: memref<2x1x128xf32, #tpu.memory_space<vmem>>, %arg7: memref<2x1x128xf32, #tpu.memory_space<vmem>>, %arg8: memref<2x128x512xbf16, #tpu.memory_space<vmem>>, %arg9: memref<2x1x512xf32, #tpu.memory_space<vmem>>, %arg10: memref<2x512x128xbf16, #tpu.memory_space<vmem>>, %arg11: memref<2x1x128xf32, #tpu.memory_space<vmem>>, %arg12: memref<2x1x128xf32, #tpu.memory_space<vmem>>, %arg13: memref<2x1x128xf32, #tpu.memory_space<vmem>>, %arg14: memref<128x256xbf16, #tpu.memory_space<vmem>>, %arg15: memref<1x256xf32, #tpu.memory_space<vmem>>, %arg16: memref<256x128xbf16, #tpu.memory_space<vmem>>, %arg17: memref<1x128xf32, #tpu.memory_space<vmem>>, %arg18: memref<8x128xf32, #tpu.memory_space<vmem>>) attributes {dimension_semantics = [#tpu.dimension_semantics<parallel>], iteration_bounds = array<i64: 2>, scalar_prefetch = 0 : i64, scratch_operands = 0 : i64, tpu.core_type = #tpu.core_type<tc>, window_params = [{transform_indices = @transform_0, window_bounds = array<i64: 8, 8, 128>}, {pipeline_mode = #tpu.pipeline_mode<synchronous>, transform_indices = @transform_1, window_bounds = array<i64: 2, 128, 384>}, {pipeline_mode = #tpu.pipeline_mode<synchronous>, transform_indices = @transform_2, window_bounds = array<i64: 2, 1, 384>}, {pipeline_mode = #tpu.pipeline_mode<synchronous>, transform_indices = @transform_3, window_bounds = array<i64: 2, 4, 32, 128>}, {pipeline_mode = #tpu.pipeline_mode<synchronous>, transform_indices = @transform_4, window_bounds = array<i64: 2, 1, 128>}, {pipeline_mode = #tpu.pipeline_mode<synchronous>, transform_indices = @transform_5, window_bounds = array<i64: 2, 1, 128>}, {pipeline_mode = #tpu.pipeline_mode<synchronous>, transform_indices = @transform_6, window_bounds = array<i64: 2, 1, 128>}, {pipeline_mode = #tpu.pipeline_mode<synchronous>, transform_indices = @transform_7, window_bounds = array<i64: 2, 128, 512>}, {pipeline_mode = #tpu.pipeline_mode<synchronous>, transform_indices = @transform_8, window_bounds = array<i64: 2, 1, 512>}, {pipeline_mode = #tpu.pipeline_mode<synchronous>, transform_indices = @transform_9, window_bounds = array<i64: 2, 512, 128>}, {pipeline_mode = #tpu.pipeline_mode<synchronous>, transform_indices = @transform_10, window_bounds = array<i64: 2, 1, 128>}, {pipeline_mode = #tpu.pipeline_mode<synchronous>, transform_indices = @transform_11, window_bounds = array<i64: 2, 1, 128>}, {pipeline_mode = #tpu.pipeline_mode<synchronous>, transform_indices = @transform_12, window_bounds = array<i64: 2, 1, 128>}, {pipeline_mode = #tpu.pipeline_mode<synchronous>, transform_indices = @transform_13, window_bounds = array<i64: 128, 256>}, {pipeline_mode = #tpu.pipeline_mode<synchronous>, transform_indices = @transform_14, window_bounds = array<i64: 1, 256>}, {pipeline_mode = #tpu.pipeline_mode<synchronous>, transform_indices = @transform_15, window_bounds = array<i64: 256, 128>}, {pipeline_mode = #tpu.pipeline_mode<synchronous>, transform_indices = @transform_16, window_bounds = array<i64: 1, 128>}, {transform_indices = @transform_17, window_bounds = array<i64: 8, 128>}]} {
    %c0 = arith.constant 0 : index
    %c0_0 = arith.constant 0 : index
    %c0_1 = arith.constant 0 : index
    %0 = vector.load %arg1[%c0, %c0_0, %c0_1] : memref<8x8x128xbf16, #tpu.memory_space<vmem>>, vector<8x8x128xbf16>
    %1 = arith.extf %0 : vector<8x8x128xbf16> to vector<8x8x128xf32>
    %2 = vector.shape_cast %1 : vector<8x8x128xf32> to vector<64x128xf32>
    %3 = arith.truncf %2 : vector<64x128xf32> to vector<64x128xbf16>
    %c0_2 = arith.constant 0 : index
    %c0_3 = arith.constant 0 : index
    %c0_4 = arith.constant 0 : index
    %4 = vector.load %arg2[%c0_2, %c0_3, %c0_4] : memref<2x128x384xbf16, #tpu.memory_space<vmem>>, vector<1x128x384xbf16>
    %5 = vector.shape_cast %4 : vector<1x128x384xbf16> to vector<128x384xbf16>
    %cst = arith.constant dense<0.000000e+00> : vector<64x384xf32>
    %6 = tpu.matmul %3, %5, %cst {dimension_numbers = #tpu.dot_dimension_numbers<[1], [0], [0], [1], [0, 0, 1, 1], [], []>} : vector<64x128xbf16>, vector<128x384xbf16>, vector<64x384xf32> -> vector<64x384xf32>
    %c0_5 = arith.constant 0 : index
    %c0_6 = arith.constant 0 : index
    %c0_7 = arith.constant 0 : index
    %7 = vector.load %arg3[%c0_5, %c0_6, %c0_7] : memref<2x1x384xf32, #tpu.memory_space<vmem>>, vector<1x1x384xf32>
    %8 = vector.shape_cast %7 : vector<1x1x384xf32> to vector<1x384xf32>
    %9 = vector.broadcast %8 : vector<1x384xf32> to vector<64x384xf32>
    %10 = arith.addf %6, %9 : vector<64x384xf32>
    %c0_8 = arith.constant 0 : index
    %c0_9 = arith.constant 0 : index
    %c0_10 = arith.constant 0 : index
    %c0_11 = arith.constant 0 : index
    %11 = vector.load %arg4[%c0_8, %c0_9, %c0_10, %c0_11] : memref<2x4x32x128xbf16, #tpu.memory_space<vmem>>, vector<1x4x32x128xbf16>
    %12 = vector.shape_cast %11 : vector<1x4x32x128xbf16> to vector<4x32x128xbf16>
    %cst_12 = arith.constant 0.000000e+00 : f32
    %13 = vector.broadcast %cst_12 : f32 to vector<64x128xf32>
    %14 = vector.extract_strided_slice %10 {offsets = [0, 0], sizes = [64, 32], strides = [1, 1]} : vector<64x384xf32> to vector<64x32xf32>
    %15 = vector.shape_cast %14 : vector<64x32xf32> to vector<8x8x32xf32>
    %16 = arith.truncf %15 : vector<8x8x32xf32> to vector<8x8x32xbf16>
    %17 = vector.extract_strided_slice %10 {offsets = [0, 128], sizes = [64, 32], strides = [1, 1]} : vector<64x384xf32> to vector<64x32xf32>
    %18 = vector.shape_cast %17 : vector<64x32xf32> to vector<8x8x32xf32>
    %19 = arith.truncf %18 : vector<8x8x32xf32> to vector<8x8x32xbf16>
    %20 = vector.extract_strided_slice %10 {offsets = [0, 256], sizes = [64, 32], strides = [1, 1]} : vector<64x384xf32> to vector<64x32xf32>
    %21 = vector.shape_cast %20 : vector<64x32xf32> to vector<8x8x32xf32>
    %22 = arith.truncf %21 : vector<8x8x32xf32> to vector<8x8x32xbf16>
    %cst_13 = arith.constant dense<0.000000e+00> : vector<8x8x8xf32>
    %23 = tpu.matmul %16, %19, %cst_13 {dimension_numbers = #tpu.dot_dimension_numbers<[2], [2], [1], [1], [0, 0, 0, 1, 1, 1], [0], [0]>} : vector<8x8x32xbf16>, vector<8x8x32xbf16>, vector<8x8x8xf32> -> vector<8x8x8xf32>
    %cst_14 = arith.constant dense<0xFF800000> : vector<8x8xf32>
    %24 = vector.multi_reduction <maximumf>, %23, %cst_14 [2] : vector<8x8x8xf32> to vector<8x8xf32>
    %25 = vector.shape_cast %24 : vector<8x8xf32> to vector<8x8x1xf32>
    %26 = vector.broadcast %25 : vector<8x8x1xf32> to vector<8x8x8xf32>
    %27 = arith.subf %23, %26 : vector<8x8x8xf32>
    %28 = math.exp %27 : vector<8x8x8xf32>
    %cst_15 = arith.constant dense<0.000000e+00> : vector<8x8xf32>
    %29 = vector.multi_reduction <add>, %28, %cst_15 [2] : vector<8x8x8xf32> to vector<8x8xf32>
    %30 = vector.shape_cast %29 : vector<8x8xf32> to vector<8x8x1xf32>
    %31 = tpu.reciprocal %30 {approx = true} : vector<8x8x1xf32> -> vector<8x8x1xf32>
    %32 = arith.truncf %28 : vector<8x8x8xf32> to vector<8x8x8xbf16>
    %cst_16 = arith.constant dense<0.000000e+00> : vector<8x8x32xf32>
    %33 = tpu.matmul %32, %22, %cst_16 {dimension_numbers = #tpu.dot_dimension_numbers<[2], [1], [1], [2], [0, 0, 0, 1, 1, 2], [0], [0]>} : vector<8x8x8xbf16>, vector<8x8x32xbf16>, vector<8x8x32xf32> -> vector<8x8x32xf32>
    %34 = vector.broadcast %31 : vector<8x8x1xf32> to vector<8x8x32xf32>
    %35 = arith.mulf %33, %34 : vector<8x8x32xf32>
    %36 = vector.shape_cast %35 : vector<8x8x32xf32> to vector<64x32xf32>
    %37 = arith.truncf %36 : vector<64x32xf32> to vector<64x32xbf16>
    %38 = vector.extract_strided_slice %12 {offsets = [0, 0, 0], sizes = [1, 32, 128], strides = [1, 1, 1]} : vector<4x32x128xbf16> to vector<1x32x128xbf16>
    %39 = vector.shape_cast %38 : vector<1x32x128xbf16> to vector<32x128xbf16>
    %cst_17 = arith.constant dense<0.000000e+00> : vector<64x128xf32>
    %40 = tpu.matmul %37, %39, %cst_17 {dimension_numbers = #tpu.dot_dimension_numbers<[1], [0], [0], [1], [0, 0, 1, 1], [], []>} : vector<64x32xbf16>, vector<32x128xbf16>, vector<64x128xf32> -> vector<64x128xf32>
    %41 = arith.addf %13, %40 : vector<64x128xf32>
    %42 = vector.extract_strided_slice %10 {offsets = [0, 32], sizes = [64, 32], strides = [1, 1]} : vector<64x384xf32> to vector<64x32xf32>
    %43 = vector.shape_cast %42 : vector<64x32xf32> to vector<8x8x32xf32>
    %44 = arith.truncf %43 : vector<8x8x32xf32> to vector<8x8x32xbf16>
    %45 = vector.extract_strided_slice %10 {offsets = [0, 160], sizes = [64, 32], strides = [1, 1]} : vector<64x384xf32> to vector<64x32xf32>
    %46 = vector.shape_cast %45 : vector<64x32xf32> to vector<8x8x32xf32>
    %47 = arith.truncf %46 : vector<8x8x32xf32> to vector<8x8x32xbf16>
    %48 = vector.extract_strided_slice %10 {offsets = [0, 288], sizes = [64, 32], strides = [1, 1]} : vector<64x384xf32> to vector<64x32xf32>
    %49 = vector.shape_cast %48 : vector<64x32xf32> to vector<8x8x32xf32>
    %50 = arith.truncf %49 : vector<8x8x32xf32> to vector<8x8x32xbf16>
    %cst_18 = arith.constant dense<0.000000e+00> : vector<8x8x8xf32>
    %51 = tpu.matmul %44, %47, %cst_18 {dimension_numbers = #tpu.dot_dimension_numbers<[2], [2], [1], [1], [0, 0, 0, 1, 1, 1], [0], [0]>} : vector<8x8x32xbf16>, vector<8x8x32xbf16>, vector<8x8x8xf32> -> vector<8x8x8xf32>
    %cst_19 = arith.constant dense<0xFF800000> : vector<8x8xf32>
    %52 = vector.multi_reduction <maximumf>, %51, %cst_19 [2] : vector<8x8x8xf32> to vector<8x8xf32>
    %53 = vector.shape_cast %52 : vector<8x8xf32> to vector<8x8x1xf32>
    %54 = vector.broadcast %53 : vector<8x8x1xf32> to vector<8x8x8xf32>
    %55 = arith.subf %51, %54 : vector<8x8x8xf32>
    %56 = math.exp %55 : vector<8x8x8xf32>
    %cst_20 = arith.constant dense<0.000000e+00> : vector<8x8xf32>
    %57 = vector.multi_reduction <add>, %56, %cst_20 [2] : vector<8x8x8xf32> to vector<8x8xf32>
    %58 = vector.shape_cast %57 : vector<8x8xf32> to vector<8x8x1xf32>
    %59 = tpu.reciprocal %58 {approx = true} : vector<8x8x1xf32> -> vector<8x8x1xf32>
    %60 = arith.truncf %56 : vector<8x8x8xf32> to vector<8x8x8xbf16>
    %cst_21 = arith.constant dense<0.000000e+00> : vector<8x8x32xf32>
    %61 = tpu.matmul %60, %50, %cst_21 {dimension_numbers = #tpu.dot_dimension_numbers<[2], [1], [1], [2], [0, 0, 0, 1, 1, 2], [0], [0]>} : vector<8x8x8xbf16>, vector<8x8x32xbf16>, vector<8x8x32xf32> -> vector<8x8x32xf32>
    %62 = vector.broadcast %59 : vector<8x8x1xf32> to vector<8x8x32xf32>
    %63 = arith.mulf %61, %62 : vector<8x8x32xf32>
    %64 = vector.shape_cast %63 : vector<8x8x32xf32> to vector<64x32xf32>
    %65 = arith.truncf %64 : vector<64x32xf32> to vector<64x32xbf16>
    %66 = vector.extract_strided_slice %12 {offsets = [1, 0, 0], sizes = [1, 32, 128], strides = [1, 1, 1]} : vector<4x32x128xbf16> to vector<1x32x128xbf16>
    %67 = vector.shape_cast %66 : vector<1x32x128xbf16> to vector<32x128xbf16>
    %cst_22 = arith.constant dense<0.000000e+00> : vector<64x128xf32>
    %68 = tpu.matmul %65, %67, %cst_22 {dimension_numbers = #tpu.dot_dimension_numbers<[1], [0], [0], [1], [0, 0, 1, 1], [], []>} : vector<64x32xbf16>, vector<32x128xbf16>, vector<64x128xf32> -> vector<64x128xf32>
    %69 = arith.addf %41, %68 : vector<64x128xf32>
    %70 = vector.extract_strided_slice %10 {offsets = [0, 64], sizes = [64, 32], strides = [1, 1]} : vector<64x384xf32> to vector<64x32xf32>
    %71 = vector.shape_cast %70 : vector<64x32xf32> to vector<8x8x32xf32>
    %72 = arith.truncf %71 : vector<8x8x32xf32> to vector<8x8x32xbf16>
    %73 = vector.extract_strided_slice %10 {offsets = [0, 192], sizes = [64, 32], strides = [1, 1]} : vector<64x384xf32> to vector<64x32xf32>
    %74 = vector.shape_cast %73 : vector<64x32xf32> to vector<8x8x32xf32>
    %75 = arith.truncf %74 : vector<8x8x32xf32> to vector<8x8x32xbf16>
    %76 = vector.extract_strided_slice %10 {offsets = [0, 320], sizes = [64, 32], strides = [1, 1]} : vector<64x384xf32> to vector<64x32xf32>
    %77 = vector.shape_cast %76 : vector<64x32xf32> to vector<8x8x32xf32>
    %78 = arith.truncf %77 : vector<8x8x32xf32> to vector<8x8x32xbf16>
    %cst_23 = arith.constant dense<0.000000e+00> : vector<8x8x8xf32>
    %79 = tpu.matmul %72, %75, %cst_23 {dimension_numbers = #tpu.dot_dimension_numbers<[2], [2], [1], [1], [0, 0, 0, 1, 1, 1], [0], [0]>} : vector<8x8x32xbf16>, vector<8x8x32xbf16>, vector<8x8x8xf32> -> vector<8x8x8xf32>
    %cst_24 = arith.constant dense<0xFF800000> : vector<8x8xf32>
    %80 = vector.multi_reduction <maximumf>, %79, %cst_24 [2] : vector<8x8x8xf32> to vector<8x8xf32>
    %81 = vector.shape_cast %80 : vector<8x8xf32> to vector<8x8x1xf32>
    %82 = vector.broadcast %81 : vector<8x8x1xf32> to vector<8x8x8xf32>
    %83 = arith.subf %79, %82 : vector<8x8x8xf32>
    %84 = math.exp %83 : vector<8x8x8xf32>
    %cst_25 = arith.constant dense<0.000000e+00> : vector<8x8xf32>
    %85 = vector.multi_reduction <add>, %84, %cst_25 [2] : vector<8x8x8xf32> to vector<8x8xf32>
    %86 = vector.shape_cast %85 : vector<8x8xf32> to vector<8x8x1xf32>
    %87 = tpu.reciprocal %86 {approx = true} : vector<8x8x1xf32> -> vector<8x8x1xf32>
    %88 = arith.truncf %84 : vector<8x8x8xf32> to vector<8x8x8xbf16>
    %cst_26 = arith.constant dense<0.000000e+00> : vector<8x8x32xf32>
    %89 = tpu.matmul %88, %78, %cst_26 {dimension_numbers = #tpu.dot_dimension_numbers<[2], [1], [1], [2], [0, 0, 0, 1, 1, 2], [0], [0]>} : vector<8x8x8xbf16>, vector<8x8x32xbf16>, vector<8x8x32xf32> -> vector<8x8x32xf32>
    %90 = vector.broadcast %87 : vector<8x8x1xf32> to vector<8x8x32xf32>
    %91 = arith.mulf %89, %90 : vector<8x8x32xf32>
    %92 = vector.shape_cast %91 : vector<8x8x32xf32> to vector<64x32xf32>
    %93 = arith.truncf %92 : vector<64x32xf32> to vector<64x32xbf16>
    %94 = vector.extract_strided_slice %12 {offsets = [2, 0, 0], sizes = [1, 32, 128], strides = [1, 1, 1]} : vector<4x32x128xbf16> to vector<1x32x128xbf16>
    %95 = vector.shape_cast %94 : vector<1x32x128xbf16> to vector<32x128xbf16>
    %cst_27 = arith.constant dense<0.000000e+00> : vector<64x128xf32>
    %96 = tpu.matmul %93, %95, %cst_27 {dimension_numbers = #tpu.dot_dimension_numbers<[1], [0], [0], [1], [0, 0, 1, 1], [], []>} : vector<64x32xbf16>, vector<32x128xbf16>, vector<64x128xf32> -> vector<64x128xf32>
    %97 = arith.addf %69, %96 : vector<64x128xf32>
    %98 = vector.extract_strided_slice %10 {offsets = [0, 96], sizes = [64, 32], strides = [1, 1]} : vector<64x384xf32> to vector<64x32xf32>
    %99 = vector.shape_cast %98 : vector<64x32xf32> to vector<8x8x32xf32>
    %100 = arith.truncf %99 : vector<8x8x32xf32> to vector<8x8x32xbf16>
    %101 = vector.extract_strided_slice %10 {offsets = [0, 224], sizes = [64, 32], strides = [1, 1]} : vector<64x384xf32> to vector<64x32xf32>
    %102 = vector.shape_cast %101 : vector<64x32xf32> to vector<8x8x32xf32>
    %103 = arith.truncf %102 : vector<8x8x32xf32> to vector<8x8x32xbf16>
    %104 = vector.extract_strided_slice %10 {offsets = [0, 352], sizes = [64, 32], strides = [1, 1]} : vector<64x384xf32> to vector<64x32xf32>
    %105 = vector.shape_cast %104 : vector<64x32xf32> to vector<8x8x32xf32>
    %106 = arith.truncf %105 : vector<8x8x32xf32> to vector<8x8x32xbf16>
    %cst_28 = arith.constant dense<0.000000e+00> : vector<8x8x8xf32>
    %107 = tpu.matmul %100, %103, %cst_28 {dimension_numbers = #tpu.dot_dimension_numbers<[2], [2], [1], [1], [0, 0, 0, 1, 1, 1], [0], [0]>} : vector<8x8x32xbf16>, vector<8x8x32xbf16>, vector<8x8x8xf32> -> vector<8x8x8xf32>
    %cst_29 = arith.constant dense<0xFF800000> : vector<8x8xf32>
    %108 = vector.multi_reduction <maximumf>, %107, %cst_29 [2] : vector<8x8x8xf32> to vector<8x8xf32>
    %109 = vector.shape_cast %108 : vector<8x8xf32> to vector<8x8x1xf32>
    %110 = vector.broadcast %109 : vector<8x8x1xf32> to vector<8x8x8xf32>
    %111 = arith.subf %107, %110 : vector<8x8x8xf32>
    %112 = math.exp %111 : vector<8x8x8xf32>
    %cst_30 = arith.constant dense<0.000000e+00> : vector<8x8xf32>
    %113 = vector.multi_reduction <add>, %112, %cst_30 [2] : vector<8x8x8xf32> to vector<8x8xf32>
    %114 = vector.shape_cast %113 : vector<8x8xf32> to vector<8x8x1xf32>
    %115 = tpu.reciprocal %114 {approx = true} : vector<8x8x1xf32> -> vector<8x8x1xf32>
    %116 = arith.truncf %112 : vector<8x8x8xf32> to vector<8x8x8xbf16>
    %cst_31 = arith.constant dense<0.000000e+00> : vector<8x8x32xf32>
    %117 = tpu.matmul %116, %106, %cst_31 {dimension_numbers = #tpu.dot_dimension_numbers<[2], [1], [1], [2], [0, 0, 0, 1, 1, 2], [0], [0]>} : vector<8x8x8xbf16>, vector<8x8x32xbf16>, vector<8x8x32xf32> -> vector<8x8x32xf32>
    %118 = vector.broadcast %115 : vector<8x8x1xf32> to vector<8x8x32xf32>
    %119 = arith.mulf %117, %118 : vector<8x8x32xf32>
    %120 = vector.shape_cast %119 : vector<8x8x32xf32> to vector<64x32xf32>
    %121 = arith.truncf %120 : vector<64x32xf32> to vector<64x32xbf16>
    %122 = vector.extract_strided_slice %12 {offsets = [3, 0, 0], sizes = [1, 32, 128], strides = [1, 1, 1]} : vector<4x32x128xbf16> to vector<1x32x128xbf16>
    %123 = vector.shape_cast %122 : vector<1x32x128xbf16> to vector<32x128xbf16>
    %cst_32 = arith.constant dense<0.000000e+00> : vector<64x128xf32>
    %124 = tpu.matmul %121, %123, %cst_32 {dimension_numbers = #tpu.dot_dimension_numbers<[1], [0], [0], [1], [0, 0, 1, 1], [], []>} : vector<64x32xbf16>, vector<32x128xbf16>, vector<64x128xf32> -> vector<64x128xf32>
    %125 = arith.addf %97, %124 : vector<64x128xf32>
    %126 = arith.addf %2, %125 : vector<64x128xf32>
    %c0_33 = arith.constant 0 : index
    %c0_34 = arith.constant 0 : index
    %c0_35 = arith.constant 0 : index
    %127 = vector.load %arg5[%c0_33, %c0_34, %c0_35] : memref<2x1x128xf32, #tpu.memory_space<vmem>>, vector<1x1x128xf32>
    %128 = vector.shape_cast %127 : vector<1x1x128xf32> to vector<1x128xf32>
    %129 = vector.broadcast %128 : vector<1x128xf32> to vector<64x128xf32>
    %130 = arith.addf %126, %129 : vector<64x128xf32>
    %c0_36 = arith.constant 0 : index
    %c0_37 = arith.constant 0 : index
    %c0_38 = arith.constant 0 : index
    %131 = vector.load %arg6[%c0_36, %c0_37, %c0_38] : memref<2x1x128xf32, #tpu.memory_space<vmem>>, vector<1x1x128xf32>
    %132 = vector.shape_cast %131 : vector<1x1x128xf32> to vector<1x128xf32>
    %c0_39 = arith.constant 0 : index
    %c0_40 = arith.constant 0 : index
    %c0_41 = arith.constant 0 : index
    %133 = vector.load %arg7[%c0_39, %c0_40, %c0_41] : memref<2x1x128xf32, #tpu.memory_space<vmem>>, vector<1x1x128xf32>
    %134 = vector.shape_cast %133 : vector<1x1x128xf32> to vector<1x128xf32>
    %cst_42 = arith.constant dense<0.000000e+00> : vector<64xf32>
    %135 = vector.multi_reduction <add>, %130, %cst_42 [1] : vector<64x128xf32> to vector<64xf32>
    %136 = vector.shape_cast %135 : vector<64xf32> to vector<64x1xf32>
    %cst_43 = arith.constant 1.280000e+02 : f32
    %137 = vector.broadcast %cst_43 : f32 to vector<64x1xf32>
    %138 = arith.divf %136, %137 : vector<64x1xf32>
    %139 = vector.broadcast %138 : vector<64x1xf32> to vector<64x128xf32>
    %140 = arith.subf %130, %139 : vector<64x128xf32>
    %141 = arith.mulf %140, %140 : vector<64x128xf32>
    %cst_44 = arith.constant dense<0.000000e+00> : vector<64xf32>
    %142 = vector.multi_reduction <add>, %141, %cst_44 [1] : vector<64x128xf32> to vector<64xf32>
    %143 = vector.shape_cast %142 : vector<64xf32> to vector<64x1xf32>
    %cst_45 = arith.constant 1.280000e+02 : f32
    %144 = vector.broadcast %cst_45 : f32 to vector<64x1xf32>
    %145 = arith.divf %143, %144 : vector<64x1xf32>
    %146 = vector.broadcast %138 : vector<64x1xf32> to vector<64x128xf32>
    %147 = arith.subf %130, %146 : vector<64x128xf32>
    %cst_46 = arith.constant 9.99999974E-6 : f32
    %148 = vector.broadcast %cst_46 : f32 to vector<64x1xf32>
    %149 = arith.addf %145, %148 : vector<64x1xf32>
    %150 = math.rsqrt %149 : vector<64x1xf32>
    %151 = vector.broadcast %150 : vector<64x1xf32> to vector<64x128xf32>
    %152 = arith.mulf %147, %151 : vector<64x128xf32>
    %153 = vector.broadcast %132 : vector<1x128xf32> to vector<64x128xf32>
    %154 = arith.mulf %152, %153 : vector<64x128xf32>
    %155 = vector.broadcast %134 : vector<1x128xf32> to vector<64x128xf32>
    %156 = arith.addf %154, %155 : vector<64x128xf32>
    %157 = arith.truncf %156 : vector<64x128xf32> to vector<64x128xbf16>
    %c0_47 = arith.constant 0 : index
    %c0_48 = arith.constant 0 : index
    %c0_49 = arith.constant 0 : index
    %158 = vector.load %arg8[%c0_47, %c0_48, %c0_49] : memref<2x128x512xbf16, #tpu.memory_space<vmem>>, vector<1x128x512xbf16>
    %159 = vector.shape_cast %158 : vector<1x128x512xbf16> to vector<128x512xbf16>
    %cst_50 = arith.constant dense<0.000000e+00> : vector<64x512xf32>
    %160 = tpu.matmul %157, %159, %cst_50 {dimension_numbers = #tpu.dot_dimension_numbers<[1], [0], [0], [1], [0, 0, 1, 1], [], []>} : vector<64x128xbf16>, vector<128x512xbf16>, vector<64x512xf32> -> vector<64x512xf32>
    %c0_51 = arith.constant 0 : index
    %c0_52 = arith.constant 0 : index
    %c0_53 = arith.constant 0 : index
    %161 = vector.load %arg9[%c0_51, %c0_52, %c0_53] : memref<2x1x512xf32, #tpu.memory_space<vmem>>, vector<1x1x512xf32>
    %162 = vector.shape_cast %161 : vector<1x1x512xf32> to vector<1x512xf32>
    %163 = vector.broadcast %162 : vector<1x512xf32> to vector<64x512xf32>
    %164 = arith.addf %160, %163 : vector<64x512xf32>
    %cst_54 = arith.constant 0.000000e+00 : f32
    %165 = vector.broadcast %cst_54 : f32 to vector<64x512xf32>
    %166 = arith.maximumf %164, %165 : vector<64x512xf32>
    %167 = arith.truncf %166 : vector<64x512xf32> to vector<64x512xbf16>
    %c0_55 = arith.constant 0 : index
    %c0_56 = arith.constant 0 : index
    %c0_57 = arith.constant 0 : index
    %168 = vector.load %arg10[%c0_55, %c0_56, %c0_57] : memref<2x512x128xbf16, #tpu.memory_space<vmem>>, vector<1x512x128xbf16>
    %169 = vector.shape_cast %168 : vector<1x512x128xbf16> to vector<512x128xbf16>
    %cst_58 = arith.constant dense<0.000000e+00> : vector<64x128xf32>
    %170 = tpu.matmul %167, %169, %cst_58 {dimension_numbers = #tpu.dot_dimension_numbers<[1], [0], [0], [1], [0, 0, 1, 1], [], []>} : vector<64x512xbf16>, vector<512x128xbf16>, vector<64x128xf32> -> vector<64x128xf32>
    %c0_59 = arith.constant 0 : index
    %c0_60 = arith.constant 0 : index
    %c0_61 = arith.constant 0 : index
    %171 = vector.load %arg11[%c0_59, %c0_60, %c0_61] : memref<2x1x128xf32, #tpu.memory_space<vmem>>, vector<1x1x128xf32>
    %172 = vector.shape_cast %171 : vector<1x1x128xf32> to vector<1x128xf32>
    %173 = vector.broadcast %172 : vector<1x128xf32> to vector<64x128xf32>
    %174 = arith.addf %170, %173 : vector<64x128xf32>
    %175 = arith.addf %156, %174 : vector<64x128xf32>
    %c0_62 = arith.constant 0 : index
    %c0_63 = arith.constant 0 : index
    %c0_64 = arith.constant 0 : index
    %176 = vector.load %arg12[%c0_62, %c0_63, %c0_64] : memref<2x1x128xf32, #tpu.memory_space<vmem>>, vector<1x1x128xf32>
    %177 = vector.shape_cast %176 : vector<1x1x128xf32> to vector<1x128xf32>
    %c0_65 = arith.constant 0 : index
    %c0_66 = arith.constant 0 : index
    %c0_67 = arith.constant 0 : index
    %178 = vector.load %arg13[%c0_65, %c0_66, %c0_67] : memref<2x1x128xf32, #tpu.memory_space<vmem>>, vector<1x1x128xf32>
    %179 = vector.shape_cast %178 : vector<1x1x128xf32> to vector<1x128xf32>
    %cst_68 = arith.constant dense<0.000000e+00> : vector<64xf32>
    %180 = vector.multi_reduction <add>, %175, %cst_68 [1] : vector<64x128xf32> to vector<64xf32>
    %181 = vector.shape_cast %180 : vector<64xf32> to vector<64x1xf32>
    %cst_69 = arith.constant 1.280000e+02 : f32
    %182 = vector.broadcast %cst_69 : f32 to vector<64x1xf32>
    %183 = arith.divf %181, %182 : vector<64x1xf32>
    %184 = vector.broadcast %183 : vector<64x1xf32> to vector<64x128xf32>
    %185 = arith.subf %175, %184 : vector<64x128xf32>
    %186 = arith.mulf %185, %185 : vector<64x128xf32>
    %cst_70 = arith.constant dense<0.000000e+00> : vector<64xf32>
    %187 = vector.multi_reduction <add>, %186, %cst_70 [1] : vector<64x128xf32> to vector<64xf32>
    %188 = vector.shape_cast %187 : vector<64xf32> to vector<64x1xf32>
    %cst_71 = arith.constant 1.280000e+02 : f32
    %189 = vector.broadcast %cst_71 : f32 to vector<64x1xf32>
    %190 = arith.divf %188, %189 : vector<64x1xf32>
    %191 = vector.broadcast %183 : vector<64x1xf32> to vector<64x128xf32>
    %192 = arith.subf %175, %191 : vector<64x128xf32>
    %cst_72 = arith.constant 9.99999974E-6 : f32
    %193 = vector.broadcast %cst_72 : f32 to vector<64x1xf32>
    %194 = arith.addf %190, %193 : vector<64x1xf32>
    %195 = math.rsqrt %194 : vector<64x1xf32>
    %196 = vector.broadcast %195 : vector<64x1xf32> to vector<64x128xf32>
    %197 = arith.mulf %192, %196 : vector<64x128xf32>
    %198 = vector.broadcast %177 : vector<1x128xf32> to vector<64x128xf32>
    %199 = arith.mulf %197, %198 : vector<64x128xf32>
    %200 = vector.broadcast %179 : vector<1x128xf32> to vector<64x128xf32>
    %201 = arith.addf %199, %200 : vector<64x128xf32>
    %202 = arith.truncf %201 : vector<64x128xf32> to vector<64x128xbf16>
    %c1 = arith.constant 1 : index
    %c0_73 = arith.constant 0 : index
    %c0_74 = arith.constant 0 : index
    %203 = vector.load %arg2[%c1, %c0_73, %c0_74] : memref<2x128x384xbf16, #tpu.memory_space<vmem>>, vector<1x128x384xbf16>
    %204 = vector.shape_cast %203 : vector<1x128x384xbf16> to vector<128x384xbf16>
    %cst_75 = arith.constant dense<0.000000e+00> : vector<64x384xf32>
    %205 = tpu.matmul %202, %204, %cst_75 {dimension_numbers = #tpu.dot_dimension_numbers<[1], [0], [0], [1], [0, 0, 1, 1], [], []>} : vector<64x128xbf16>, vector<128x384xbf16>, vector<64x384xf32> -> vector<64x384xf32>
    %c1_76 = arith.constant 1 : index
    %c0_77 = arith.constant 0 : index
    %c0_78 = arith.constant 0 : index
    %206 = vector.load %arg3[%c1_76, %c0_77, %c0_78] : memref<2x1x384xf32, #tpu.memory_space<vmem>>, vector<1x1x384xf32>
    %207 = vector.shape_cast %206 : vector<1x1x384xf32> to vector<1x384xf32>
    %208 = vector.broadcast %207 : vector<1x384xf32> to vector<64x384xf32>
    %209 = arith.addf %205, %208 : vector<64x384xf32>
    %c1_79 = arith.constant 1 : index
    %c0_80 = arith.constant 0 : index
    %c0_81 = arith.constant 0 : index
    %c0_82 = arith.constant 0 : index
    %210 = vector.load %arg4[%c1_79, %c0_80, %c0_81, %c0_82] : memref<2x4x32x128xbf16, #tpu.memory_space<vmem>>, vector<1x4x32x128xbf16>
    %211 = vector.shape_cast %210 : vector<1x4x32x128xbf16> to vector<4x32x128xbf16>
    %cst_83 = arith.constant 0.000000e+00 : f32
    %212 = vector.broadcast %cst_83 : f32 to vector<64x128xf32>
    %213 = vector.extract_strided_slice %209 {offsets = [0, 0], sizes = [64, 32], strides = [1, 1]} : vector<64x384xf32> to vector<64x32xf32>
    %214 = vector.shape_cast %213 : vector<64x32xf32> to vector<8x8x32xf32>
    %215 = arith.truncf %214 : vector<8x8x32xf32> to vector<8x8x32xbf16>
    %216 = vector.extract_strided_slice %209 {offsets = [0, 128], sizes = [64, 32], strides = [1, 1]} : vector<64x384xf32> to vector<64x32xf32>
    %217 = vector.shape_cast %216 : vector<64x32xf32> to vector<8x8x32xf32>
    %218 = arith.truncf %217 : vector<8x8x32xf32> to vector<8x8x32xbf16>
    %219 = vector.extract_strided_slice %209 {offsets = [0, 256], sizes = [64, 32], strides = [1, 1]} : vector<64x384xf32> to vector<64x32xf32>
    %220 = vector.shape_cast %219 : vector<64x32xf32> to vector<8x8x32xf32>
    %221 = arith.truncf %220 : vector<8x8x32xf32> to vector<8x8x32xbf16>
    %cst_84 = arith.constant dense<0.000000e+00> : vector<8x8x8xf32>
    %222 = tpu.matmul %215, %218, %cst_84 {dimension_numbers = #tpu.dot_dimension_numbers<[2], [2], [1], [1], [0, 0, 0, 1, 1, 1], [0], [0]>} : vector<8x8x32xbf16>, vector<8x8x32xbf16>, vector<8x8x8xf32> -> vector<8x8x8xf32>
    %cst_85 = arith.constant dense<0xFF800000> : vector<8x8xf32>
    %223 = vector.multi_reduction <maximumf>, %222, %cst_85 [2] : vector<8x8x8xf32> to vector<8x8xf32>
    %224 = vector.shape_cast %223 : vector<8x8xf32> to vector<8x8x1xf32>
    %225 = vector.broadcast %224 : vector<8x8x1xf32> to vector<8x8x8xf32>
    %226 = arith.subf %222, %225 : vector<8x8x8xf32>
    %227 = math.exp %226 : vector<8x8x8xf32>
    %cst_86 = arith.constant dense<0.000000e+00> : vector<8x8xf32>
    %228 = vector.multi_reduction <add>, %227, %cst_86 [2] : vector<8x8x8xf32> to vector<8x8xf32>
    %229 = vector.shape_cast %228 : vector<8x8xf32> to vector<8x8x1xf32>
    %230 = tpu.reciprocal %229 {approx = true} : vector<8x8x1xf32> -> vector<8x8x1xf32>
    %231 = arith.truncf %227 : vector<8x8x8xf32> to vector<8x8x8xbf16>
    %cst_87 = arith.constant dense<0.000000e+00> : vector<8x8x32xf32>
    %232 = tpu.matmul %231, %221, %cst_87 {dimension_numbers = #tpu.dot_dimension_numbers<[2], [1], [1], [2], [0, 0, 0, 1, 1, 2], [0], [0]>} : vector<8x8x8xbf16>, vector<8x8x32xbf16>, vector<8x8x32xf32> -> vector<8x8x32xf32>
    %233 = vector.broadcast %230 : vector<8x8x1xf32> to vector<8x8x32xf32>
    %234 = arith.mulf %232, %233 : vector<8x8x32xf32>
    %235 = vector.shape_cast %234 : vector<8x8x32xf32> to vector<64x32xf32>
    %236 = arith.truncf %235 : vector<64x32xf32> to vector<64x32xbf16>
    %237 = vector.extract_strided_slice %211 {offsets = [0, 0, 0], sizes = [1, 32, 128], strides = [1, 1, 1]} : vector<4x32x128xbf16> to vector<1x32x128xbf16>
    %238 = vector.shape_cast %237 : vector<1x32x128xbf16> to vector<32x128xbf16>
    %cst_88 = arith.constant dense<0.000000e+00> : vector<64x128xf32>
    %239 = tpu.matmul %236, %238, %cst_88 {dimension_numbers = #tpu.dot_dimension_numbers<[1], [0], [0], [1], [0, 0, 1, 1], [], []>} : vector<64x32xbf16>, vector<32x128xbf16>, vector<64x128xf32> -> vector<64x128xf32>
    %240 = arith.addf %212, %239 : vector<64x128xf32>
    %241 = vector.extract_strided_slice %209 {offsets = [0, 32], sizes = [64, 32], strides = [1, 1]} : vector<64x384xf32> to vector<64x32xf32>
    %242 = vector.shape_cast %241 : vector<64x32xf32> to vector<8x8x32xf32>
    %243 = arith.truncf %242 : vector<8x8x32xf32> to vector<8x8x32xbf16>
    %244 = vector.extract_strided_slice %209 {offsets = [0, 160], sizes = [64, 32], strides = [1, 1]} : vector<64x384xf32> to vector<64x32xf32>
    %245 = vector.shape_cast %244 : vector<64x32xf32> to vector<8x8x32xf32>
    %246 = arith.truncf %245 : vector<8x8x32xf32> to vector<8x8x32xbf16>
    %247 = vector.extract_strided_slice %209 {offsets = [0, 288], sizes = [64, 32], strides = [1, 1]} : vector<64x384xf32> to vector<64x32xf32>
    %248 = vector.shape_cast %247 : vector<64x32xf32> to vector<8x8x32xf32>
    %249 = arith.truncf %248 : vector<8x8x32xf32> to vector<8x8x32xbf16>
    %cst_89 = arith.constant dense<0.000000e+00> : vector<8x8x8xf32>
    %250 = tpu.matmul %243, %246, %cst_89 {dimension_numbers = #tpu.dot_dimension_numbers<[2], [2], [1], [1], [0, 0, 0, 1, 1, 1], [0], [0]>} : vector<8x8x32xbf16>, vector<8x8x32xbf16>, vector<8x8x8xf32> -> vector<8x8x8xf32>
    %cst_90 = arith.constant dense<0xFF800000> : vector<8x8xf32>
    %251 = vector.multi_reduction <maximumf>, %250, %cst_90 [2] : vector<8x8x8xf32> to vector<8x8xf32>
    %252 = vector.shape_cast %251 : vector<8x8xf32> to vector<8x8x1xf32>
    %253 = vector.broadcast %252 : vector<8x8x1xf32> to vector<8x8x8xf32>
    %254 = arith.subf %250, %253 : vector<8x8x8xf32>
    %255 = math.exp %254 : vector<8x8x8xf32>
    %cst_91 = arith.constant dense<0.000000e+00> : vector<8x8xf32>
    %256 = vector.multi_reduction <add>, %255, %cst_91 [2] : vector<8x8x8xf32> to vector<8x8xf32>
    %257 = vector.shape_cast %256 : vector<8x8xf32> to vector<8x8x1xf32>
    %258 = tpu.reciprocal %257 {approx = true} : vector<8x8x1xf32> -> vector<8x8x1xf32>
    %259 = arith.truncf %255 : vector<8x8x8xf32> to vector<8x8x8xbf16>
    %cst_92 = arith.constant dense<0.000000e+00> : vector<8x8x32xf32>
    %260 = tpu.matmul %259, %249, %cst_92 {dimension_numbers = #tpu.dot_dimension_numbers<[2], [1], [1], [2], [0, 0, 0, 1, 1, 2], [0], [0]>} : vector<8x8x8xbf16>, vector<8x8x32xbf16>, vector<8x8x32xf32> -> vector<8x8x32xf32>
    %261 = vector.broadcast %258 : vector<8x8x1xf32> to vector<8x8x32xf32>
    %262 = arith.mulf %260, %261 : vector<8x8x32xf32>
    %263 = vector.shape_cast %262 : vector<8x8x32xf32> to vector<64x32xf32>
    %264 = arith.truncf %263 : vector<64x32xf32> to vector<64x32xbf16>
    %265 = vector.extract_strided_slice %211 {offsets = [1, 0, 0], sizes = [1, 32, 128], strides = [1, 1, 1]} : vector<4x32x128xbf16> to vector<1x32x128xbf16>
    %266 = vector.shape_cast %265 : vector<1x32x128xbf16> to vector<32x128xbf16>
    %cst_93 = arith.constant dense<0.000000e+00> : vector<64x128xf32>
    %267 = tpu.matmul %264, %266, %cst_93 {dimension_numbers = #tpu.dot_dimension_numbers<[1], [0], [0], [1], [0, 0, 1, 1], [], []>} : vector<64x32xbf16>, vector<32x128xbf16>, vector<64x128xf32> -> vector<64x128xf32>
    %268 = arith.addf %240, %267 : vector<64x128xf32>
    %269 = vector.extract_strided_slice %209 {offsets = [0, 64], sizes = [64, 32], strides = [1, 1]} : vector<64x384xf32> to vector<64x32xf32>
    %270 = vector.shape_cast %269 : vector<64x32xf32> to vector<8x8x32xf32>
    %271 = arith.truncf %270 : vector<8x8x32xf32> to vector<8x8x32xbf16>
    %272 = vector.extract_strided_slice %209 {offsets = [0, 192], sizes = [64, 32], strides = [1, 1]} : vector<64x384xf32> to vector<64x32xf32>
    %273 = vector.shape_cast %272 : vector<64x32xf32> to vector<8x8x32xf32>
    %274 = arith.truncf %273 : vector<8x8x32xf32> to vector<8x8x32xbf16>
    %275 = vector.extract_strided_slice %209 {offsets = [0, 320], sizes = [64, 32], strides = [1, 1]} : vector<64x384xf32> to vector<64x32xf32>
    %276 = vector.shape_cast %275 : vector<64x32xf32> to vector<8x8x32xf32>
    %277 = arith.truncf %276 : vector<8x8x32xf32> to vector<8x8x32xbf16>
    %cst_94 = arith.constant dense<0.000000e+00> : vector<8x8x8xf32>
    %278 = tpu.matmul %271, %274, %cst_94 {dimension_numbers = #tpu.dot_dimension_numbers<[2], [2], [1], [1], [0, 0, 0, 1, 1, 1], [0], [0]>} : vector<8x8x32xbf16>, vector<8x8x32xbf16>, vector<8x8x8xf32> -> vector<8x8x8xf32>
    %cst_95 = arith.constant dense<0xFF800000> : vector<8x8xf32>
    %279 = vector.multi_reduction <maximumf>, %278, %cst_95 [2] : vector<8x8x8xf32> to vector<8x8xf32>
    %280 = vector.shape_cast %279 : vector<8x8xf32> to vector<8x8x1xf32>
    %281 = vector.broadcast %280 : vector<8x8x1xf32> to vector<8x8x8xf32>
    %282 = arith.subf %278, %281 : vector<8x8x8xf32>
    %283 = math.exp %282 : vector<8x8x8xf32>
    %cst_96 = arith.constant dense<0.000000e+00> : vector<8x8xf32>
    %284 = vector.multi_reduction <add>, %283, %cst_96 [2] : vector<8x8x8xf32> to vector<8x8xf32>
    %285 = vector.shape_cast %284 : vector<8x8xf32> to vector<8x8x1xf32>
    %286 = tpu.reciprocal %285 {approx = true} : vector<8x8x1xf32> -> vector<8x8x1xf32>
    %287 = arith.truncf %283 : vector<8x8x8xf32> to vector<8x8x8xbf16>
    %cst_97 = arith.constant dense<0.000000e+00> : vector<8x8x32xf32>
    %288 = tpu.matmul %287, %277, %cst_97 {dimension_numbers = #tpu.dot_dimension_numbers<[2], [1], [1], [2], [0, 0, 0, 1, 1, 2], [0], [0]>} : vector<8x8x8xbf16>, vector<8x8x32xbf16>, vector<8x8x32xf32> -> vector<8x8x32xf32>
    %289 = vector.broadcast %286 : vector<8x8x1xf32> to vector<8x8x32xf32>
    %290 = arith.mulf %288, %289 : vector<8x8x32xf32>
    %291 = vector.shape_cast %290 : vector<8x8x32xf32> to vector<64x32xf32>
    %292 = arith.truncf %291 : vector<64x32xf32> to vector<64x32xbf16>
    %293 = vector.extract_strided_slice %211 {offsets = [2, 0, 0], sizes = [1, 32, 128], strides = [1, 1, 1]} : vector<4x32x128xbf16> to vector<1x32x128xbf16>
    %294 = vector.shape_cast %293 : vector<1x32x128xbf16> to vector<32x128xbf16>
    %cst_98 = arith.constant dense<0.000000e+00> : vector<64x128xf32>
    %295 = tpu.matmul %292, %294, %cst_98 {dimension_numbers = #tpu.dot_dimension_numbers<[1], [0], [0], [1], [0, 0, 1, 1], [], []>} : vector<64x32xbf16>, vector<32x128xbf16>, vector<64x128xf32> -> vector<64x128xf32>
    %296 = arith.addf %268, %295 : vector<64x128xf32>
    %297 = vector.extract_strided_slice %209 {offsets = [0, 96], sizes = [64, 32], strides = [1, 1]} : vector<64x384xf32> to vector<64x32xf32>
    %298 = vector.shape_cast %297 : vector<64x32xf32> to vector<8x8x32xf32>
    %299 = arith.truncf %298 : vector<8x8x32xf32> to vector<8x8x32xbf16>
    %300 = vector.extract_strided_slice %209 {offsets = [0, 224], sizes = [64, 32], strides = [1, 1]} : vector<64x384xf32> to vector<64x32xf32>
    %301 = vector.shape_cast %300 : vector<64x32xf32> to vector<8x8x32xf32>
    %302 = arith.truncf %301 : vector<8x8x32xf32> to vector<8x8x32xbf16>
    %303 = vector.extract_strided_slice %209 {offsets = [0, 352], sizes = [64, 32], strides = [1, 1]} : vector<64x384xf32> to vector<64x32xf32>
    %304 = vector.shape_cast %303 : vector<64x32xf32> to vector<8x8x32xf32>
    %305 = arith.truncf %304 : vector<8x8x32xf32> to vector<8x8x32xbf16>
    %cst_99 = arith.constant dense<0.000000e+00> : vector<8x8x8xf32>
    %306 = tpu.matmul %299, %302, %cst_99 {dimension_numbers = #tpu.dot_dimension_numbers<[2], [2], [1], [1], [0, 0, 0, 1, 1, 1], [0], [0]>} : vector<8x8x32xbf16>, vector<8x8x32xbf16>, vector<8x8x8xf32> -> vector<8x8x8xf32>
    %cst_100 = arith.constant dense<0xFF800000> : vector<8x8xf32>
    %307 = vector.multi_reduction <maximumf>, %306, %cst_100 [2] : vector<8x8x8xf32> to vector<8x8xf32>
    %308 = vector.shape_cast %307 : vector<8x8xf32> to vector<8x8x1xf32>
    %309 = vector.broadcast %308 : vector<8x8x1xf32> to vector<8x8x8xf32>
    %310 = arith.subf %306, %309 : vector<8x8x8xf32>
    %311 = math.exp %310 : vector<8x8x8xf32>
    %cst_101 = arith.constant dense<0.000000e+00> : vector<8x8xf32>
    %312 = vector.multi_reduction <add>, %311, %cst_101 [2] : vector<8x8x8xf32> to vector<8x8xf32>
    %313 = vector.shape_cast %312 : vector<8x8xf32> to vector<8x8x1xf32>
    %314 = tpu.reciprocal %313 {approx = true} : vector<8x8x1xf32> -> vector<8x8x1xf32>
    %315 = arith.truncf %311 : vector<8x8x8xf32> to vector<8x8x8xbf16>
    %cst_102 = arith.constant dense<0.000000e+00> : vector<8x8x32xf32>
    %316 = tpu.matmul %315, %305, %cst_102 {dimension_numbers = #tpu.dot_dimension_numbers<[2], [1], [1], [2], [0, 0, 0, 1, 1, 2], [0], [0]>} : vector<8x8x8xbf16>, vector<8x8x32xbf16>, vector<8x8x32xf32> -> vector<8x8x32xf32>
    %317 = vector.broadcast %314 : vector<8x8x1xf32> to vector<8x8x32xf32>
    %318 = arith.mulf %316, %317 : vector<8x8x32xf32>
    %319 = vector.shape_cast %318 : vector<8x8x32xf32> to vector<64x32xf32>
    %320 = arith.truncf %319 : vector<64x32xf32> to vector<64x32xbf16>
    %321 = vector.extract_strided_slice %211 {offsets = [3, 0, 0], sizes = [1, 32, 128], strides = [1, 1, 1]} : vector<4x32x128xbf16> to vector<1x32x128xbf16>
    %322 = vector.shape_cast %321 : vector<1x32x128xbf16> to vector<32x128xbf16>
    %cst_103 = arith.constant dense<0.000000e+00> : vector<64x128xf32>
    %323 = tpu.matmul %320, %322, %cst_103 {dimension_numbers = #tpu.dot_dimension_numbers<[1], [0], [0], [1], [0, 0, 1, 1], [], []>} : vector<64x32xbf16>, vector<32x128xbf16>, vector<64x128xf32> -> vector<64x128xf32>
    %324 = arith.addf %296, %323 : vector<64x128xf32>
    %325 = arith.addf %201, %324 : vector<64x128xf32>
    %c1_104 = arith.constant 1 : index
    %c0_105 = arith.constant 0 : index
    %c0_106 = arith.constant 0 : index
    %326 = vector.load %arg5[%c1_104, %c0_105, %c0_106] : memref<2x1x128xf32, #tpu.memory_space<vmem>>, vector<1x1x128xf32>
    %327 = vector.shape_cast %326 : vector<1x1x128xf32> to vector<1x128xf32>
    %328 = vector.broadcast %327 : vector<1x128xf32> to vector<64x128xf32>
    %329 = arith.addf %325, %328 : vector<64x128xf32>
    %c1_107 = arith.constant 1 : index
    %c0_108 = arith.constant 0 : index
    %c0_109 = arith.constant 0 : index
    %330 = vector.load %arg6[%c1_107, %c0_108, %c0_109] : memref<2x1x128xf32, #tpu.memory_space<vmem>>, vector<1x1x128xf32>
    %331 = vector.shape_cast %330 : vector<1x1x128xf32> to vector<1x128xf32>
    %c1_110 = arith.constant 1 : index
    %c0_111 = arith.constant 0 : index
    %c0_112 = arith.constant 0 : index
    %332 = vector.load %arg7[%c1_110, %c0_111, %c0_112] : memref<2x1x128xf32, #tpu.memory_space<vmem>>, vector<1x1x128xf32>
    %333 = vector.shape_cast %332 : vector<1x1x128xf32> to vector<1x128xf32>
    %cst_113 = arith.constant dense<0.000000e+00> : vector<64xf32>
    %334 = vector.multi_reduction <add>, %329, %cst_113 [1] : vector<64x128xf32> to vector<64xf32>
    %335 = vector.shape_cast %334 : vector<64xf32> to vector<64x1xf32>
    %cst_114 = arith.constant 1.280000e+02 : f32
    %336 = vector.broadcast %cst_114 : f32 to vector<64x1xf32>
    %337 = arith.divf %335, %336 : vector<64x1xf32>
    %338 = vector.broadcast %337 : vector<64x1xf32> to vector<64x128xf32>
    %339 = arith.subf %329, %338 : vector<64x128xf32>
    %340 = arith.mulf %339, %339 : vector<64x128xf32>
    %cst_115 = arith.constant dense<0.000000e+00> : vector<64xf32>
    %341 = vector.multi_reduction <add>, %340, %cst_115 [1] : vector<64x128xf32> to vector<64xf32>
    %342 = vector.shape_cast %341 : vector<64xf32> to vector<64x1xf32>
    %cst_116 = arith.constant 1.280000e+02 : f32
    %343 = vector.broadcast %cst_116 : f32 to vector<64x1xf32>
    %344 = arith.divf %342, %343 : vector<64x1xf32>
    %345 = vector.broadcast %337 : vector<64x1xf32> to vector<64x128xf32>
    %346 = arith.subf %329, %345 : vector<64x128xf32>
    %cst_117 = arith.constant 9.99999974E-6 : f32
    %347 = vector.broadcast %cst_117 : f32 to vector<64x1xf32>
    %348 = arith.addf %344, %347 : vector<64x1xf32>
    %349 = math.rsqrt %348 : vector<64x1xf32>
    %350 = vector.broadcast %349 : vector<64x1xf32> to vector<64x128xf32>
    %351 = arith.mulf %346, %350 : vector<64x128xf32>
    %352 = vector.broadcast %331 : vector<1x128xf32> to vector<64x128xf32>
    %353 = arith.mulf %351, %352 : vector<64x128xf32>
    %354 = vector.broadcast %333 : vector<1x128xf32> to vector<64x128xf32>
    %355 = arith.addf %353, %354 : vector<64x128xf32>
    %356 = arith.truncf %355 : vector<64x128xf32> to vector<64x128xbf16>
    %c1_118 = arith.constant 1 : index
    %c0_119 = arith.constant 0 : index
    %c0_120 = arith.constant 0 : index
    %357 = vector.load %arg8[%c1_118, %c0_119, %c0_120] : memref<2x128x512xbf16, #tpu.memory_space<vmem>>, vector<1x128x512xbf16>
    %358 = vector.shape_cast %357 : vector<1x128x512xbf16> to vector<128x512xbf16>
    %cst_121 = arith.constant dense<0.000000e+00> : vector<64x512xf32>
    %359 = tpu.matmul %356, %358, %cst_121 {dimension_numbers = #tpu.dot_dimension_numbers<[1], [0], [0], [1], [0, 0, 1, 1], [], []>} : vector<64x128xbf16>, vector<128x512xbf16>, vector<64x512xf32> -> vector<64x512xf32>
    %c1_122 = arith.constant 1 : index
    %c0_123 = arith.constant 0 : index
    %c0_124 = arith.constant 0 : index
    %360 = vector.load %arg9[%c1_122, %c0_123, %c0_124] : memref<2x1x512xf32, #tpu.memory_space<vmem>>, vector<1x1x512xf32>
    %361 = vector.shape_cast %360 : vector<1x1x512xf32> to vector<1x512xf32>
    %362 = vector.broadcast %361 : vector<1x512xf32> to vector<64x512xf32>
    %363 = arith.addf %359, %362 : vector<64x512xf32>
    %cst_125 = arith.constant 0.000000e+00 : f32
    %364 = vector.broadcast %cst_125 : f32 to vector<64x512xf32>
    %365 = arith.maximumf %363, %364 : vector<64x512xf32>
    %366 = arith.truncf %365 : vector<64x512xf32> to vector<64x512xbf16>
    %c1_126 = arith.constant 1 : index
    %c0_127 = arith.constant 0 : index
    %c0_128 = arith.constant 0 : index
    %367 = vector.load %arg10[%c1_126, %c0_127, %c0_128] : memref<2x512x128xbf16, #tpu.memory_space<vmem>>, vector<1x512x128xbf16>
    %368 = vector.shape_cast %367 : vector<1x512x128xbf16> to vector<512x128xbf16>
    %cst_129 = arith.constant dense<0.000000e+00> : vector<64x128xf32>
    %369 = tpu.matmul %366, %368, %cst_129 {dimension_numbers = #tpu.dot_dimension_numbers<[1], [0], [0], [1], [0, 0, 1, 1], [], []>} : vector<64x512xbf16>, vector<512x128xbf16>, vector<64x128xf32> -> vector<64x128xf32>
    %c1_130 = arith.constant 1 : index
    %c0_131 = arith.constant 0 : index
    %c0_132 = arith.constant 0 : index
    %370 = vector.load %arg11[%c1_130, %c0_131, %c0_132] : memref<2x1x128xf32, #tpu.memory_space<vmem>>, vector<1x1x128xf32>
    %371 = vector.shape_cast %370 : vector<1x1x128xf32> to vector<1x128xf32>
    %372 = vector.broadcast %371 : vector<1x128xf32> to vector<64x128xf32>
    %373 = arith.addf %369, %372 : vector<64x128xf32>
    %374 = arith.addf %355, %373 : vector<64x128xf32>
    %c1_133 = arith.constant 1 : index
    %c0_134 = arith.constant 0 : index
    %c0_135 = arith.constant 0 : index
    %375 = vector.load %arg12[%c1_133, %c0_134, %c0_135] : memref<2x1x128xf32, #tpu.memory_space<vmem>>, vector<1x1x128xf32>
    %376 = vector.shape_cast %375 : vector<1x1x128xf32> to vector<1x128xf32>
    %c1_136 = arith.constant 1 : index
    %c0_137 = arith.constant 0 : index
    %c0_138 = arith.constant 0 : index
    %377 = vector.load %arg13[%c1_136, %c0_137, %c0_138] : memref<2x1x128xf32, #tpu.memory_space<vmem>>, vector<1x1x128xf32>
    %378 = vector.shape_cast %377 : vector<1x1x128xf32> to vector<1x128xf32>
    %cst_139 = arith.constant dense<0.000000e+00> : vector<64xf32>
    %379 = vector.multi_reduction <add>, %374, %cst_139 [1] : vector<64x128xf32> to vector<64xf32>
    %380 = vector.shape_cast %379 : vector<64xf32> to vector<64x1xf32>
    %cst_140 = arith.constant 1.280000e+02 : f32
    %381 = vector.broadcast %cst_140 : f32 to vector<64x1xf32>
    %382 = arith.divf %380, %381 : vector<64x1xf32>
    %383 = vector.broadcast %382 : vector<64x1xf32> to vector<64x128xf32>
    %384 = arith.subf %374, %383 : vector<64x128xf32>
    %385 = arith.mulf %384, %384 : vector<64x128xf32>
    %cst_141 = arith.constant dense<0.000000e+00> : vector<64xf32>
    %386 = vector.multi_reduction <add>, %385, %cst_141 [1] : vector<64x128xf32> to vector<64xf32>
    %387 = vector.shape_cast %386 : vector<64xf32> to vector<64x1xf32>
    %cst_142 = arith.constant 1.280000e+02 : f32
    %388 = vector.broadcast %cst_142 : f32 to vector<64x1xf32>
    %389 = arith.divf %387, %388 : vector<64x1xf32>
    %390 = vector.broadcast %382 : vector<64x1xf32> to vector<64x128xf32>
    %391 = arith.subf %374, %390 : vector<64x128xf32>
    %cst_143 = arith.constant 9.99999974E-6 : f32
    %392 = vector.broadcast %cst_143 : f32 to vector<64x1xf32>
    %393 = arith.addf %389, %392 : vector<64x1xf32>
    %394 = math.rsqrt %393 : vector<64x1xf32>
    %395 = vector.broadcast %394 : vector<64x1xf32> to vector<64x128xf32>
    %396 = arith.mulf %391, %395 : vector<64x128xf32>
    %397 = vector.broadcast %376 : vector<1x128xf32> to vector<64x128xf32>
    %398 = arith.mulf %396, %397 : vector<64x128xf32>
    %399 = vector.broadcast %378 : vector<1x128xf32> to vector<64x128xf32>
    %400 = arith.addf %398, %399 : vector<64x128xf32>
    %401 = vector.shape_cast %400 : vector<64x128xf32> to vector<8x8x128xf32>
    %cst_144 = arith.constant dense<0.000000e+00> : vector<8x128xf32>
    %402 = vector.multi_reduction <add>, %401, %cst_144 [1] : vector<8x8x128xf32> to vector<8x128xf32>
    %cst_145 = arith.constant 8.000000e+00 : f32
    %403 = vector.broadcast %cst_145 : f32 to vector<8x128xf32>
    %404 = arith.divf %402, %403 : vector<8x128xf32>
    %405 = arith.truncf %404 : vector<8x128xf32> to vector<8x128xbf16>
    %c0_146 = arith.constant 0 : index
    %c0_147 = arith.constant 0 : index
    %406 = vector.load %arg14[%c0_146, %c0_147] : memref<128x256xbf16, #tpu.memory_space<vmem>>, vector<128x256xbf16>
    %cst_148 = arith.constant dense<0.000000e+00> : vector<8x256xf32>
    %407 = tpu.matmul %405, %406, %cst_148 {dimension_numbers = #tpu.dot_dimension_numbers<[1], [0], [0], [1], [0, 0, 1, 1], [], []>} : vector<8x128xbf16>, vector<128x256xbf16>, vector<8x256xf32> -> vector<8x256xf32>
    %c0_149 = arith.constant 0 : index
    %c0_150 = arith.constant 0 : index
    %408 = vector.load %arg15[%c0_149, %c0_150] : memref<1x256xf32, #tpu.memory_space<vmem>>, vector<1x256xf32>
    %409 = vector.broadcast %408 : vector<1x256xf32> to vector<8x256xf32>
    %410 = arith.addf %407, %409 : vector<8x256xf32>
    %cst_151 = arith.constant 0.000000e+00 : f32
    %411 = vector.broadcast %cst_151 : f32 to vector<8x256xf32>
    %412 = arith.maximumf %410, %411 : vector<8x256xf32>
    %413 = arith.truncf %412 : vector<8x256xf32> to vector<8x256xbf16>
    %c0_152 = arith.constant 0 : index
    %c0_153 = arith.constant 0 : index
    %414 = vector.load %arg16[%c0_152, %c0_153] : memref<256x128xbf16, #tpu.memory_space<vmem>>, vector<256x128xbf16>
    %cst_154 = arith.constant dense<0.000000e+00> : vector<8x128xf32>
    %415 = tpu.matmul %413, %414, %cst_154 {dimension_numbers = #tpu.dot_dimension_numbers<[1], [0], [0], [1], [0, 0, 1, 1], [], []>} : vector<8x256xbf16>, vector<256x128xbf16>, vector<8x128xf32> -> vector<8x128xf32>
    %c0_155 = arith.constant 0 : index
    %c0_156 = arith.constant 0 : index
    %416 = vector.load %arg17[%c0_155, %c0_156] : memref<1x128xf32, #tpu.memory_space<vmem>>, vector<1x128xf32>
    %417 = vector.broadcast %416 : vector<1x128xf32> to vector<8x128xf32>
    %418 = arith.addf %415, %417 : vector<8x128xf32>
    %c0_157 = arith.constant 0 : index
    %c0_158 = arith.constant 0 : index
    %419 = vector.load %arg18[%c0_157, %c0_158] : memref<8x128xf32, #tpu.memory_space<vmem>>, vector<8x128xf32>
    tpu.vector_store %arg18[%c0_157, %c0_158], %418 {strides = array<i32>} : memref<8x128xf32, #tpu.memory_space<vmem>>, vector<8x128xf32>,
    return
  }
  func.func @transform_0(%arg0: i32) -> (i32, i32, i32) {
    %c0_i32 = arith.constant 0 : i32
    %c0_i32_0 = arith.constant 0 : i32
    %c0_i32_1 = arith.constant 0 : i32
    return %arg0, %c0_i32, %c0_i32_0 : i32, i32, i32
  }
  func.func @transform_1(%arg0: i32) -> (i32, i32, i32) {
    %c0_i32 = arith.constant 0 : i32
    %c0_i32_0 = arith.constant 0 : i32
    %c0_i32_1 = arith.constant 0 : i32
    %c0_i32_2 = arith.constant 0 : i32
    return %c0_i32, %c0_i32_0, %c0_i32_1 : i32, i32, i32
  }
  func.func @transform_2(%arg0: i32) -> (i32, i32, i32) {
    %c0_i32 = arith.constant 0 : i32
    %c0_i32_0 = arith.constant 0 : i32
    %c0_i32_1 = arith.constant 0 : i32
    %c0_i32_2 = arith.constant 0 : i32
    return %c0_i32, %c0_i32_0, %c0_i32_1 : i32, i32, i32
  }
  func.func @transform_3(%arg0: i32) -> (i32, i32, i32, i32) {
    %c0_i32 = arith.constant 0 : i32
    %c0_i32_0 = arith.constant 0 : i32
    %c0_i32_1 = arith.constant 0 : i32
    %c0_i32_2 = arith.constant 0 : i32
    %c0_i32_3 = arith.constant 0 : i32
    return %c0_i32, %c0_i32_0, %c0_i32_1, %c0_i32_2 : i32, i32, i32, i32
  }
  func.func @transform_4(%arg0: i32) -> (i32, i32, i32) {
    %c0_i32 = arith.constant 0 : i32
    %c0_i32_0 = arith.constant 0 : i32
    %c0_i32_1 = arith.constant 0 : i32
    %c0_i32_2 = arith.constant 0 : i32
    return %c0_i32, %c0_i32_0, %c0_i32_1 : i32, i32, i32
  }
  func.func @transform_5(%arg0: i32) -> (i32, i32, i32) {
    %c0_i32 = arith.constant 0 : i32
    %c0_i32_0 = arith.constant 0 : i32
    %c0_i32_1 = arith.constant 0 : i32
    %c0_i32_2 = arith.constant 0 : i32
    return %c0_i32, %c0_i32_0, %c0_i32_1 : i32, i32, i32
  }
  func.func @transform_6(%arg0: i32) -> (i32, i32, i32) {
    %c0_i32 = arith.constant 0 : i32
    %c0_i32_0 = arith.constant 0 : i32
    %c0_i32_1 = arith.constant 0 : i32
    %c0_i32_2 = arith.constant 0 : i32
    return %c0_i32, %c0_i32_0, %c0_i32_1 : i32, i32, i32
  }
  func.func @transform_7(%arg0: i32) -> (i32, i32, i32) {
    %c0_i32 = arith.constant 0 : i32
    %c0_i32_0 = arith.constant 0 : i32
    %c0_i32_1 = arith.constant 0 : i32
    %c0_i32_2 = arith.constant 0 : i32
    return %c0_i32, %c0_i32_0, %c0_i32_1 : i32, i32, i32
  }
  func.func @transform_8(%arg0: i32) -> (i32, i32, i32) {
    %c0_i32 = arith.constant 0 : i32
    %c0_i32_0 = arith.constant 0 : i32
    %c0_i32_1 = arith.constant 0 : i32
    %c0_i32_2 = arith.constant 0 : i32
    return %c0_i32, %c0_i32_0, %c0_i32_1 : i32, i32, i32
  }
  func.func @transform_9(%arg0: i32) -> (i32, i32, i32) {
    %c0_i32 = arith.constant 0 : i32
    %c0_i32_0 = arith.constant 0 : i32
    %c0_i32_1 = arith.constant 0 : i32
    %c0_i32_2 = arith.constant 0 : i32
    return %c0_i32, %c0_i32_0, %c0_i32_1 : i32, i32, i32
  }
  func.func @transform_10(%arg0: i32) -> (i32, i32, i32) {
    %c0_i32 = arith.constant 0 : i32
    %c0_i32_0 = arith.constant 0 : i32
    %c0_i32_1 = arith.constant 0 : i32
    %c0_i32_2 = arith.constant 0 : i32
    return %c0_i32, %c0_i32_0, %c0_i32_1 : i32, i32, i32
  }
  func.func @transform_11(%arg0: i32) -> (i32, i32, i32) {
    %c0_i32 = arith.constant 0 : i32
    %c0_i32_0 = arith.constant 0 : i32
    %c0_i32_1 = arith.constant 0 : i32
    %c0_i32_2 = arith.constant 0 : i32
    return %c0_i32, %c0_i32_0, %c0_i32_1 : i32, i32, i32
  }
  func.func @transform_12(%arg0: i32) -> (i32, i32, i32) {
    %c0_i32 = arith.constant 0 : i32
    %c0_i32_0 = arith.constant 0 : i32
    %c0_i32_1 = arith.constant 0 : i32
    %c0_i32_2 = arith.constant 0 : i32
    return %c0_i32, %c0_i32_0, %c0_i32_1 : i32, i32, i32
  }
  func.func @transform_13(%arg0: i32) -> (i32, i32) {
    %c0_i32 = arith.constant 0 : i32
    %c0_i32_0 = arith.constant 0 : i32
    %c0_i32_1 = arith.constant 0 : i32
    return %c0_i32, %c0_i32_0 : i32, i32
  }
  func.func @transform_14(%arg0: i32) -> (i32, i32) {
    %c0_i32 = arith.constant 0 : i32
    %c0_i32_0 = arith.constant 0 : i32
    %c0_i32_1 = arith.constant 0 : i32
    return %c0_i32, %c0_i32_0 : i32, i32
  }
  func.func @transform_15(%arg0: i32) -> (i32, i32) {
    %c0_i32 = arith.constant 0 : i32
    %c0_i32_0 = arith.constant 0 : i32
    %c0_i32_1 = arith.constant 0 : i32
    return %c0_i32, %c0_i32_0 : i32, i32
  }
  func.func @transform_16(%arg0: i32) -> (i32, i32) {
    %c0_i32 = arith.constant 0 : i32
    %c0_i32_0 = arith.constant 0 : i32
    %c0_i32_1 = arith.constant 0 : i32
    return %c0_i32, %c0_i32_0 : i32, i32
  }
  func.func @transform_17(%arg0: i32) -> (i32, i32) {
    %c0_i32 = arith.constant 0 : i32
    %c0_i32_0 = arith.constant 0 : i32
    return %arg0, %c0_i32 : i32, i32
  }
}

</mosaic_0001>

<bundles_post_ra>
// kernel: tpu_custom_call.1
= control target key start
LH: loop header
LB: loop body
LE: loop exit
PB: predicated region body
PF: predicated region fallthrough
CT: control target
= control target key end

     0   :  { %s13348_s0 = inlined_call_operand.hbm [shape: bf16[16,8,128], index: 0, kind: input, shape index: {}]   ;;  %s13349_s1 = inlined_call_operand.hbm [shape: bf16[2,128,384], index: 1, kind: input, shape index: {}]   ;;  %s13350_s2 = inlined_call_operand.hbm [shape: f32[2,1,384], index: 2, kind: input, shape index: {}]   ;;  %s13351_s3 = inlined_call_operand.hbm [shape: bf16[2,4,32,128], index: 3, kind: input, shape index: {}]   ;;  %s13352_s4 = inlined_call_operand.vmem [shape: f32[2,1,128], index: 4, kind: input, shape index: {}]   ;;  %s13353_s5 = inlined_call_operand.vmem [shape: f32[2,1,128], index: 5, kind: input, shape index: {}]   ;;  %s13354_s6 = inlined_call_operand.hbm [shape: f32[2,1,128], index: 6, kind: input, shape index: {}]   ;;  %s13355_s7 = inlined_call_operand.hbm [shape: bf16[2,128,512], index: 7, kind: input, shape index: {}]   ;;  %s13356_s8 = inlined_call_operand.hbm [shape: f32[2,1,512], index: 8, kind: input, shape index: {}]   ;;  %s13357_s9 = inlined_call_operand.hbm [shape: bf16[2,512,128], index: 9, kind: input, shape index: {}]   ;;  %s13358_s10 = inlined_call_operand.vmem [shape: f32[2,1,128], index: 10, kind: input, shape index: {}]   ;;  %s13359_s11 = inlined_call_operand.vmem [shape: f32[2,1,128], index: 11, kind: input, shape index: {}]   ;;  %s13360_s12 = inlined_call_operand.vmem [shape: f32[2,1,128], index: 12, kind: input, shape index: {}]   ;;  %s13361_s13 = inlined_call_operand.hbm [shape: bf16[128,256], index: 13, kind: input, shape index: {}]   ;;  %s13362_s14 = inlined_call_operand.vmem [shape: f32[1,256], index: 14, kind: input, shape index: {}]   ;;  %s13363_s15 = inlined_call_operand.hbm [shape: bf16[256,128], index: 15, kind: input, shape index: {}]   ;;  %s13364_s16 = inlined_call_operand.vmem [shape: f32[1,128], index: 16, kind: input, shape index: {}]   ;;  %s13365_s17 = inlined_call_operand.hbm [shape: f32[16,128], index: 17, kind: output, shape index: {}]  }
   0x1   :  { %13393 = sst [smem:[#allocation40_spill]] %s13348_s0 }
   0x2   :  { %13394 = sst [smem:[#allocation41_spill]] %s13349_s1 }
   0x3   :  { %13395 = sst [smem:[#allocation42_spill]] %s13350_s2 }
   0x4   :  { %13396 = sst [smem:[#allocation43_spill]] %s13351_s3 }
   0x5   :  { %13397 = sst [smem:[#allocation44_spill]] %s13354_s6 }
   0x6   :  { %13398 = sst [smem:[#allocation45_spill]] %s13355_s7 }
   0x7   :  { %13399 = sst [smem:[#allocation46_spill]] %s13356_s8 }
   0x8   :  { %13400 = sst [smem:[#allocation47_spill]] %s13357_s9 }
   0x9   :  { %13401 = sst [smem:[#allocation48_spill]] %s13358_s10 }
   0xa   :  { %13402 = sst [smem:[#allocation49_spill]] %s13359_s11 }
   0xb   :  { %13403 = sst [smem:[#allocation50_spill]] %s13360_s12 }
   0xc   :  { %13404 = sst [smem:[#allocation51_spill]] %s13362_s14 }
   0xd   :  { %13405 = sst [smem:[#allocation52_spill]] %s13364_s16 }
   0xe   :  { %13406 = sst [smem:[#allocation53_spill]] %s13365_s17 }
   0xf   :  { %22 = vsyncpa [#allocation3], 0 }
  0x10   :  { %24 = vsyncpa [#allocation3 + $0x1], 0 }
  0x11   :  { %25 = vsyncpa [#allocation6], 0 }
  0x12   :  { %26 = vsyncpa [#allocation9], 0 }
  0x13   :  { %27 = vsyncpa [#allocation12], 0 }
  0x14   :  { %28 = vsyncpa [#allocation15], 0 }
  0x15   :  { %29 = vsyncpa [#allocation18], 0 }
  0x16   :  { %30 = vsyncpa [#allocation4], 0 }
  0x17   :  { %32 = vsyncpa [#allocation4 + $0x1], 0  ;;  %s10659_s24 = smov 0   ;;  %s10661_s25 = smov 0  }
  0x18   :  { %s10663_s26 = smov 0   ;;  %s10665_s27 = smov 0  }
  0x19 LB: > { %s13407_s0 = sld [smem:[#allocation41_spill]]  ;;  %s10683_s18 = sadd.s32 4294967295, %s10542_s27   ;;  %s10542_s27 = sphi %s10665_s27, %s13482_s27   ;;  %s10538_s26 = sphi %s10663_s26, %s13481_s26   ;;  %s10534_s25 = sphi %s10661_s25, %s13480_s25   ;;  %s10530_s24 = sphi %s10659_s24, %s13479_s24  }
  0x1a   : > { %p8327_p0 = scmp.ge.s32.totalorder %s10542_s27, 1  ;;  %p59_p1 = scmp.eq.s32.totalorder %s10683_s18, 0 }
  0x1b   : > { %p431_p2 = scmp.lt.s32.totalorder %s10542_s27, 3  ;;  %s10544_s1 = smov [#allocation5]  }
  0x1c   : > { %s444_s20 = sshll.u32 %s10544_s1, 4  ;;  %s13409_s3 = sld [smem:[#allocation43_spill]]  ;;  %s445_s20 = int_to_ptr.vmem [resolvable:$true] %s444_s20 }
  0x1d   : > { %p10688_p3 = pnand %p8327_p0, %p431_p2  ;;  %s10545_s29 = smov [#allocation8]  }
  0x1e   : > { %s10546_s1 = smov 192   ;;  %s10547_s17 = smov 12  }
  0x1f   : > { %s442_s30 = sshll.u32 %s13407_s0, 4  ;;  %p9702_p4 = pneg %p10688_p3  ;;  %s443_s30 = int_to_ptr.hbm [resolvable:$true] %s442_s30 }
  0x20   : > { %s472_s0 = sshll.u32 %s10545_s29, 4  ;;  %s13371_s16 = smov 64   ;;  %s473_s0 = int_to_ptr.vmem [resolvable:$true] %s472_s0 }
  0x21   : > { %p10700_p6 = pnand %p9702_p4, %p59_p1  ;;  %s13373_s14 = smov 4  }
  0x22   : > { %s470_s23 = sshll.u32 %s13409_s3, 4  ;;  %s13411_s7 = sld [smem:[#allocation45_spill]]  ;;  %s471_s23 = int_to_ptr.hbm [resolvable:$true] %s470_s23 }
  0x23   : > { %9705 = dma.hbm_to_vmem [thread:$0]  (!%p10700_p6), %s443_s30, 6144, %s445_s20, [#allocation6], %s10546_s1, %s10546_s1, %s10547_s17  }
  0x24   : > { %9711 = dma.hbm_to_vmem [thread:$0]  (!%p10700_p6), %s471_s23, 2048, %s473_s0, [#allocation9], %s13371_s16, %s13371_s16, %s13373_s14  }
  0x25   : > { %s10550_s29 = smov [#allocation11]   ;;  %s13412_s9 = sld [smem:[#allocation47_spill]] }
  0x26   : > { %s506_s12 = sshll.u32 %s10550_s29, 4  ;;  %s10551_s30 = smov 256   ;;  %s507_s12 = int_to_ptr.vmem [resolvable:$true] %s506_s12 }
  0x27   : > { %s10552_s20 = smov 16   ;;  %s10553_s23 = smov [#allocation14]  }
  0x28   : > { %s504_s3 = sshll.u32 %s13411_s7, 4  ;;  %s534_s0 = sshll.u32 %s10553_s23, 4  ;;  %s505_s3 = int_to_ptr.hbm [resolvable:$true] %s504_s3  ;;  %s535_s0 = int_to_ptr.vmem [resolvable:$true] %s534_s0 }
  0x29   : > { %9717 = dma.hbm_to_vmem [thread:$0]  (!%p10700_p6), %s505_s3, 8192, %s507_s12, [#allocation12], %s10551_s30, %s10551_s30, %s10552_s20  }
  0x2a   : > { %s13413_s2 = sld [smem:[#allocation42_spill]]  ;;  %s10554_s10 = smov [#allocation7]  }
  0x2b   : > { %s532_s17 = sshll.u32 %s13412_s9, 4  ;;  %s458_s11 = sshll.u32 %s10554_s10, 4  ;;  %s533_s17 = int_to_ptr.hbm [resolvable:$true] %s532_s17  ;;  %s459_s11 = int_to_ptr.vmem [resolvable:$true] %s458_s11 }
  0x2c   : > { %9723 = dma.hbm_to_vmem [thread:$0]  (!%p10700_p6), %s533_s17, 8192, %s535_s0, [#allocation15], %s13371_s16, %s13371_s16, %s13373_s14  }
  0x2d   : > { %s13414_s6 = sld [smem:[#allocation44_spill]]  ;;  %s10555_s30 = smov 48  }
  0x2e   : > { %s10556_s23 = smov 3   ;;  %s10557_s1 = smov [#allocation10]  }
  0x2f   : > { %s492_s21 = sshll.u32 %s10557_s1, 4  ;;  %s13415_s8 = sld [smem:[#allocation46_spill]]  ;;  %s493_s21 = int_to_ptr.vmem [resolvable:$true] %s492_s21 }
  0x30   : > { %s456_s22 = sshll.u32 %s13413_s2, 4  ;;  %s10558_s0 = smov 1   ;;  %s457_s22 = int_to_ptr.hbm [resolvable:$true] %s456_s22 }
  0x31   : > { %9708 = dma.hbm_to_vmem [thread:$0]  (!%p10700_p6), %s457_s22, 96, %s459_s11, [#allocation6], %s10555_s30, %s10555_s30, %s10556_s23  }
  0x32   : > { %s10559_s10 = smov [#allocation13]   ;;  %s555_s22 = sshll.u32 %s13361_s13, 4  ;;  %s556_s22 = int_to_ptr.hbm [resolvable:$true] %s555_s22 }
  0x33   : > { %s490_s12 = sshll.u32 %s13414_s6, 4  ;;  %s520_s29 = sshll.u32 %s10559_s10, 4  ;;  %s491_s12 = int_to_ptr.hbm [resolvable:$true] %s490_s12  ;;  %s521_s29 = int_to_ptr.vmem [resolvable:$true] %s520_s29 }
  0x34   : > { %9714 = dma.hbm_to_vmem [thread:$0]  (!%p10700_p6), %s491_s12, 32, %s493_s21, [#allocation9], %s10552_s20, %s10552_s20, %s10558_s0  }
  0x35   : > { %s518_s17 = sshll.u32 %s13415_s8, 4  ;;  %s13416_s2 = smov 64   ;;  %s519_s17 = int_to_ptr.hbm [resolvable:$true] %s518_s17 }
  0x36   : > { %9720 = dma.hbm_to_vmem [thread:$0]  (!%p10700_p6), %s519_s17, 128, %s521_s29, [#allocation12], %s13416_s2, %s13416_s2, %s13373_s14  }
  0x37   : > { %s10560_s7 = smov [#allocation16]   ;;  %s572_s12 = sshll.u32 %s13363_s15, 4  ;;  %s573_s12 = int_to_ptr.hbm [resolvable:$true] %s572_s12 }
  0x38   : > { %s557_s20 = sshll.u32 %s10560_s7, 4  ;;  %s10561_s30 = smov 128   ;;  %s558_s20 = int_to_ptr.vmem [resolvable:$true] %s557_s20 }
  0x39   : > { %s10562_s23 = smov 8   ;;  %s10563_s1 = smov [#allocation17]  }
  0x3a   : > { %9726 = dma.hbm_to_vmem [thread:$0]  (!%p10700_p6), %s556_s22, 2048, %s558_s20, [#allocation15], %s10561_s30, %s10561_s30, %s10562_s23  }
  0x3b   : > { %s574_s21 = sshll.u32 %s10563_s1, 4  ;;  %s8326_s17 = sadd.s32 4294967294, %s10542_s27   ;;  %s575_s21 = int_to_ptr.vmem [resolvable:$true] %s574_s21 }
  0x3c   : > { %9729 = dma.hbm_to_vmem [thread:$0]  (!%p10700_p6), %s573_s12, 2048, %s575_s21, [#allocation18], %s13416_s2, %s13416_s2, %s13373_s14  }
  0x3d   : > { %s10757_s0 = sadd.s32 1, %s10542_s27   ;;  %s45_s29 = sadd.s32 1, %s10538_s26 }
  0x3e   : > { %s42_s10 = ssub.s32 %s10542_s27, %s10757_s0  ;;  %p52_p8 = scmp.ne.s32.totalorder %s10538_s26, %s10534_s25 }
  0x3f   : > { %p43_p7 = scmp.eq.s32.totalorder %s42_s10, 0  ;;  %p53_p9 = scmp.eq.s32.totalorder %s10542_s27, 0 }
  0x40   : > { %p58_p10 = scmp.ne.s32.totalorder %s10534_s25, %s10530_s24  ;;  %p418_p13 = scmp.eq.s32.totalorder %s10683_s18, 1 }
  0x41   : > { %s10768_s3 = scalar_select %p43_p7, %s10538_s26, %s45_s29  }
  0x42   : > { %p10770_p11 = por %p53_p9, %p52_p8  ;;  %p10776_p12 = por %p59_p1, %p58_p10 }
  0x43   : > { %p424_p0 = scmp.eq.s32.totalorder %s8326_s17, 1  ;;  %p9747_p2 = scmp.lt.s32.totalorder %s10542_s27, 2 }
  0x44   : > { %s591_s7 = sand.u32 1, %s10538_s26   ;;  %p10783_p4 = por %p418_p13, %p52_p8 }
  0x45   : > { %p10787_p6 = por %p424_p0, %p58_p10  ;;  %s8338_s16 = sshll.u32 %s591_s7, 5 }
  0x46   : > { %s9418_s12 = sshll.u32 %s10542_s27, 5  ;;  %s13421_s1 = sld [smem:[#allocation40_spill]] }
  0x47   : > { %s595_s10 = scalar_lea.vmem [#allocation2], %s8338_s16  ;;  %p10797_p7 = pnand %p9747_p2, %p10770_p11 }
  0x48   : > { %s603_s29 = sshll.u32 %s595_s10, 4  ;;  %s592_s6 = scalar_lea.sflag [#allocation3], %s591_s7  ;;  %s604_s29 = int_to_ptr.vmem [resolvable:$true] %s603_s29 }
  0x49   : > { %p10430_p9 = pneg %p10797_p7 }
  0x4c   : > { %s600_s21 = scalar_lea.hbm %s13421_s1, %s9418_s12  ;;  %s10433_s30 = scalar_lea.hbm %s13421_s1, 64 }
  0x4d   : > { %s601_s14 = sshll.u32 %s600_s21, 4  ;;  %s602_s14 = int_to_ptr.hbm [resolvable:$true] %s601_s14 }
  0x4e   : > { %s10426_s8 = sshra.s32 %s602_s14, 4  ;;  %s10427_s8 = int_to_ptr.hbm [resolvable:$true] %s10426_s8 }
  0x4f   : > { %s10428_s9 = scalar_lea.hbm %s10427_s8, 32  ;;  %p10434_p11 = scmp.lt.s32.totalorder %s10427_s8, %s13421_s1 }
  0x50   : > { %p10429_p8 = scmp.ne.s32.totalorder %s10427_s8, %s10428_s9  ;;  %p10435_p0 = scmp.lt.s32.totalorder %s10433_s30, %s10428_s9 }
  0x52   : > { %p10431_p10 = pnand %p10430_p9, %p10429_p8  ;;  %p10436_p2 = por %p10435_p0, %p10434_p11 }
  0x54   : > { %p10432_p13 = pneg %p10431_p10 }
  0x56   : > { %p10437_p5 = pnand %p10436_p2, %p10432_p13 }
  0x58   : > { %10440 = shalt.err (!%p10437_p5)
}
  0x59   : > { %s13423_s7 = smov 4   ;;  %615 = sbr.rel (%p10688_p3) target bundleno = 5796 (0x16a4), region = 88 }
  0x5a   : > { %9733 = dma.hbm_to_vmem [thread:$0]  (!%p10797_p7), %s602_s14, 512, %s604_s29, %s592_s6, %s13416_s2, %s13416_s2, %s13423_s7  }
  0x5e   : > { %s10817_s21 = sand.u32 1, %s10534_s25  }
  0x5f   : > { %s8342_s8 = sshll.u32 %s10817_s21, 5  ;;  %s618_s9 = scalar_lea.sflag [#allocation3], %s10817_s21 }
  0x60   : > { %s10821_s10 = scalar_lea.vmem [#allocation2], %s8342_s8 }
  0x61   : > { %10501 = dma.done.wait (%p10776_p12), %s618_s9, 512  }
  0x62   : > { %10503 = vsyncadd (%p10776_p12), %s618_s9, 4294966784 }
  0x63   : > { %10505 = dma.done.wait (%p59_p1), [#allocation6], 6240  }
  0x64   : > { %10507 = vsyncadd (%p59_p1), [#allocation6], 4294961056 }
  0x65   : > { %10509 = dma.done.wait (%p59_p1), [#allocation9], 2080  }
  0x66   : > { %10511 = vsyncadd (%p59_p1), [#allocation9], 4294965216 }
  0x67   : > { %10513 = dma.done.wait (%p59_p1), [#allocation12], 8320  }
  0x68   : > { %10515 = vsyncadd (%p59_p1), [#allocation12], 4294958976 }
  0x69   : > { %10517 = dma.done.wait (%p59_p1), [#allocation15], 10240  }
  0x6a   : > { %10519 = vsyncadd (%p59_p1), [#allocation15], 4294957056 }
  0x6b   : > { %10521 = dma.done.wait (%p59_p1), [#allocation18], 2048  }
  0x6c   : > { %10523 = vsyncadd (%p59_p1), [#allocation18], 4294965248  ;;  %v8439_v0 = vld [vmem:[#allocation5 + $0xa8] sm:$0xf]  ;;  %v9441_v1 = vld [vmem:[#allocation5 + $0xb0] sm:$0xf0] }
  0x6d   : > { %v9440_v2 = vld [vmem:[#allocation5 + $0xac] sm:$0xf]  ;;  %v8440_v3 = vor.u32 %v9441_v1, %v8439_v0  ;;  %v8441_v4 = vld [vmem:[#allocation5 + $0xb4] sm:$0xf0]  ;;  %v8427_v5 = vld [vmem:[#allocation5 + $0x90] sm:$0xf] }
  0x6e   : > { %v9438_v6 = vld [vmem:[#allocation5 + $0x98] sm:$0xf0]  ;;  %v8444_v7 = vor.u32 %v9440_v2, %v8441_v4  ;;  %v9437_v8 = vld [vmem:[#allocation5 + $0x94] sm:$0xf]  ;;  %v8429_v9 = vld [vmem:[#allocation5 + $0x9c] sm:$0xf0] }
  0x6f   : > { %908 = vmatpush.bf16.msra.mxu0 %v8440_v3  ;;  %v8428_v10 = vor.u32 %v9438_v6, %v8427_v5  ;;  %v8432_v11 = vor.u32 %v9437_v8, %v8429_v9  ;;  %v8415_v12 = vld [vmem:[#allocation5 + $0x78] sm:$0xf]  ;;  %v9435_v13 = vld [vmem:[#allocation5 + $0x80] sm:$0xf0]  ;;  %v9434_v14 = vld [vmem:[#allocation5 + $0x7c] sm:$0xf] }
  0x70   : > { %937 = vmatpush.bf16.msra.mxu1 %v8444_v7  ;;  %v8417_v15 = vld [vmem:[#allocation5 + $0x84] sm:$0xf0]  ;;  %v8416_v16 = vor.u32 %v9435_v13, %v8415_v12  ;;  %v8403_v18 = vld [vmem:[#allocation5 + $0x60] sm:$0xf]  ;;  %v9432_v19 = vld [vmem:[#allocation5 + $0x68] sm:$0xf0] }
  0x71   : > { %v8420_v17 = vor.u32 %v9434_v14, %v8417_v15  ;;  %v9431_v20 = vld [vmem:[#allocation5 + $0x64] sm:$0xf]  ;;  %v8405_v21 = vld [vmem:[#allocation5 + $0x6c] sm:$0xf0]  ;;  %v8391_v22 = vld [vmem:[#allocation5 + $0x48] sm:$0xf]  ;;  %v8404_v24 = vor.u32 %v9432_v19, %v8403_v18 }
  0x72   : > { %v9429_v23 = vld [vmem:[#allocation5 + $0x50] sm:$0xf0]  ;;  %v9428_v25 = vld [vmem:[#allocation5 + $0x4c] sm:$0xf]  ;;  %v8393_v26 = vld [vmem:[#allocation5 + $0x54] sm:$0xf0]  ;;  %v8408_v27 = vor.u32 %v9431_v20, %v8405_v21 }
  0x73   : > { %909 = vmatpush.bf16.msra.mxu0 %v8428_v10  ;;  %v8392_v28 = vor.u32 %v9429_v23, %v8391_v22  ;;  %v8396_v29 = vor.u32 %v9428_v25, %v8393_v26  ;;  %v8379_v30 = vld [vmem:[#allocation5 + $0x30] sm:$0xf]  ;;  %v9426_v31 = vld [vmem:[#allocation5 + $0x38] sm:$0xf0]  ;;  %v9425_v32 = vld [vmem:[#allocation5 + $0x34] sm:$0xf] }
  0x74   : > { %938 = vmatpush.bf16.msra.mxu1 %v8432_v11  ;;  %v8381_v33 = vld [vmem:[#allocation5 + $0x3c] sm:$0xf0]  ;;  %v8380_v34 = vor.u32 %v9426_v31, %v8379_v30  ;;  %v8367_v36 = vld [vmem:[#allocation5 + $0x18] sm:$0xf]  ;;  %v9423_v37 = vld [vmem:[#allocation5 + $0x20] sm:$0xf0] }
  0x75   : > { %v8384_v35 = vor.u32 %v9425_v32, %v8381_v33  ;;  %v9422_v38 = vld [vmem:[#allocation5 + $0x1c] sm:$0xf]  ;;  %v8369_v39 = vld [vmem:[#allocation5 + $0x24] sm:$0xf0]  ;;  %v8368_v40 = vor.u32 %v9423_v37, %v8367_v36  ;;  %v8355_v42 = vld [vmem:[#allocation5] sm:$0xf] }
  0x76   : > { %v8372_v41 = vor.u32 %v9422_v38, %v8369_v39  ;;  %v9420_v43 = vld [vmem:[#allocation5 + $0x8] sm:$0xf0]  ;;  %v9419_v44 = vld [vmem:[#allocation5 + $0x4] sm:$0xf]  ;;  %v8357_v45 = vld [vmem:[#allocation5 + $0xc] sm:$0xf0] }
  0x77   : > { %910 = vmatpush.bf16.msra.mxu0 %v8416_v16  ;;  %v8356_v46 = vor.u32 %v9420_v43, %v8355_v42  ;;  %v8360_v47 = vor.u32 %v9419_v44, %v8357_v45  ;;  %v10848_v48 = vld [vmem:[%s10821_s10] sm:$0xff]   ;;  %v10853_v49 = vld [vmem:[%s10821_s10 + $0x8] sm:$0xff]   ;;  %v10858_v50 = vld [vmem:[%s10821_s10 + $0x10] sm:$0xff]   ;;  %vm1035_vm0 = vcmask 261120   ;;  %s10564_s6 = smov 96   ;;  %vm1188_vm1 = vcmask 64512  }
  0x78   : > { %939 = vmatpush.bf16.msra.mxu1 %v8420_v17  ;;  %v10863_v51 = vld [vmem:[%s10821_s10 + $0x18] sm:$0xff]   ;;  %v10867_v52 = vld [vmem:[#allocation7] sm:$0x7]  ;;  %v8447_v2 = vld [vmem:[#allocation5 + $0xb0] sm:$0xf]  ;;  %vm1280_vm2 = vcmask 1043456  }
  0x79   : > { %v10870_v53 = vperm.slane %v10867_v52, 1  ;;  %v10873_v56 = vperm.slane %v10867_v52, 0  ;;  %v9442_v3 = vld [vmem:[#allocation5 + $0xb8] sm:$0xf0]  ;;  %v8435_v9 = vld [vmem:[#allocation5 + $0x98] sm:$0xf] }
  0x7a   : > { %v8448_v5 = vor.u32 %v9442_v3, %v8447_v2  ;;  %v9439_v10 = vld [vmem:[#allocation5 + $0xa0] sm:$0xf0]  ;;  %v8423_v15 = vld [vmem:[#allocation5 + $0x80] sm:$0xf]  ;;  %v9436_v16 = vld [vmem:[#allocation5 + $0x88] sm:$0xf0] }
  0x7b   : > { %911 = vmatpush.bf16.msra.mxu0 %v8404_v24  ;;  %v8436_v12 = vor.u32 %v9439_v10, %v8435_v9  ;;  %v8424_v19 = vor.u32 %v9436_v16, %v8423_v15  ;;  %v8411_v25 = vld [vmem:[#allocation5 + $0x68] sm:$0xf]  ;;  %v9433_v26 = vld [vmem:[#allocation5 + $0x70] sm:$0xf0]  ;;  %v8399_v33 = vld [vmem:[#allocation5 + $0x50] sm:$0xf] }
  0x7c   : > { %940 = vmatpush.bf16.msra.mxu1 %v8408_v27  ;;  %966 = vmatpush.bf16.msra.mxu2 %v8448_v5  ;;  %v8387_v42 = vld [vmem:[#allocation5 + $0x38] sm:$0xf]  ;;  %v9427_v43 = vld [vmem:[#allocation5 + $0x40] sm:$0xf0]  ;;  %s10565_s14 = smov 64   ;;  %s10566_s19 = smov 32  }
  0x7d   : > { %v8388_v45 = vor.u32 %v9427_v43, %v8387_v42  ;;  %s13435_s30 = sld [smem:[#allocation48_spill]] }
  0x7e   : > { %s13436_s7 = sld [smem:[#allocation49_spill]] }
  0x7f   : > { %912 = vmatpush.bf16.msra.mxu0 %v8392_v28  ;;  %s13475_s9 = sld [smem:[#allocation51_spill]] }
  0x80   : > { %941 = vmatpush.bf16.msra.mxu1 %v8396_v29  ;;  %967 = vmatpush.bf16.msra.mxu2 %v8436_v12  ;;  %v8412_v29 = vor.u32 %v9433_v26, %v8411_v25  ;;  %s13476_s22 = sld [smem:[#allocation52_spill]] }
  0x81   : > { %s13477_s16 = sld [smem:[#allocation53_spill]] }
  0x83   : > { %913 = vmatpush.bf16.msra.mxu0 %v8380_v34  ;;  %v9430_v34 = vld [vmem:[#allocation5 + $0x58] sm:$0xf0] }
  0x84   : > { %942 = vmatpush.bf16.msra.mxu1 %v8384_v35  ;;  %968 = vmatpush.bf16.msra.mxu2 %v8424_v19  ;;  %v8400_v38 = vor.u32 %v9430_v34, %v8399_v33 }
  0x87   : > { %914 = vmatpush.bf16.msra.mxu0 %v8368_v40 }
  0x88   : > { %943 = vmatpush.bf16.msra.mxu1 %v8372_v41  ;;  %969 = vmatpush.bf16.msra.mxu2 %v8412_v29 }
  0x8b   : > { %915 = vmatpush.bf16.msra.mxu0 %v8356_v46  ;;  %v8375_v46 = vld [vmem:[#allocation5 + $0x20] sm:$0xf] }
  0x8c   : > { %944 = vmatpush.bf16.msra.mxu1 %v8360_v47  ;;  %970 = vmatpush.bf16.msra.mxu2 %v8400_v38  ;;  %v9424_v47 = vld [vmem:[#allocation5 + $0x28] sm:$0xf0] }
  0x8e   : > { %916 = vmatmul.bf16.vlgmr.msra.gmra.mxu0 %v10848_v48 }
  0x8f   : > { %945 = vmatmul.bf16.vlgmr.msra.gmra.mxu1 %v10848_v48 }
  0x90   : > { %971 = vmatpush.bf16.msra.mxu2 %v8388_v45 }
  0x9e   : > { %921 = vmatmul.bf16.gmra.mxu0 %v10853_v49 }
  0x9f   : > { %950 = vmatmul.bf16.gmra.mxu1 %v10853_v49 }
  0xae   : > { %926 = vmatmul.bf16.gmra.mxu0 %v10858_v50 }
  0xaf   : > { %955 = vmatmul.bf16.gmra.mxu1 %v10858_v50 }
  0xbe   : > { %931 = vmatmul.bf16.gmra.mxu0 %v10863_v51 }
  0xbf   : > { %960 = vmatmul.bf16.gmra.mxu1 %v10863_v51 }
 0x10b   : > { %v917_v54 = vpop.f32.mrf.mxu0 }
 0x10c   : > { %v946_v55 = vpop.f32.mrf.mxu1  ;;  %v918_v59 = vadd.f32 %v917_v54, %v10873_v56 }
 0x10d   : > { %v947_v57 = vadd.f32 %v946_v55, %v10870_v53  ;;  %v8376_v55 = vor.u32 %v9424_v47, %v8375_v46 }
 0x10e   : > { %v10881_v63 = vpack.c.bf16 %v918_v59, %v918_v59  ;;  %v9421_v59 = vld [vmem:[#allocation5 + $0x10] sm:$0xf0] }
 0x10f   : > { %v10876_v58 = vpack.c.bf16 %v947_v57, %v947_v57  ;;  %v8363_v57 = vld [vmem:[#allocation5 + $0x8] sm:$0xf]  ;;  %972 = vmatpush.bf16.msra.mxu2 %v8376_v55 }
 0x111   : > { %v1040_v60 = vsel %vm1035_vm0, %v10876_v58, 0 }
 0x112   : > { %1049 = vmatpush.bf16.xpose.msra.mxu3 %v1040_v60 }
 0x113   : > { %v919_v61 = vpop.f32.mrf.mxu0 }
 0x114   : > { %v948_v62 = vpop.f32.mrf.mxu1  ;;  %v920_v20 = vadd.f32 %v919_v61, %v10873_v56 }
 0x115   : > { %v949_v0 = vadd.f32 %v948_v62, %v10870_v53 }
 0x116   : > { %v10900_v30 = vpack.c.bf16 %v920_v20, %v920_v20 }
 0x117   : > { %v10884_v1 = vpack.c.bf16 %v949_v0, %v949_v0  ;;  %v8364_v0 = vor.u32 %v9421_v59, %v8363_v57 }
 0x119   : > { %8449 = vmatmul.msk.bf16.vlgmr.msra.gmra.mxu3 %vm1035_vm0, %v10881_v63  ;;  %v1059_v4 = vsel %vm1035_vm0, %v10884_v1, 0  ;;  %973 = vmatpush.bf16.msra.mxu2 %v8364_v0 }
 0x11a   : > { %1068 = vmatpush.bf16.xpose.msrb.mxu3 %v1059_v4 }
 0x11b   : > { %v922_v6 = vpop.f32.mrf.mxu0 }
 0x11c   : > { %v923_v7 = vadd.f32 %v922_v6, %v10873_v56  ;;  %v951_v8 = vpop.f32.mrf.mxu1  ;;  %974 = vmatmul.bf16.vlgmr.msra.gmra.mxu2 %v10848_v48 }
 0x11d   : > { %v952_v11 = vadd.f32 %v951_v8, %v10870_v53 }
 0x11e   : > { %v1013_v14 = vpack.c.bf16 %v923_v7, %v923_v7 }
 0x11f   : > { %v1021_v13 = vpack.c.bf16 %v952_v11, %v952_v11 }
 0x120   : > { %v1501_v23 = vunpack.c.l.b16 %v1013_v14 }
 0x121   : > { %v1078_v17 = vsel %vm1035_vm0, %v1021_v13, 0  ;;  %v1506_v18 = vunpack.c.l.b16 %v1021_v13 }
 0x122   : > { %1087 = vmatpush.bf16.xpose.msra.mxu3 %v1078_v17  ;;  %v10902_v32 = vpack.c.b16 %v1501_v23, %v1501_v23 }
 0x123   : > { %v10894_v21 = vpack.c.b16 %v1506_v18, %v1506_v18  ;;  %v924_v22 = vpop.f32.mrf.mxu0 }
 0x124   : > { %v953_v24 = vpop.f32.mrf.mxu1  ;;  %v925_v27 = vadd.f32 %v924_v22, %v10873_v56 }
 0x125   : > { %v954_v28 = vadd.f32 %v953_v24, %v10870_v53  ;;  %1508 = vrot.lane.b32.xlu2 %v10894_v21, %s10564_s6 }
 0x126   : > { %v1014_v35 = vpack.c.bf16 %v925_v27, %v925_v27 }
 0x127   : > { %v1022_v31 = vpack.c.bf16 %v954_v28, %v954_v28 }
 0x128   : > { %v1530_v44 = vunpack.c.l.b16 %v1014_v35 }
 0x129   : > { %v1535_v36 = vunpack.c.l.b16 %v1022_v31  ;;  %8450 = vmatmul.msk.bf16.vlgmr.msrb.gmra.mxu3 %vm1035_vm0, %v10900_v30  ;;  %v1097_v37 = vsel %vm1035_vm0, %v1022_v31, 0 }
 0x12a   : > { %1106 = vmatpush.bf16.xpose.msrb.mxu3 %v1097_v37  ;;  %v10914_v60 = vpack.c.b16 %v1530_v44, %v1530_v44 }
 0x12b   : > { %v927_v39 = vpop.f32.mrf.mxu0  ;;  %v10907_v40 = vpack.c.b16 %v1535_v36, %v1535_v36 }
 0x12c   : > { %v956_v41 = vpop.f32.mrf.mxu1  ;;  %979 = vmatmul.bf16.gmra.mxu2 %v10853_v49  ;;  %v928_v20 = vadd.f32 %v927_v39, %v10873_v56  ;;  %v10981_v39 = vperm.slane %v10867_v52, 2 }
 0x12d   : > { %1537 = vrot.lane.b32.xlu0 %v10907_v40, %s10564_s6  ;;  %1503 = vrot.lane.b32.xlu2 %v10902_v32, %s10564_s6  ;;  %v957_v54 = vadd.f32 %v956_v41, %v10870_v53 }
 0x12f   : > { %v10916_v61 = vpack.c.bf16 %v957_v54, %v957_v54 }
 0x131   : > { %v1116_v3 = vsel %vm1035_vm0, %v10916_v61, 0 }
 0x133   : > { %v929_v62 = vpop.f32.mrf.mxu0 }
 0x134   : > { %v958_v2 = vpop.f32.mrf.mxu1  ;;  %v930_v23 = vadd.f32 %v929_v62, %v10873_v56 }
 0x135   : > { %1532 = vrot.lane.b32.xlu2 %v10914_v60, %s10564_s6  ;;  %v959_v9 = vadd.f32 %v958_v2, %v10870_v53 }
 0x136   : > { %v10955_v49 = vpack.c.bf16 %v930_v23, %v930_v23 }
 0x139   : > { %8451 = vmatmul.msk.bf16.vlgmr.msra.gmra.mxu3 %vm1035_vm0, %v1013_v14  ;;  %v10933_v14 = vpack.c.bf16 %v959_v9, %v959_v9 }
 0x13a   : > { %1125 = vmatpush.bf16.xpose.msra.mxu3 %v1116_v3 }
 0x13b   : > { %v932_v4 = vpop.f32.mrf.mxu0  ;;  %v1135_v17 = vsel %vm1035_vm0, %v10933_v14, 0 }
 0x13c   : > { %v933_v5 = vadd.f32 %v932_v4, %v10873_v56  ;;  %v961_v6 = vpop.f32.mrf.mxu1  ;;  %984 = vmatmul.bf16.gmra.mxu2 %v10858_v50 }
 0x13d   : > { %v962_v7 = vadd.f32 %v961_v6, %v10870_v53 }
 0x13e   : > { %v1017_v8 = vpack.c.bf16 %v933_v5, %v933_v5 }
 0x13f   : > { %v10927_v10 = vpack.c.bf16 %v962_v7, %v962_v7 }
 0x140   : > { %v1617_v11 = vunpack.c.l.b16 %v1017_v8 }
 0x141   : > { %v1154_v12 = vsel %vm1035_vm0, %v10927_v10, 0 }
 0x142   : > { %v10931_v13 = vpack.c.b16 %v1617_v11, %v1617_v11  ;;  %1163 = vmatpush.bf16.xpose.msrb.mxu0 %v1154_v12 }
 0x143   : > { %v934_v24 = vpop.f32.mrf.mxu0 }
 0x144   : > { %v963_v48 = vpop.f32.mrf.mxu1  ;;  %1619 = vrot.lane.b32.xlu2 %v10931_v13, %s10564_s6  ;;  %v935_v25 = vadd.f32 %v934_v24, %v10873_v56 }
 0x145   : > { %v964_v15 = vadd.f32 %v963_v48, %v10870_v53  ;;  %v10948_v53 = vpack.c.bf16 %v928_v20, %v928_v20 }
 0x146   : > { %v1018_v26 = vpack.c.bf16 %v935_v25, %v935_v25  ;;  %v1443_v25 = vunpack.c.l.b16 %v10881_v63 }
 0x147   : > { %v1026_v16 = vpack.c.bf16 %v964_v15, %v964_v15 }
 0x148   : > { %v1646_v55 = vunpack.c.l.b16 %v1018_v26 }
 0x149   : > { %v1651_v18 = vunpack.c.l.b16 %v1026_v16  ;;  %8452 = vmatmul.msk.bf16.vlgmr.msrb.gmra.mxu3 %vm1035_vm0, %v1014_v35  ;;  %8455 = vmatmul.msk.bf16.vlgmr.msrb.gmra.mxu0 %vm1035_vm0, %v1017_v8  ;;  %v1173_v22 = vsel %vm1035_vm0, %v1026_v16, 0 }
 0x14a   : > { %1144 = vmatpush.bf16.xpose.msrb.mxu3 %v1135_v17  ;;  %v10992_v59 = vpack.c.b16 %v1646_v55, %v1646_v55 }
 0x14b   : > { %v10943_v19 = vpack.c.b16 %v1651_v18, %v1651_v18 }
 0x14c   : > { %989 = vmatmul.bf16.gmra.mxu2 %v10863_v51  ;;  %13425 = vst [vmem:[#allocation28_spill] sm:$0xff] %v10992_v59 }
 0x14d   : > { %13424 = vst [vmem:[#allocation27_spill] sm:$0xff] %v10943_v19  ;;  %1653 = vrot.lane.b32.xlu2 %v10943_v19, %s10564_s6 }
 0x159   : > { %8453 = vmatmul.msk.bf16.vlgmr.msra.gmra.mxu3 %vm1035_vm0, %v10948_v53 }
 0x15a   : > { %1182 = vmatpush.bf16.xpose.msra.mxu3 %v1173_v22 }
 0x169   : > { %8454 = vmatmul.msk.bf16.vlgmr.msrb.gmra.mxu3 %vm1035_vm0, %v10955_v49 }
 0x179   : > { %8456 = vmatmul.msk.bf16.vlgmr.msra.gmra.mxu3 %vm1035_vm0, %v1018_v26  ;;  %v11030_v26 = vpack.c.b16 %v1443_v25, %v1443_v25 }
 0x17f   : > { %v10996_v62 = vpop.permute.xlu2 %1508 }
 0x187   : > { %v11002_v4 = vpop.permute.xlu2 %1503 }
 0x18f   : > { %v11019_v18 = vpop.permute.xlu2 %1532 }
 0x19c   : > { %v10962_v27 = vpop.f32.mrf.mxu3 }
 0x19d   : > { %v1189_v50 = vsel %vm1188_vm1, %v10962_v27, -inf }
 0x19e   : > { %1190 = vmax.xlane.f32.xlu2 %v1189_v50  ;;  %v11027_v24 = vpop.permute.xlu2 %1619 }
 0x19f   : > { %v975_v56 = vpop.f32.mrf.mxu2 }
 0x1a0   : > { %v976_v9 = vadd.f32 %v975_v56, %v10981_v39 }
 0x1a2   : > { %v11015_v15 = vpack.c.bf16 %v976_v9, %v976_v9 }
 0x1a4   : > { %v1053_v28 = vpop.f32.mrf.mxu3  ;;  %v1282_v20 = vsel %vm1280_vm2, %v11015_v15, 0 }
 0x1a5   : > { %1291 = vmatpush.bf16.msrb.mxu2 %v1282_v20 }
 0x1a7   : > { %v10972_v35 = vpop.f32.mrf.mxu2 }
 0x1ac   : > { %v10966_v29 = vpop.f32.mrf.mxu3 }
 0x1af   : > { %v980_v42 = vpop.f32.mrf.mxu2 }
 0x1b0   : > { %v981_v43 = vadd.f32 %v980_v42, %v10981_v39 }
 0x1b2   : > { %v10986_v45 = vpack.c.bf16 %v981_v43, %v981_v43  ;;  %v1622_v43 = vunpack.c.l.b16 %v10927_v10 }
 0x1b4   : > { %v1072_v31 = vpop.f32.mrf.mxu3  ;;  %v1320_v46 = vsel %vm1280_vm2, %v10986_v45, 0  ;;  %v11049_v55 = vpack.c.b16 %v1622_v43, %v1622_v43 }
 0x1b5   : > { %1329 = vmatpush.bf16.msra.mxu0 %v1320_v46  ;;  %v1593_v31 = vunpack.c.l.b16 %v10933_v14 }
 0x1b7   : > { %v982_v54 = vpop.f32.mrf.mxu2 }
 0x1b8   : > { %v983_v28 = vadd.f32 %v982_v54, %v10981_v39 }
 0x1ba   : > { %v1030_v56 = vpack.c.bf16 %v983_v28, %v983_v28 }
 0x1bc   : > { %v10968_v33 = vpop.f32.mrf.mxu3  ;;  %v1835_v63 = vunpack.c.l.b16 %v1030_v56 }
 0x1bd   : > { %v1195_v51 = vsel %vm1188_vm1, %v10968_v33, -inf }
 0x1be   : > { %1196 = vmax.xlane.f32.xlu0 %v1195_v51  ;;  %v11036_v51 = vpop.permute.xlu2 %1653 }
 0x1bf   : > { %v985_v57 = vpop.f32.mrf.mxu2 }
 0x1c0   : > { %v986_v7 = vadd.f32 %v985_v57, %v10981_v39 }
 0x1c2   : > { %v11011_v12 = vpack.c.bf16 %v986_v7, %v986_v7  ;;  %v1472_v7 = vunpack.c.l.b16 %v10900_v30  ;;  %v978_v30 = vadd.f32 %v10972_v35, %v10981_v39 }
 0x1c4   : > { %v1091_v34 = vpop.f32.mrf.mxu3  ;;  %v1358_v17 = vsel %vm1280_vm2, %v11011_v12, 0  ;;  %v11085_v20 = vpack.c.bf16 %v978_v30, %v978_v30 }
 0x1c5   : > { %1367 = vmatpush.bf16.msra.mxu2 %v1358_v17 }
 0x1c6   : > { %v10974_v36 = vpop.f32.mrf.mxu0  ;;  %v1301_v35 = vsel %vm1280_vm2, %v11085_v20, 0 }
 0x1c7   : > { %v1207_v37 = vsel %vm1188_vm1, %v10974_v36, -inf  ;;  %v10998_v2 = vpop.f32.mrf.mxu2  ;;  %1310 = vmatpush.bf16.msrb.mxu3 %v1301_v35 }
 0x1c8   : > { %1208 = vmax.xlane.f32.xlu1 %v1207_v37 }
 0x1cc   : > { %v10978_v38 = vpop.f32.mrf.mxu3 }
 0x1cd   : > { %v1198_v41 = vsel %vm1188_vm1, %v10978_v38, -inf }
 0x1ce   : > { %1199 = vmax.xlane.f32.xlu0 %v1198_v41  ;;  %v1167_v44 = vpop.f32.mrf.mxu0  ;;  %v11040_v41 = vpack.c.b16 %v1593_v31, %v1593_v31 }
 0x1cf   : > { %v990_v6 = vpop.f32.mrf.mxu2 }
 0x1d0   : > { %v991_v8 = vadd.f32 %v990_v6, %v10981_v39 }
 0x1d2   : > { %v11009_v11 = vpack.c.bf16 %v991_v8, %v991_v8  ;;  %v1339_v8 = vsel %vm1280_vm2, %v1030_v56, 0 }
 0x1d3   : > { %1348 = vmatpush.bf16.msrb.mxu1 %v1339_v8 }
 0x1d4   : > { %v1110_v47 = vpop.f32.mrf.mxu3  ;;  %v1396_v48 = vsel %vm1280_vm2, %v11009_v11, 0  ;;  %v1907_v8 = vunpack.c.l.b16 %v11009_v11 }
 0x1d5   : > { %1405 = vmatpush.bf16.msrb.mxu0 %v1396_v48  ;;  %v11047_v47 = vpack.c.b16 %v1835_v63, %v1835_v63  ;;  %v1538_v48 = vpop.permute.xlu0 %1537  ;;  %v1514_v63 = vsel %vm1035_vm0, %v10996_v62, 0 }
 0x1d7   : > { %v992_v37 = vpop.f32.mrf.mxu2 }
 0x1d8   : > { %v993_v42 = vadd.f32 %v992_v37, %v10981_v39 }
 0x1da   : > { %v1034_v46 = vpack.c.bf16 %v993_v42, %v993_v42 }
 0x1dc   : > { %v10990_v52 = vpop.f32.mrf.mxu3  ;;  %v1931_v57 = vunpack.c.l.b16 %v1034_v46  ;;  %v1415_v9 = vsel %vm1280_vm2, %v1034_v46, 0 }
 0x1dd   : > { %v1201_v34 = vsel %vm1188_vm1, %v10990_v52, -inf  ;;  %1424 = vmatpush.bf16.msra.mxu1 %v1415_v9  ;;  %v11151_v9 = vpack.c.b16 %v1907_v8, %v1907_v8 }
 0x1de   : > { %v11056_v10 = vpack.c.b16 %v1931_v57, %v1931_v57 }
 0x1e2   : > { %1648 = vrot.lane.b32.xlu0 %v10992_v59, %s10564_s6 }
 0x1e4   : > { %v1129_v0 = vpop.f32.mrf.mxu3 }
 0x1e5   : > { %v1477_v0 = vunpack.c.l.b16 %v10884_v1  ;;  %v11072_v1 = vpack.c.b16 %v1472_v7, %v1472_v7 }
 0x1e7   : > { %v11064_v6 = vpack.c.b16 %v1477_v0, %v1477_v0 }
 0x1ec   : > { %v11000_v3 = vpop.f32.mrf.mxu3 }
 0x1ed   : > { %v1204_v5 = vsel %vm1188_vm1, %v11000_v3, -inf }
 0x1ee   : > { %1205 = vmax.xlane.f32.xlu2 %v1204_v5 }
 0x1f4   : > { %v1148_v16 = vpop.f32.mrf.mxu3 }
 0x1f5   : > { %v1559_v16 = vunpack.c.l.b16 %v10948_v53 }
 0x1f7   : > { %v11081_v17 = vpack.c.b16 %v1559_v16, %v1559_v16 }
 0x1f9   : > { %13426 = vst [vmem:[#allocation29_spill] sm:$0xff] %v11081_v17 }
 0x1fc   : > { %v11023_v22 = vpop.f32.mrf.mxu3 }
 0x1fd   : > { %v1210_v23 = vsel %vm1188_vm1, %v11023_v22, -inf }
 0x1fe   : > { %1211 = vmax.xlane.f32.xlu1 %v1210_v23  ;;  %v1811_v23 = vunpack.c.l.b16 %v10986_v45  ;;  %v1448_v45 = vunpack.c.l.b16 %v10876_v58  ;;  %v1192_v58 = vsel %vm1188_vm1, %v10966_v29, -inf }
 0x200   : > { %v11091_v53 = vpack.c.b16 %v1811_v23, %v1811_v23  ;;  %v11105_v37 = vpack.c.b16 %v1448_v45, %v1448_v45 }
 0x204   : > { %v1186_v50 = vpop.f32.mrf.mxu3 }
 0x206   : > { %1445 = vrot.lane.b32.xlu2 %v11030_v26, %s10564_s6 }
 0x20c   : > { %1202 = vmax.xlane.f32.xlu0 %v1201_v34 }
 0x20e   : > { %1595 = vrot.lane.b32.xlu2 %v11040_v41, %s10564_s6 }
 0x211   : > { %v1191_v44 = vpop.xlane.xlu2 %1190 }
 0x212   : > { %v1213_v14 = vsub.f32 %v10962_v27, %v1191_v44 }
 0x214   : > { %v1221_v54 = vmul.f32 1.442695, %v1213_v14  ;;  %v1564_v14 = vunpack.c.l.b16 %v10916_v61 }
 0x216   : > { %9828 = vpow2.f32 %v1221_v54  ;;  %1837 = vrot.lane.b32.xlu2 %v11047_v47, %s10564_s6  ;;  %v11126_v0 = vpack.c.b16 %v1564_v14, %v1564_v14 }
 0x217   : > { %1624 = vrot.lane.b32.xlu1 %v11049_v55, %s10564_s6 }
 0x218   : > { %13427 = vst [vmem:[#allocation30_spill] sm:$0xff] %v11126_v0 }
 0x21c   : > { %v11058_v5 = vpop.eup %9828 }
 0x21d   : > { %v1269_v27 = vpack.c.bf16 %v11058_v5, %v11058_v5 }
 0x21e   : > { %1933 = vrot.lane.b32.xlu2 %v11056_v10, %s10564_s6 }
 0x21f   : > { %8457 = vmatmul.msk.bf16.vlgmr.msrb.gmra.mxu2 %vm1188_vm1, %v1269_v27  ;;  %v988_v27 = vadd.f32 %v10998_v2, %v10981_v39  ;;  %v1588_v39 = vunpack.c.l.b16 %v10955_v49 }
 0x220   : > { %1479 = vrot.lane.b32.xlu0 %v11064_v6, %s10564_s6 }
 0x221   : > { %v11135_v61 = vpack.c.bf16 %v988_v27, %v988_v27  ;;  %v11146_v2 = vpack.c.b16 %v1588_v39, %v1588_v39 }
 0x223   : > { %v1377_v7 = vsel %vm1280_vm2, %v11135_v61, 0  ;;  %13428 = vst [vmem:[#allocation31_spill] sm:$0xff] %v11146_v2 }
 0x224   : > { %1386 = vmatpush.bf16.msra.mxu3 %v1377_v7 }
 0x226   : > { %2097 = vrot.lane.b32.xlu2 %v11064_v6, %s10565_s14 }
 0x228   : > { %1474 = vrot.lane.b32.xlu0 %v11072_v1, %s10564_s6 }
 0x22e   : > { %2118 = vrot.lane.b32.xlu2 %v10902_v32, %s10565_s14 }
 0x230   : > { %1561 = vrot.lane.b32.xlu0 %v11081_v17, %s10564_s6 }
 0x231   : > { %v1197_v25 = vpop.xlane.xlu0 %1196 }
 0x232   : > { %v1215_v50 = vsub.f32 %v10968_v33, %v1197_v25 }
 0x234   : > { %v1225_v28 = vmul.f32 1.442695, %v1215_v50  ;;  %v1659_v50 = vsel %vm1035_vm0, %v11036_v51, 0 }
 0x236   : > { %9830 = vpow2.f32 %v1225_v28  ;;  %2141 = vrot.lane.b32.xlu2 %v10914_v60, %s10565_s14 }
 0x238   : > { %1813 = vrot.lane.b32.xlu0 %v11091_v53, %s10564_s6 }
 0x23b   : > { %v1209_v31 = vpop.xlane.xlu1 %1208 }
 0x23c   : > { %v11100_v56 = vpop.eup %9830  ;;  %v1219_v33 = vsub.f32 %v10974_v36, %v1209_v31 }
 0x23d   : > { %v1271_v34 = vpack.c.bf16 %v11100_v56, %v11100_v56 }
 0x23e   : > { %v1233_v42 = vmul.f32 1.442695, %v1219_v33 }
 0x23f   : > { %8459 = vmatmul.msk.bf16.vlgmr.msra.gmra.mxu0 %vm1188_vm1, %v1271_v34 }
 0x240   : > { %1523 = vmatpush.bf16.xpose.msra.mxu0 %v1514_v63  ;;  %2074 = vrot.lane.b32.xlu0 %v11105_v37, %s10565_s14  ;;  %9832 = vpow2.f32 %v1233_v42 }
 0x241   : > { %v1200_v43 = vpop.xlane.xlu0 %1199  ;;  %1193 = vmax.xlane.f32.xlu1 %v1192_v58 }
 0x242   : > { %v1216_v36 = vsub.f32 %v10978_v38, %v1200_v43  ;;  %v1543_v38 = vsel %vm1035_vm0, %v1538_v48, 0 }
 0x244   : > { %v1227_v44 = vmul.f32 1.442695, %v1216_v36 }
 0x246   : > { %9834 = vpow2.f32 %v1227_v44  ;;  %v11117_v62 = vpop.eup %9832 }
 0x247   : > { %v1275_v54 = vpack.c.bf16 %v11117_v62, %v11117_v62 }
 0x248   : > { %2095 = vrot.lane.b32.xlu0 %v11072_v1, %s10565_s14 }
 0x24c   : > { %v11120_v46 = vpop.eup %9834 }
 0x24d   : > { %v1272_v57 = vpack.c.bf16 %v11120_v46, %v11120_v46 }
 0x24f   : > { %8460 = vmatmul.msk.bf16.vlgmr.msrb.gmra.mxu1 %vm1188_vm1, %v1272_v57  ;;  %8463 = vmatmul.msk.bf16.vlgmr.msrb.gmra.mxu0 %vm1188_vm1, %v1275_v54 }
 0x250   : > { %1552 = vmatpush.bf16.xpose.msrb.mxu1 %v1543_v38  ;;  %2166 = vrot.lane.b32.xlu0 %v11126_v0, %s10565_s14 }
 0x254   : > { %v1649_v23 = vpop.permute.xlu0 %1648 }
 0x25a   : > { %1450 = vrot.lane.b32.xlu1 %v11105_v37, %s10564_s6 }
 0x25f   : > { %8467 = vmatmul.msk.bf16.vlgmr.msra.gmra.mxu0 %vm1035_vm0, %v11002_v4 }
 0x261   : > { %v1206_v48 = vpop.xlane.xlu2 %1205 }
 0x262   : > { %1566 = vrot.lane.b32.xlu1 %v11126_v0, %s10564_s6  ;;  %v1218_v8 = vsub.f32 %v11000_v3, %v1206_v48  ;;  %v1859_v0 = vunpack.c.l.b16 %v11011_v12 }
 0x269   : > { %v11156_v49 = vpop.permute.xlu2 %1445 }
 0x26a   : > { %1590 = vrot.lane.b32.xlu1 %v11146_v2, %s10564_s6 }
 0x271   : > { %v1212_v16 = vpop.xlane.xlu1 %1211  ;;  %v1596_v35 = vpop.permute.xlu2 %1595 }
 0x272   : > { %v1220_v30 = vsub.f32 %v11023_v22, %v1212_v16  ;;  %1909 = vrot.lane.b32.xlu1 %v11151_v9, %s10564_s6 }
 0x274   : > { %v1235_v4 = vmul.f32 1.442695, %v1220_v30 }
 0x276   : > { %9836 = vpow2.f32 %v1235_v4  ;;  %v1231_v4 = vmul.f32 1.442695, %v1218_v8 }
 0x27a   : > { %2072 = vrot.lane.b32.xlu1 %v11030_v26, %s10565_s14 }
 0x27c   : > { %v11160_v11 = vpop.eup %9836 }
 0x27d   : > { %v1276_v25 = vpack.c.bf16 %v11160_v11, %v11160_v11 }
 0x27f   : > { %v1203_v22 = vpop.xlane.xlu0 %1202  ;;  %8464 = vmatmul.msk.bf16.vlgmr.msra.gmra.mxu1 %vm1188_vm1, %v1276_v25 }
 0x280   : > { %v1217_v28 = vsub.f32 %v10990_v52, %v1203_v22  ;;  %1668 = vmatpush.bf16.xpose.msra.mxu1 %v1659_v50  ;;  %v1838_v52 = vpop.permute.xlu2 %1837 }
 0x281   : > { %v1843_v63 = vsel %vm1280_vm2, %v1838_v52, 0 }
 0x282   : > { %v1229_v45 = vmul.f32 1.442695, %v1217_v28  ;;  %2120 = vrot.lane.b32.xlu1 %v10894_v21, %s10565_s14  ;;  %v1601_v28 = vsel %vm1035_vm0, %v1596_v35, 0 }
 0x284   : > { %9838 = vpow2.f32 %v1229_v45 }
 0x288   : > { %v1934_v43 = vpop.permute.xlu2 %1933 }
 0x289   : > { %v1625_v31 = vpop.permute.xlu1 %1624  ;;  %v1939_v36 = vsel %vm1280_vm2, %v1934_v43, 0 }
 0x28a   : > { %v11170_v33 = vpop.eup %9838  ;;  %v1630_v34 = vsel %vm1035_vm0, %v1625_v31, 0  ;;  %2143 = vrot.lane.b32.xlu1 %v10907_v40, %s10565_s14 }
 0x28b   : > { %v1273_v51 = vpack.c.bf16 %v11170_v33, %v11170_v33  ;;  %1639 = vmatpush.bf16.xpose.msrb.mxu0 %v1630_v34  ;;  %v1249_v12 = vsel %vm1188_vm1, %v11170_v33, 0.0 }
 0x28d   : > { %8461 = vmatmul.msk.bf16.vlgmr.msra.gmra.mxu2 %vm1188_vm1, %v1273_v51 }
 0x28f   : > { %8468 = vmatmul.msk.bf16.vlgmr.msrb.gmra.mxu1 %vm1035_vm0, %v11019_v18 }
 0x290   : > { %1852 = vmatpush.bf16.msrb.mxu1 %v1843_v63 }
 0x292   : > { %v1480_v42 = vpop.permute.xlu0 %1479  ;;  %8471 = vmatmul.msk.bf16.vlgmr.msrb.gmra.mxu0 %vm1035_vm0, %v11027_v24 }
 0x293   : > { %v1485_v30 = vsel %vm1035_vm0, %v1480_v42, 0 }
 0x29a   : > { %v1475_v58 = vpop.permute.xlu0 %1474 }
 0x29f   : > { %8472 = vmatmul.msk.bf16.vlgmr.msra.gmra.mxu1 %vm1035_vm0, %v1649_v23 }
 0x2a0   : > { %1948 = vmatpush.bf16.msra.mxu1 %v1939_v36 }
 0x2a2   : > { %v11185_v44 = vpop.f32.mrf.mxu2  ;;  %v1562_v14 = vpop.permute.xlu0 %1561 }
 0x2aa   : > { %v1295_v54 = vpop.f32.mrf.mxu2  ;;  %v1814_v57 = vpop.permute.xlu0 %1813 }
 0x2ab   : > { %v1819_v38 = vsel %vm1280_vm2, %v1814_v57, 0 }
 0x2ac   : > { %1828 = vmatpush.bf16.msra.mxu0 %v1819_v38 }
 0x2b4   : > { %v1194_v18 = vpop.xlane.xlu1 %1193 }
 0x2b5   : > { %v1214_v27 = vsub.f32 %v10966_v29, %v1194_v18 }
 0x2b7   : > { %v1223_v7 = vmul.f32 1.442695, %v1214_v27  ;;  %v1787_v27 = vunpack.c.l.b16 %v11085_v20 }
 0x2b9   : > { %9840 = vpow2.f32 %v1223_v7 }
 0x2ba   : > { %9842 = vpow2.f32 %v1231_v4 }
 0x2bc   : > { %v11189_v24 = vpop.f32.mrf.mxu0 }
 0x2bf   : > { %v11191_v39 = vpop.eup %9840 }
 0x2c0   : > { %v1270_v16 = vpack.c.bf16 %v11191_v39, %v11191_v39  ;;  %v11202_v50 = vpop.eup %9842 }
 0x2c1   : > { %v1274_v48 = vpack.c.bf16 %v11202_v50, %v11202_v50  ;;  %v1252_v33 = vsel %vm1188_vm1, %v11202_v50, 0.0 }
 0x2c2   : > { %8458 = vmatmul.msk.bf16.vlgmr.msrb.gmra.mxu3 %vm1188_vm1, %v1270_v16  ;;  %v11241_v16 = vpack.c.b16 %v1787_v27, %v1787_v27 }
 0x2c3   : > { %1494 = vmatpush.bf16.xpose.msrb.mxu3 %v1485_v30 }
 0x2c4   : > { %v1333_v23 = vpop.f32.mrf.mxu0 }
 0x2cc   : > { %v11198_v29 = vpop.f32.mrf.mxu1  ;;  %v11200_v25 = vpop.f32.mrf.mxu0 }
 0x2cd   : > { %v1451_v22 = vpop.permute.xlu1 %1450 }
 0x2ce   : > { %v1456_v3 = vsel %vm1035_vm0, %v1451_v22, 0  ;;  %v11253_v22 = vpop.permute.xlu2 %2097 }
 0x2cf   : > { %1465 = vmatpush.bf16.xpose.msrb.mxu2 %v1456_v3 }
 0x2d2   : > { %8462 = vmatmul.msk.bf16.vlgmr.msra.gmra.mxu3 %vm1188_vm1, %v1274_v48 }
 0x2d3   : > { %1610 = vmatpush.bf16.xpose.msra.mxu3 %v1601_v28 }
 0x2d4   : > { %v1352_v45 = vpop.f32.mrf.mxu1  ;;  %v1409_v31 = vpop.f32.mrf.mxu0 }
 0x2d5   : > { %v1567_v34 = vpop.permute.xlu1 %1566 }
 0x2d6   : > { %v1572_v51 = vsel %vm1035_vm0, %v1567_v34, 0  ;;  %8465 = vmatmul.msk.bf16.vlgmr.msrb.gmra.mxu2 %vm1035_vm0, %v11156_v49  ;;  %v11255_v3 = vpop.permute.xlu2 %2118 }
 0x2d7   : > { %1581 = vmatpush.bf16.xpose.msra.mxu2 %v1572_v51 }
 0x2dc   : > { %v1525_v52 = vpop.f32.mrf.mxu0 }
 0x2dd   : > { %v1591_v63 = vpop.permute.xlu1 %1590  ;;  %v1680_v42 = vsel %vm1188_vm1, %v1525_v52, -inf }
 0x2de   : > { %1681 = vmax.xlane.f32.xlu2 %v1680_v42  ;;  %v11259_v28 = vpop.permute.xlu2 %2141 }
 0x2e2   : > { %8466 = vmatmul.msk.bf16.vlgmr.msrb.gmra.mxu3 %vm1035_vm0, %v1475_v58  ;;  %v1763_v58 = vunpack.c.l.b16 %v11015_v15 }
 0x2e4   : > { %v1527_v35 = vpop.f32.mrf.mxu0  ;;  %v11226_v57 = vpack.c.b16 %v1763_v58, %v1763_v58 }
 0x2e5   : > { %v1910_v43 = vpop.permute.xlu1 %1909 }
 0x2e6   : > { %v1915_v36 = vsel %vm1280_vm2, %v1910_v43, 0  ;;  %8469 = vmatmul.msk.bf16.vlgmr.msra.gmra.mxu2 %vm1035_vm0, %v1562_v14 }
 0x2e7   : > { %1924 = vmatpush.bf16.msrb.mxu0 %v1915_v36 }
 0x2f2   : > { %8470 = vmatmul.msk.bf16.vlgmr.msra.gmra.mxu3 %vm1035_vm0, %v1591_v63 }
 0x2f6   : > { %2212 = vrot.lane.b32.xlu2 %v11049_v55, %s10565_s14 }
 0x2fc   : > { %v11219_v49 = vpop.f32.mrf.mxu1 }
 0x2fe   : > { %2187 = vrot.lane.b32.xlu2 %v11146_v2, %s10565_s14 }
 0x304   : > { %v1428_v54 = vpop.f32.mrf.mxu1 }
 0x305   : > { %v2075_v54 = vpop.permute.xlu0 %2074 }
 0x306   : > { %2210 = vrot.lane.b32.xlu2 %v10931_v13, %s10565_s14 }
 0x30c   : > { %v11228_v14 = vpop.f32.mrf.mxu1 }
 0x30d   : > { %v1683_v38 = vsel %vm1188_vm1, %v11228_v14, -inf }
 0x30e   : > { %1765 = vrot.lane.b32.xlu2 %v11226_v57, %s10564_s6  ;;  %1684 = vmax.xlane.f32.xlu1 %v1683_v38 }
 0x30f   : > { %v11234_v18 = vpop.f32.mrf.mxu0 }
 0x310   : > { %v11237_v7 = vpop.f32.mrf.mxu2  ;;  %v1692_v15 = vsel %vm1188_vm1, %v11234_v18, -inf }
 0x311   : > { %1693 = vmax.xlane.f32.xlu0 %v1692_v15 }
 0x314   : > { %v1556_v8 = vpop.f32.mrf.mxu1 }
 0x315   : > { %v2073_v8 = vpop.permute.xlu1 %2072 }
 0x316   : > { %1789 = vrot.lane.b32.xlu2 %v11241_v16, %s10564_s6 }
 0x317   : > { %v1643_v30 = vpop.f32.mrf.mxu0 }
 0x318   : > { %v1371_v4 = vpop.f32.mrf.mxu2 }
 0x31c   : > { %v11245_v23 = vpop.f32.mrf.mxu1 }
 0x31e   : > { %2235 = vrot.lane.b32.xlu2 %v10943_v19, %s10565_s14  ;;  %v1243_v19 = vsel %vm1188_vm1, %v11100_v56, 0.0 }
 0x324   : > { %v1672_v20 = vpop.f32.mrf.mxu1 }
 0x325   : > { %2189 = vrot.lane.b32.xlu0 %v11040_v41, %s10565_s14 }
 0x327   : > { %2164 = vrot.lane.b32.xlu1 %v11081_v17, %s10565_s14 }
 0x345   : > { %v11257_v48 = vpop.f32.mrf.mxu3 }
 0x34d   : > { %v1314_v45 = vpop.f32.mrf.mxu3 }
 0x351   : > { %v1682_v31 = vpop.xlane.xlu2 %1681 }
 0x352   : > { %v1700_v34 = vsub.f32 %v1525_v52, %v1682_v31  ;;  %v2080_v52 = vsel %vm1035_vm0, %v2075_v54, 0 }
 0x354   : > { %v1710_v51 = vmul.f32 1.442695, %v1700_v34 }
 0x355   : > { %v11261_v63 = vpop.f32.mrf.mxu3 }
 0x356   : > { %9844 = vpow2.f32 %v1710_v51  ;;  %v2121_v51 = vpop.permute.xlu1 %2120 }
 0x359   : > { %v11263_v42 = vpop.f32.mrf.mxu2  ;;  %v11265_v35 = vpop.permute.xlu2 %2212 }
 0x35a   : > { %v1674_v43 = vsel %vm1188_vm1, %v11263_v42, -inf  ;;  %v2218_v50 = vsel %vm1035_vm0, %v11265_v35, 0 }
 0x35b   : > { %1675 = vmax.xlane.f32.xlu1 %v1674_v43 }
 0x35c   : > { %v11269_v36 = vpop.eup %9844 }
 0x35d   : > { %v1756_v58 = vpack.c.bf16 %v11269_v36, %v11269_v36  ;;  %v1390_v38 = vpop.f32.mrf.mxu3 }
 0x35f   : > { %8475 = vmatmul.msk.bf16.vlgmr.msra.gmra.mxu0 %vm1188_vm1, %v1756_v58  ;;  %v11287_v58 = vpop.permute.xlu0 %2095 }
 0x360   : > { %2089 = vmatpush.bf16.xpose.msra.mxu0 %v2080_v52 }
 0x361   : > { %v1469_v27 = vpop.f32.mrf.mxu2  ;;  %v11275_v15 = vpop.permute.xlu2 %2187 }
 0x362   : > { %v1883_v27 = vunpack.c.l.b16 %v11135_v61 }
 0x365   : > { %v11277_v30 = vpop.f32.mrf.mxu3 }
 0x366   : > { %v1677_v4 = vsel %vm1188_vm1, %v11277_v30, -inf }
 0x367   : > { %1678 = vmax.xlane.f32.xlu0 %v1677_v4  ;;  %v1695_v4 = vsel %vm1188_vm1, %v11245_v23, -inf }
 0x369   : > { %v11281_v20 = vpop.f32.mrf.mxu2  ;;  %v11283_v45 = vpop.permute.xlu2 %2210 }
 0x36a   : > { %v1686_v34 = vsel %vm1188_vm1, %v11281_v20, -inf }
 0x36d   : > { %v1498_v31 = vpop.f32.mrf.mxu3 }
 0x36f   : > { %1687 = vmax.xlane.f32.xlu0 %v1686_v34  ;;  %v11299_v34 = vpop.permute.xlu1 %2143 }
 0x371   : > { %v1585_v43 = vpop.f32.mrf.mxu2  ;;  %v1766_v54 = vpop.permute.xlu2 %1765 }
 0x372   : > { %v1771_v38 = vsel %vm1280_vm2, %v1766_v54, 0 }
 0x373   : > { %1780 = vmatpush.bf16.msrb.mxu2 %v1771_v38  ;;  %v11302_v38 = vpack.c.b16 %v1883_v27, %v1883_v27 }
 0x374   : > { %2233 = vrot.lane.b32.xlu1 %v10992_v59, %s10565_s14  ;;  %v2167_v59 = vpop.permute.xlu0 %2166 }
 0x375   : > { %v11292_v52 = vpop.f32.mrf.mxu3 }
 0x376   : > { %v1689_v31 = vsel %vm1188_vm1, %v11292_v52, -inf }
 0x377   : > { %1696 = vmax.xlane.f32.xlu0 %v1695_v4  ;;  %1690 = vmax.xlane.f32.xlu2 %v1689_v31 }
 0x379   : > { %v1790_v43 = vpop.permute.xlu2 %1789 }
 0x37a   : > { %v1795_v54 = vsel %vm1280_vm2, %v1790_v43, 0  ;;  %v1246_v43 = vsel %vm1188_vm1, %v11120_v46, 0.0  ;;  %v2103_v46 = vsel %vm1035_vm0, %v11253_v22, 0  ;;  %v1255_v22 = vsel %vm1188_vm1, %v11117_v62, 0.0 }
 0x37b   : > { %1804 = vmatpush.bf16.msrb.mxu3 %v1795_v54  ;;  %v1258_v62 = vsel %vm1188_vm1, %v11160_v11, 0.0 }
 0x37c   : > { %1885 = vrot.lane.b32.xlu1 %v11302_v38, %s10564_s6 }
 0x37d   : > { %v1614_v61 = vpop.f32.mrf.mxu3 }
 0x37e   : > { %v11313_v61 = vpack.c.b16 %v1859_v0, %v1859_v0 }
 0x37f   : > { %1244 = vadd.xlane.f32.xlu2 %v1243_v19 }
 0x381   : > { %v1685_v2 = vpop.xlane.xlu1 %1684 }
 0x382   : > { %v1701_v4 = vsub.f32 %v11228_v14, %v1685_v2  ;;  %v2126_v2 = vsel %vm1035_vm0, %v2121_v51, 0  ;;  %v2172_v14 = vsel %vm1035_vm0, %v2167_v59, 0  ;;  %v1237_v59 = vsel %vm1188_vm1, %v11058_v5, 0.0 }
 0x384   : > { %v1712_v31 = vmul.f32 1.442695, %v1701_v4  ;;  %v1694_v17 = vpop.xlane.xlu0 %1693 }
 0x385   : > { %v1704_v27 = vsub.f32 %v11234_v18, %v1694_v17  ;;  %v1240_v18 = vsel %vm1188_vm1, %v11191_v39, 0.0 }
 0x386   : > { %9846 = vpow2.f32 %v1712_v31 }
 0x387   : > { %v1718_v54 = vmul.f32 1.442695, %v1704_v27  ;;  %1247 = vadd.xlane.f32.xlu2 %v1246_v43 }
 0x389   : > { %9848 = vpow2.f32 %v1718_v54 }
 0x38b   : > { %1861 = vrot.lane.b32.xlu0 %v11313_v61, %s10564_s6 }
 0x38c   : > { %v11317_v19 = vpop.eup %9846 }
 0x38d   : > { %v1757_v56 = vpack.c.bf16 %v11317_v19, %v11317_v19 }
 0x38f   : > { %v11323_v17 = vpop.eup %9848  ;;  %8476 = vmatmul.msk.bf16.vlgmr.msrb.gmra.mxu1 %vm1188_vm1, %v1757_v56  ;;  %1250 = vadd.xlane.f32.xlu2 %v1249_v12 }
 0x390   : > { %v1760_v0 = vpack.c.bf16 %v11323_v17, %v11323_v17  ;;  %2112 = vmatpush.bf16.xpose.msrb.mxu1 %v2103_v46 }
 0x392   : > { %8479 = vmatmul.msk.bf16.vlgmr.msrb.gmra.mxu0 %vm1188_vm1, %v1760_v0  ;;  %v1728_v0 = vsel %vm1188_vm1, %v11269_v36, 0.0  ;;  %v1731_v36 = vsel %vm1188_vm1, %v11317_v19, 0.0 }
 0x393   : > { %2135 = vmatpush.bf16.xpose.msrb.mxu0 %v2126_v2 }
 0x397   : > { %1253 = vadd.xlane.f32.xlu2 %v1252_v33 }
 0x399   : > { %v2165_v39 = vpop.permute.xlu1 %2164 }
 0x3a2   : > { %8505 = vmatmul.msk.bf16.vlgmr.msra.gmra.mxu0 %vm1035_vm0, %v2073_v8  ;;  %v11360_v8 = vpop.permute.xlu0 %2189 }
 0x3a3   : > { %2181 = vmatpush.bf16.xpose.msra.mxu0 %v2172_v14 }
 0x3a6   : > { %1241 = vadd.xlane.f32.xlu1 %v1240_v18 }
 0x3ae   : > { %1256 = vadd.xlane.f32.xlu1 %v1255_v22 }
 0x3af   : > { %2407 = vrot.lane.b32.xlu2 %v11047_v47, %s10565_s14 }
 0x3b2   : > { %8507 = vmatmul.msk.bf16.vlgmr.msrb.gmra.mxu0 %vm1035_vm0, %v11255_v3 }
 0x3b3   : > { %2227 = vmatpush.bf16.xpose.msrb.mxu0 %v2218_v50 }
 0x3b5   : > { %1238 = vadd.xlane.f32.xlu0 %v1237_v59 }
 0x3b7   : > { %2449 = vrot.lane.b32.xlu2 %v11302_v38, %s10565_s14 }
 0x3bd   : > { %1259 = vadd.xlane.f32.xlu0 %v1258_v62 }
 0x3bf   : > { %2470 = vrot.lane.b32.xlu2 %v11151_v9, %s10565_s14 }
 0x3c2   : > { %8509 = vmatmul.msk.bf16.vlgmr.msra.gmra.mxu0 %vm1035_vm0, %v2165_v39 }
 0x3c7   : > { %2365 = vrot.lane.b32.xlu1 %v11241_v16, %s10565_s14 }
 0x3ce   : > { %v1676_v3 = vpop.xlane.xlu1 %1675 }
 0x3cf   : > { %v1698_v5 = vsub.f32 %v11263_v42, %v1676_v3 }
 0x3d1   : > { %v1706_v35 = vmul.f32 1.442695, %v1698_v5  ;;  %2386 = vrot.lane.b32.xlu0 %v11091_v53, %s10565_s14 }
 0x3d2   : > { %8511 = vmatmul.msk.bf16.vlgmr.msrb.gmra.mxu0 %vm1035_vm0, %v11283_v45  ;;  %v11374_v45 = vpop.permute.xlu2 %2235 }
 0x3d3   : > { %9850 = vpow2.f32 %v1706_v35 }
 0x3d9   : > { %v11364_v11 = vpop.eup %9850  ;;  %2587 = vrot.lane.b32.xlu0 %v11105_v37, %s10566_s19 }
 0x3da   : > { %v1754_v51 = vpack.c.bf16 %v11364_v11, %v11364_v11  ;;  %v1679_v42 = vpop.xlane.xlu0 %1678 }
 0x3db   : > { %v1699_v4 = vsub.f32 %v11277_v30, %v1679_v42  ;;  %v2149_v42 = vsel %vm1035_vm0, %v11299_v34, 0  ;;  %v1740_v34 = vsel %vm1188_vm1, %v11323_v17, 0.0 }
 0x3dc   : > { %8473 = vmatmul.msk.bf16.vlgmr.msrb.gmra.mxu2 %vm1188_vm1, %v1754_v51  ;;  %v11372_v31 = vpop.f32.mrf.mxu0 }
 0x3dd   : > { %v1708_v27 = vmul.f32 1.442695, %v1699_v4 }
 0x3df   : > { %9852 = vpow2.f32 %v1708_v27 }
 0x3e2   : > { %v1688_v43 = vpop.xlane.xlu0 %1687 }
 0x3e3   : > { %v1702_v37 = vsub.f32 %v11281_v20, %v1688_v43 }
 0x3e4   : > { %v1832_v54 = vpop.f32.mrf.mxu0 }
 0x3e5   : > { %v9853_v56 = vpop.eup %9852  ;;  %v1714_v30 = vmul.f32 1.442695, %v1702_v37  ;;  %v1722_v37 = vsel %vm1188_vm1, %v11364_v11, 0.0 }
 0x3e6   : > { %v1755_v12 = vpack.c.bf16 %v9853_v56, %v9853_v56  ;;  %v11377_v46 = vpop.permute.xlu1 %2233  ;;  %v1725_v62 = vsel %vm1188_vm1, %v9853_v56, 0.0 }
 0x3e7   : > { %9854 = vpow2.f32 %v1714_v30  ;;  %v9444_v30 = vld [vmem:[#allocation8 + $0x8] sm:$0xff] }
 0x3e8   : > { %8474 = vmatmul.msk.bf16.vlgmr.msrb.gmra.mxu3 %vm1188_vm1, %v1755_v12  ;;  %1729 = vadd.xlane.f32.xlu2 %v1728_v0  ;;  %v2195_v12 = vsel %vm1035_vm0, %v11360_v8, 0  ;;  %v2241_v8 = vsel %vm1035_vm0, %v11374_v45, 0 }
 0x3ea   : > { %v1697_v2 = vpop.xlane.xlu0 %1696  ;;  %v1691_v33 = vpop.xlane.xlu2 %1690 }
 0x3eb   : > { %v1705_v14 = vsub.f32 %v11245_v23, %v1697_v2  ;;  %v1703_v18 = vsub.f32 %v11292_v52, %v1691_v33  ;;  %v9443_v33 = vld [vmem:[#allocation8] sm:$0xff] }
 0x3ed   : > { %v1720_v22 = vmul.f32 1.442695, %v1705_v14  ;;  %v1716_v50 = vmul.f32 1.442695, %v1703_v18  ;;  %v9855_v39 = vpop.eup %9854 }
 0x3ee   : > { %v1886_v59 = vpop.permute.xlu1 %1885  ;;  %v1734_v51 = vsel %vm1188_vm1, %v9855_v39, 0.0  ;;  %v1758_v54 = vpack.c.bf16 %v9855_v39, %v9855_v39 }
 0x3ef   : > { %9856 = vpow2.f32 %v1720_v22  ;;  %v1891_v20 = vsel %vm1280_vm2, %v1886_v59, 0 }
 0x3f0   : > { %9858 = vpow2.f32 %v1716_v50  ;;  %1900 = vmatpush.bf16.msra.mxu3 %v1891_v20  ;;  %1726 = vadd.xlane.f32.xlu2 %v1725_v62 }
 0x3f1   : > { %1732 = vadd.xlane.f32.xlu1 %v1731_v36 }
 0x3f2   : > { %v1245_v19 = vpop.xlane.xlu2 %1244 }
 0x3f4   : > { %2049 = vmatpush.bf16.msrb.mxu3 %v9444_v30 }
 0x3f5   : > { %v9857_v23 = vpop.eup %9856 }
 0x3f6   : > { %v9859_v3 = vpop.eup %9858  ;;  %v1761_v52 = vpack.c.bf16 %v9857_v23, %v9857_v23  ;;  %v1743_v5 = vsel %vm1188_vm1, %v9857_v23, 0.0 }
 0x3f7   : > { %v1759_v35 = vpack.c.bf16 %v9859_v3, %v9859_v3  ;;  %v1737_v43 = vsel %vm1188_vm1, %v9859_v3, 0.0 }
 0x3f8   : > { %8480 = vmatmul.msk.bf16.vlgmr.msra.gmra.mxu1 %vm1188_vm1, %v1761_v52  ;;  %1735 = vadd.xlane.f32.xlu2 %v1734_v51 }
 0x3f9   : > { %2158 = vmatpush.bf16.xpose.msra.mxu1 %v2149_v42  ;;  %1744 = vadd.xlane.f32.xlu1 %v1743_v5 }
 0x3fa   : > { %8478 = vmatmul.msk.bf16.vlgmr.msra.gmra.mxu3 %vm1188_vm1, %v1759_v35  ;;  %v1248_v56 = vpop.xlane.xlu2 %1247 }
 0x3fb   : > { %2050 = vmatpush.bf16.msrb.mxu3 %v9443_v33 }
 0x3fd   : > { %v1862_v4 = vpop.permute.xlu0 %1861 }
 0x3fe   : > { %v1867_v27 = vsel %vm1280_vm2, %v1862_v4, 0 }
 0x3ff   : > { %1876 = vmatpush.bf16.msra.mxu2 %v1867_v27 }
 0x400   : > { %1738 = vadd.xlane.f32.xlu2 %v1737_v43 }
 0x402   : > { %8477 = vmatmul.msk.bf16.vlgmr.msra.gmra.mxu2 %vm1188_vm1, %v1758_v54  ;;  %v1251_v17 = vpop.xlane.xlu2 %1250 }
 0x403   : > { %1741 = vadd.xlane.f32.xlu0 %v1740_v34 }
 0x408   : > { %8506 = vmatmul.msk.bf16.vlgmr.msrb.gmra.mxu1 %vm1035_vm0, %v11287_v58 }
 0x409   : > { %2204 = vmatpush.bf16.xpose.msrb.mxu1 %v2195_v12 }
 0x40a   : > { %v1254_v58 = vpop.xlane.xlu2 %1253 }
 0x40b   : > { %1723 = vadd.xlane.f32.xlu0 %v1722_v37 }
 0x40c   : > { %v11405_v0 = vpop.f32.mrf.mxu1 }
 0x40f   : > { %v11407_v2 = vpop.f32.mrf.mxu0 }
 0x412   : > { %v2408_v50 = vpop.permute.xlu2 %2407 }
 0x413   : > { %v2413_v20 = vsel %vm1280_vm2, %v2408_v50, 0 }
 0x414   : > { %v1856_v14 = vpop.f32.mrf.mxu1 }
 0x417   : > { %v1928_v18 = vpop.f32.mrf.mxu0 }
 0x418   : > { %8508 = vmatmul.msk.bf16.vlgmr.msra.gmra.mxu1 %vm1035_vm0, %v11259_v28 }
 0x419   : > { %2250 = vmatpush.bf16.xpose.msra.mxu1 %v2241_v8  ;;  %v1242_v22 = vpop.xlane.xlu1 %1241 }
 0x41a   : > { %9860 = vrcp.f32 %v1242_v22  ;;  %v2450_v35 = vpop.permute.xlu2 %2449 }
 0x41f   : > { %v11413_v11 = vpop.f32.mrf.mxu0 }
 0x420   : > { %v9861_v45 = vpop.eup %9860 }
 0x421   : > { %v1431_v28 = vmul.f32 %v9861_v45, %v11257_v48  ;;  %v1257_v52 = vpop.xlane.xlu1 %1256  ;;  %v9446_v45 = vld [vmem:[#allocation8 + $0x18] sm:$0xff] }
 0x422   : > { %v2471_v34 = vpop.permute.xlu2 %2470  ;;  %1996 = vmatpush.bf16.msrb.mxu2 %v9446_v45 }
 0x423   : > { %v2476_v37 = vsel %vm1280_vm2, %v2471_v34, 0 }
 0x427   : > { %v2093_v59 = vpop.f32.mrf.mxu0 }
 0x428   : > { %8510 = vmatmul.msk.bf16.vlgmr.msrb.gmra.mxu1 %vm1035_vm0, %v11275_v15  ;;  %v1239_v62 = vpop.xlane.xlu0 %1238 }
 0x429   : > { %9862 = vrcp.f32 %v1239_v62  ;;  %2422 = vmatpush.bf16.msrb.mxu1 %v2413_v20 }
 0x42a   : > { %9864 = vrcp.f32 %v1248_v56 }
 0x42b   : > { %9866 = vrcp.f32 %v1245_v19 }
 0x42c   : > { %9868 = vrcp.f32 %v1254_v58 }
 0x42d   : > { %9870 = vrcp.f32 %v1251_v17 }
 0x42f   : > { %v9863_v36 = vpop.eup %9862  ;;  %v11418_v39 = vpop.f32.mrf.mxu0 }
 0x430   : > { %v1430_v23 = vmul.f32 %v9863_v36, %v11185_v44  ;;  %v2262_v3 = vsel %vm1188_vm1, %v11418_v39, -inf  ;;  %v9865_v42 = vpop.eup %9864  ;;  %v2455_v44 = vsel %vm1280_vm2, %v2450_v35, 0  ;;  %v1260_v4 = vpop.xlane.xlu0 %1259  ;;  %v9445_v36 = vld [vmem:[#allocation8 + $0x10] sm:$0xff] }
 0x431   : > { %2263 = vmax.xlane.f32.xlu2 %v2262_v3  ;;  %v9867_v27 = vpop.eup %9866  ;;  %v1433_v43 = vmul.f32 %v9865_v42, %v11198_v29  ;;  %9872 = vrcp.f32 %v1260_v4  ;;  %1997 = vmatpush.bf16.msrb.mxu2 %v9445_v36 }
 0x432   : > { %v1438_v5 = vpack.c.bf16 %v1431_v28, %v1430_v23  ;;  %v1432_v19 = vmul.f32 %v9867_v27, %v11189_v24  ;;  %v9869_v29 = vpop.eup %9868  ;;  %9874 = vrcp.f32 %v1257_v52 }
 0x433   : > { %v9871_v33 = vpop.eup %9870  ;;  %v1435_v24 = vmul.f32 %v9869_v29, %v11261_v63 }
 0x434   : > { %8501 = vmatmul.msk.bf16.vlgmr.msrb.gmra.mxu3 %vm1035_vm0, %v1438_v5  ;;  %v1439_v56 = vpack.c.bf16 %v1433_v43, %v1432_v19  ;;  %v1434_v18 = vmul.f32 %v9871_v33, %v11237_v7  ;;  %v2256_v33 = vsel %vm1188_vm1, %v11413_v11, -inf }
 0x436   : > { %v1440_v58 = vpack.c.bf16 %v1435_v24, %v1434_v18 }
 0x437   : > { %v2139_v15 = vpop.f32.mrf.mxu0  ;;  %v9873_v22 = vpop.eup %9872 }
 0x438   : > { %8512 = vmatmul.msk.bf16.vlgmr.msra.gmra.mxu1 %vm1035_vm0, %v11377_v46  ;;  %v9875_v50 = vpop.eup %9874  ;;  %v1437_v59 = vmul.f32 %v9873_v22, %v11219_v49 }
 0x439   : > { %v2366_v51 = vpop.permute.xlu1 %2365  ;;  %v1436_v63 = vmul.f32 %v9875_v50, %v11200_v25 }
 0x43a   : > { %v2371_v48 = vsel %vm1280_vm2, %v2366_v51, 0 }
 0x43b   : > { %2380 = vmatpush.bf16.msra.mxu3 %v2371_v48  ;;  %v1441_v62 = vpack.c.bf16 %v1437_v59, %v1436_v63 }
 0x43f   : > { %2464 = vmatpush.bf16.msrb.mxu3 %v2455_v44  ;;  %v11430_v54 = vpop.f32.mrf.mxu0 }
 0x443   : > { %v2387_v12 = vpop.permute.xlu0 %2386 }
 0x444   : > { %v2392_v46 = vsel %vm1280_vm2, %v2387_v12, 0  ;;  %8502 = vmatmul.msk.bf16.gmra.mxu3 %vm1035_vm0, %v1439_v56 }
 0x445   : > { %2401 = vmatpush.bf16.msra.mxu0 %v2392_v46 }
 0x447   : > { %v2185_v30 = vpop.f32.mrf.mxu0 }
 0x449   : > { %2485 = vmatpush.bf16.msrb.mxu0 %v2476_v37  ;;  %2344 = vrot.lane.b32.xlu2 %v11226_v57, %s10565_s14 }
 0x44b   : > { %v11450_v23 = vpop.permute.xlu0 %2587 }
 0x44f   : > { %v11439_v14 = vpop.f32.mrf.mxu0 }
 0x450   : > { %v2274_v8 = vsel %vm1188_vm1, %v11439_v14, -inf }
 0x451   : > { %2275 = vmax.xlane.f32.xlu1 %v2274_v8 }
 0x454   : > { %8503 = vmatmul.msk.bf16.gmra.mxu3 %vm1035_vm0, %v1440_v58 }
 0x457   : > { %v2231_v17 = vpop.f32.mrf.mxu0 }
 0x45b   : > { %v1730_v3 = vpop.xlane.xlu2 %1729 }
 0x45f   : > { %v1782_v20 = vpop.f32.mrf.mxu2 }
 0x463   : > { %v1727_v25 = vpop.xlane.xlu2 %1726 }
 0x464   : > { %8504 = vmatmul.msk.bf16.gmra.mxu3 %vm1035_vm0, %v1441_v62  ;;  %9876 = vrcp.f32 %v1727_v25  ;;  %v1733_v34 = vpop.xlane.xlu1 %1732 }
 0x467   : > { %v1784_v7 = vpop.f32.mrf.mxu2 }
 0x46a   : > { %2610 = vrot.lane.b32.xlu1 %v11064_v6, %s10566_s19  ;;  %v9877_v48 = vpop.eup %9876 }
 0x46b   : > { %v1806_v28 = vpop.f32.mrf.mxu3  ;;  %v1736_v37 = vpop.xlane.xlu2 %1735 }
 0x46c   : > { %v1955_v27 = vmul.f32 %v9877_v48, %v1806_v28  ;;  %v1745_v28 = vpop.xlane.xlu1 %1744 }
 0x473   : > { %v1808_v52 = vpop.f32.mrf.mxu3  ;;  %v1739_v22 = vpop.xlane.xlu2 %1738 }
 0x475   : > { %v11452_v49 = vpop.f32.mrf.mxu1 }
 0x476   : > { %v1742_v5 = vpop.xlane.xlu0 %1741 }
 0x47d   : > { %v1902_v15 = vpop.f32.mrf.mxu3  ;;  %v1952_v35 = vpop.f32.mrf.mxu1 }
 0x47e   : > { %v1724_v51 = vpop.xlane.xlu0 %1723 }
 0x47f   : > { %9878 = vrcp.f32 %v1724_v51 }
 0x480   : > { %9880 = vrcp.f32 %v1733_v34 }
 0x481   : > { %9882 = vrcp.f32 %v1730_v3 }
 0x482   : > { %9884 = vrcp.f32 %v1736_v37 }
 0x483   : > { %9886 = vrcp.f32 %v1739_v22 }
 0x485   : > { %v9879_v42 = vpop.eup %9878  ;;  %v1904_v44 = vpop.f32.mrf.mxu3 }
 0x486   : > { %v1878_v4 = vpop.f32.mrf.mxu2  ;;  %v1954_v6 = vmul.f32 %v9879_v42, %v1782_v20  ;;  %v11454_v43 = vpop.f32.mrf.mxu1 }
 0x487   : > { %v2259_v19 = vsel %vm1188_vm1, %v11454_v43, -inf  ;;  %v9881_v30 = vpop.eup %9880 }
 0x488   : > { %v1962_v56 = vpack.c.bf16 %v1955_v27, %v1954_v6  ;;  %2260 = vmax.xlane.f32.xlu0 %v2259_v19  ;;  %v9883_v29 = vpop.eup %9882  ;;  %v1957_v24 = vmul.f32 %v9881_v30, %v11405_v0  ;;  %v13429_v6 = vld [vmem:[#allocation30_spill] sm:$0xff] }
 0x489   : > { %v1956_v8 = vmul.f32 %v9883_v29, %v11372_v31  ;;  %v9885_v59 = vpop.eup %9884 }
 0x48a   : > { %8489 = vmatmul.msk.bf16.vlgmr.msrb.gmra.mxu2 %vm1035_vm0, %v1962_v56  ;;  %v9887_v0 = vpop.eup %9886  ;;  %v1958_v20 = vmul.f32 %v9885_v59, %v1878_v4  ;;  %v13432_v59 = vld [vmem:[#allocation27_spill] sm:$0xff] }
 0x48b   : > { %v1963_v17 = vpack.c.bf16 %v1957_v24, %v1956_v8  ;;  %v1959_v62 = vmul.f32 %v9887_v0, %v1902_v15 }
 0x48d   : > { %v1964_v36 = vpack.c.bf16 %v1959_v62, %v1958_v20 }
 0x48e   : > { %v1880_v12 = vpop.f32.mrf.mxu2  ;;  %v2116_v46 = vpop.f32.mrf.mxu1 }
 0x48f   : > { %v2593_v46 = vsel %vm1035_vm0, %v11450_v23, 0  ;;  %v13431_v23 = vld [vmem:[#allocation31_spill] sm:$0xff] }
 0x494   : > { %2257 = vmax.xlane.f32.xlu1 %v2256_v33 }
 0x496   : > { %v11462_v18 = vpop.f32.mrf.mxu1 }
 0x497   : > { %v2265_v58 = vsel %vm1188_vm1, %v11462_v18, -inf }
 0x498   : > { %2266 = vmax.xlane.f32.xlu2 %v2265_v58 }
 0x49a   : > { %8490 = vmatmul.msk.bf16.gmra.mxu2 %vm1035_vm0, %v1963_v17 }
 0x49c   : > { %2491 = vrot.lane.b32.xlu0 %v11056_v10, %s10565_s14 }
 0x49e   : > { %v2162_v50 = vpop.f32.mrf.mxu1 }
 0x4a4   : > { %2585 = vrot.lane.b32.xlu0 %v11030_v26, %s10566_s19  ;;  %v2264_v31 = vpop.xlane.xlu2 %2263 }
 0x4a5   : > { %v2282_v63 = vsub.f32 %v11418_v39, %v2264_v31  ;;  %v13433_v31 = vld [vmem:[#allocation28_spill] sm:$0xff] }
 0x4a6   : > { %v11473_v45 = vpop.f32.mrf.mxu1 }
 0x4a7   : > { %v2292_v7 = vmul.f32 1.442695, %v2282_v63 }
 0x4a9   : > { %9888 = vpow2.f32 %v2292_v7 }
 0x4aa   : > { %8491 = vmatmul.msk.bf16.gmra.mxu2 %vm1035_vm0, %v1964_v36  ;;  %9890 = vrcp.f32 %v1742_v5 }
 0x4ab   : > { %9892 = vrcp.f32 %v1745_v28 }
 0x4ac   : > { %2608 = vrot.lane.b32.xlu0 %v11072_v1, %s10566_s19  ;;  %v2345_v3 = vpop.permute.xlu2 %2344 }
 0x4ad   : > { %v2350_v52 = vsel %vm1280_vm2, %v2345_v3, 0  ;;  %2702 = vrot.lane.b32.xlu1 %v11040_v41, %s10566_s19 }
 0x4ae   : > { %v2208_v26 = vpop.f32.mrf.mxu1  ;;  %2359 = vmatpush.bf16.msra.mxu2 %v2350_v52 }
 0x4af   : > { %v11481_v39 = vpop.eup %9888 }
 0x4b0   : > { %v2338_v25 = vpack.c.bf16 %v11481_v39, %v11481_v39  ;;  %v9891_v15 = vpop.eup %9890 }
 0x4b1   : > { %v1960_v5 = vmul.f32 %v9891_v15, %v11407_v2  ;;  %v9893_v1 = vpop.eup %9892 }
 0x4b2   : > { %8515 = vmatmul.msk.bf16.vlgmr.msra.gmra.mxu0 %vm1188_vm1, %v2338_v25  ;;  %v1961_v41 = vmul.f32 %v9893_v1, %v11452_v49 }
 0x4b4   : > { %2633 = vrot.lane.b32.xlu0 %v10894_v21, %s10566_s19  ;;  %v1965_v48 = vpack.c.bf16 %v1961_v41, %v1960_v5 }
 0x4b5   : > { %2725 = vrot.lane.b32.xlu1 %v11049_v55, %s10566_s19 }
 0x4b6   : > { %v11492_v35 = vpop.f32.mrf.mxu1 }
 0x4b7   : > { %v2277_v51 = vsel %vm1188_vm1, %v11492_v35, -inf  ;;  %v11559_v5 = vpop.f32.mrf.mxu3 }
 0x4b8   : > { %2278 = vmax.xlane.f32.xlu2 %v2277_v51 }
 0x4ba   : > { %8492 = vmatmul.msk.bf16.gmra.mxu2 %vm1035_vm0, %v1965_v48 }
 0x4bc   : > { %2656 = vrot.lane.b32.xlu0 %v10907_v40, %s10566_s19 }
 0x4bd   : > { %2723 = vrot.lane.b32.xlu1 %v10931_v13, %s10566_s19  ;;  %v2271_v13 = vsel %vm1188_vm1, %v11473_v45, -inf }
 0x4be   : > { %v2254_v21 = vpop.f32.mrf.mxu1 }
 0x4bf   : > { %v11561_v1 = vpop.f32.mrf.mxu3 }
 0x4c4   : > { %v2276_v2 = vpop.xlane.xlu1 %2275 }
 0x4c5   : > { %v2286_v55 = vsub.f32 %v11439_v14, %v2276_v2  ;;  %2899 = vrot.lane.b32.xlu1 %v11091_v53, %s10566_s19  ;;  %v2268_v53 = vsel %vm1188_vm1, %v11430_v54, -inf }
 0x4c7   : > { %v2300_v49 = vmul.f32 1.442695, %v2286_v55 }
 0x4c9   : > { %9894 = vpow2.f32 %v2300_v49 }
 0x4cf   : > { %v9895_v42 = vpop.eup %9894 }
 0x4d0   : > { %v2342_v44 = vpack.c.bf16 %v9895_v42, %v9895_v42  ;;  %2654 = vrot.lane.b32.xlu2 %v10914_v60, %s10566_s19 }
 0x4d2   : > { %8519 = vmatmul.msk.bf16.vlgmr.msrb.gmra.mxu0 %vm1188_vm1, %v2342_v44 }
 0x4dc   : > { %v2611_v40 = vpop.permute.xlu1 %2610 }
 0x4dd   : > { %v2616_v4 = vsel %vm1035_vm0, %v2611_v40, 0 }
 0x4de   : > { %2625 = vmatpush.bf16.xpose.msra.mxu0 %v2616_v4 }
 0x4e6   : > { %2272 = vmax.xlane.f32.xlu0 %v2271_v13 }
 0x4f9   : > { %2269 = vmax.xlane.f32.xlu2 %v2268_v53 }
 0x4fa   : > { %2631 = vrot.lane.b32.xlu0 %v10902_v32, %s10566_s19 }
 0x4fb   : > { %v2261_v14 = vpop.xlane.xlu0 %2260 }
 0x4fc   : > { %v2281_v60 = vsub.f32 %v11454_v43, %v2261_v14  ;;  %v13430_v43 = vld [vmem:[#allocation29_spill] sm:$0xff] }
 0x4fe   : > { %v2290_v27 = vmul.f32 1.442695, %v2281_v60 }
 0x500   : > { %9896 = vpow2.f32 %v2290_v27 }
 0x502   : > { %2679 = vrot.lane.b32.xlu0 %v13429_v6, %s10566_s19 }
 0x506   : > { %v11517_v19 = vpop.eup %9896 }
 0x507   : > { %v2337_v34 = vpack.c.bf16 %v11517_v19, %v11517_v19  ;;  %v2258_v56 = vpop.xlane.xlu1 %2257 }
 0x508   : > { %v2280_v12 = vsub.f32 %v11413_v11, %v2258_v56 }
 0x509   : > { %8514 = vmatmul.msk.bf16.vlgmr.msra.gmra.mxu3 %vm1188_vm1, %v2337_v34 }
 0x50a   : > { %v2288_v32 = vmul.f32 1.442695, %v2280_v12  ;;  %2602 = vmatpush.bf16.xpose.msra.mxu3 %v2593_v46  ;;  %2677 = vrot.lane.b32.xlu0 %v13430_v43, %s10566_s19 }
 0x50b   : > { %v2267_v37 = vpop.xlane.xlu2 %2266 }
 0x50c   : > { %9898 = vpow2.f32 %v2288_v32  ;;  %v2283_v30 = vsub.f32 %v11462_v18, %v2267_v37 }
 0x50d   : > { %v11563_v41 = vpop.f32.mrf.mxu2 }
 0x50e   : > { %v2294_v29 = vmul.f32 1.442695, %v2283_v30  ;;  %v2492_v33 = vpop.permute.xlu0 %2491 }
 0x50f   : > { %v2497_v24 = vsel %vm1280_vm2, %v2492_v33, 0 }
 0x510   : > { %9900 = vpow2.f32 %v2294_v29  ;;  %2506 = vmatpush.bf16.msra.mxu1 %v2497_v24 }
 0x511   : > { %2878 = vrot.lane.b32.xlu2 %v11241_v16, %s10566_s19  ;;  %v2322_v16 = vsel %vm1188_vm1, %v9895_v42, 0.0  ;;  %v2310_v42 = vsel %vm1188_vm1, %v11481_v39, 0.0 }
 0x512   : > { %v9899_v11 = vpop.eup %9898  ;;  %2700 = vrot.lane.b32.xlu0 %v13431_v23, %s10566_s19 }
 0x513   : > { %v2336_v8 = vpack.c.bf16 %v9899_v11, %v9899_v11  ;;  %v2304_v58 = vsel %vm1188_vm1, %v9899_v11, 0.0  ;;  %v2307_v11 = vsel %vm1188_vm1, %v11517_v19, 0.0 }
 0x514   : > { %2305 = vadd.xlane.f32.xlu1 %v2304_v58 }
 0x515   : > { %8513 = vmatmul.msk.bf16.vlgmr.msra.gmra.mxu2 %vm1188_vm1, %v2336_v8  ;;  %v11569_v48 = vpop.f32.mrf.mxu2 }
 0x516   : > { %v11535_v18 = vpop.eup %9900  ;;  %v11537_v17 = vpop.permute.xlu0 %2585 }
 0x517   : > { %v2339_v22 = vpack.c.bf16 %v11535_v18, %v11535_v18 }
 0x519   : > { %8516 = vmatmul.msk.bf16.vlgmr.msrb.gmra.mxu1 %vm1188_vm1, %v2339_v22 }
 0x51a   : > { %2428 = vrot.lane.b32.xlu0 %v11313_v61, %s10565_s14 }
 0x51c   : > { %2323 = vadd.xlane.f32.xlu1 %v2322_v16  ;;  %v2313_v16 = vsel %vm1188_vm1, %v11535_v18, 0.0 }
 0x51d   : > { %v11576_v40 = vpop.f32.mrf.mxu2 }
 0x51e   : > { %v2609_v50 = vpop.permute.xlu0 %2608 }
 0x51f   : > { %8534 = vmatmul.msk.bf16.vlgmr.msra.gmra.mxu0 %vm1035_vm0, %v2609_v50  ;;  %v2703_v3 = vpop.permute.xlu1 %2702 }
 0x520   : > { %v2708_v15 = vsel %vm1035_vm0, %v2703_v3, 0 }
 0x522   : > { %2748 = vrot.lane.b32.xlu0 %v13432_v59, %s10566_s19 }
 0x526   : > { %v2634_v0 = vpop.permute.xlu0 %2633 }
 0x527   : > { %v2639_v20 = vsel %vm1035_vm0, %v2634_v0, 0  ;;  %v2726_v46 = vpop.permute.xlu1 %2725 }
 0x528   : > { %2648 = vmatpush.bf16.xpose.msrb.mxu1 %v2639_v20  ;;  %v2731_v30 = vsel %vm1035_vm0, %v2726_v46, 0 }
 0x52a   : > { %2746 = vrot.lane.b32.xlu0 %v13433_v31, %s10566_s19 }
 0x52b   : > { %v2279_v63 = vpop.xlane.xlu2 %2278 }
 0x52c   : > { %v2287_v62 = vsub.f32 %v11492_v35, %v2279_v63 }
 0x52e   : > { %v2302_v7 = vmul.f32 1.442695, %v2287_v62  ;;  %v2657_v51 = vpop.permute.xlu0 %2656 }
 0x52f   : > { %v11552_v36 = vpop.f32.mrf.mxu0  ;;  %v2662_v60 = vsel %vm1035_vm0, %v2657_v51, 0  ;;  %v2724_v50 = vpop.permute.xlu1 %2723 }
 0x530   : > { %9902 = vpow2.f32 %v2302_v7 }
 0x532   : > { %2857 = vrot.lane.b32.xlu0 %v11226_v57, %s10566_s19  ;;  %v11567_v57 = vpop.f32.mrf.mxu3 }
 0x533   : > { %v2655_v13 = vpop.permute.xlu2 %2654 }
 0x536   : > { %v9903_v28 = vpop.eup %9902 }
 0x537   : > { %v2343_v52 = vpack.c.bf16 %v9903_v28, %v9903_v28  ;;  %v2405_v26 = vpop.f32.mrf.mxu0  ;;  %v2325_v25 = vsel %vm1188_vm1, %v9903_v28, 0.0  ;;  %v2900_v62 = vpop.permute.xlu1 %2899 }
 0x538   : > { %2326 = vadd.xlane.f32.xlu1 %v2325_v25  ;;  %v2905_v3 = vsel %vm1280_vm2, %v2900_v62, 0 }
 0x539   : > { %8520 = vmatmul.msk.bf16.vlgmr.msra.gmra.mxu1 %vm1188_vm1, %v2343_v52 }
 0x53a   : > { %2717 = vmatpush.bf16.xpose.msra.mxu1 %v2708_v15  ;;  %v11572_v49 = vpop.f32.mrf.mxu3 }
 0x542   : > { %v11578_v53 = vpop.f32.mrf.mxu3 }
 0x54a   : > { %v11586_v34 = vpop.f32.mrf.mxu3 }
 0x54f   : > { %v11565_v35 = vpop.f32.mrf.mxu0 }
 0x552   : > { %v11595_v29 = vpop.f32.mrf.mxu3 }
 0x557   : > { %v2489_v21 = vpop.f32.mrf.mxu0 }
 0x559   : > { %v2273_v2 = vpop.xlane.xlu0 %2272 }
 0x55a   : > { %v2285_v55 = vsub.f32 %v11473_v45, %v2273_v2  ;;  %v11582_v45 = vpop.f32.mrf.mxu2  ;;  %v11602_v23 = vpop.f32.mrf.mxu3 }
 0x55c   : > { %v2298_v44 = vmul.f32 1.442695, %v2285_v55  ;;  %2311 = vadd.xlane.f32.xlu0 %v2310_v42 }
 0x55e   : > { %9904 = vpow2.f32 %v2298_v44 }
 0x562   : > { %v11588_v12 = vpop.f32.mrf.mxu2 }
 0x564   : > { %v9905_v4 = vpop.eup %9904 }
 0x565   : > { %v2341_v14 = vpack.c.bf16 %v9905_v4, %v9905_v4  ;;  %v2319_v63 = vsel %vm1188_vm1, %v9905_v4, 0.0 }
 0x567   : > { %8518 = vmatmul.msk.bf16.vlgmr.msrb.gmra.mxu3 %vm1188_vm1, %v2341_v14 }
 0x568   : > { %2671 = vmatpush.bf16.xpose.msrb.mxu3 %v2662_v60 }
 0x56a   : > { %v11597_v33 = vpop.f32.mrf.mxu2 }
 0x56c   : > { %v2632_v27 = vpop.permute.xlu0 %2631  ;;  %v2270_v6 = vpop.xlane.xlu2 %2269 }
 0x56d   : > { %v2284_v39 = vsub.f32 %v11430_v54, %v2270_v6  ;;  %8535 = vmatmul.msk.bf16.vlgmr.msrb.gmra.mxu1 %vm1035_vm0, %v2632_v27 }
 0x56f   : > { %v2296_v56 = vmul.f32 1.442695, %v2284_v39 }
 0x571   : > { %9906 = vpow2.f32 %v2296_v56 }
 0x574   : > { %v2680_v32 = vpop.permute.xlu0 %2679  ;;  %v2879_v8 = vpop.permute.xlu2 %2878 }
 0x575   : > { %v2685_v43 = vsel %vm1035_vm0, %v2680_v32, 0  ;;  %v2884_v22 = vsel %vm1280_vm2, %v2879_v8, 0 }
 0x576   : > { %2694 = vmatpush.bf16.xpose.msrb.mxu0 %v2685_v43  ;;  %v9448_v43 = vld [vmem:[#allocation8 + $0x28] sm:$0xff] }
 0x577   : > { %v9907_v37 = vpop.eup %9906  ;;  %8533 = vmatmul.msk.bf16.vlgmr.msra.gmra.mxu3 %vm1035_vm0, %v11537_v17  ;;  %v11605_v17 = vpop.f32.mrf.mxu2 }
 0x578   : > { %2740 = vmatpush.bf16.xpose.msra.mxu3 %v2731_v30  ;;  %v2316_v54 = vsel %vm1188_vm1, %v9907_v37, 0.0  ;;  %v2340_v20 = vpack.c.bf16 %v9907_v37, %v9907_v37  ;;  %v9447_v37 = vld [vmem:[#allocation8 + $0x20] sm:$0xff] }
 0x579   : > { %2317 = vadd.xlane.f32.xlu2 %v2316_v54 }
 0x57c   : > { %v2678_v24 = vpop.permute.xlu0 %2677 }
 0x57d   : > { %8537 = vmatmul.msk.bf16.vlgmr.msrb.gmra.mxu0 %vm1035_vm0, %v2678_v24 }
 0x57f   : > { %v11612_v31 = vpop.f32.mrf.mxu2 }
 0x581   : > { %2308 = vadd.xlane.f32.xlu2 %v2307_v11 }
 0x584   : > { %v2701_v58 = vpop.permute.xlu0 %2700 }
 0x585   : > { %8538 = vmatmul.msk.bf16.vlgmr.msra.gmra.mxu1 %vm1035_vm0, %v2701_v58 }
 0x587   : > { %8536 = vmatmul.msk.bf16.vlgmr.msrb.gmra.mxu3 %vm1035_vm0, %v2655_v13  ;;  %v2306_v25 = vpop.xlane.xlu1 %2305 }
 0x588   : > { %2893 = vmatpush.bf16.msrb.mxu3 %v2884_v22 }
 0x589   : > { %2314 = vadd.xlane.f32.xlu2 %v2313_v16 }
 0x58c   : > { %v2429_v19 = vpop.permute.xlu0 %2428  ;;  %v2382_v59 = vpop.f32.mrf.mxu3 }
 0x58d   : > { %v2434_v0 = vsel %vm1280_vm2, %v2429_v19, 0 }
 0x58e   : > { %2443 = vmatpush.bf16.msrb.mxu2 %v2434_v0 }
 0x58f   : > { %v2324_v4 = vpop.xlane.xlu1 %2323 }
 0x590   : > { %9908 = vrcp.f32 %v2324_v4 }
 0x591   : > { %2320 = vadd.xlane.f32.xlu2 %v2319_v63  ;;  %8517 = vmatmul.msk.bf16.vlgmr.msrb.gmra.mxu2 %vm1188_vm1, %v2340_v20 }
 0x592   : > { %2554 = vmatpush.bf16.msra.mxu2 %v9448_v43 }
 0x594   : > { %v2749_v7 = vpop.permute.xlu0 %2748  ;;  %v2384_v28 = vpop.f32.mrf.mxu3 }
 0x595   : > { %v2754_v18 = vsel %vm1035_vm0, %v2749_v7, 0 }
 0x596   : > { %v11618_v52 = vpop.f32.mrf.mxu1  ;;  %2763 = vmatpush.bf16.xpose.msra.mxu0 %v2754_v18  ;;  %v9909_v60 = vpop.eup %9908  ;;  %2555 = vmatpush.bf16.msra.mxu2 %v9447_v37 }
 0x597   : > { %8539 = vmatmul.msk.bf16.vlgmr.msra.gmra.mxu3 %vm1035_vm0, %v2724_v50  ;;  %v11628_v39 = vmul.f32 %v9909_v60, %v11565_v35 }
 0x598   : > { %v2361_v26 = vpop.f32.mrf.mxu2 }
 0x59c   : > { %v2747_v15 = vpop.permute.xlu0 %2746  ;;  %v11621_v51 = vpop.f32.mrf.mxu0 }
 0x59d   : > { %8540 = vmatmul.msk.bf16.vlgmr.msra.gmra.mxu0 %vm1035_vm0, %v2747_v15  ;;  %v2772_v21 = vsel %vm1188_vm1, %v11621_v51, -inf }
 0x59e   : > { %2914 = vmatpush.bf16.msrb.mxu0 %v2905_v3  ;;  %v2426_v2 = vpop.f32.mrf.mxu1  ;;  %2773 = vmax.xlane.f32.xlu2 %v2772_v21 }
 0x5a0   : > { %v2363_v55 = vpop.f32.mrf.mxu2 }
 0x5a4   : > { %v2858_v42 = vpop.permute.xlu0 %2857  ;;  %v2629_v44 = vpop.f32.mrf.mxu0 }
 0x5a5   : > { %v2863_v13 = vsel %vm1280_vm2, %v2858_v42, 0 }
 0x5a6   : > { %2872 = vmatpush.bf16.msrb.mxu1 %v2863_v13 }
 0x5ab   : > { %v2327_v14 = vpop.xlane.xlu1 %2326 }
 0x5ac   : > { %9910 = vrcp.f32 %v2327_v14 }
 0x5ad   : > { %9912 = vrcp.f32 %v2306_v25 }
 0x5b2   : > { %v9911_v27 = vpop.eup %9910 }
 0x5b3   : > { %v9913_v35 = vpop.eup %9912 }
 0x5b4   : > { %v2512_v20 = vmul.f32 %v9913_v35, %v2361_v26 }
 0x5b6   : > { %v2508_v6 = vpop.f32.mrf.mxu1 }
 0x5b7   : > { %v11630_v56 = vmul.f32 %v9911_v27, %v2508_v6 }
 0x5b9   : > { %v2523_v46 = vpack.c.bf16 %v11630_v56, %v11628_v39 }
 0x5be   : > { %v2510_v32 = vpop.f32.mrf.mxu1 }
 0x5cf   : > { %v2312_v28 = vpop.xlane.xlu0 %2311 }
 0x5ea   : > { %v2466_v30 = vpop.f32.mrf.mxu3  ;;  %v11634_v54 = vpop.f32.mrf.mxu1 }
 0x5eb   : > { %v2775_v15 = vsel %vm1188_vm1, %v11634_v54, -inf }
 0x5ec   : > { %v2318_v24 = vpop.xlane.xlu2 %2317 }
 0x5f2   : > { %v2468_v11 = vpop.f32.mrf.mxu3  ;;  %v2652_v8 = vpop.f32.mrf.mxu1 }
 0x5f4   : > { %v2309_v58 = vpop.xlane.xlu2 %2308 }
 0x5f5   : > { %9914 = vrcp.f32 %v2309_v58 }
 0x5fa   : > { %v11636_v22 = vpop.f32.mrf.mxu3  ;;  %v11638_v16 = vpop.f32.mrf.mxu0 }
 0x5fb   : > { %v9915_v50 = vpop.eup %9914  ;;  %v2781_v19 = vsel %vm1188_vm1, %v11638_v16, -inf  ;;  %v2769_v0 = vsel %vm1188_vm1, %v11636_v22, -inf }
 0x5fc   : > { %v2513_v63 = vmul.f32 %v9915_v50, %v2382_v59  ;;  %2782 = vmax.xlane.f32.xlu0 %v2781_v19  ;;  %2770 = vmax.xlane.f32.xlu1 %v2769_v0  ;;  %v2315_v7 = vpop.xlane.xlu2 %2314 }
 0x5fd   : > { %9916 = vrcp.f32 %v2315_v7 }
 0x5fe   : > { %v2520_v62 = vpack.c.bf16 %v2513_v63, %v2512_v20  ;;  %9918 = vrcp.f32 %v2312_v28 }
 0x5ff   : > { %9920 = vrcp.f32 %v2318_v24 }
 0x600   : > { %8529 = vmatmul.msk.bf16.vlgmr.msra.gmra.mxu2 %vm1035_vm0, %v2520_v62 }
 0x602   : > { %v2606_v18 = vpop.f32.mrf.mxu3  ;;  %v2698_v3 = vpop.f32.mrf.mxu0 }
 0x603   : > { %v11645_v25 = vpop.f32.mrf.mxu1  ;;  %v9917_v21 = vpop.eup %9916 }
 0x604   : > { %2776 = vmax.xlane.f32.xlu1 %v2775_v15  ;;  %v9919_v26 = vpop.eup %9918  ;;  %v2321_v59 = vpop.xlane.xlu2 %2320  ;;  %v2515_v2 = vmul.f32 %v9917_v21, %v11618_v52  ;;  %v2784_v44 = vsel %vm1188_vm1, %v11645_v25, -inf }
 0x605   : > { %v2514_v13 = vmul.f32 %v9919_v26, %v11552_v36  ;;  %9922 = vrcp.f32 %v2321_v59  ;;  %v9921_v43 = vpop.eup %9920 }
 0x607   : > { %v2521_v14 = vpack.c.bf16 %v2515_v2, %v2514_v13 }
 0x60a   : > { %v11650_v55 = vpop.f32.mrf.mxu3 }
 0x60b   : > { %v2721_v42 = vpop.f32.mrf.mxu1  ;;  %v2778_v4 = vsel %vm1188_vm1, %v11650_v55, -inf  ;;  %v9923_v37 = vpop.eup %9922 }
 0x60c   : > { %2785 = vmax.xlane.f32.xlu1 %v2784_v44  ;;  %2779 = vmax.xlane.f32.xlu2 %v2778_v4 }
 0x610   : > { %2962 = vrot.lane.b32.xlu0 %v11302_v38, %s10566_s19  ;;  %8530 = vmatmul.msk.bf16.gmra.mxu2 %vm1035_vm0, %v2521_v14  ;;  %v2517_v38 = vmul.f32 %v9923_v37, %v2466_v30 }
 0x611   : > { %v2774_v52 = vpop.xlane.xlu2 %2773 }
 0x612   : > { %v2794_v60 = vsub.f32 %v11621_v51, %v2774_v52  ;;  %v2675_v27 = vpop.f32.mrf.mxu3 }
 0x614   : > { %v2803_v6 = vmul.f32 1.442695, %v2794_v60  ;;  %v2445_v32 = vpop.f32.mrf.mxu2 }
 0x615   : > { %v2516_v36 = vmul.f32 %v9921_v43, %v2445_v32 }
 0x616   : > { %9924 = vpow2.f32 %v2803_v6 }
 0x617   : > { %v2522_v19 = vpack.c.bf16 %v2517_v38, %v2516_v36 }
 0x61a   : > { %v11661_v11 = vpop.f32.mrf.mxu3  ;;  %v11663_v8 = vpop.f32.mrf.mxu0 }
 0x61b   : > { %v2790_v30 = vsel %vm1188_vm1, %v11663_v8, -inf }
 0x61c   : > { %v9925_v58 = vpop.eup %9924  ;;  %v2447_v35 = vpop.f32.mrf.mxu2 }
 0x61d   : > { %v2850_v50 = vpack.c.bf16 %v9925_v58, %v9925_v58 }
 0x61f   : > { %8542 = vmatmul.msk.bf16.vlgmr.msrb.gmra.mxu3 %vm1188_vm1, %v2850_v50 }
 0x620   : > { %8531 = vmatmul.msk.bf16.gmra.mxu2 %vm1035_vm0, %v2522_v19 }
 0x622   : > { %v2744_v51 = vpop.f32.mrf.mxu3  ;;  %v2767_v24 = vpop.f32.mrf.mxu0 }
 0x624   : > { %2941 = vrot.lane.b32.xlu2 %v11313_v61, %s10566_s19  ;;  %v2787_v61 = vsel %vm1188_vm1, %v11661_v11, -inf }
 0x625   : > { %2920 = vrot.lane.b32.xlu1 %v11047_v47, %s10566_s19  ;;  %v2820_v47 = vsel %vm1188_vm1, %v9925_v58, 0.0  ;;  %v2058_v58 = vadd.f32 %v11567_v57, %v11576_v40  ;;  %v2063_v57 = vadd.f32 %v11578_v53, %v11588_v12 }
 0x62c   : > { %2983 = vrot.lane.b32.xlu2 %v11151_v9, %s10566_s19 }
 0x630   : > { %8532 = vmatmul.msk.bf16.gmra.mxu2 %vm1035_vm0, %v2523_v46 }
 0x634   : > { %3004 = vrot.lane.b32.xlu2 %v11056_v10, %s10566_s19 }
 0x63a   : > { %2791 = vmax.xlane.f32.xlu0 %v2790_v30 }
 0x64f   : > { %2788 = vmax.xlane.f32.xlu1 %v2787_v61 }
 0x657   : > { %2821 = vadd.xlane.f32.xlu1 %v2820_v47 }
 0x66f   : > { %v2771_v9 = vpop.xlane.xlu1 %2770  ;;  %v2783_v56 = vpop.xlane.xlu0 %2782 }
 0x670   : > { %v2793_v0 = vsub.f32 %v11636_v22, %v2771_v9  ;;  %v2797_v20 = vsub.f32 %v11638_v16, %v2783_v56  ;;  %v2053_v16 = vadd.f32 %v11559_v5, %v11563_v41 }
 0x672   : > { %v2801_v39 = vmul.f32 1.442695, %v2793_v0  ;;  %v2809_v18 = vmul.f32 1.442695, %v2797_v20 }
 0x674   : > { %9926 = vpow2.f32 %v2801_v39 }
 0x677   : > { %v2777_v46 = vpop.xlane.xlu1 %2776 }
 0x678   : > { %v2795_v10 = vsub.f32 %v11634_v54, %v2777_v46 }
 0x67a   : > { %v2805_v63 = vmul.f32 1.442695, %v2795_v10  ;;  %v9927_v62 = vpop.eup %9926 }
 0x67b   : > { %v2849_v7 = vpack.c.bf16 %v9927_v62, %v9927_v62  ;;  %v2817_v28 = vsel %vm1188_vm1, %v9927_v62, 0.0 }
 0x67c   : > { %9928 = vpow2.f32 %v2805_v63  ;;  %2818 = vadd.xlane.f32.xlu2 %v2817_v28  ;;  %v2068_v63 = vadd.f32 %v11595_v29, %v11605_v17  ;;  %v9450_v17 = vld [vmem:[#allocation8 + $0x38] sm:$0xff] }
 0x67d   : > { %8541 = vmatmul.msk.bf16.vlgmr.msrb.gmra.mxu1 %vm1188_vm1, %v2849_v7  ;;  %9930 = vpow2.f32 %v2809_v18 }
 0x67f   : > { %v2786_v3 = vpop.xlane.xlu1 %2785  ;;  %v2780_v22 = vpop.xlane.xlu2 %2779 }
 0x680   : > { %v2798_v15 = vsub.f32 %v11645_v25, %v2786_v3  ;;  %v2796_v21 = vsub.f32 %v11650_v55, %v2780_v22 }
 0x682   : > { %v9929_v54 = vpop.eup %9928  ;;  %v2811_v26 = vmul.f32 1.442695, %v2798_v15  ;;  %v2807_v59 = vmul.f32 1.442695, %v2796_v21  ;;  %v2963_v2 = vpop.permute.xlu0 %2962  ;;  %v9449_v21 = vld [vmem:[#allocation8 + $0x30] sm:$0xff] }
 0x683   : > { %v2851_v42 = vpack.c.bf16 %v9929_v54, %v9929_v54  ;;  %v2968_v44 = vsel %vm1280_vm2, %v2963_v2, 0  ;;  %v2557_v4 = vpop.f32.mrf.mxu2  ;;  %v2823_v13 = vsel %vm1188_vm1, %v9929_v54, 0.0  ;;  %v9931_v25 = vpop.eup %9930 }
 0x684   : > { %9932 = vpow2.f32 %v2811_v26  ;;  %v11695_v14 = vadd.f32 %v2557_v4, %v2053_v16  ;;  %2977 = vmatpush.bf16.msra.mxu3 %v2968_v44  ;;  %2824 = vadd.xlane.f32.xlu1 %v2823_v13  ;;  %v2853_v52 = vpack.c.bf16 %v9931_v25, %v9931_v25  ;;  %v2829_v32 = vsel %vm1188_vm1, %v9931_v25, 0.0 }
 0x685   : > { %9934 = vpow2.f32 %v2807_v59  ;;  %8543 = vmatmul.msk.bf16.vlgmr.msrb.gmra.mxu0 %vm1188_vm1, %v2851_v42 }
 0x687   : > { %v2942_v55 = vpop.permute.xlu2 %2941 }
 0x688   : > { %v2947_v5 = vsel %vm1280_vm2, %v2942_v55, 0 }
 0x689   : > { %2956 = vmatpush.bf16.msrb.mxu2 %v2947_v5 }
 0x68a   : > { %v9933_v41 = vpop.eup %9932 }
 0x68b   : > { %v9935_v60 = vpop.eup %9934  ;;  %v2854_v27 = vpack.c.bf16 %v9933_v41, %v9933_v41  ;;  %v11699_v6 = vpop.f32.mrf.mxu2  ;;  %v2832_v50 = vsel %vm1188_vm1, %v9933_v41, 0.0 }
 0x68c   : > { %v2826_v43 = vsel %vm1188_vm1, %v9935_v60, 0.0  ;;  %8545 = vmatmul.msk.bf16.vlgmr.msrb.gmra.mxu2 %vm1188_vm1, %v2853_v52  ;;  %2830 = vadd.xlane.f32.xlu1 %v2829_v32  ;;  %v2852_v61 = vpack.c.bf16 %v9935_v60, %v9935_v60 }
 0x68d   : > { %2827 = vadd.xlane.f32.xlu0 %v2826_v43  ;;  %8546 = vmatmul.msk.bf16.vlgmr.msra.gmra.mxu3 %vm1188_vm1, %v2854_v27 }
 0x68e   : > { %3067 = vmatpush.bf16.msra.mxu2 %v9450_v17  ;;  %v11743_v17 = vld [vmem:[%s13352_s4] ss:$0 sm:$0xff] }
 0x68f   : > { %v2984_v37 = vpop.permute.xlu2 %2983 }
 0x690   : > { %v2989_v36 = vsel %vm1280_vm2, %v2984_v37, 0 }
 0x691   : > { %2998 = vmatpush.bf16.msra.mxu0 %v2989_v36 }
 0x692   : > { %3068 = vmatpush.bf16.msra.mxu2 %v9449_v21 }
 0x693   : > { %v2562_v38 = vpop.f32.mrf.mxu2 }
 0x694   : > { %v11708_v35 = vadd.f32 %v2562_v38, %v2058_v58 }
 0x695   : > { %2833 = vadd.xlane.f32.xlu0 %v2832_v50 }
 0x697   : > { %v2921_v19 = vpop.permute.xlu1 %2920  ;;  %v3005_v51 = vpop.permute.xlu2 %3004 }
 0x698   : > { %v2926_v24 = vsel %vm1280_vm2, %v2921_v19, 0  ;;  %v3010_v30 = vsel %vm1280_vm2, %v3005_v51, 0 }
 0x699   : > { %2935 = vmatpush.bf16.msra.mxu1 %v2926_v24 }
 0x69b   : > { %v11713_v47 = vpop.f32.mrf.mxu2 }
 0x69c   : > { %8544 = vmatmul.msk.bf16.vlgmr.msra.gmra.mxu1 %vm1188_vm1, %v2852_v61 }
 0x69d   : > { %3019 = vmatpush.bf16.msrb.mxu1 %v3010_v30 }
 0x6a2   : > { %v2895_v40 = vpop.f32.mrf.mxu3 }
 0x6a3   : > { %v2567_v9 = vpop.f32.mrf.mxu2 }
 0x6a4   : > { %v11718_v0 = vadd.f32 %v2567_v9, %v2063_v57 }
 0x6aa   : > { %v2897_v39 = vpop.f32.mrf.mxu3 }
 0x6ab   : > { %v11720_v56 = vpop.f32.mrf.mxu2 }
 0x6ad   : > { %v2792_v46 = vpop.xlane.xlu0 %2791 }
 0x6ae   : > { %v2800_v10 = vsub.f32 %v11663_v8, %v2792_v46 }
 0x6b0   : > { %v2815_v20 = vmul.f32 1.442695, %v2800_v10 }
 0x6b2   : > { %9936 = vpow2.f32 %v2815_v20 }
 0x6b3   : > { %v2572_v62 = vpop.f32.mrf.mxu2 }
 0x6b4   : > { %v11725_v7 = vadd.f32 %v2572_v62, %v2068_v63 }
 0x6b8   : > { %v9937_v28 = vpop.eup %9936 }
 0x6b9   : > { %v2856_v53 = vpack.c.bf16 %v9937_v28, %v9937_v28  ;;  %v2838_v12 = vsel %vm1188_vm1, %v9937_v28, 0.0 }
 0x6ba   : > { %2839 = vadd.xlane.f32.xlu2 %v2838_v12 }
 0x6bb   : > { %8548 = vmatmul.msk.bf16.vlgmr.msrb.gmra.mxu1 %vm1188_vm1, %v2856_v53  ;;  %v11733_v25 = vpop.f32.mrf.mxu2 }
 0x6c2   : > { %v2789_v18 = vpop.xlane.xlu1 %2788 }
 0x6c3   : > { %v2799_v3 = vsub.f32 %v11661_v11, %v2789_v18 }
 0x6c5   : > { %v2813_v22 = vmul.f32 1.442695, %v2799_v3 }
 0x6c7   : > { %9938 = vpow2.f32 %v2813_v22  ;;  %v10152_v22 = vld [vmem:[%s10821_s10] sm:$0xff]  }
 0x6ca   : > { %v2822_v54 = vpop.xlane.xlu1 %2821 }
 0x6cb   : > { %9940 = vrcp.f32 %v2822_v54  ;;  %v2055_v54 = vadd.f32 %v11561_v1, %v11569_v48  ;;  %v2060_v1 = vadd.f32 %v11572_v49, %v11582_v45  ;;  %v2065_v49 = vadd.f32 %v11586_v34, %v11597_v33 }
 0x6cc   : > { %v10567_v33 = vmov 128.0  }
 0x6cd   : > { %v9939_v8 = vpop.eup %9938 }
 0x6ce   : > { %v2855_v15 = vpack.c.bf16 %v9939_v8, %v9939_v8  ;;  %v2835_v29 = vsel %vm1188_vm1, %v9939_v8, 0.0  ;;  %v9645_v8 = vunpack.c.l.bf16 %v10152_v22 }
 0x6cf   : > { %2836 = vadd.xlane.f32.xlu1 %v2835_v29 }
 0x6d0   : > { %8547 = vmatmul.msk.bf16.vlgmr.msra.gmra.mxu0 %vm1188_vm1, %v2855_v15 }
 0x6d1   : > { %v9941_v26 = vpop.eup %9940 }
 0x6d2   : > { %v3026_v42 = vmul.f32 %v9941_v26, %v2895_v40  ;;  %v2578_v26 = vadd.f32 %v11699_v6, %v2055_v54  ;;  %v2580_v6 = vadd.f32 %v11713_v47, %v2060_v1  ;;  %v2582_v47 = vadd.f32 %v11720_v56, %v2065_v49  ;;  %v9480_v1 = vld [vmem:[#allocation11 + $0xec] sm:$0xf]  ;;  %v9479_v49 = vld [vmem:[#allocation11 + $0xe4] sm:$0xf] }
 0x6ef   : > { %v2819_v16 = vpop.xlane.xlu2 %2818 }
 0x6f0   : > { %9942 = vrcp.f32 %v2819_v16 }
 0x6f6   : > { %v9943_v59 = vpop.eup %9942 }
 0x6f7   : > { %v2825_v5 = vpop.xlane.xlu1 %2824 }
 0x6f8   : > { %9944 = vrcp.f32 %v2825_v5 }
 0x6fa   : > { %v2874_v11 = vpop.f32.mrf.mxu1 }
 0x6fb   : > { %v3025_v2 = vmul.f32 %v9943_v59, %v2874_v11  ;;  %v9646_v59 = vunpack.c.h.bf16 %v10152_v22 }
 0x6fd   : > { %v3033_v44 = vpack.c.bf16 %v3026_v42, %v3025_v2 }
 0x6fe   : > { %v9945_v32 = vpop.eup %9944 }
 0x6ff   : > { %8557 = vmatmul.msk.bf16.vlgmr.msra.gmra.mxu2 %vm1035_vm0, %v3033_v44  ;;  %v2831_v19 = vpop.xlane.xlu1 %2830  ;;  %v10153_v44 = vld [vmem:[%s10821_s10 + $0x8] sm:$0xff]  }
 0x700   : > { %v2828_v52 = vpop.xlane.xlu0 %2827 }
 0x701   : > { %9946 = vrcp.f32 %v2828_v52 }
 0x702   : > { %v2916_v4 = vpop.f32.mrf.mxu0  ;;  %v2876_v13 = vpop.f32.mrf.mxu1  ;;  %9948 = vrcp.f32 %v2831_v19 }
 0x703   : > { %v3027_v58 = vmul.f32 %v9945_v32, %v2916_v4  ;;  %v9649_v4 = vunpack.c.l.bf16 %v10153_v44 }
 0x707   : > { %v9947_v37 = vpop.eup %9946 }
 0x708   : > { %v2834_v51 = vpop.xlane.xlu0 %2833  ;;  %v9949_v30 = vpop.eup %9948 }
 0x709   : > { %9950 = vrcp.f32 %v2834_v51 }
 0x70a   : > { %v2918_v55 = vpop.f32.mrf.mxu0 }
 0x70f   : > { %v2958_v41 = vpop.f32.mrf.mxu2  ;;  %v9951_v61 = vpop.eup %9950 }
 0x710   : > { %v2979_v60 = vpop.f32.mrf.mxu3  ;;  %v3029_v57 = vmul.f32 %v9949_v30, %v2958_v41  ;;  %v9650_v41 = vunpack.c.h.bf16 %v10153_v44  ;;  %v10155_v30 = vld [vmem:[%s10821_s10 + $0x18] sm:$0xff]  }
 0x711   : > { %v3030_v40 = vmul.f32 %v9951_v61, %v2979_v60  ;;  %v9657_v61 = vunpack.c.l.bf16 %v10155_v30  ;;  %v9658_v22 = vunpack.c.h.bf16 %v10155_v30  ;;  %v9477_v30 = vld [vmem:[#allocation11 + $0xcc] sm:$0xf0] }
 0x713   : > { %v3035_v9 = vpack.c.bf16 %v3030_v40, %v3029_v57 }
 0x717   : > { %v2960_v27 = vpop.f32.mrf.mxu2 }
 0x718   : > { %v2981_v43 = vpop.f32.mrf.mxu3 }
 0x719   : > { %v2937_v36 = vpop.f32.mrf.mxu1  ;;  %v10154_v43 = vld [vmem:[%s10821_s10 + $0x10] sm:$0xff]   ;;  %s13437_s10 = sld [smem:[#allocation50_spill]] }
 0x71a   : > { %v3028_v38 = vmul.f32 %v9947_v37, %v2937_v36  ;;  %v9653_v37 = vunpack.c.l.bf16 %v10154_v43 }
 0x71c   : > { %v3034_v50 = vpack.c.bf16 %v3028_v38, %v3027_v58  ;;  %v9654_v38 = vunpack.c.h.bf16 %v10154_v43 }
 0x71e   : > { %8558 = vmatmul.msk.bf16.gmra.mxu2 %vm1035_vm0, %v3034_v50 }
 0x721   : > { %v2939_v24 = vpop.f32.mrf.mxu1 }
 0x72d   : > { %v2840_v10 = vpop.xlane.xlu2 %2839 }
 0x72e   : > { %8559 = vmatmul.msk.bf16.gmra.mxu2 %vm1035_vm0, %v3035_v9  ;;  %9952 = vrcp.f32 %v2840_v10 }
 0x734   : > { %v9953_v63 = vpop.eup %9952 }
 0x738   : > { %v3021_v39 = vpop.f32.mrf.mxu1 }
 0x739   : > { %v3032_v53 = vmul.f32 %v9953_v63, %v3021_v39 }
 0x740   : > { %v3023_v46 = vpop.f32.mrf.mxu1 }
 0x742   : > { %v2837_v20 = vpop.xlane.xlu1 %2836 }
 0x743   : > { %9954 = vrcp.f32 %v2837_v20 }
 0x744   : > { %9956 = vrcp.f32 %v10567_v33 }
 0x749   : > { %v9955_v62 = vpop.eup %9954 }
 0x74a   : > { %v9957_v56 = vpop.eup %9956 }
 0x74b   : > { %v3137_v9 = vmul.f32 128.0, %v9957_v56  ;;  %vm3141_vm3 = vweird.f32 %v9957_v56 }
 0x74d   : > { %v3000_v28 = vpop.f32.mrf.mxu0  ;;  %v3138_v39 = vsub.f32 1.0, %v3137_v9  ;;  %v9472_v9 = vld [vmem:[#allocation11 + $0xac] sm:$0xf] }
 0x74e   : > { %v3031_v12 = vmul.f32 %v9955_v62, %v3000_v28  ;;  %v2070_v62 = vadd.f32 %v11602_v23, %v11612_v31 }
 0x74f   : > { %v3139_v46 = vmul.f32 %v9957_v56, %v3138_v39  ;;  %v8653_v39 = vld [vmem:[#allocation11 + $0xb8] sm:$0xf0] }
 0x750   : > { %v3036_v18 = vpack.c.bf16 %v3032_v53, %v3031_v12  ;;  %v2584_v53 = vadd.f32 %v11733_v25, %v2070_v62  ;;  %v9471_v62 = vld [vmem:[#allocation11 + $0xa4] sm:$0xf] }
 0x751   : > { %v3140_v10 = vadd.f32 %v9957_v56, %v3139_v46  ;;  %v8643_v46 = vld [vmem:[#allocation11 + $0xa0] sm:$0xf] }
 0x752   : > { %8560 = vmatmul.msk.bf16.gmra.mxu2 %vm1035_vm0, %v3036_v18 }
 0x753   : > { %v11767_v20 = vsel %vm3141_vm3, %v9957_v56, %v3140_v10  ;;  %v8656_v10 = vor.u32 %v9472_v9, %v8653_v39 }
 0x754   : > { %13434 = vst [vmem:[#allocation30_spill] sm:$0xff] %v11767_v20 }
 0x755   : > { %v3002_v3 = vpop.f32.mrf.mxu0 }
 0x782   : > { %v3070_v15 = vpop.f32.mrf.mxu2 }
 0x783   : > { %v3090_v29 = vadd.f32 %v3070_v15, %v11695_v14 }
 0x785   : > { %v3098_v21 = vadd.f32 %v9645_v8, %v3090_v29 }
 0x787   : > { %v3110_v16 = vadd.f32 %v11743_v17, %v3098_v21 }
 0x789   : > { %3120 = vadd.xlane.f32.xlu0 %v3110_v16 }
 0x78a   : > { %v3072_v11 = vpop.f32.mrf.mxu2 }
 0x78b   : > { %v3091_v2 = vadd.f32 %v3072_v11, %v2578_v26 }
 0x78d   : > { %v3099_v42 = vadd.f32 %v9646_v59, %v3091_v2 }
 0x78f   : > { %v3111_v14 = vadd.f32 %v11743_v17, %v3099_v42 }
 0x791   : > { %3122 = vadd.xlane.f32.xlu1 %v3111_v14 }
 0x7a1   : > { %v3075_v13 = vpop.f32.mrf.mxu2 }
 0x7a2   : > { %v3092_v55 = vadd.f32 %v3075_v13, %v11708_v35 }
 0x7a4   : > { %v3100_v5 = vadd.f32 %v9649_v4, %v3092_v55 }
 0x7a6   : > { %v3112_v48 = vadd.f32 %v11743_v17, %v3100_v5 }
 0x7a8   : > { %3124 = vadd.xlane.f32.xlu2 %v3112_v48 }
 0x7a9   : > { %v3077_v52 = vpop.f32.mrf.mxu2 }
 0x7aa   : > { %v3093_v60 = vadd.f32 %v3077_v52, %v2580_v6  ;;  %v9476_v6 = vld [vmem:[#allocation11 + $0xcc] sm:$0xf]  ;;  %v8669_v52 = vld [vmem:[#allocation11 + $0xd8] sm:$0xf0] }
 0x7ac   : > { %v3101_v27 = vadd.f32 %v9650_v41, %v3093_v60 }
 0x7ae   : > { %v3113_v32 = vadd.f32 %v11743_v17, %v3101_v27  ;;  %v8672_v27 = vor.u32 %v9476_v6, %v8669_v52  ;;  %v8619_v6 = vld [vmem:[#allocation11 + $0x68] sm:$0xf] }
 0x7b0   : > { %3126 = vadd.xlane.f32.xlu0 %v3113_v32 }
 0x7b1   : > { %v3080_v35 = vpop.f32.mrf.mxu2 }
 0x7b2   : > { %v3094_v36 = vadd.f32 %v3080_v35, %v11718_v0 }
 0x7b4   : > { %v3102_v58 = vadd.f32 %v9653_v37, %v3094_v36  ;;  %v8675_v36 = vld [vmem:[#allocation11 + $0xe0] sm:$0xf] }
 0x7b6   : > { %v3114_v45 = vadd.f32 %v11743_v17, %v3102_v58  ;;  %v9481_v58 = vld [vmem:[#allocation11 + $0xec] sm:$0xf0] }
 0x7b8   : > { %3128 = vadd.xlane.f32.xlu1 %v3114_v45 }
 0x7b9   : > { %v3082_v50 = vpop.f32.mrf.mxu2 }
 0x7ba   : > { %v3095_v19 = vadd.f32 %v3082_v50, %v2582_v47  ;;  %v8677_v47 = vld [vmem:[#allocation11 + $0xf0] sm:$0xf0]  ;;  %v9482_v50 = vld [vmem:[#allocation11 + $0xf4] sm:$0xf0] }
 0x7bc   : > { %v3103_v51 = vadd.f32 %v9654_v38, %v3095_v19  ;;  %v8683_v38 = vld [vmem:[#allocation11 + $0xe8] sm:$0xf]  ;;  %v8680_v19 = vor.u32 %v9479_v49, %v8677_v47 }
 0x7bd   : > { %v8603_v47 = vld [vmem:[#allocation11 + $0x48] sm:$0xf] }
 0x7be   : > { %v3115_v24 = vadd.f32 %v11743_v17, %v3103_v51  ;;  %v8684_v51 = vor.u32 %v9482_v50, %v8683_v38  ;;  %3544 = vmatpush.bf16.msrb.mxu0 %v8680_v19  ;;  %v9462_v38 = vld [vmem:[#allocation11 + $0x54] sm:$0xf0] }
 0x7bf   : > { %v8604_v19 = vor.u32 %v9462_v38, %v8603_v47 }
 0x7c0   : > { %3130 = vadd.xlane.f32.xlu2 %v3115_v24  ;;  %3573 = vmatpush.bf16.msra.mxu1 %v8684_v51  ;;  %v9460_v51 = vld [vmem:[#allocation11 + $0x4c] sm:$0xf] }
 0x7d5   : > { %v3085_v57 = vpop.f32.mrf.mxu2 }
 0x7d6   : > { %v3096_v0 = vadd.f32 %v3085_v57, %v11725_v7 }
 0x7d8   : > { %v3104_v40 = vadd.f32 %v9657_v61, %v3096_v0  ;;  %v9475_v61 = vld [vmem:[#allocation11 + $0xc4] sm:$0xf]  ;;  %v8661_v0 = vld [vmem:[#allocation11 + $0xd0] sm:$0xf0] }
 0x7d9   : > { %v8664_v33 = vor.u32 %v9475_v61, %v8661_v0  ;;  %v8579_v61 = vld [vmem:[#allocation11 + $0x20] sm:$0xf]  ;;  %v9455_v0 = vld [vmem:[#allocation11 + $0x24] sm:$0xf] }
 0x7da   : > { %v3116_v34 = vadd.f32 %v11743_v17, %v3104_v40  ;;  %v8667_v40 = vld [vmem:[#allocation11 + $0xc8] sm:$0xf] }
 0x7db   : > { %3545 = vmatpush.bf16.msrb.mxu0 %v8664_v33  ;;  %v8587_v33 = vld [vmem:[#allocation11 + $0x28] sm:$0xf] }
 0x7dc   : > { %3132 = vadd.xlane.f32.xlu2 %v3116_v34 }
 0x7dd   : > { %v3087_v28 = vpop.f32.mrf.mxu2 }
 0x7de   : > { %v3097_v18 = vadd.f32 %v3087_v28, %v2584_v53 }
 0x7e0   : > { %v3105_v29 = vadd.f32 %v9658_v22, %v3097_v18  ;;  %v8651_v18 = vld [vmem:[#allocation11 + $0xa8] sm:$0xf] }
 0x7e2   : > { %v11783_v31 = vadd.f32 %v11743_v17, %v3105_v29  ;;  %v8627_v29 = vld [vmem:[#allocation11 + $0x80] sm:$0xf] }
 0x7fc   : > { %v3121_v63 = vpop.xlane.xlu0 %3120 }
 0x7fd   : > { %v3143_v7 = vmul.f32 %v11767_v20, %v3121_v63  ;;  %v9473_v63 = vld [vmem:[#allocation11 + $0xac] sm:$0xf0] }
 0x7fe   : > { %v8644_v28 = vor.u32 %v9473_v63, %v8643_v46  ;;  %v9456_v46 = vld [vmem:[#allocation11 + $0x2c] sm:$0xf] }
 0x7ff   : > { %v11773_v12 = vsub.f32 %v3110_v16, %v3143_v7  ;;  %v8645_v7 = vld [vmem:[#allocation11 + $0xb0] sm:$0xf0] }
 0x800   : > { %v8648_v53 = vor.u32 %v9471_v62, %v8645_v7 }
 0x801   : > { %v3159_v3 = vmul.f32 %v11773_v12, %v11773_v12 }
 0x802   : > { %3546 = vmatpush.bf16.msrb.mxu0 %v8648_v53  ;;  %v9453_v53 = vld [vmem:[#allocation11 + $0xc] sm:$0xf0] }
 0x803   : > { %3167 = vadd.xlane.f32.xlu0 %v3159_v3  ;;  %v9474_v3 = vld [vmem:[#allocation11 + $0xb4] sm:$0xf0] }
 0x804   : > { %v3123_v8 = vpop.xlane.xlu1 %3122  ;;  %v8652_v22 = vor.u32 %v9474_v3, %v8651_v18  ;;  %v9451_v18 = vld [vmem:[#allocation11 + $0x4] sm:$0xf] }
 0x805   : > { %v3144_v15 = vmul.f32 %v11767_v20, %v3123_v8  ;;  %v9468_v8 = vld [vmem:[#allocation11 + $0x8c] sm:$0xf] }
 0x807   : > { %v11778_v21 = vsub.f32 %v3111_v14, %v3144_v15  ;;  %v8637_v15 = vld [vmem:[#allocation11 + $0x98] sm:$0xf0] }
 0x809   : > { %v3160_v23 = vmul.f32 %v11778_v21, %v11778_v21 }
 0x80b   : > { %3169 = vadd.xlane.f32.xlu1 %v3160_v23  ;;  %3134 = vadd.xlane.f32.xlu0 %v11783_v31  ;;  %v8640_v23 = vor.u32 %v9468_v8, %v8637_v15  ;;  %v8571_v8 = vld [vmem:[#allocation11 + $0x8] sm:$0xf]  ;;  %v9454_v15 = vld [vmem:[#allocation11 + $0x14] sm:$0xf0] }
 0x81b   : > { %v3125_v25 = vpop.xlane.xlu2 %3124 }
 0x81c   : > { %v3145_v54 = vmul.f32 %v11767_v20, %v3125_v25  ;;  %v9469_v25 = vld [vmem:[#allocation11 + $0x8c] sm:$0xf0] }
 0x81e   : > { %v11787_v16 = vsub.f32 %v3112_v48, %v3145_v54  ;;  %v8685_v48 = vld [vmem:[#allocation11 + $0xf8] sm:$0xf0]  ;;  %v9467_v54 = vld [vmem:[#allocation11 + $0x84] sm:$0xf] }
 0x81f   : > { %v8688_v41 = vor.u32 %v9480_v1, %v8685_v48  ;;  %v8613_v48 = vld [vmem:[#allocation11 + $0x70] sm:$0xf0] }
 0x820   : > { %v3161_v26 = vmul.f32 %v11787_v16, %v11787_v16 }
 0x821   : > { %3602 = vmatpush.bf16.msrb.mxu2 %v8688_v41  ;;  %v9466_v41 = vld [vmem:[#allocation11 + $0x74] sm:$0xf0] }
 0x822   : > { %3171 = vadd.xlane.f32.xlu1 %v3161_v26  ;;  %v8629_v26 = vld [vmem:[#allocation11 + $0x90] sm:$0xf0] }
 0x823   : > { %v3127_v59 = vpop.xlane.xlu0 %3126 }
 0x824   : > { %v3146_v11 = vmul.f32 %v11767_v20, %v3127_v59  ;;  %v8628_v59 = vor.u32 %v9469_v25, %v8627_v29  ;;  %v8572_v25 = vor.u32 %v9454_v15, %v8571_v8 }
 0x825   : > { %3603 = vmatpush.bf16.msrb.mxu2 %v8672_v27  ;;  %v9464_v27 = vld [vmem:[#allocation11 + $0x6c] sm:$0xf] }
 0x826   : > { %v11792_v2 = vsub.f32 %v3113_v32, %v3146_v11  ;;  %v8632_v11 = vor.u32 %v9467_v54, %v8629_v26  ;;  %v9452_v54 = vld [vmem:[#allocation11 + $0xc] sm:$0xf]  ;;  %v8573_v26 = vld [vmem:[#allocation11 + $0x18] sm:$0xf0] }
 0x828   : > { %v3162_v17 = vmul.f32 %v11792_v2, %v11792_v2  ;;  %3547 = vmatpush.bf16.msrb.mxu0 %v8632_v11 }
 0x829   : > { %3604 = vmatpush.bf16.msrb.mxu2 %v8656_v10  ;;  %v8589_v10 = vld [vmem:[#allocation11 + $0x38] sm:$0xf0] }
 0x82a   : > { %3173 = vadd.xlane.f32.xlu2 %v3162_v17  ;;  %v8635_v17 = vld [vmem:[#allocation11 + $0x88] sm:$0xf]  ;;  %v8592_v62 = vor.u32 %v9456_v46, %v8589_v10 }
 0x82b   : > { %v3129_v42 = vpop.xlane.xlu1 %3128 }
 0x82c   : > { %v3147_v14 = vmul.f32 %v11767_v20, %v3129_v42  ;;  %v9470_v42 = vld [vmem:[#allocation11 + $0x94] sm:$0xf0] }
 0x82d   : > { %3605 = vmatpush.bf16.msrb.mxu2 %v8640_v23 }
 0x82e   : > { %v11797_v44 = vsub.f32 %v3114_v45, %v3147_v14  ;;  %v8676_v45 = vor.u32 %v9481_v58, %v8675_v36  ;;  %v8636_v14 = vor.u32 %v9470_v42, %v8635_v17  ;;  %v9461_v36 = vld [vmem:[#allocation11 + $0x4c] sm:$0xf0]  ;;  %v9459_v58 = vld [vmem:[#allocation11 + $0x44] sm:$0xf] }
 0x830   : > { %v3163_v4 = vmul.f32 %v11797_v44, %v11797_v44  ;;  %3515 = vmatpush.bf16.msrb.mxu3 %v8676_v45  ;;  %v8597_v45 = vld [vmem:[#allocation11 + $0x50] sm:$0xf0] }
 0x831   : > { %v8600_v50 = vor.u32 %v9459_v58, %v8597_v45  ;;  %v11822_v58 = vld [vmem:[%s13353_s5] ss:$0 sm:$0xff] }
 0x832   : > { %3175 = vadd.xlane.f32.xlu0 %v3163_v4  ;;  %v8611_v4 = vld [vmem:[#allocation11 + $0x60] sm:$0xf] }
 0x833   : > { %v3131_v13 = vpop.xlane.xlu2 %3130 }
 0x834   : > { %v3148_v55 = vmul.f32 %v11767_v20, %v3131_v13  ;;  %v9465_v13 = vld [vmem:[#allocation11 + $0x6c] sm:$0xf0] }
 0x835   : > { %v8612_v1 = vor.u32 %v9465_v13, %v8611_v4 }
 0x836   : > { %v11802_v5 = vsub.f32 %v3115_v24, %v3148_v55  ;;  %v8659_v24 = vld [vmem:[#allocation11 + $0xc0] sm:$0xf]  ;;  %v9463_v55 = vld [vmem:[#allocation11 + $0x64] sm:$0xf] }
 0x837   : > { %v8660_v57 = vor.u32 %v9477_v30, %v8659_v24  ;;  %v8616_v52 = vor.u32 %v9463_v55, %v8613_v48  ;;  %v8605_v24 = vld [vmem:[#allocation11 + $0x58] sm:$0xf0] }
 0x838   : > { %v3164_v60 = vmul.f32 %v11802_v5, %v11802_v5  ;;  %v8608_v30 = vor.u32 %v9460_v51, %v8605_v24  ;;  %v11828_v24 = vld [vmem:[#allocation10] ss:$0 sm:$0xff] }
 0x839   : > { %3516 = vmatpush.bf16.msrb.mxu3 %v8660_v57  ;;  %3548 = vmatpush.bf16.msrb.mxu0 %v8616_v52  ;;  %v9457_v57 = vld [vmem:[#allocation11 + $0x2c] sm:$0xf0] }
 0x83a   : > { %3177 = vadd.xlane.f32.xlu1 %v3164_v60  ;;  %v8620_v60 = vor.u32 %v9466_v41, %v8619_v6 }
 0x83d   : > { %3517 = vmatpush.bf16.msrb.mxu3 %v8644_v28  ;;  %3549 = vmatpush.bf16.msrb.mxu0 %v8600_v50  ;;  %v8563_v28 = vld [vmem:[#allocation11] sm:$0xf] }
 0x83e   : > { %v8564_v3 = vor.u32 %v9453_v53, %v8563_v28 }
 0x841   : > { %3518 = vmatpush.bf16.msrb.mxu3 %v8628_v59  ;;  %v8576_v59 = vor.u32 %v9452_v54, %v8573_v26 }
 0x845   : > { %3519 = vmatpush.bf16.msrb.mxu3 %v8612_v1 }
 0x84f   : > { %v3133_v32 = vpop.xlane.xlu2 %3132 }
 0x850   : > { %v3149_v43 = vmul.f32 %v11767_v20, %v3133_v32  ;;  %v8621_v32 = vld [vmem:[#allocation11 + $0x78] sm:$0xf0] }
 0x852   : > { %v11807_v37 = vsub.f32 %v3116_v34, %v3149_v43  ;;  %v9478_v34 = vld [vmem:[#allocation11 + $0xd4] sm:$0xf0]  ;;  %v8624_v43 = vor.u32 %v9464_v27, %v8621_v32 }
 0x853   : > { %v8668_v56 = vor.u32 %v9478_v34, %v8667_v40  ;;  %v8580_v40 = vor.u32 %v9457_v57, %v8579_v61  ;;  %v8581_v34 = vld [vmem:[#allocation11 + $0x30] sm:$0xf0] }
 0x854   : > { %v3165_v35 = vmul.f32 %v11807_v37, %v11807_v37  ;;  %3606 = vmatpush.bf16.msrb.mxu2 %v8624_v43  ;;  %v8584_v9 = vor.u32 %v9455_v0, %v8581_v34 }
 0x855   : > { %3574 = vmatpush.bf16.msra.mxu1 %v8668_v56  ;;  %v9458_v56 = vld [vmem:[#allocation11 + $0x34] sm:$0xf0] }
 0x856   : > { %3179 = vadd.xlane.f32.xlu2 %v3165_v35  ;;  %v8595_v35 = vld [vmem:[#allocation11 + $0x40] sm:$0xf]  ;;  %v8588_v39 = vor.u32 %v9458_v56, %v8587_v33  ;;  %3550 = vmatpush.bf16.msrb.mxu0 %v8584_v9 }
 0x857   : > { %v8596_v49 = vor.u32 %v9461_v36, %v8595_v35 }
 0x858   : > { %3607 = vmatpush.bf16.msrb.mxu2 %v8608_v30 }
 0x859   : > { %3575 = vmatpush.bf16.msra.mxu1 %v8652_v22  ;;  %3520 = vmatpush.bf16.msrb.mxu3 %v8596_v49  ;;  %v8565_v22 = vld [vmem:[#allocation11 + $0x10] sm:$0xf0] }
 0x85a   : > { %v8568_v23 = vor.u32 %v9451_v18, %v8565_v22 }
 0x85c   : > { %3608 = vmatpush.bf16.msrb.mxu2 %v8592_v62  ;;  %3551 = vmatpush.bf16.msrb.mxu0 %v8568_v23 }
 0x85d   : > { %3576 = vmatpush.bf16.msra.mxu1 %v8636_v14  ;;  %3521 = vmatpush.bf16.msrb.mxu3 %v8580_v40 }
 0x860   : > { %3609 = vmatpush.bf16.msrb.mxu2 %v8576_v59 }
 0x861   : > { %3577 = vmatpush.bf16.msra.mxu1 %v8620_v60  ;;  %3522 = vmatpush.bf16.msrb.mxu3 %v8564_v3 }
 0x865   : > { %3578 = vmatpush.bf16.msra.mxu1 %v8604_v19 }
 0x869   : > { %3579 = vmatpush.bf16.msra.mxu1 %v8588_v39 }
 0x86d   : > { %3580 = vmatpush.bf16.msra.mxu1 %v8572_v25 }
 0x876   : > { %v3168_v63 = vpop.xlane.xlu0 %3167 }
 0x877   : > { %v3183_v7 = vmul.f32 %v3168_v63, %v11767_v20 }
 0x879   : > { %v3191_v29 = vadd.f32 1e-05, %v3183_v7 }
 0x87b   : > { %9958 = vrsqrt.f32 %v3191_v29  ;;  %vm3205_vm5 = vweird.f32 %v3191_v29 }
 0x87e   : > { %v3170_v11 = vpop.xlane.xlu1 %3169  ;;  %v3135_v17 = vpop.xlane.xlu0 %3134 }
 0x87f   : > { %v3184_v42 = vmul.f32 %v3170_v11, %v11767_v20  ;;  %v3150_v14 = vmul.f32 %v11767_v20, %v3135_v17 }
 0x881   : > { %v9959_v4 = vpop.eup %9958  ;;  %v3192_v13 = vadd.f32 1e-05, %v3184_v42  ;;  %v11815_v55 = vsub.f32 %v11783_v31, %v3150_v14 }
 0x882   : > { %v3200_v1 = vmul.f32 %v9959_v4, %v3191_v29  ;;  %vm3206_vm4 = vweird.f32 %v9959_v4 }
 0x883   : > { %9960 = vrsqrt.f32 %v3192_v13  ;;  %v3166_v48 = vmul.f32 %v11815_v55, %v11815_v55  ;;  %vm3207_vm6 = vmor %vm3205_vm5, %vm3206_vm4  ;;  %vm3215_vm8 = vweird.f32 %v3192_v13 }
 0x884   : > { %v3201_v6 = vmul.f32 %v9959_v4, %v3200_v1 }
 0x885   : > { %3181 = vadd.xlane.f32.xlu0 %v3166_v48 }
 0x886   : > { %v3202_v41 = vmul.f32 0.5, %v3201_v6 }
 0x888   : > { %v3203_v52 = vsub.f32 1.5, %v3202_v41 }
 0x889   : > { %v9961_v60 = vpop.eup %9960 }
 0x88a   : > { %v3204_v27 = vmul.f32 %v9959_v4, %v3203_v52  ;;  %v3210_v32 = vmul.f32 %v9961_v60, %v3192_v13  ;;  %vm3216_vm7 = vweird.f32 %v9961_v60 }
 0x88b   : > { %vm3217_vm9 = vmor %vm3215_vm8, %vm3216_vm7 }
 0x88c   : > { %v3211_v43 = vmul.f32 %v9961_v60, %v3210_v32  ;;  %v3208_v35 = vsel %vm3207_vm6, %v9959_v4, %v3204_v27 }
 0x88d   : > { %v3279_v49 = vmul.f32 %v3208_v35, %v11773_v12 }
 0x88e   : > { %v3212_v36 = vmul.f32 0.5, %v3211_v43 }
 0x88f   : > { %v3290_v50 = vmul.f32 %v11822_v58, %v3279_v49 }
 0x890   : > { %v3213_v31 = vsub.f32 1.5, %v3212_v36 }
 0x891   : > { %v11832_v57 = vadd.f32 %v11828_v24, %v3290_v50 }
 0x892   : > { %v3214_v45 = vmul.f32 %v9961_v60, %v3213_v31 }
 0x894   : > { %v3218_v47 = vsel %vm3217_vm9, %v9961_v60, %v3214_v45 }
 0x895   : > { %v3172_v38 = vpop.xlane.xlu1 %3171  ;;  %v3280_v19 = vmul.f32 %v3218_v47, %v11778_v21 }
 0x896   : > { %v3185_v51 = vmul.f32 %v3172_v38, %v11767_v20 }
 0x897   : > { %v3291_v30 = vmul.f32 %v11822_v58, %v3280_v19 }
 0x898   : > { %v3193_v61 = vadd.f32 1e-05, %v3185_v51 }
 0x899   : > { %v11835_v12 = vadd.f32 %v11828_v24, %v3291_v30  ;;  %v9498_v30 = vld [vmem:[#allocation14 + $0x78] sm:$0xff] }
 0x89a   : > { %9962 = vrsqrt.f32 %v3193_v61  ;;  %vm3225_vm11 = vweird.f32 %v3193_v61  ;;  %3968 = vmatpush.bf16.msra.mxu0 %v9498_v30 }
 0x89b   : > { %v3309_v0 = vpack.c.bf16 %v11835_v12, %v11832_v57 }
 0x89d   : > { %v3174_v40 = vpop.xlane.xlu2 %3173  ;;  %3523 = vmatmul.bf16.vlgmr.msrb.gmra.mxu3 %v3309_v0  ;;  %3552 = vmatmul.bf16.vlgmr.msrb.gmra.mxu0 %v3309_v0 }
 0x89e   : > { %v3186_v21 = vmul.f32 %v3174_v40, %v11767_v20  ;;  %3581 = vmatmul.bf16.vlgmr.msra.gmra.mxu1 %v3309_v0  ;;  %3610 = vmatmul.bf16.vlgmr.msrb.gmra.mxu2 %v3309_v0  ;;  %v9497_v0 = vld [vmem:[#allocation14 + $0x70] sm:$0xff] }
 0x89f   : > { %v9505_v40 = vld [vmem:[#allocation14 + $0xb0] sm:$0xff]  ;;  %3969 = vmatpush.bf16.msra.mxu0 %v9497_v0  ;;  %v3345_v0 = vld [vmem:[#allocation13] sm:$0xf] }
 0x8a0   : > { %v9963_v34 = vpop.eup %9962  ;;  %v3194_v33 = vadd.f32 1e-05, %v3186_v21  ;;  %v9490_v21 = vld [vmem:[#allocation14 + $0x38] sm:$0xff] }
 0x8a1   : > { %v3220_v56 = vmul.f32 %v9963_v34, %v3193_v61  ;;  %vm3226_vm10 = vweird.f32 %v9963_v34  ;;  %v9506_v61 = vld [vmem:[#allocation14 + $0xb8] sm:$0xff]  ;;  %3939 = vmatpush.bf16.msra.mxu3 %v9490_v21  ;;  %v11892_v21 = vperm.slane %v3345_v0, 1 }
 0x8a2   : > { %9964 = vrsqrt.f32 %v3194_v33  ;;  %vm3227_vm12 = vmor %vm3225_vm11, %vm3226_vm10  ;;  %vm3235_vm14 = vweird.f32 %v3194_v33  ;;  %3997 = vmatpush.bf16.msrb.mxu1 %v9506_v61 }
 0x8a3   : > { %v3221_v9 = vmul.f32 %v9963_v34, %v3220_v56 }
 0x8a5   : > { %v3222_v39 = vmul.f32 0.5, %v3221_v9  ;;  %v3176_v46 = vpop.xlane.xlu0 %3175  ;;  %v9513_v9 = vld [vmem:[#allocation14 + $0xf0] sm:$0xff] }
 0x8a6   : > { %v3187_v10 = vmul.f32 %v3176_v46, %v11767_v20  ;;  %3998 = vmatpush.bf16.msrb.mxu1 %v9505_v40  ;;  %v9504_v46 = vld [vmem:[#allocation14 + $0xa8] sm:$0xff] }
 0x8a7   : > { %v3223_v63 = vsub.f32 1.5, %v3222_v39  ;;  %v9496_v39 = vld [vmem:[#allocation14 + $0x68] sm:$0xff] }
 0x8a8   : > { %v9965_v62 = vpop.eup %9964  ;;  %v3195_v7 = vadd.f32 1e-05, %v3187_v10  ;;  %3970 = vmatpush.bf16.msra.mxu0 %v9496_v39  ;;  %v9495_v10 = vld [vmem:[#allocation14 + $0x60] sm:$0xff]  ;;  %v11898_v39 = vperm.slane %v3345_v0, 0 }
 0x8a9   : > { %v3224_v28 = vmul.f32 %v9963_v34, %v3223_v63  ;;  %v3230_v53 = vmul.f32 %v9965_v62, %v3194_v33  ;;  %vm3236_vm13 = vweird.f32 %v9965_v62  ;;  %v9489_v33 = vld [vmem:[#allocation14 + $0x30] sm:$0xff]  ;;  %v9503_v63 = vld [vmem:[#allocation14 + $0xa0] sm:$0xff] }
 0x8aa   : > { %9966 = vrsqrt.f32 %v3195_v7  ;;  %vm3237_vm15 = vmor %vm3235_vm14, %vm3236_vm13  ;;  %vm3245_vm4 = vweird.f32 %v3195_v7  ;;  %3999 = vmatpush.bf16.msrb.mxu1 %v9504_v46  ;;  %3940 = vmatpush.bf16.msra.mxu3 %v9489_v33 }
 0x8ab   : > { %v3231_v18 = vmul.f32 %v9965_v62, %v3230_v53  ;;  %v3228_v3 = vsel %vm3227_vm12, %v9963_v34, %v3224_v28  ;;  %v9514_v34 = vld [vmem:[#allocation14 + $0xf8] sm:$0xff]  ;;  %v9512_v28 = vld [vmem:[#allocation14 + $0xe8] sm:$0xff] }
 0x8ac   : > { %v3281_v25 = vmul.f32 %v3228_v3, %v11787_v16  ;;  %4026 = vmatpush.bf16.msra.mxu2 %v9514_v34  ;;  %3971 = vmatpush.bf16.msra.mxu0 %v9495_v10  ;;  %v9487_v3 = vld [vmem:[#allocation14 + $0x20] sm:$0xff]  ;;  %v11894_v34 = vperm.slane %v3345_v0, 2 }
 0x8ad   : > { %v3232_v22 = vmul.f32 0.5, %v3231_v18  ;;  %v3178_v8 = vpop.xlane.xlu1 %3177 }
 0x8ae   : > { %v3188_v15 = vmul.f32 %v3178_v8, %v11767_v20  ;;  %v3292_v14 = vmul.f32 %v11822_v58, %v3281_v25  ;;  %4000 = vmatpush.bf16.msrb.mxu1 %v9503_v63  ;;  %v9511_v8 = vld [vmem:[#allocation14 + $0xe0] sm:$0xff]  ;;  %v11901_v63 = vperm.slane %v3345_v0, 3 }
 0x8af   : > { %v3233_v29 = vsub.f32 1.5, %v3232_v22 }
 0x8b0   : > { %v9967_v23 = vpop.eup %9966  ;;  %v3196_v54 = vadd.f32 1e-05, %v3188_v15  ;;  %v11847_v6 = vadd.f32 %v11828_v24, %v3292_v14  ;;  %4027 = vmatpush.bf16.msra.mxu2 %v9513_v9  ;;  %v9494_v15 = vld [vmem:[#allocation14 + $0x58] sm:$0xff]  ;;  %v9500_v14 = vld [vmem:[#allocation14 + $0x88] sm:$0xff] }
 0x8b1   : > { %v3234_v26 = vmul.f32 %v9965_v62, %v3233_v29  ;;  %v3240_v59 = vmul.f32 %v9967_v23, %v3195_v7  ;;  %vm3246_vm3 = vweird.f32 %v9967_v23  ;;  %v9488_v7 = vld [vmem:[#allocation14 + $0x28] sm:$0xff]  ;;  %v9502_v29 = vld [vmem:[#allocation14 + $0x98] sm:$0xff]  ;;  %3972 = vmatpush.bf16.msra.mxu0 %v9494_v15 }
 0x8b2   : > { %9968 = vrsqrt.f32 %v3196_v54  ;;  %vm3247_vm5 = vmor %vm3245_vm4, %vm3246_vm3  ;;  %vm3255_vm7 = vweird.f32 %v3196_v54  ;;  %3941 = vmatpush.bf16.msra.mxu3 %v9488_v7  ;;  %4001 = vmatpush.bf16.msrb.mxu1 %v9502_v29 }
 0x8b3   : > { %v3238_v11 = vsel %vm3237_vm15, %v9965_v62, %v3234_v26  ;;  %v3241_v17 = vmul.f32 %v9967_v23, %v3240_v59  ;;  %v9501_v26 = vld [vmem:[#allocation14 + $0x90] sm:$0xff]  ;;  %v9486_v59 = vld [vmem:[#allocation14 + $0x18] sm:$0xff] }
 0x8b4   : > { %v3282_v42 = vmul.f32 %v3238_v11, %v11792_v2  ;;  %4028 = vmatpush.bf16.msra.mxu2 %v9512_v28  ;;  %v9510_v11 = vld [vmem:[#allocation14 + $0xd8] sm:$0xff] }
 0x8b5   : > { %v3242_v4 = vmul.f32 0.5, %v3241_v17 }
 0x8b6   : > { %v3293_v13 = vmul.f32 %v11822_v58, %v3282_v42  ;;  %3942 = vmatpush.bf16.msra.mxu3 %v9487_v3  ;;  %4002 = vmatpush.bf16.msrb.mxu1 %v9501_v26  ;;  %v9492_v42 = vld [vmem:[#allocation14 + $0x48] sm:$0xff] }
 0x8b7   : > { %v3243_v1 = vsub.f32 1.5, %v3242_v4 }
 0x8b8   : > { %v9969_v48 = vpop.eup %9968  ;;  %v11850_v16 = vadd.f32 %v11828_v24, %v3293_v13  ;;  %4029 = vmatpush.bf16.msra.mxu2 %v9511_v8  ;;  %v9485_v13 = vld [vmem:[#allocation14 + $0x10] sm:$0xff] }
 0x8b9   : > { %v3244_v41 = vmul.f32 %v9967_v23, %v3243_v1  ;;  %v3250_v52 = vmul.f32 %v9969_v48, %v3196_v54  ;;  %vm3256_vm6 = vweird.f32 %v9969_v48  ;;  %v9493_v54 = vld [vmem:[#allocation14 + $0x50] sm:$0xff] }
 0x8ba   : > { %v3310_v60 = vpack.c.bf16 %v11850_v16, %v11847_v6  ;;  %vm3257_vm8 = vmor %vm3255_vm7, %vm3256_vm6  ;;  %3973 = vmatpush.bf16.msra.mxu0 %v9493_v54  ;;  %3943 = vmatpush.bf16.msra.mxu3 %v9486_v59  ;;  %v9509_v1 = vld [vmem:[#allocation14 + $0xd0] sm:$0xff] }
 0x8bb   : > { %v3251_v2 = vmul.f32 %v9969_v48, %v3250_v52  ;;  %v3248_v27 = vsel %vm3247_vm5, %v9967_v23, %v3244_v41  ;;  %4003 = vmatpush.bf16.msrb.mxu1 %v9500_v14  ;;  %v9491_v52 = vld [vmem:[#allocation14 + $0x40] sm:$0xff] }
 0x8bc   : > { %3528 = vmatmul.bf16.gmra.mxu3 %v3310_v60  ;;  %3557 = vmatmul.bf16.gmra.mxu0 %v3310_v60  ;;  %v3283_v35 = vmul.f32 %v3248_v27, %v11797_v44  ;;  %v9484_v27 = vld [vmem:[#allocation14 + $0x8] sm:$0xff] }
 0x8bd   : > { %v3252_v32 = vmul.f32 0.5, %v3251_v2  ;;  %3586 = vmatmul.bf16.gmra.mxu1 %v3310_v60  ;;  %3615 = vmatmul.bf16.gmra.mxu2 %v3310_v60  ;;  %v9499_v60 = vld [vmem:[#allocation14 + $0x80] sm:$0xff] }
 0x8be   : > { %v3294_v45 = vmul.f32 %v11822_v58, %v3283_v35  ;;  %4030 = vmatpush.bf16.msra.mxu2 %v9510_v11  ;;  %3974 = vmatpush.bf16.msra.mxu0 %v9492_v42 }
 0x8bf   : > { %v3253_v43 = vsub.f32 1.5, %v3252_v32  ;;  %3944 = vmatpush.bf16.msra.mxu3 %v9485_v13  ;;  %4004 = vmatpush.bf16.msrb.mxu1 %v9499_v60  ;;  %v9508_v32 = vld [vmem:[#allocation14 + $0xc8] sm:$0xff] }
 0x8c0   : > { %v11859_v38 = vadd.f32 %v11828_v24, %v3294_v45  ;;  %v9507_v45 = vld [vmem:[#allocation14 + $0xc0] sm:$0xff] }
 0x8c1   : > { %v3254_v36 = vmul.f32 %v9969_v48, %v3253_v43 }
 0x8c2   : > { %4031 = vmatpush.bf16.msra.mxu2 %v9509_v1  ;;  %3975 = vmatpush.bf16.msra.mxu0 %v9491_v52 }
 0x8c3   : > { %v3258_v31 = vsel %vm3257_vm8, %v9969_v48, %v3254_v36  ;;  %3945 = vmatpush.bf16.msra.mxu3 %v9484_v27 }
 0x8c4   : > { %v3284_v49 = vmul.f32 %v3258_v31, %v11802_v5 }
 0x8c6   : > { %v3295_v47 = vmul.f32 %v11822_v58, %v3284_v49  ;;  %4032 = vmatpush.bf16.msra.mxu2 %v9508_v32  ;;  %v9483_v49 = vld [vmem:[#allocation14] sm:$0xff] }
 0x8c7   : > { %3946 = vmatpush.bf16.msra.mxu3 %v9483_v49 }
 0x8c8   : > { %v11862_v50 = vadd.f32 %v11828_v24, %v3295_v47 }
 0x8c9   : > { %v3180_v44 = vpop.xlane.xlu2 %3179 }
 0x8ca   : > { %v3311_v19 = vpack.c.bf16 %v11862_v50, %v11859_v38  ;;  %v3189_v5 = vmul.f32 %v3180_v44, %v11767_v20  ;;  %4033 = vmatpush.bf16.msra.mxu2 %v9507_v45 }
 0x8cc   : > { %3533 = vmatmul.bf16.gmra.mxu3 %v3311_v19  ;;  %3562 = vmatmul.bf16.gmra.mxu0 %v3311_v19  ;;  %v11867_v51 = vadd.f32 1e-05, %v3189_v5 }
 0x8cd   : > { %3591 = vmatmul.bf16.gmra.mxu1 %v3311_v19  ;;  %3620 = vmatmul.bf16.gmra.mxu2 %v3311_v19 }
 0x8ce   : > { %9970 = vrsqrt.f32 %v11867_v51  ;;  %vm3265_vm10 = vweird.f32 %v11867_v51 }
 0x8d4   : > { %v11870_v56 = vpop.eup %9970 }
 0x8d5   : > { %v3260_v62 = vmul.f32 %v11870_v56, %v11867_v51  ;;  %vm3266_vm9 = vweird.f32 %v11870_v56 }
 0x8d6   : > { %vm3267_vm11 = vmor %vm3265_vm10, %vm3266_vm9 }
 0x8d7   : > { %v3261_v53 = vmul.f32 %v11870_v56, %v3260_v62 }
 0x8d9   : > { %v3262_v25 = vmul.f32 0.5, %v3261_v53 }
 0x8db   : > { %v3263_v17 = vsub.f32 1.5, %v3262_v25 }
 0x8dd   : > { %v3264_v48 = vmul.f32 %v11870_v56, %v3263_v17 }
 0x8df   : > { %v3268_v43 = vsel %vm3267_vm11, %v11870_v56, %v3264_v48 }
 0x8e0   : > { %v3285_v31 = vmul.f32 %v3268_v43, %v11807_v37 }
 0x8e2   : > { %v3296_v5 = vmul.f32 %v11822_v58, %v3285_v31 }
 0x8e4   : > { %v11885_v30 = vadd.f32 %v11828_v24, %v3296_v5 }
 0x8f8   : > { %v3182_v18 = vpop.xlane.xlu0 %3181 }
 0x8f9   : > { %v3190_v22 = vmul.f32 %v3182_v18, %v11767_v20 }
 0x8fb   : > { %v3198_v23 = vadd.f32 1e-05, %v3190_v22 }
 0x8fd   : > { %9972 = vrsqrt.f32 %v3198_v23  ;;  %vm3275_vm13 = vweird.f32 %v3198_v23 }
 0x903   : > { %v9973_v4 = vpop.eup %9972 }
 0x904   : > { %v3270_v41 = vmul.f32 %v9973_v4, %v3198_v23  ;;  %vm3276_vm12 = vweird.f32 %v9973_v4 }
 0x905   : > { %vm3277_vm14 = vmor %vm3275_vm13, %vm3276_vm12 }
 0x906   : > { %v3271_v2 = vmul.f32 %v9973_v4, %v3270_v41 }
 0x908   : > { %v3272_v35 = vmul.f32 0.5, %v3271_v2 }
 0x90a   : > { %v3273_v36 = vsub.f32 1.5, %v3272_v35 }
 0x90c   : > { %v3274_v47 = vmul.f32 %v9973_v4, %v3273_v36 }
 0x90e   : > { %v3278_v19 = vsel %vm3277_vm14, %v9973_v4, %v3274_v47 }
 0x90f   : > { %v3286_v44 = vmul.f32 %v3278_v19, %v11815_v55 }
 0x911   : > { %v3297_v51 = vmul.f32 %v11822_v58, %v3286_v44 }
 0x913   : > { %v11888_v61 = vadd.f32 %v11828_v24, %v3297_v51 }
 0x915   : > { %v3312_v37 = vpack.c.bf16 %v11888_v61, %v11885_v30 }
 0x917   : > { %3538 = vmatmul.bf16.gmra.mxu3 %v3312_v37  ;;  %3567 = vmatmul.bf16.gmra.mxu0 %v3312_v37 }
 0x918   : > { %3596 = vmatmul.bf16.gmra.mxu1 %v3312_v37  ;;  %3625 = vmatmul.bf16.gmra.mxu2 %v3312_v37 }
 0x91a   : > { %v3553_v40 = vpop.f32.mrf.mxu0 }
 0x91b   : > { %v3582_v55 = vpop.f32.mrf.mxu1  ;;  %v3554_v33 = vadd.f32 %v3553_v40, %v11892_v21 }
 0x91c   : > { %v3583_v24 = vadd.f32 %v3582_v55, %v11894_v34 }
 0x91d   : > { %v3632_v7 = vmax.f32 %v3554_v33, 0.0 }
 0x91e   : > { %v3633_v53 = vmax.f32 %v3583_v24, 0.0 }
 0x920   : > { %v3524_v58 = vpop.f32.mrf.mxu3 }
 0x921   : > { %v3611_v56 = vpop.f32.mrf.mxu2  ;;  %v3525_v3 = vadd.f32 %v3524_v58, %v11898_v39 }
 0x922   : > { %v3555_v9 = vpop.f32.mrf.mxu0  ;;  %v3612_v8 = vadd.f32 %v3611_v56, %v11901_v63 }
 0x923   : > { %v3556_v46 = vadd.f32 %v3555_v9, %v11892_v21  ;;  %v3584_v10 = vpop.f32.mrf.mxu1  ;;  %v3631_v26 = vmax.f32 %v3525_v3, 0.0 }
 0x924   : > { %v3585_v62 = vadd.f32 %v3584_v10, %v11894_v34  ;;  %v3634_v11 = vmax.f32 %v3612_v8, 0.0 }
 0x925   : > { %v3636_v28 = vmax.f32 %v3556_v46, 0.0 }
 0x926   : > { %v3637_v18 = vmax.f32 %v3585_v62, 0.0 }
 0x927   : > { %v3664_v22 = vpack.c.bf16 %v3636_v28, %v3632_v7 }
 0x928   : > { %v3665_v15 = vpack.c.bf16 %v3637_v18, %v3633_v53  ;;  %v3526_v29 = vpop.f32.mrf.mxu3 }
 0x929   : > { %v3527_v23 = vadd.f32 %v3526_v29, %v11898_v39  ;;  %v3613_v25 = vpop.f32.mrf.mxu2  ;;  %3976 = vmatmul.bf16.vlgmr.msra.gmra.mxu0 %v3664_v22 }
 0x92a   : > { %v3614_v54 = vadd.f32 %v3613_v25, %v11901_v63  ;;  %4005 = vmatmul.bf16.vlgmr.msrb.gmra.mxu1 %v3665_v15 }
 0x92b   : > { %v3635_v59 = vmax.f32 %v3527_v23, 0.0 }
 0x92c   : > { %v3638_v17 = vmax.f32 %v3614_v54, 0.0 }
 0x92d   : > { %v3663_v42 = vpack.c.bf16 %v3635_v59, %v3631_v26 }
 0x92e   : > { %v3666_v14 = vpack.c.bf16 %v3638_v17, %v3634_v11 }
 0x92f   : > { %3947 = vmatmul.bf16.vlgmr.msra.gmra.mxu3 %v3663_v42 }
 0x930   : > { %4034 = vmatmul.bf16.vlgmr.msra.gmra.mxu2 %v3666_v14 }
 0x939   : > { %v3558_v4 = vpop.f32.mrf.mxu0 }
 0x93a   : > { %v3587_v13 = vpop.f32.mrf.mxu1  ;;  %v3559_v48 = vadd.f32 %v3558_v4, %v11892_v21 }
 0x93b   : > { %v3588_v52 = vadd.f32 %v3587_v13, %v11894_v34 }
 0x93c   : > { %v3640_v43 = vmax.f32 %v3559_v48, 0.0 }
 0x93d   : > { %v3641_v36 = vmax.f32 %v3588_v52, 0.0 }
 0x93f   : > { %v3529_v1 = vpop.f32.mrf.mxu3 }
 0x940   : > { %v3616_v41 = vpop.f32.mrf.mxu2  ;;  %v3530_v49 = vadd.f32 %v3529_v1, %v11898_v39 }
 0x941   : > { %v3560_v60 = vpop.f32.mrf.mxu0  ;;  %v3617_v47 = vadd.f32 %v3616_v41, %v11901_v63 }
 0x942   : > { %v3561_v2 = vadd.f32 %v3560_v60, %v11892_v21  ;;  %v3589_v27 = vpop.f32.mrf.mxu1  ;;  %v3639_v40 = vmax.f32 %v3530_v49, 0.0 }
 0x943   : > { %v3590_v32 = vadd.f32 %v3589_v27, %v11894_v34  ;;  %v3642_v33 = vmax.f32 %v3617_v47, 0.0 }
 0x944   : > { %v3644_v35 = vmax.f32 %v3561_v2, 0.0 }
 0x945   : > { %v3645_v31 = vmax.f32 %v3590_v32, 0.0 }
 0x946   : > { %v3668_v45 = vpack.c.bf16 %v3644_v35, %v3640_v43 }
 0x947   : > { %v3531_v19 = vpop.f32.mrf.mxu3  ;;  %v3669_v44 = vpack.c.bf16 %v3645_v31, %v3641_v36 }
 0x948   : > { %v3532_v5 = vadd.f32 %v3531_v19, %v11898_v39  ;;  %v3618_v51 = vpop.f32.mrf.mxu2  ;;  %3981 = vmatmul.bf16.gmra.mxu0 %v3668_v45 }
 0x949   : > { %v3619_v37 = vadd.f32 %v3618_v51, %v11901_v63  ;;  %4010 = vmatmul.bf16.gmra.mxu1 %v3669_v44  ;;  %v3563_v0 = vpop.f32.mrf.mxu0 }
 0x94a   : > { %v3643_v55 = vmax.f32 %v3532_v5, 0.0  ;;  %v3592_v58 = vpop.f32.mrf.mxu1  ;;  %v3564_v10 = vadd.f32 %v3563_v0, %v11892_v21 }
 0x94b   : > { %v3646_v56 = vmax.f32 %v3619_v37, 0.0  ;;  %v3593_v7 = vadd.f32 %v3592_v58, %v11894_v34 }
 0x94c   : > { %v3667_v24 = vpack.c.bf16 %v3643_v55, %v3639_v40  ;;  %v3648_v22 = vmax.f32 %v3564_v10, 0.0  ;;  %v11935_v10 = vld [vmem:[%s13435_s30] ss:$0 sm:$0xff] }
 0x94d   : > { %v3670_v9 = vpack.c.bf16 %v3646_v56, %v3642_v33  ;;  %v3649_v15 = vmax.f32 %v3593_v7, 0.0 }
 0x94e   : > { %3952 = vmatmul.bf16.gmra.mxu3 %v3667_v24 }
 0x94f   : > { %4039 = vmatmul.bf16.gmra.mxu2 %v3670_v9  ;;  %v3534_v46 = vpop.f32.mrf.mxu3 }
 0x950   : > { %v3621_v62 = vpop.f32.mrf.mxu2  ;;  %v3535_v23 = vadd.f32 %v3534_v46, %v11898_v39 }
 0x951   : > { %v3565_v28 = vpop.f32.mrf.mxu0  ;;  %v3622_v54 = vadd.f32 %v3621_v62, %v11901_v63 }
 0x952   : > { %v3566_v53 = vadd.f32 %v3565_v28, %v11892_v21  ;;  %v3594_v18 = vpop.f32.mrf.mxu1  ;;  %v3647_v14 = vmax.f32 %v3535_v23, 0.0 }
 0x953   : > { %v3595_v3 = vadd.f32 %v3594_v18, %v11894_v34  ;;  %v3650_v13 = vmax.f32 %v3622_v54, 0.0 }
 0x954   : > { %v3652_v8 = vmax.f32 %v3566_v53, 0.0 }
 0x955   : > { %v3653_v29 = vmax.f32 %v3595_v3, 0.0 }
 0x956   : > { %v3672_v25 = vpack.c.bf16 %v3652_v8, %v3648_v22 }
 0x957   : > { %v3536_v26 = vpop.f32.mrf.mxu3  ;;  %v3673_v59 = vpack.c.bf16 %v3653_v29, %v3649_v15 }
 0x958   : > { %v3537_v11 = vadd.f32 %v3536_v26, %v11898_v39  ;;  %v3623_v17 = vpop.f32.mrf.mxu2  ;;  %3986 = vmatmul.bf16.gmra.mxu0 %v3672_v25 }
 0x959   : > { %v3624_v42 = vadd.f32 %v3623_v17, %v11901_v63  ;;  %4015 = vmatmul.bf16.gmra.mxu1 %v3673_v59 }
 0x95a   : > { %v3651_v4 = vmax.f32 %v3537_v11, 0.0 }
 0x95b   : > { %v3654_v1 = vmax.f32 %v3624_v42, 0.0 }
 0x95c   : > { %v3671_v48 = vpack.c.bf16 %v3651_v4, %v3647_v14 }
 0x95d   : > { %v3674_v41 = vpack.c.bf16 %v3654_v1, %v3650_v13 }
 0x95e   : > { %3957 = vmatmul.bf16.gmra.mxu3 %v3671_v48 }
 0x95f   : > { %4044 = vmatmul.bf16.gmra.mxu2 %v3674_v41 }
 0x994   : > { %v3568_v52 = vpop.f32.mrf.mxu0 }
 0x995   : > { %v3597_v60 = vpop.f32.mrf.mxu1  ;;  %v3569_v27 = vadd.f32 %v3568_v52, %v11892_v21 }
 0x996   : > { %v3598_v43 = vadd.f32 %v3597_v60, %v11894_v34 }
 0x997   : > { %v3656_v45 = vmax.f32 %v3569_v27, 0.0 }
 0x998   : > { %v3657_v19 = vmax.f32 %v3598_v43, 0.0 }
 0x99a   : > { %v3539_v2 = vpop.f32.mrf.mxu3 }
 0x99b   : > { %v3626_v32 = vpop.f32.mrf.mxu2  ;;  %v3540_v5 = vadd.f32 %v3539_v2, %v11898_v39 }
 0x99c   : > { %v3570_v35 = vpop.f32.mrf.mxu0  ;;  %v3627_v37 = vadd.f32 %v3626_v32, %v11901_v63 }
 0x99d   : > { %v3571_v36 = vadd.f32 %v3570_v35, %v11892_v21  ;;  %v3599_v31 = vpop.f32.mrf.mxu1  ;;  %v3655_v33 = vmax.f32 %v3540_v5, 0.0 }
 0x99e   : > { %v3600_v49 = vadd.f32 %v3599_v31, %v11894_v34  ;;  %v3658_v56 = vmax.f32 %v3627_v37, 0.0 }
 0x99f   : > { %v3660_v47 = vmax.f32 %v3571_v36, 0.0 }
 0x9a0   : > { %v3661_v44 = vmax.f32 %v3600_v49, 0.0 }
 0x9a1   : > { %v3676_v51 = vpack.c.bf16 %v3660_v47, %v3656_v45 }
 0x9a2   : > { %v3541_v0 = vpop.f32.mrf.mxu3  ;;  %v3677_v40 = vpack.c.bf16 %v3661_v44, %v3657_v19 }
 0x9a3   : > { %v3542_v55 = vadd.f32 %v3541_v0, %v11898_v39  ;;  %v3628_v58 = vpop.f32.mrf.mxu2  ;;  %3991 = vmatmul.bf16.gmra.mxu0 %v3676_v51 }
 0x9a4   : > { %v3629_v21 = vadd.f32 %v3628_v58, %v11901_v63  ;;  %4020 = vmatmul.bf16.gmra.mxu1 %v3677_v40 }
 0x9a5   : > { %v3659_v34 = vmax.f32 %v3542_v55, 0.0 }
 0x9a6   : > { %v3662_v24 = vmax.f32 %v3629_v21, 0.0  ;;  %v3977_v62 = vpop.f32.mrf.mxu0 }
 0x9a7   : > { %v3675_v9 = vpack.c.bf16 %v3659_v34, %v3655_v33  ;;  %v4006_v28 = vpop.f32.mrf.mxu1 }
 0x9a8   : > { %v3678_v46 = vpack.c.bf16 %v3662_v24, %v3658_v56 }
 0x9a9   : > { %3962 = vmatmul.bf16.gmra.mxu3 %v3675_v9 }
 0x9aa   : > { %4049 = vmatmul.bf16.gmra.mxu2 %v3678_v46 }
 0x9ae   : > { %v3979_v29 = vpop.f32.mrf.mxu0 }
 0x9af   : > { %v4008_v25 = vpop.f32.mrf.mxu1 }
 0x9b2   : > { %v3948_v39 = vpop.f32.mrf.mxu3 }
 0x9b3   : > { %v3949_v7 = vadd.f32 %v11935_v10, %v3948_v39  ;;  %v4035_v53 = vpop.f32.mrf.mxu2 }
 0x9b5   : > { %v3978_v63 = vadd.f32 %v3977_v62, %v3949_v7 }
 0x9b7   : > { %v4007_v18 = vadd.f32 %v4006_v28, %v3978_v63 }
 0x9b9   : > { %v4036_v3 = vadd.f32 %v4035_v53, %v4007_v18 }
 0x9ba   : > { %v3950_v22 = vpop.f32.mrf.mxu3 }
 0x9bb   : > { %v3951_v8 = vadd.f32 %v11935_v10, %v3950_v22  ;;  %v4055_v15 = vadd.f32 %v4036_v3, %v11832_v57  ;;  %v4037_v26 = vpop.f32.mrf.mxu2 }
 0x9bd   : > { %v3980_v23 = vadd.f32 %v3979_v29, %v3951_v8  ;;  %4065 = vadd.xlane.f32.xlu1 %v4055_v15 }
 0x9bf   : > { %v4009_v54 = vadd.f32 %v4008_v25, %v3980_v23 }
 0x9c1   : > { %v4038_v59 = vadd.f32 %v4037_v26, %v4009_v54 }
 0x9c3   : > { %v11941_v11 = vadd.f32 %v4038_v59, %v11835_v12 }
 0x9c5   : > { %4067 = vadd.xlane.f32.xlu2 %v11941_v11  ;;  %v3982_v17 = vpop.f32.mrf.mxu0 }
 0x9c6   : > { %v4011_v42 = vpop.f32.mrf.mxu1 }
 0x9cd   : > { %v3984_v48 = vpop.f32.mrf.mxu0 }
 0x9ce   : > { %v4013_v52 = vpop.f32.mrf.mxu1 }
 0x9d1   : > { %v3953_v14 = vpop.f32.mrf.mxu3 }
 0x9d2   : > { %v3954_v4 = vadd.f32 %v11935_v10, %v3953_v14  ;;  %v4040_v13 = vpop.f32.mrf.mxu2 }
 0x9d4   : > { %v3983_v1 = vadd.f32 %v3982_v17, %v3954_v4 }
 0x9d5   : > { %v3987_v36 = vpop.f32.mrf.mxu0 }
 0x9d6   : > { %v4012_v57 = vadd.f32 %v4011_v42, %v3983_v1  ;;  %v4016_v47 = vpop.f32.mrf.mxu1 }
 0x9d8   : > { %v4041_v41 = vadd.f32 %v4040_v13, %v4012_v57 }
 0x9d9   : > { %v3955_v60 = vpop.f32.mrf.mxu3 }
 0x9da   : > { %v4057_v2 = vadd.f32 %v4041_v41, %v11847_v6  ;;  %v3956_v27 = vadd.f32 %v11935_v10, %v3955_v60  ;;  %v4042_v12 = vpop.f32.mrf.mxu2 }
 0x9dc   : > { %v3985_v32 = vadd.f32 %v3984_v48, %v3956_v27  ;;  %4069 = vadd.xlane.f32.xlu0 %v4057_v2 }
 0x9dd   : > { %v3989_v40 = vpop.f32.mrf.mxu0 }
 0x9de   : > { %v4014_v43 = vadd.f32 %v4013_v52, %v3985_v32  ;;  %v4018_v58 = vpop.f32.mrf.mxu1 }
 0x9e0   : > { %v4043_v35 = vadd.f32 %v4042_v12, %v4014_v43  ;;  %v8903_v43 = vld [vmem:[#allocation5 + $0x168] sm:$0xf] }
 0x9e1   : > { %v3958_v31 = vpop.f32.mrf.mxu3 }
 0x9e2   : > { %v3959_v49 = vadd.f32 %v11935_v10, %v3958_v31  ;;  %v4058_v45 = vadd.f32 %v4043_v35, %v11850_v16  ;;  %v4045_v44 = vpop.f32.mrf.mxu2  ;;  %v9537_v35 = vld [vmem:[#allocation5 + $0x170] sm:$0xf0] }
 0x9e3   : > { %v8904_v31 = vor.u32 %v9537_v35, %v8903_v43  ;;  %v9519_v43 = vld [vmem:[#allocation5 + $0xe0] sm:$0xf0]  ;;  %v9518_v35 = vld [vmem:[#allocation5 + $0xdc] sm:$0xf] }
 0x9e4   : > { %v3988_v19 = vadd.f32 %v3987_v36, %v3959_v49  ;;  %4071 = vadd.xlane.f32.xlu1 %v4058_v45  ;;  %v9536_v36 = vld [vmem:[#allocation5 + $0x16c] sm:$0xf]  ;;  %v8905_v49 = vld [vmem:[#allocation5 + $0x174] sm:$0xf0] }
 0x9e5   : > { %4421 = vmatpush.bf16.msrb.mxu3 %v8904_v31  ;;  %v8833_v31 = vld [vmem:[#allocation5 + $0xe4] sm:$0xf0] }
 0x9e6   : > { %v4017_v5 = vadd.f32 %v4016_v47, %v3988_v19  ;;  %v9538_v47 = vld [vmem:[#allocation5 + $0x178] sm:$0xf0]  ;;  %v8908_v19 = vor.u32 %v9536_v36, %v8905_v49  ;;  %v8839_v49 = vld [vmem:[#allocation5 + $0xe0] sm:$0xf] }
 0x9e8   : > { %v4046_v51 = vadd.f32 %v4045_v44, %v4017_v5  ;;  %4450 = vmatpush.bf16.msrb.mxu0 %v8908_v19  ;;  %v8891_v5 = vld [vmem:[#allocation5 + $0x150] sm:$0xf] }
 0x9e9   : > { %v3960_v6 = vpop.f32.mrf.mxu3 }
 0x9ea   : > { %v4059_v37 = vadd.f32 %v4046_v51, %v11859_v38  ;;  %v3961_v0 = vadd.f32 %v11935_v10, %v3960_v6  ;;  %v4047_v33 = vpop.f32.mrf.mxu2  ;;  %v9534_v51 = vld [vmem:[#allocation5 + $0x158] sm:$0xf0]  ;;  %v9533_v6 = vld [vmem:[#allocation5 + $0x154] sm:$0xf] }
 0x9ec   : > { %v3990_v55 = vadd.f32 %v3989_v40, %v3961_v0  ;;  %4073 = vadd.xlane.f32.xlu2 %v4059_v37  ;;  %v8893_v0 = vld [vmem:[#allocation5 + $0x15c] sm:$0xf0]  ;;  %v8899_v40 = vld [vmem:[#allocation5 + $0x158] sm:$0xf] }
 0x9ee   : > { %v4019_v21 = vadd.f32 %v4018_v58, %v3990_v55  ;;  %v9535_v55 = vld [vmem:[#allocation5 + $0x160] sm:$0xf0]  ;;  %v8896_v58 = vor.u32 %v9533_v6, %v8893_v0  ;;  %v9516_v0 = vld [vmem:[#allocation5 + $0xc8] sm:$0xf0] }
 0x9f0   : > { %v4048_v34 = vadd.f32 %v4047_v33, %v4019_v21  ;;  %v8900_v21 = vor.u32 %v9535_v55, %v8899_v40  ;;  %4451 = vmatpush.bf16.msrb.mxu0 %v8896_v58  ;;  %v8879_v33 = vld [vmem:[#allocation5 + $0x138] sm:$0xf]  ;;  %v9515_v40 = vld [vmem:[#allocation5 + $0xc4] sm:$0xf] }
 0x9f2   : > { %v4060_v16 = vadd.f32 %v4048_v34, %v11862_v50  ;;  %v9531_v34 = vld [vmem:[#allocation5 + $0x140] sm:$0xf0] }
 0x9f4   : > { %4075 = vadd.xlane.f32.xlu0 %v4060_v16 }
 0xa20   : > { %v3992_v56 = vpop.f32.mrf.mxu0 }
 0xa21   : > { %v4021_v46 = vpop.f32.mrf.mxu1 }
 0xa28   : > { %v3994_v8 = vpop.f32.mrf.mxu0 }
 0xa29   : > { %v4023_v23 = vpop.f32.mrf.mxu1 }
 0xa2c   : > { %v3963_v24 = vpop.f32.mrf.mxu3 }
 0xa2d   : > { %v3964_v9 = vadd.f32 %v11935_v10, %v3963_v24  ;;  %v4050_v39 = vpop.f32.mrf.mxu2  ;;  %v8881_v24 = vld [vmem:[#allocation5 + $0x144] sm:$0xf0] }
 0xa2f   : > { %v3993_v62 = vadd.f32 %v3992_v56, %v3964_v9  ;;  %v8880_v56 = vor.u32 %v9531_v34, %v8879_v33  ;;  %v8887_v9 = vld [vmem:[#allocation5 + $0x140] sm:$0xf]  ;;  %v8821_v33 = vld [vmem:[#allocation5 + $0xcc] sm:$0xf0]  ;;  %v8827_v34 = vld [vmem:[#allocation5 + $0xc8] sm:$0xf] }
 0xa30   : > { %v4066_v38 = vpop.xlane.xlu1 %4065 }
 0xa31   : > { %v4022_v7 = vadd.f32 %v4021_v46, %v3993_v62  ;;  %v4081_v28 = vmul.f32 %v4066_v38, %v11767_v20  ;;  %v9532_v46 = vld [vmem:[#allocation5 + $0x148] sm:$0xf0]  ;;  %v8867_v38 = vld [vmem:[#allocation5 + $0x120] sm:$0xf] }
 0xa33   : > { %v4051_v63 = vadd.f32 %v4050_v39, %v4022_v7  ;;  %v11954_v53 = vsub.f32 %v4055_v15, %v4081_v28  ;;  %v8888_v39 = vor.u32 %v9532_v46, %v8887_v9  ;;  %v9528_v7 = vld [vmem:[#allocation5 + $0x128] sm:$0xf0]  ;;  %v9527_v28 = vld [vmem:[#allocation5 + $0x124] sm:$0xf] }
 0xa34   : > { %v3965_v18 = vpop.f32.mrf.mxu3 }
 0xa35   : > { %v11957_v3 = vadd.f32 %v4051_v63, %v11885_v30  ;;  %v3966_v50 = vadd.f32 %v11935_v10, %v3965_v18  ;;  %v4097_v22 = vmul.f32 %v11954_v53, %v11954_v53  ;;  %v4052_v26 = vpop.f32.mrf.mxu2  ;;  %v8868_v63 = vor.u32 %v9528_v7, %v8867_v38  ;;  %v8869_v18 = vld [vmem:[#allocation5 + $0x12c] sm:$0xf0] }
 0xa37   : > { %v3995_v29 = vadd.f32 %v3994_v8, %v3966_v50  ;;  %4105 = vadd.xlane.f32.xlu1 %v4097_v22  ;;  %4077 = vadd.xlane.f32.xlu0 %v11957_v3  ;;  %v8875_v50 = vld [vmem:[#allocation5 + $0x128] sm:$0xf]  ;;  %v9529_v22 = vld [vmem:[#allocation5 + $0x130] sm:$0xf0]  ;;  %v8872_v8 = vor.u32 %v9527_v28, %v8869_v18 }
 0xa38   : > { %v4068_v25 = vpop.xlane.xlu2 %4067 }
 0xa39   : > { %v4024_v54 = vadd.f32 %v4023_v23, %v3995_v29  ;;  %v4082_v15 = vmul.f32 %v4068_v25, %v11767_v20  ;;  %v8876_v29 = vor.u32 %v9529_v22, %v8875_v50  ;;  %v8855_v23 = vld [vmem:[#allocation5 + $0x108] sm:$0xf]  ;;  %v9525_v25 = vld [vmem:[#allocation5 + $0x110] sm:$0xf0] }
 0xa3b   : > { %v4053_v59 = vadd.f32 %v4052_v26, %v4024_v54  ;;  %v11965_v30 = vsub.f32 %v11941_v11, %v4082_v15  ;;  %v9524_v54 = vld [vmem:[#allocation5 + $0x10c] sm:$0xf]  ;;  %v8856_v15 = vor.u32 %v9525_v25, %v8855_v23  ;;  %v8857_v26 = vld [vmem:[#allocation5 + $0x114] sm:$0xf0] }
 0xa3d   : > { %v4098_v10 = vmul.f32 %v11965_v30, %v11965_v30  ;;  %v11970_v17 = vadd.f32 %v4053_v59, %v11888_v61  ;;  %v8863_v59 = vld [vmem:[#allocation5 + $0x110] sm:$0xf] }
 0xa3f   : > { %4107 = vadd.xlane.f32.xlu2 %v4098_v10  ;;  %4079 = vadd.xlane.f32.xlu1 %v11970_v17  ;;  %v9526_v10 = vld [vmem:[#allocation5 + $0x118] sm:$0xf0] }
 0xa4f   : > { %v4070_v42 = vpop.xlane.xlu0 %4069 }
 0xa50   : > { %v4083_v14 = vmul.f32 %v4070_v42, %v11767_v20  ;;  %v8860_v42 = vor.u32 %v9524_v54, %v8857_v26 }
 0xa52   : > { %v11974_v4 = vsub.f32 %v4057_v2, %v4083_v14  ;;  %v8864_v14 = vor.u32 %v9526_v10, %v8863_v59  ;;  %v12010_v59 = vld [vmem:[%s13436_s7] ss:$0 sm:$0xff] }
 0xa54   : > { %v4099_v13 = vmul.f32 %v11974_v4, %v11974_v4 }
 0xa56   : > { %4109 = vadd.xlane.f32.xlu2 %v4099_v13  ;;  %v8843_v13 = vld [vmem:[#allocation5 + $0xf0] sm:$0xf] }
 0xa57   : > { %v4072_v11 = vpop.xlane.xlu1 %4071 }
 0xa58   : > { %v4084_v1 = vmul.f32 %v4072_v11, %v11767_v20  ;;  %v9522_v11 = vld [vmem:[#allocation5 + $0xf8] sm:$0xf0] }
 0xa5a   : > { %v11979_v57 = vsub.f32 %v4058_v45, %v4084_v1  ;;  %v8911_v45 = vld [vmem:[#allocation5 + $0x170] sm:$0xf]  ;;  %v9521_v1 = vld [vmem:[#allocation5 + $0xf4] sm:$0xf] }
 0xa5b   : > { %v8912_v44 = vor.u32 %v9538_v47, %v8911_v45  ;;  %v9520_v45 = vld [vmem:[#allocation5 + $0xe8] sm:$0xf0] }
 0xa5c   : > { %v4100_v61 = vmul.f32 %v11979_v57, %v11979_v57 }
 0xa5d   : > { %4479 = vmatpush.bf16.msra.mxu1 %v8912_v44  ;;  %v8836_v44 = vor.u32 %v9518_v35, %v8833_v31 }
 0xa5e   : > { %4111 = vadd.xlane.f32.xlu0 %v4100_v61  ;;  %v8844_v61 = vor.u32 %v9522_v11, %v8843_v13 }
 0xa5f   : > { %v4074_v48 = vpop.xlane.xlu2 %4073 }
 0xa60   : > { %v4085_v41 = vmul.f32 %v4074_v48, %v11767_v20  ;;  %v8845_v48 = vld [vmem:[#allocation5 + $0xfc] sm:$0xf0] }
 0xa61   : > { %4480 = vmatpush.bf16.msra.mxu1 %v8900_v21 }
 0xa62   : > { %v11984_v52 = vsub.f32 %v4059_v37, %v4085_v41  ;;  %v8892_v37 = vor.u32 %v9534_v51, %v8891_v5  ;;  %v8851_v41 = vld [vmem:[#allocation5 + $0xf8] sm:$0xf]  ;;  %v8840_v5 = vor.u32 %v9520_v45, %v8839_v49 }
 0xa64   : > { %v4101_v60 = vmul.f32 %v11984_v52, %v11984_v52  ;;  %4422 = vmatpush.bf16.msrb.mxu3 %v8892_v37  ;;  %v8819_v37 = vld [vmem:[#allocation5 + $0xc0] sm:$0xf] }
 0xa65   : > { %4481 = vmatpush.bf16.msra.mxu1 %v8888_v39  ;;  %v8820_v21 = vor.u32 %v9516_v0, %v8819_v37 }
 0xa66   : > { %4113 = vadd.xlane.f32.xlu1 %v4101_v60  ;;  %v9523_v60 = vld [vmem:[#allocation5 + $0x100] sm:$0xf0] }
 0xa67   : > { %v4076_v2 = vpop.xlane.xlu0 %4075 }
 0xa68   : > { %v4086_v27 = vmul.f32 %v4076_v2, %v11767_v20  ;;  %4423 = vmatpush.bf16.msrb.mxu3 %v8880_v56  ;;  %v8848_v2 = vor.u32 %v9521_v1, %v8845_v48  ;;  %v9517_v56 = vld [vmem:[#allocation5 + $0xd0] sm:$0xf0]  ;;  %v12019_v48 = vld [vmem:[%s13437_s10] ss:$0 sm:$0xff] }
 0xa69   : > { %4482 = vmatpush.bf16.msra.mxu1 %v8876_v29  ;;  %v8828_v9 = vor.u32 %v9517_v56, %v8827_v34 }
 0xa6a   : > { %v11989_v12 = vsub.f32 %v4060_v16, %v4086_v27  ;;  %v9530_v16 = vld [vmem:[#allocation5 + $0x13c] sm:$0xf]  ;;  %v8852_v27 = vor.u32 %v9523_v60, %v8851_v41 }
 0xa6b   : > { %v8884_v62 = vor.u32 %v9530_v16, %v8881_v24  ;;  %v8824_v16 = vor.u32 %v9515_v40, %v8821_v33 }
 0xa6c   : > { %v4102_v32 = vmul.f32 %v11989_v12, %v11989_v12  ;;  %4424 = vmatpush.bf16.msrb.mxu3 %v8868_v63 }
 0xa6d   : > { %4452 = vmatpush.bf16.msrb.mxu0 %v8884_v62  ;;  %4483 = vmatpush.bf16.msra.mxu1 %v8864_v14 }
 0xa6e   : > { %4115 = vadd.xlane.f32.xlu2 %v4102_v32  ;;  %v8831_v32 = vld [vmem:[#allocation5 + $0xd8] sm:$0xf] }
 0xa6f   : > { %v8832_v36 = vor.u32 %v9519_v43, %v8831_v32 }
 0xa70   : > { %4425 = vmatpush.bf16.msrb.mxu3 %v8856_v15 }
 0xa71   : > { %4453 = vmatpush.bf16.msrb.mxu0 %v8872_v8  ;;  %4484 = vmatpush.bf16.msra.mxu1 %v8852_v27 }
 0xa74   : > { %4426 = vmatpush.bf16.msrb.mxu3 %v8844_v61 }
 0xa75   : > { %4454 = vmatpush.bf16.msrb.mxu0 %v8860_v42  ;;  %4485 = vmatpush.bf16.msra.mxu1 %v8840_v5 }
 0xa78   : > { %4427 = vmatpush.bf16.msrb.mxu3 %v8832_v36 }
 0xa79   : > { %4455 = vmatpush.bf16.msrb.mxu0 %v8848_v2  ;;  %4486 = vmatpush.bf16.msra.mxu1 %v8828_v9 }
 0xa7c   : > { %4428 = vmatpush.bf16.msrb.mxu3 %v8820_v21 }
 0xa7d   : > { %4456 = vmatpush.bf16.msrb.mxu0 %v8836_v44 }
 0xa81   : > { %4457 = vmatpush.bf16.msrb.mxu0 %v8824_v16 }
 0xaaa   : > { %v4106_v47 = vpop.xlane.xlu1 %4105  ;;  %v4078_v19 = vpop.xlane.xlu0 %4077 }
 0xaab   : > { %v4121_v51 = vmul.f32 %v4106_v47, %v11767_v20  ;;  %v4087_v6 = vmul.f32 %v4078_v19, %v11767_v20 }
 0xaad   : > { %v4129_v55 = vadd.f32 1e-05, %v4121_v51  ;;  %v11996_v58 = vsub.f32 %v11957_v3, %v4087_v6 }
 0xaaf   : > { %9974 = vrsqrt.f32 %v4129_v55  ;;  %v4103_v24 = vmul.f32 %v11996_v58, %v11996_v58  ;;  %vm4143_vm3 = vweird.f32 %v4129_v55 }
 0xab1   : > { %4117 = vadd.xlane.f32.xlu0 %v4103_v24 }
 0xab2   : > { %v4108_v46 = vpop.xlane.xlu2 %4107  ;;  %v4080_v62 = vpop.xlane.xlu1 %4079 }
 0xab3   : > { %v4122_v39 = vmul.f32 %v4108_v46, %v11767_v20  ;;  %v4088_v3 = vmul.f32 %v4080_v62, %v11767_v20 }
 0xab5   : > { %v9975_v38 = vpop.eup %9974  ;;  %v4130_v7 = vadd.f32 1e-05, %v4122_v39  ;;  %v12003_v28 = vsub.f32 %v11970_v17, %v4088_v3 }
 0xab6   : > { %v4138_v63 = vmul.f32 %v9975_v38, %v4129_v55  ;;  %vm4144_vm15 = vweird.f32 %v9975_v38 }
 0xab7   : > { %9976 = vrsqrt.f32 %v4130_v7  ;;  %v4104_v18 = vmul.f32 %v12003_v28, %v12003_v28  ;;  %vm4145_vm4 = vmor %vm4143_vm3, %vm4144_vm15  ;;  %vm4153_vm6 = vweird.f32 %v4130_v7 }
 0xab8   : > { %v4139_v50 = vmul.f32 %v9975_v38, %v4138_v63 }
 0xab9   : > { %4119 = vadd.xlane.f32.xlu1 %v4104_v18 }
 0xaba   : > { %v4140_v22 = vmul.f32 0.5, %v4139_v50 }
 0xabc   : > { %v4141_v8 = vsub.f32 1.5, %v4140_v22 }
 0xabd   : > { %v9977_v29 = vpop.eup %9976 }
 0xabe   : > { %v4142_v23 = vmul.f32 %v9975_v38, %v4141_v8  ;;  %v4148_v25 = vmul.f32 %v9977_v29, %v4130_v7  ;;  %vm4154_vm5 = vweird.f32 %v9977_v29 }
 0xabf   : > { %vm4155_vm7 = vmor %vm4153_vm6, %vm4154_vm5 }
 0xac0   : > { %v4149_v54 = vmul.f32 %v9977_v29, %v4148_v25  ;;  %v4146_v15 = vsel %vm4145_vm4, %v9975_v38, %v4142_v23 }
 0xac1   : > { %v4217_v10 = vmul.f32 %v4146_v15, %v11954_v53 }
 0xac2   : > { %v4150_v26 = vmul.f32 0.5, %v4149_v54 }
 0xac3   : > { %v4228_v11 = vmul.f32 %v12010_v59, %v4217_v10 }
 0xac4   : > { %v4151_v17 = vsub.f32 1.5, %v4150_v26 }
 0xac5   : > { %v12023_v53 = vadd.f32 %v12019_v48, %v4228_v11 }
 0xac6   : > { %v4152_v42 = vmul.f32 %v9977_v29, %v4151_v17 }
 0xac7   : > { %13438 = vst [vmem:[#allocation29_spill] sm:$0xff] %v12023_v53 }
 0xac8   : > { %v4156_v14 = vsel %vm4155_vm7, %v9977_v29, %v4152_v42 }
 0xac9   : > { %v4110_v13 = vpop.xlane.xlu2 %4109  ;;  %v4218_v1 = vmul.f32 %v4156_v14, %v11965_v30 }
 0xaca   : > { %v4123_v61 = vmul.f32 %v4110_v13, %v11767_v20 }
 0xacb   : > { %v4229_v41 = vmul.f32 %v12010_v59, %v4218_v1 }
 0xacc   : > { %v4131_v60 = vadd.f32 1e-05, %v4123_v61 }
 0xacd   : > { %v12026_v2 = vadd.f32 %v12019_v48, %v4229_v41 }
 0xace   : > { %9978 = vrsqrt.f32 %v4131_v60  ;;  %vm4163_vm9 = vweird.f32 %v4131_v60 }
 0xacf   : > { %13439 = vst [vmem:[#allocation31_spill] sm:$0xff] %v12026_v2  ;;  %v4247_v30 = vpack.c.bf16 %v12026_v2, %v12023_v53 }
 0xad1   : > { %v4112_v27 = vpop.xlane.xlu0 %4111  ;;  %4429 = vmatmul.bf16.vlgmr.msrb.gmra.mxu3 %v4247_v30  ;;  %4458 = vmatmul.bf16.vlgmr.msrb.gmra.mxu0 %v4247_v30 }
 0xad2   : > { %v4124_v32 = vmul.f32 %v4112_v27, %v11767_v20  ;;  %4487 = vmatmul.bf16.vlgmr.msra.gmra.mxu1 %v4247_v30 }
 0xad4   : > { %v9979_v43 = vpop.eup %9978  ;;  %v4132_v35 = vadd.f32 1e-05, %v4124_v32 }
 0xad5   : > { %v4158_v36 = vmul.f32 %v9979_v43, %v4131_v60  ;;  %vm4164_vm8 = vweird.f32 %v9979_v43 }
 0xad6   : > { %9980 = vrsqrt.f32 %v4132_v35  ;;  %vm4165_vm10 = vmor %vm4163_vm9, %vm4164_vm8  ;;  %vm4173_vm12 = vweird.f32 %v4132_v35 }
 0xad7   : > { %v4159_v31 = vmul.f32 %v9979_v43, %v4158_v36 }
 0xad9   : > { %v4160_v49 = vmul.f32 0.5, %v4159_v31  ;;  %v4114_v45 = vpop.xlane.xlu1 %4113 }
 0xada   : > { %v4125_v47 = vmul.f32 %v4114_v45, %v11767_v20 }
 0xadb   : > { %v4161_v19 = vsub.f32 1.5, %v4160_v49 }
 0xadc   : > { %v9981_v44 = vpop.eup %9980  ;;  %v4133_v5 = vadd.f32 1e-05, %v4125_v47 }
 0xadd   : > { %v4162_v51 = vmul.f32 %v9979_v43, %v4161_v19  ;;  %v4168_v6 = vmul.f32 %v9981_v44, %v4132_v35  ;;  %vm4174_vm11 = vweird.f32 %v9981_v44 }
 0xade   : > { %9982 = vrsqrt.f32 %v4133_v5  ;;  %vm4175_vm13 = vmor %vm4173_vm12, %vm4174_vm11  ;;  %vm4183_vm15 = vweird.f32 %v4133_v5 }
 0xadf   : > { %v4169_v37 = vmul.f32 %v9981_v44, %v4168_v6  ;;  %v4166_v0 = vsel %vm4165_vm10, %v9979_v43, %v4162_v51 }
 0xae0   : > { %v4219_v56 = vmul.f32 %v4166_v0, %v11974_v4 }
 0xae1   : > { %v4170_v40 = vmul.f32 0.5, %v4169_v37  ;;  %v4116_v55 = vpop.xlane.xlu2 %4115 }
 0xae2   : > { %v4126_v21 = vmul.f32 %v4116_v55, %v11767_v20  ;;  %v4230_v3 = vmul.f32 %v12010_v59, %v4219_v56 }
 0xae3   : > { %v4171_v33 = vsub.f32 1.5, %v4170_v40 }
 0xae4   : > { %v9983_v34 = vpop.eup %9982  ;;  %v4134_v16 = vadd.f32 1e-05, %v4126_v21  ;;  %v12038_v50 = vadd.f32 %v12019_v48, %v4230_v3 }
 0xae5   : > { %v4172_v24 = vmul.f32 %v9981_v44, %v4171_v33  ;;  %v4178_v9 = vmul.f32 %v9983_v34, %v4133_v5  ;;  %vm4184_vm14 = vweird.f32 %v9983_v34 }
 0xae6   : > { %9984 = vrsqrt.f32 %v4134_v16  ;;  %13440 = vst [vmem:[#allocation27_spill] sm:$0xff] %v12038_v50  ;;  %vm4185_vm3 = vmor %vm4183_vm15, %vm4184_vm14  ;;  %vm4193_vm5 = vweird.f32 %v4134_v16 }
 0xae7   : > { %v4176_v46 = vsel %vm4175_vm13, %v9981_v44, %v4172_v24  ;;  %v4179_v62 = vmul.f32 %v9983_v34, %v4178_v9 }
 0xae8   : > { %v4220_v39 = vmul.f32 %v4176_v46, %v11979_v57 }
 0xae9   : > { %v4180_v38 = vmul.f32 0.5, %v4179_v62 }
 0xaea   : > { %v4231_v7 = vmul.f32 %v12010_v59, %v4220_v39 }
 0xaeb   : > { %v4181_v63 = vsub.f32 1.5, %v4180_v38 }
 0xaec   : > { %v9985_v18 = vpop.eup %9984  ;;  %v12041_v4 = vadd.f32 %v12019_v48, %v4231_v7 }
 0xaed   : > { %v4182_v22 = vmul.f32 %v9983_v34, %v4181_v63  ;;  %v4188_v8 = vmul.f32 %v9985_v18, %v4134_v16  ;;  %vm4194_vm4 = vweird.f32 %v9985_v18 }
 0xaee   : > { %13441 = vst [vmem:[#allocation28_spill] sm:$0xff] %v12041_v4  ;;  %v4248_v29 = vpack.c.bf16 %v12041_v4, %v12038_v50  ;;  %vm4195_vm6 = vmor %vm4193_vm5, %vm4194_vm4 }
 0xaef   : > { %v4189_v57 = vmul.f32 %v9985_v18, %v4188_v8  ;;  %v4186_v23 = vsel %vm4185_vm3, %v9983_v34, %v4182_v22  ;;  %v4285_v34 = vld [vmem:[#allocation7 + $0x3] sm:$0x7] }
 0xaf0   : > { %4434 = vmatmul.bf16.gmra.mxu3 %v4248_v29  ;;  %4463 = vmatmul.bf16.gmra.mxu0 %v4248_v29  ;;  %v4221_v15 = vmul.f32 %v4186_v23, %v11984_v52  ;;  %v12071_v16 = vperm.slane %v4285_v34, 1 }
 0xaf1   : > { %v4190_v25 = vmul.f32 0.5, %v4189_v57  ;;  %4492 = vmatmul.bf16.gmra.mxu1 %v4248_v29 }
 0xaf2   : > { %v4232_v42 = vmul.f32 %v12010_v59, %v4221_v15 }
 0xaf3   : > { %v4191_v54 = vsub.f32 1.5, %v4190_v25 }
 0xaf4   : > { %v12050_v13 = vadd.f32 %v12019_v48, %v4232_v42 }
 0xaf5   : > { %v4192_v26 = vmul.f32 %v9985_v18, %v4191_v54 }
 0xaf6   : > { %13442 = vst [vmem:[#allocation32_spill] sm:$0xff] %v12050_v13 }
 0xaf7   : > { %v4196_v17 = vsel %vm4195_vm6, %v9985_v18, %v4192_v26 }
 0xaf8   : > { %v4222_v10 = vmul.f32 %v4196_v17, %v11989_v12 }
 0xafa   : > { %v4233_v14 = vmul.f32 %v12010_v59, %v4222_v10 }
 0xafc   : > { %v12053_v11 = vadd.f32 %v12019_v48, %v4233_v14 }
 0xafe   : > { %13443 = vst [vmem:[#allocation33_spill] sm:$0xff] %v12053_v11  ;;  %v4249_v1 = vpack.c.bf16 %v12053_v11, %v12050_v13 }
 0xb00   : > { %4439 = vmatmul.bf16.gmra.mxu3 %v4249_v1  ;;  %4468 = vmatmul.bf16.gmra.mxu0 %v4249_v1 }
 0xb01   : > { %4497 = vmatmul.bf16.gmra.mxu1 %v4249_v1 }
 0xb24   : > { %v4118_v52 = vpop.xlane.xlu0 %4117 }
 0xb25   : > { %v4127_v61 = vmul.f32 %v4118_v52, %v11767_v20 }
 0xb27   : > { %v4135_v12 = vadd.f32 1e-05, %v4127_v61 }
 0xb29   : > { %9986 = vrsqrt.f32 %v4135_v12  ;;  %vm4203_vm8 = vweird.f32 %v4135_v12 }
 0xb2c   : > { %v4120_v41 = vpop.xlane.xlu1 %4119 }
 0xb2d   : > { %v4128_v60 = vmul.f32 %v4120_v41, %v11767_v20 }
 0xb2f   : > { %v9987_v30 = vpop.eup %9986  ;;  %v4136_v27 = vadd.f32 1e-05, %v4128_v60 }
 0xb30   : > { %v4198_v32 = vmul.f32 %v9987_v30, %v4135_v12  ;;  %vm4204_vm7 = vweird.f32 %v9987_v30  ;;  %v12107_v12 = vperm.slane %v4285_v34, 2 }
 0xb31   : > { %9988 = vrsqrt.f32 %v4136_v27  ;;  %vm4205_vm9 = vmor %vm4203_vm8, %vm4204_vm7  ;;  %vm4213_vm11 = vweird.f32 %v4136_v27 }
 0xb32   : > { %v4199_v43 = vmul.f32 %v9987_v30, %v4198_v32 }
 0xb34   : > { %v4200_v35 = vmul.f32 0.5, %v4199_v43 }
 0xb36   : > { %v4201_v36 = vsub.f32 1.5, %v4200_v35 }
 0xb37   : > { %v9989_v31 = vpop.eup %9988 }
 0xb38   : > { %v4202_v49 = vmul.f32 %v9987_v30, %v4201_v36  ;;  %v4208_v45 = vmul.f32 %v9989_v31, %v4136_v27  ;;  %vm4214_vm10 = vweird.f32 %v9989_v31 }
 0xb39   : > { %vm4215_vm12 = vmor %vm4213_vm11, %vm4214_vm10 }
 0xb3a   : > { %v4209_v47 = vmul.f32 %v9989_v31, %v4208_v45  ;;  %v4206_v19 = vsel %vm4205_vm9, %v9987_v30, %v4202_v49 }
 0xb3b   : > { %v4223_v51 = vmul.f32 %v4206_v19, %v11996_v58 }
 0xb3c   : > { %v4210_v44 = vmul.f32 0.5, %v4209_v47 }
 0xb3d   : > { %v4234_v40 = vmul.f32 %v12010_v59, %v4223_v51 }
 0xb3e   : > { %v4211_v5 = vsub.f32 1.5, %v4210_v44 }
 0xb3f   : > { %v12064_v21 = vadd.f32 %v12019_v48, %v4234_v40 }
 0xb40   : > { %v4212_v6 = vmul.f32 %v9989_v31, %v4211_v5 }
 0xb41   : > { %13444 = vst [vmem:[#allocation34_spill] sm:$0xff] %v12064_v21 }
 0xb42   : > { %v4216_v37 = vsel %vm4215_vm12, %v9989_v31, %v4212_v6 }
 0xb43   : > { %v4224_v0 = vmul.f32 %v4216_v37, %v12003_v28 }
 0xb45   : > { %v4235_v55 = vmul.f32 %v12010_v59, %v4224_v0  ;;  %v12076_v59 = vperm.slane %v4285_v34, 0 }
 0xb47   : > { %v12067_v33 = vadd.f32 %v12019_v48, %v4235_v55 }
 0xb49   : > { %13445 = vst [vmem:[#allocation35_spill] sm:$0xff] %v12067_v33  ;;  %v4250_v58 = vpack.c.bf16 %v12067_v33, %v12064_v21 }
 0xb4b   : > { %4444 = vmatmul.bf16.gmra.mxu3 %v4250_v58  ;;  %4473 = vmatmul.bf16.gmra.mxu0 %v4250_v58 }
 0xb4c   : > { %4502 = vmatmul.bf16.gmra.mxu1 %v4250_v58 }
 0xb4e   : > { %v4459_v28 = vpop.f32.mrf.mxu0 }
 0xb4f   : > { %v4460_v56 = vadd.f32 %v4459_v28, %v12071_v16  ;;  %v4488_v7 = vpop.f32.mrf.mxu1 }
 0xb50   : > { %v4489_v43 = vadd.f32 %v4488_v7, %v12107_v12 }
 0xb51   : > { %v12074_v24 = vpack.c.bf16 %v4460_v56, %v4460_v56 }
 0xb52   : > { %v12122_v19 = vpack.c.bf16 %v4489_v43, %v4489_v43 }
 0xb53   : > { %v4553_v48 = vsel %vm1035_vm0, %v12074_v24, 0 }
 0xb54   : > { %v4430_v9 = vpop.f32.mrf.mxu3  ;;  %4562 = vmatpush.bf16.xpose.msrb.mxu2 %v4553_v48  ;;  %v4793_v37 = vsel %vm1280_vm2, %v12122_v19, 0 }
 0xb55   : > { %v4431_v46 = vadd.f32 %v4430_v9, %v12076_v59 }
 0xb56   : > { %v4461_v62 = vpop.f32.mrf.mxu0 }
 0xb57   : > { %v4462_v39 = vadd.f32 %v4461_v62, %v12071_v16  ;;  %v12082_v3 = vpack.c.bf16 %v4431_v46, %v4431_v46  ;;  %v4490_v22 = vpop.f32.mrf.mxu1 }
 0xb58   : > { %v4491_v0 = vadd.f32 %v4490_v22, %v12107_v12 }
 0xb59   : > { %v12084_v38 = vpack.c.bf16 %v4462_v39, %v4462_v39 }
 0xb5a   : > { %v12140_v56 = vpack.c.bf16 %v4491_v0, %v4491_v0 }
 0xb5b   : > { %8913 = vmatmul.msk.bf16.vlgmr.msrb.gmra.mxu2 %vm1035_vm0, %v12082_v3  ;;  %v4572_v63 = vsel %vm1035_vm0, %v12084_v38, 0 }
 0xb5c   : > { %4581 = vmatpush.bf16.xpose.msra.mxu2 %v4572_v63  ;;  %v4432_v18 = vpop.f32.mrf.mxu3 }
 0xb5d   : > { %v4433_v8 = vadd.f32 %v4432_v18, %v12076_v59  ;;  %v4812_v18 = vsel %vm1280_vm2, %v12140_v56, 0 }
 0xb5f   : > { %v12091_v29 = vpack.c.bf16 %v4433_v8, %v4433_v8 }
 0xb6b   : > { %8914 = vmatmul.msk.bf16.vlgmr.msra.gmra.mxu2 %vm1035_vm0, %v12091_v29 }
 0xb6d   : > { %v4464_v57 = vpop.f32.mrf.mxu0 }
 0xb6e   : > { %v4465_v23 = vadd.f32 %v4464_v57, %v12071_v16  ;;  %v12096_v25 = vpop.f32.mrf.mxu1 }
 0xb70   : > { %v4535_v54 = vpack.c.bf16 %v4465_v23, %v4465_v23 }
 0xb72   : > { %v4591_v15 = vsel %vm1035_vm0, %v4535_v54, 0  ;;  %v5017_v26 = vunpack.c.l.b16 %v4535_v54  ;;  %v4494_v54 = vadd.f32 %v12096_v25, %v12107_v12 }
 0xb73   : > { %v4435_v17 = vpop.f32.mrf.mxu3  ;;  %4600 = vmatpush.bf16.xpose.msra.mxu3 %v4591_v15 }
 0xb74   : > { %v12099_v10 = vpack.c.b16 %v5017_v26, %v5017_v26  ;;  %v4436_v42 = vadd.f32 %v4435_v17, %v12076_v59 }
 0xb75   : > { %v4466_v14 = vpop.f32.mrf.mxu0 }
 0xb76   : > { %v4527_v1 = vpack.c.bf16 %v4436_v42, %v4436_v42  ;;  %v4467_v52 = vadd.f32 %v4466_v14, %v12071_v16  ;;  %v12103_v61 = vpop.f32.mrf.mxu1  ;;  %5019 = vrot.lane.b32.xlu2 %v12099_v10, %s10564_s6  ;;  %v12167_v42 = vpack.c.bf16 %v4494_v54, %v4494_v54 }
 0xb78   : > { %v5012_v41 = vunpack.c.l.b16 %v4527_v1  ;;  %v4536_v60 = vpack.c.bf16 %v4467_v52, %v4467_v52 }
 0xb7a   : > { %v12109_v30 = vpack.c.b16 %v5012_v41, %v5012_v41  ;;  %v5046_v27 = vunpack.c.l.b16 %v4536_v60  ;;  %8915 = vmatmul.msk.bf16.vlgmr.msra.gmra.mxu3 %vm1035_vm0, %v4527_v1  ;;  %v4610_v32 = vsel %vm1035_vm0, %v4536_v60, 0  ;;  %v4831_v60 = vsel %vm1280_vm2, %v12167_v42, 0 }
 0xb7b   : > { %v4437_v35 = vpop.f32.mrf.mxu3  ;;  %4619 = vmatpush.bf16.xpose.msra.mxu0 %v4610_v32 }
 0xb7c   : > { %v12114_v36 = vpack.c.b16 %v5046_v27, %v5046_v27  ;;  %v4438_v31 = vadd.f32 %v4437_v35, %v12076_v59  ;;  %5014 = vrot.lane.b32.xlu0 %v12109_v30, %s10564_s6  ;;  %v4496_v27 = vadd.f32 %v12103_v61, %v12107_v12 }
 0xb7d   : > { %v4469_v49 = vpop.f32.mrf.mxu0 }
 0xb7e   : > { %v4470_v45 = vadd.f32 %v4469_v49, %v12071_v16  ;;  %v4498_v47 = vpop.f32.mrf.mxu1  ;;  %5048 = vrot.lane.b32.xlu2 %v12114_v36, %s10564_s6  ;;  %v12124_v44 = vpack.c.bf16 %v4438_v31, %v4438_v31 }
 0xb7f   : > { %v4499_v6 = vadd.f32 %v4498_v47, %v12107_v12  ;;  %v12183_v47 = vpack.c.bf16 %v4496_v27, %v4496_v27 }
 0xb80   : > { %v12126_v5 = vpack.c.bf16 %v4470_v45, %v4470_v45 }
 0xb81   : > { %v12137_v58 = vpack.c.bf16 %v4499_v6, %v4499_v6 }
 0xb82   : > { %v4629_v51 = vsel %vm1035_vm0, %v12126_v5, 0  ;;  %8916 = vmatmul.msk.bf16.vlgmr.msra.gmra.mxu0 %vm1035_vm0, %v12124_v44 }
 0xb83   : > { %v4440_v40 = vpop.f32.mrf.mxu3  ;;  %4638 = vmatpush.bf16.xpose.msrb.mxu1 %v4629_v51  ;;  %v4869_v62 = vsel %vm1280_vm2, %v12137_v58, 0  ;;  %v5370_v50 = vunpack.c.l.b16 %v12137_v58 }
 0xb84   : > { %v4441_v55 = vadd.f32 %v4440_v40, %v12076_v59 }
 0xb85   : > { %v4471_v34 = vpop.f32.mrf.mxu0  ;;  %v12479_v53 = vpack.c.b16 %v5370_v50, %v5370_v50 }
 0xb86   : > { %v4472_v28 = vadd.f32 %v4471_v34, %v12071_v16  ;;  %v4500_v48 = vpop.f32.mrf.mxu1  ;;  %v12142_v9 = vpack.c.bf16 %v4441_v55, %v4441_v55  ;;  %v4850_v34 = vsel %vm1280_vm2, %v12183_v47, 0 }
 0xb87   : > { %v4501_v39 = vadd.f32 %v4500_v48, %v12107_v12 }
 0xb88   : > { %v12144_v46 = vpack.c.bf16 %v4472_v28, %v4472_v28 }
 0xb89   : > { %v12156_v8 = vpack.c.bf16 %v4501_v39, %v4501_v39 }
 0xb8a   : > { %8917 = vmatmul.msk.bf16.vlgmr.msrb.gmra.mxu1 %vm1035_vm0, %v12142_v9  ;;  %v4648_v7 = vsel %vm1035_vm0, %v12144_v46, 0 }
 0xb8b   : > { %4802 = vmatpush.bf16.msra.mxu1 %v4793_v37  ;;  %v4442_v63 = vpop.f32.mrf.mxu3  ;;  %4657 = vmatpush.bf16.xpose.msrb.mxu2 %v4648_v7  ;;  %v4888_v23 = vsel %vm1280_vm2, %v12156_v8, 0 }
 0xb8c   : > { %v4443_v22 = vadd.f32 %v4442_v63, %v12076_v59 }
 0xb8e   : > { %v12158_v57 = vpack.c.bf16 %v4443_v22, %v4443_v22 }
 0xb8f   : > { %4878 = vmatpush.bf16.msrb.mxu1 %v4869_v62 }
 0xb92   : > { %8918 = vmatmul.msk.bf16.vlgmr.msrb.gmra.mxu2 %vm1035_vm0, %v12158_v57 }
 0xb93   : > { %4821 = vmatpush.bf16.msra.mxu2 %v4812_v18 }
 0xb97   : > { %4897 = vmatpush.bf16.msrb.mxu2 %v4888_v23 }
 0xbc8   : > { %v4474_v15 = vpop.f32.mrf.mxu0 }
 0xbc9   : > { %v4475_v26 = vadd.f32 %v4474_v15, %v12071_v16  ;;  %v4503_v17 = vpop.f32.mrf.mxu1 }
 0xbca   : > { %v4504_v41 = vadd.f32 %v4503_v17, %v12107_v12 }
 0xbcb   : > { %v4539_v14 = vpack.c.bf16 %v4475_v26, %v4475_v26 }
 0xbcc   : > { %v12178_v31 = vpack.c.bf16 %v4504_v41, %v4504_v41 }
 0xbcd   : > { %v4667_v1 = vsel %vm1035_vm0, %v4539_v14, 0  ;;  %v5133_v52 = vunpack.c.l.b16 %v4539_v14 }
 0xbce   : > { %v4445_v32 = vpop.f32.mrf.mxu3  ;;  %4676 = vmatpush.bf16.xpose.msrb.mxu3 %v4667_v1  ;;  %v4907_v37 = vsel %vm1280_vm2, %v12178_v31, 0 }
 0xbcf   : > { %v12175_v25 = vpack.c.b16 %v5133_v52, %v5133_v52  ;;  %v4446_v43 = vadd.f32 %v4445_v32, %v12076_v59  ;;  %v4988_v32 = vunpack.c.l.b16 %v12084_v38 }
 0xbd0   : > { %v4476_v35 = vpop.f32.mrf.mxu0 }
 0xbd1   : > { %v4531_v49 = vpack.c.bf16 %v4446_v43, %v4446_v43  ;;  %v4477_v45 = vadd.f32 %v4476_v35, %v12071_v16  ;;  %5135 = vrot.lane.b32.xlu1 %v12175_v25, %s10564_s6  ;;  %v4505_v51 = vpop.f32.mrf.mxu1  ;;  %v12219_v43 = vpack.c.b16 %v4988_v32, %v4988_v32 }
 0xbd2   : > { %v4506_v40 = vadd.f32 %v4505_v51, %v12107_v12 }
 0xbd3   : > { %v5128_v61 = vunpack.c.l.b16 %v4531_v49  ;;  %v4540_v6 = vpack.c.bf16 %v4477_v45, %v4477_v45 }
 0xbd4   : > { %v12197_v48 = vpack.c.bf16 %v4506_v40, %v4506_v40  ;;  %v5075_v40 = vunpack.c.l.b16 %v12126_v5 }
 0xbd5   : > { %v12187_v0 = vpack.c.b16 %v5128_v61, %v5128_v61  ;;  %8919 = vmatmul.msk.bf16.vlgmr.msrb.gmra.mxu3 %vm1035_vm0, %v4531_v49  ;;  %v4686_v55 = vsel %vm1035_vm0, %v4540_v6, 0  ;;  %v5162_v1 = vunpack.c.l.b16 %v4540_v6  ;;  %v4954_v49 = vunpack.c.l.b16 %v12082_v3  ;;  %v5020_v6 = vpop.permute.xlu2 %5019 }
 0xbd6   : > { %4840 = vmatpush.bf16.msra.mxu3 %v4831_v60  ;;  %v4447_v16 = vpop.f32.mrf.mxu3  ;;  %4695 = vmatpush.bf16.xpose.msrb.mxu0 %v4686_v55  ;;  %v4926_v12 = vsel %vm1280_vm2, %v12197_v48, 0  ;;  %v12237_v55 = vpack.c.b16 %v5075_v40, %v5075_v40 }
 0xbd7   : > { %v4448_v28 = vadd.f32 %v4447_v16, %v12076_v59  ;;  %5130 = vrot.lane.b32.xlu0 %v12187_v0, %s10564_s6  ;;  %v12210_v52 = vpack.c.b16 %v5162_v1, %v5162_v1  ;;  %v12232_v38 = vpack.c.b16 %v4954_v49, %v4954_v49  ;;  %v5041_v16 = vunpack.c.l.b16 %v12124_v44 }
 0xbd8   : > { %v5104_v49 = vunpack.c.l.b16 %v12144_v46  ;;  %v4959_v46 = vunpack.c.l.b16 %v12074_v24 }
 0xbd9   : > { %v4532_v62 = vpack.c.bf16 %v4448_v28, %v4448_v28  ;;  %13446 = vst [vmem:[#allocation36_spill] sm:$0xff] %v12210_v52 }
 0xbda   : > { %4916 = vmatpush.bf16.msrb.mxu3 %v4907_v37 }
 0xbdb   : > { %v5157_v5 = vunpack.c.l.b16 %v4532_v62 }
 0xbdd   : > { %8920 = vmatmul.msk.bf16.vlgmr.msrb.gmra.mxu0 %vm1035_vm0, %v4532_v62  ;;  %v5049_v28 = vpop.permute.xlu2 %5048 }
 0xbde   : > { %4859 = vmatpush.bf16.msra.mxu0 %v4850_v34  ;;  %v12202_v39 = vpop.f32.mrf.mxu2  ;;  %v5322_v34 = vunpack.c.l.b16 %v12167_v42  ;;  %v5054_v32 = vsel %vm1035_vm0, %v5049_v28, 0 }
 0xbdf   : > { %v4701_v27 = vsel %vm1188_vm1, %v12202_v39, -inf }
 0xbe2   : > { %4935 = vmatpush.bf16.msrb.mxu0 %v4926_v12 }
 0xbe6   : > { %v4566_v7 = vpop.f32.mrf.mxu2 }
 0xbe7   : > { %v12245_v7 = vpack.c.b16 %v5041_v16, %v5041_v16  ;;  %v4983_v16 = vunpack.c.l.b16 %v12091_v29 }
 0xbee   : > { %v12204_v63 = vpop.f32.mrf.mxu2  ;;  %v5015_v29 = vpop.permute.xlu0 %5014 }
 0xbf6   : > { %v4585_v18 = vpop.f32.mrf.mxu2 }
 0xbf7   : > { %v12247_v18 = vpack.c.b16 %v5322_v34, %v5322_v34 }
 0xbfd   : > { %v4602_v59 = vpop.f32.mrf.mxu3 }
 0xbfe   : > { %v4707_v22 = vsel %vm1188_vm1, %v4602_v59, -inf }
 0xbff   : > { %v4621_v23 = vpop.f32.mrf.mxu0  ;;  %4708 = vmax.xlane.f32.xlu2 %v4707_v22  ;;  %v5418_v22 = vunpack.c.l.b16 %v12178_v31 }
 0xc00   : > { %v4710_v54 = vsel %vm1188_vm1, %v4621_v23, -inf }
 0xc01   : > { %4711 = vmax.xlane.f32.xlu1 %v4710_v54  ;;  %v12256_v1 = vpack.c.b16 %v5418_v22, %v5418_v22  ;;  %v12296_v22 = vpack.c.b16 %v4983_v16, %v4983_v16 }
 0xc05   : > { %v4604_v15 = vpop.f32.mrf.mxu3 }
 0xc06   : > { %v12254_v15 = vpack.c.b16 %v5157_v5, %v5157_v5 }
 0xc07   : > { %v4623_v26 = vpop.f32.mrf.mxu0  ;;  %v12208_v17 = vpop.f32.mrf.mxu1 }
 0xc08   : > { %13447 = vst [vmem:[#allocation37_spill] sm:$0xff] %v12254_v15 }
 0xc0f   : > { %v4642_v14 = vpop.f32.mrf.mxu1 }
 0xc15   : > { %v12212_v41 = vpop.f32.mrf.mxu2 }
 0xc17   : > { %5164 = vrot.lane.b32.xlu2 %v12210_v52, %s10564_s6 }
 0xc1d   : > { %v4661_v60 = vpop.f32.mrf.mxu2 }
 0xc40   : > { %4702 = vmax.xlane.f32.xlu2 %v4701_v27 }
 0xc43   : > { %v12243_v12 = vpop.permute.xlu1 %5135 }
 0xc58   : > { %4990 = vrot.lane.b32.xlu2 %v12219_v43, %s10564_s6  ;;  %v12223_v35 = vpop.f32.mrf.mxu3 }
 0xc59   : > { %v4719_v45 = vsel %vm1188_vm1, %v12223_v35, -inf }
 0xc5a   : > { %v12228_v51 = vpop.f32.mrf.mxu0  ;;  %4720 = vmax.xlane.f32.xlu0 %v4719_v45  ;;  %v12279_v45 = vpack.c.b16 %v5104_v49, %v5104_v49 }
 0xc5b   : > { %v4722_v61 = vsel %vm1188_vm1, %v12228_v51, -inf }
 0xc5c   : > { %4723 = vmax.xlane.f32.xlu1 %v4722_v61  ;;  %13448 = vst [vmem:[#allocation38_spill] sm:$0xff] %v12279_v45  ;;  %v4704_v61 = vsel %vm1188_vm1, %v12204_v63, -inf }
 0xc60   : > { %4956 = vrot.lane.b32.xlu2 %v12232_v38, %s10564_s6  ;;  %v4680_v37 = vpop.f32.mrf.mxu3 }
 0xc61   : > { %v4713_v37 = vsel %vm1188_vm1, %v12208_v17, -inf }
 0xc62   : > { %v4699_v3 = vpop.f32.mrf.mxu0 }
 0xc63   : > { %v12290_v3 = vpack.c.b16 %v4959_v46, %v4959_v46  ;;  %v5141_v46 = vsel %vm1035_vm0, %v12243_v12, 0 }
 0xc68   : > { %5077 = vrot.lane.b32.xlu2 %v12237_v55, %s10564_s6 }
 0xc6e   : > { %5043 = vrot.lane.b32.xlu0 %v12245_v7, %s10564_s6 }
 0xc70   : > { %5324 = vrot.lane.b32.xlu2 %v12247_v18, %s10564_s6 }
 0xc72   : > { %v4709_v54 = vpop.xlane.xlu2 %4708 }
 0xc73   : > { %v4727_v44 = vsub.f32 %v4602_v59, %v4709_v54  ;;  %v5099_v54 = vunpack.c.l.b16 %v12158_v57  ;;  %v5346_v57 = vunpack.c.l.b16 %v12183_v47 }
 0xc74   : > { %v4712_v42 = vpop.xlane.xlu1 %4711 }
 0xc75   : > { %v4737_v26 = vmul.f32 1.442695, %v4727_v44  ;;  %v4728_v14 = vsub.f32 %v4621_v23, %v4712_v42  ;;  %5159 = vrot.lane.b32.xlu1 %v12254_v15, %s10564_s6  ;;  %v5025_v23 = vsel %vm1035_vm0, %v5020_v6, 0  ;;  %v4716_v6 = vsel %vm1188_vm1, %v12212_v41, -inf }
 0xc76   : > { %v12306_v44 = vpack.c.b16 %v5099_v54, %v5099_v54 }
 0xc77   : > { %9990 = vpow2.f32 %v4737_v26  ;;  %v4739_v60 = vmul.f32 1.442695, %v4728_v14  ;;  %v5131_v14 = vpop.permute.xlu0 %5130 }
 0xc78   : > { %5420 = vrot.lane.b32.xlu2 %v12256_v1, %s10564_s6 }
 0xc79   : > { %9992 = vpow2.f32 %v4739_v60  ;;  %v12318_v60 = vpack.c.b16 %v5346_v57, %v5346_v57 }
 0xc7a   : > { %v5165_v40 = vpop.permute.xlu2 %5164 }
 0xc7d   : > { %v12262_v62 = vpop.eup %9990 }
 0xc7e   : > { %v4783_v31 = vpack.c.bf16 %v12262_v62, %v12262_v62 }
 0xc7f   : > { %v12266_v59 = vpop.eup %9992 }
 0xc80   : > { %v4784_v27 = vpack.c.bf16 %v12266_v59, %v12266_v59  ;;  %5631 = vrot.lane.b32.xlu2 %v12099_v10, %s10565_s14  ;;  %8923 = vmatmul.msk.bf16.vlgmr.msra.gmra.mxu3 %vm1188_vm1, %v4783_v31 }
 0xc81   : > { %5034 = vmatpush.bf16.xpose.msra.mxu3 %v5025_v23  ;;  %v5442_v23 = vunpack.c.l.b16 %v12197_v48 }
 0xc82   : > { %8924 = vmatmul.msk.bf16.vlgmr.msra.gmra.mxu0 %vm1188_vm1, %v4784_v27 }
 0xc83   : > { %5063 = vmatpush.bf16.xpose.msra.mxu0 %v5054_v32 }
 0xc88   : > { %5723 = vrot.lane.b32.xlu2 %v12175_v25, %s10565_s14 }
 0xc90   : > { %5700 = vrot.lane.b32.xlu2 %v12279_v45, %s10565_s14 }
 0xc98   : > { %4705 = vmax.xlane.f32.xlu0 %v4704_v61  ;;  %v12329_v61 = vpack.c.b16 %v5442_v23, %v5442_v23 }
 0xc9f   : > { %4717 = vmax.xlane.f32.xlu1 %v4716_v6 }
 0xca0   : > { %4714 = vmax.xlane.f32.xlu0 %v4713_v37 }
 0xcb3   : > { %v4703_v34 = vpop.xlane.xlu2 %4702 }
 0xcb4   : > { %v4725_v28 = vsub.f32 %v12202_v39, %v4703_v34  ;;  %4961 = vrot.lane.b32.xlu0 %v12290_v3, %s10564_s6  ;;  %v5070_v39 = vunpack.c.l.b16 %v12142_v9  ;;  %v5170_v34 = vsel %vm1035_vm0, %v5165_v40, 0 }
 0xcb6   : > { %v4733_v5 = vmul.f32 1.442695, %v4725_v28  ;;  %v12314_v26 = vpack.c.b16 %v5070_v39, %v5070_v39 }
 0xcb8   : > { %9994 = vpow2.f32 %v4733_v5  ;;  %4985 = vrot.lane.b32.xlu1 %v12296_v22, %s10564_s6  ;;  %13449 = vst [vmem:[#allocation39_spill] sm:$0xff] %v12314_v26 }
 0xcbb   : > { %v4991_v9 = vpop.permute.xlu2 %4990 }
 0xcbc   : > { %5106 = vrot.lane.b32.xlu0 %v12279_v45, %s10564_s6 }
 0xcbe   : > { %v12303_v24 = vpop.eup %9994 }
 0xcbf   : > { %v4781_v42 = vpack.c.bf16 %v12303_v24, %v12303_v24 }
 0xcc0   : > { %5101 = vrot.lane.b32.xlu1 %v12306_v44, %s10564_s6 }
 0xcc1   : > { %8921 = vmatmul.msk.bf16.vlgmr.msra.gmra.mxu1 %vm1188_vm1, %v4781_v42 }
 0xcc3   : > { %v12331_v37 = vpop.permute.xlu2 %4956 }
 0xcc4   : > { %5072 = vrot.lane.b32.xlu0 %v12314_v26, %s10564_s6 }
 0xcc8   : > { %5348 = vrot.lane.b32.xlu1 %v12318_v60, %s10564_s6 }
 0xccb   : > { %v5078_v28 = vpop.permute.xlu2 %5077 }
 0xccc   : > { %5585 = vrot.lane.b32.xlu0 %v12290_v3, %s10565_s14 }
 0xccd   : > { %v4721_v31 = vpop.xlane.xlu0 %4720 }
 0xcce   : > { %v4731_v47 = vsub.f32 %v12223_v35, %v4721_v31 }
 0xccf   : > { %v4724_v27 = vpop.xlane.xlu1 %4723 }
 0xcd0   : > { %v4745_v32 = vmul.f32 1.442695, %v4731_v47  ;;  %v4732_v49 = vsub.f32 %v12228_v51, %v4724_v27  ;;  %5583 = vrot.lane.b32.xlu1 %v12232_v38, %s10565_s14 }
 0xcd2   : > { %9996 = vpow2.f32 %v4745_v32  ;;  %v4747_v6 = vmul.f32 1.442695, %v4732_v49 }
 0xcd3   : > { %v5325_v12 = vpop.permute.xlu2 %5324 }
 0xcd4   : > { %9998 = vpow2.f32 %v4747_v6  ;;  %5444 = vrot.lane.b32.xlu0 %v12329_v61, %s10564_s6  ;;  %v5330_v5 = vsel %vm1280_vm2, %v5325_v12, 0  ;;  %v4996_v12 = vsel %vm1035_vm0, %v4991_v9, 0 }
 0xcd8   : > { %v12335_v48 = vpop.eup %9996  ;;  %5629 = vrot.lane.b32.xlu1 %v12109_v30, %s10565_s14 }
 0xcd9   : > { %v4787_v35 = vpack.c.bf16 %v12335_v48, %v12335_v48 }
 0xcda   : > { %v12341_v51 = vpop.eup %9998 }
 0xcdb   : > { %v4788_v16 = vpack.c.bf16 %v12341_v51, %v12341_v51  ;;  %8927 = vmatmul.msk.bf16.vlgmr.msrb.gmra.mxu3 %vm1188_vm1, %v4787_v35  ;;  %v5421_v40 = vpop.permute.xlu2 %5420 }
 0xcdc   : > { %5150 = vmatpush.bf16.xpose.msrb.mxu3 %v5141_v46  ;;  %5608 = vrot.lane.b32.xlu0 %v12219_v43, %s10565_s14  ;;  %v5426_v39 = vsel %vm1280_vm2, %v5421_v40, 0 }
 0xcdd   : > { %8928 = vmatmul.msk.bf16.vlgmr.msrb.gmra.mxu0 %vm1188_vm1, %v4788_v16 }
 0xcde   : > { %5179 = vmatpush.bf16.xpose.msrb.mxu0 %v5170_v34 }
 0xce0   : > { %5677 = vrot.lane.b32.xlu1 %v12237_v55, %s10565_s14  ;;  %v5044_v54 = vpop.permute.xlu0 %5043 }
 0xce3   : > { %v12448_v33 = vpop.permute.xlu2 %5631 }
 0xce4   : > { %5606 = vrot.lane.b32.xlu0 %v12296_v22, %s10565_s14 }
 0xce7   : > { %v5160_v42 = vpop.permute.xlu1 %5159 }
 0xce8   : > { %5675 = vrot.lane.b32.xlu1 %v12314_v26, %s10565_s14 }
 0xceb   : > { %8931 = vmatmul.msk.bf16.vlgmr.msra.gmra.mxu3 %vm1035_vm0, %v5015_v29  ;;  %v12461_v11 = vpop.permute.xlu2 %5723 }
 0xcec   : > { %5339 = vmatpush.bf16.msra.mxu3 %v5330_v5  ;;  %5654 = vrot.lane.b32.xlu0 %v12114_v36, %s10565_s14 }
 0xced   : > { %8932 = vmatmul.msk.bf16.vlgmr.msra.gmra.mxu0 %vm1035_vm0, %v5044_v54 }
 0xcf0   : > { %5652 = vrot.lane.b32.xlu1 %v12245_v7, %s10565_s14 }
 0xcf3   : > { %v12474_v13 = vpop.permute.xlu2 %5700 }
 0xcf4   : > { %5721 = vrot.lane.b32.xlu0 %v12187_v0, %s10565_s14 }
 0xcfb   : > { %8935 = vmatmul.msk.bf16.vlgmr.msrb.gmra.mxu3 %vm1035_vm0, %v5131_v14 }
 0xcfc   : > { %5435 = vmatpush.bf16.msrb.mxu3 %v5426_v39  ;;  %v5083_v39 = vsel %vm1035_vm0, %v5078_v28, 0 }
 0xcfd   : > { %8936 = vmatmul.msk.bf16.vlgmr.msrb.gmra.mxu0 %vm1035_vm0, %v5160_v42 }
 0xcff   : > { %v12370_v29 = vpop.f32.mrf.mxu0 }
 0xd03   : > { %v12372_v57 = vpop.f32.mrf.mxu3 }
 0xd07   : > { %v4863_v31 = vpop.f32.mrf.mxu0 }
 0xd0b   : > { %v4844_v23 = vpop.f32.mrf.mxu3  ;;  %v4706_v47 = vpop.xlane.xlu0 %4705 }
 0xd0c   : > { %v4726_v27 = vsub.f32 %v12204_v63, %v4706_v47 }
 0xd0e   : > { %v4735_v32 = vmul.f32 1.442695, %v4726_v27 }
 0xd10   : > { %10000 = vpow2.f32 %v4735_v32 }
 0xd12   : > { %v4718_v49 = vpop.xlane.xlu1 %4717 }
 0xd13   : > { %v4715_v6 = vpop.xlane.xlu0 %4714  ;;  %v4730_v46 = vsub.f32 %v12212_v41, %v4718_v49 }
 0xd14   : > { %v4729_v35 = vsub.f32 %v12208_v17, %v4715_v6 }
 0xd15   : > { %v4743_v63 = vmul.f32 1.442695, %v4730_v46 }
 0xd16   : > { %v12376_v14 = vpop.eup %10000  ;;  %v4741_v16 = vmul.f32 1.442695, %v4729_v35 }
 0xd17   : > { %v4782_v34 = vpack.c.bf16 %v12376_v14, %v12376_v14 }
 0xd18   : > { %10002 = vpow2.f32 %v4741_v16 }
 0xd19   : > { %8922 = vmatmul.msk.bf16.vlgmr.msra.gmra.mxu2 %vm1188_vm1, %v4782_v34  ;;  %10004 = vpow2.f32 %v4743_v63 }
 0xd1a   : > { %5005 = vmatpush.bf16.xpose.msra.mxu2 %v4996_v12 }
 0xd1e   : > { %v12383_v5 = vpop.eup %10002 }
 0xd1f   : > { %v4785_v17 = vpack.c.bf16 %v12383_v5, %v12383_v5  ;;  %v12388_v41 = vpop.eup %10004 }
 0xd20   : > { %v4786_v40 = vpack.c.bf16 %v12388_v41, %v12388_v41 }
 0xd21   : > { %8925 = vmatmul.msk.bf16.vlgmr.msrb.gmra.mxu1 %vm1188_vm1, %v4785_v17 }
 0xd26   : > { %v4962_v54 = vpop.permute.xlu0 %4961 }
 0xd27   : > { %v4967_v9 = vsel %vm1035_vm0, %v4962_v54, 0 }
 0xd28   : > { %4976 = vmatpush.bf16.xpose.msra.mxu1 %v4967_v9 }
 0xd29   : > { %8926 = vmatmul.msk.bf16.vlgmr.msrb.gmra.mxu2 %vm1188_vm1, %v4786_v40 }
 0xd2a   : > { %v4986_v42 = vpop.permute.xlu1 %4985 }
 0xd2e   : > { %v5107_v31 = vpop.permute.xlu0 %5106 }
 0xd2f   : > { %v5112_v23 = vsel %vm1035_vm0, %v5107_v31, 0 }
 0xd30   : > { %5092 = vmatpush.bf16.xpose.msrb.mxu1 %v5083_v39  ;;  %5121 = vmatpush.bf16.xpose.msrb.mxu2 %v5112_v23 }
 0xd31   : > { %8929 = vmatmul.msk.bf16.vlgmr.msra.gmra.mxu1 %vm1035_vm0, %v12331_v37 }
 0xd32   : > { %v5102_v47 = vpop.permute.xlu1 %5101 }
 0xd36   : > { %v5073_v27 = vpop.permute.xlu0 %5072 }
 0xd39   : > { %8930 = vmatmul.msk.bf16.vlgmr.msra.gmra.mxu2 %vm1035_vm0, %v4986_v42 }
 0xd3a   : > { %v5349_v32 = vpop.permute.xlu1 %5348 }
 0xd3b   : > { %v5354_v49 = vsel %vm1280_vm2, %v5349_v32, 0 }
 0xd3c   : > { %5363 = vmatpush.bf16.msra.mxu0 %v5354_v49 }
 0xd3e   : > { %v12400_v28 = vpop.f32.mrf.mxu1  ;;  %v12402_v6 = vpop.permute.xlu0 %5585 }
 0xd41   : > { %8933 = vmatmul.msk.bf16.vlgmr.msrb.gmra.mxu1 %vm1035_vm0, %v5073_v27  ;;  %v5298_v27 = vunpack.c.l.b16 %v12140_v56 }
 0xd43   : > { %v12422_v49 = vpack.c.b16 %v5298_v27, %v5298_v27 }
 0xd46   : > { %v4806_v35 = vpop.f32.mrf.mxu1  ;;  %v5445_v46 = vpop.permute.xlu0 %5444 }
 0xd47   : > { %v5450_v16 = vsel %vm1280_vm2, %v5445_v46, 0 }
 0xd48   : > { %5459 = vmatpush.bf16.msrb.mxu0 %v5450_v16 }
 0xd49   : > { %8934 = vmatmul.msk.bf16.vlgmr.msrb.gmra.mxu2 %vm1035_vm0, %v5102_v47 }
 0xd4e   : > { %v5609_v45 = vpop.permute.xlu0 %5608 }
 0xd4f   : > { %v5614_v50 = vsel %vm1035_vm0, %v5609_v45, 0  ;;  %v4752_v45 = vsel %vm1188_vm1, %v12376_v14, 0.0  ;;  %v4770_v14 = vsel %vm1188_vm1, %v12341_v51, 0.0  ;;  %v4767_v51 = vsel %vm1188_vm1, %v12335_v48, 0.0 }
 0xd5a   : > { %v12407_v37 = vpop.f32.mrf.mxu0 }
 0xd5e   : > { %v12409_v34 = vpop.f32.mrf.mxu3 }
 0xd62   : > { %v4939_v12 = vpop.f32.mrf.mxu0 }
 0xd66   : > { %v4920_v63 = vpop.f32.mrf.mxu3 }
 0xd6a   : > { %v5065_v17 = vpop.f32.mrf.mxu0 }
 0xd6b   : > { %v5194_v54 = vsel %vm1188_vm1, %v5065_v17, -inf }
 0xd6c   : > { %5195 = vmax.xlane.f32.xlu2 %v5194_v54 }
 0xd6e   : > { %v5036_v40 = vpop.f32.mrf.mxu3 }
 0xd6f   : > { %v5191_v9 = vsel %vm1188_vm1, %v5036_v40, -inf }
 0xd70   : > { %5192 = vmax.xlane.f32.xlu1 %v5191_v9  ;;  %v12436_v9 = vpop.permute.xlu1 %5583 }
 0xd72   : > { %v5067_v39 = vpop.f32.mrf.mxu0 }
 0xd76   : > { %v5038_v42 = vpop.f32.mrf.mxu3 }
 0xd7a   : > { %v12413_v31 = vpop.f32.mrf.mxu0 }
 0xd7b   : > { %v5206_v42 = vsel %vm1188_vm1, %v12413_v31, -inf }
 0xd7e   : > { %v12415_v23 = vpop.f32.mrf.mxu3 }
 0xd82   : > { %v5183_v47 = vpop.f32.mrf.mxu0 }
 0xd84   : > { %5746 = vrot.lane.b32.xlu2 %v12210_v52, %s10565_s14 }
 0xd86   : > { %v5154_v32 = vpop.f32.mrf.mxu3 }
 0xd87   : > { %v12442_v32 = vpop.permute.xlu1 %5629 }
 0xd89   : > { %5698 = vrot.lane.b32.xlu1 %v12306_v44, %s10565_s14 }
 0xd8c   : > { %5300 = vrot.lane.b32.xlu2 %v12422_v49, %s10564_s6 }
 0xd9c   : > { %v12426_v35 = vpop.f32.mrf.mxu2 }
 0xd9e   : > { %v12428_v46 = vpop.f32.mrf.mxu1 }
 0xda4   : > { %v4825_v16 = vpop.f32.mrf.mxu2 }
 0xda6   : > { %v4882_v12 = vpop.f32.mrf.mxu1 }
 0xdac   : > { %v12430_v63 = vpop.f32.mrf.mxu2 }
 0xdae   : > { %v12432_v54 = vpop.f32.mrf.mxu1 }
 0xdaf   : > { %v5185_v56 = vsel %vm1188_vm1, %v12432_v54, -inf }
 0xdb3   : > { %5186 = vmax.xlane.f32.xlu1 %v5185_v56 }
 0xdb4   : > { %v4901_v39 = vpop.f32.mrf.mxu2 }
 0xdb5   : > { %5207 = vmax.xlane.f32.xlu2 %v5206_v42  ;;  %v5394_v39 = vunpack.c.l.b16 %v12156_v8  ;;  %v5274_v8 = vunpack.c.l.b16 %v12122_v19 }
 0xdb6   : > { %v4980_v47 = vpop.f32.mrf.mxu1 }
 0xdb7   : > { %v12453_v47 = vpop.permute.xlu1 %5677  ;;  %v12455_v21 = vpack.c.b16 %v5394_v39, %v5394_v39  ;;  %v12470_v39 = vpack.c.b16 %v5274_v8, %v5274_v8 }
 0xdbc   : > { %v12440_v27 = vpop.f32.mrf.mxu2 }
 0xdbd   : > { %v5188_v16 = vsel %vm1188_vm1, %v12440_v27, -inf }
 0xdbe   : > { %5189 = vmax.xlane.f32.xlu0 %v5188_v16  ;;  %v12446_v12 = vpop.f32.mrf.mxu1 }
 0xdbf   : > { %v5197_v56 = vsel %vm1188_vm1, %v12446_v12, -inf }
 0xdc4   : > { %v5009_v20 = vpop.f32.mrf.mxu2 }
 0xdc5   : > { %v5203_v20 = vsel %vm1188_vm1, %v12415_v23, -inf }
 0xdc6   : > { %5198 = vmax.xlane.f32.xlu0 %v5197_v56  ;;  %v5096_v42 = vpop.f32.mrf.mxu1  ;;  %v12468_v56 = vpop.permute.xlu1 %5675 }
 0xdcc   : > { %5396 = vrot.lane.b32.xlu1 %v12455_v21, %s10564_s6  ;;  %v12459_v16 = vpop.f32.mrf.mxu2 }
 0xdcd   : > { %5744 = vrot.lane.b32.xlu2 %v12254_v15, %s10565_s14 }
 0xdce   : > { %5204 = vmax.xlane.f32.xlu0 %v5203_v20  ;;  %v12476_v4 = vpop.permute.xlu1 %5652 }
 0xdd4   : > { %v5125_v42 = vpop.f32.mrf.mxu2 }
 0xdd5   : > { %5276 = vrot.lane.b32.xlu2 %v12470_v39, %s10564_s6 }
 0xddf   : > { %v5196_v2 = vpop.xlane.xlu2 %5195 }
 0xde0   : > { %v5212_v20 = vsub.f32 %v5065_v17, %v5196_v2 }
 0xde2   : > { %v5223_v15 = vmul.f32 1.442695, %v5212_v20  ;;  %5372 = vrot.lane.b32.xlu0 %v12479_v53, %s10564_s6  ;;  %v5591_v20 = vsel %vm1035_vm0, %v12402_v6, 0  ;;  %v4758_v6 = vsel %vm1188_vm1, %v12266_v59, 0.0  ;;  %s9415_s6 = sshll.u32 %s10683_s18, 3  ;;  %s8155_s18 = scalar_lea.sflag [#allocation4], %s10817_s21 }
 0xde3   : > { %v5193_v19 = vpop.xlane.xlu1 %5192  ;;  %s8165_s12 = scalar_lea.hbm %s13477_s16, %s9415_s6 }
 0xde4   : > { %10006 = vpow2.f32 %v5223_v15  ;;  %v5211_v8 = vsub.f32 %v5036_v40, %v5193_v19  ;;  %v5200_v19 = vsel %vm1188_vm1, %v12459_v16, -inf  ;;  %s8169_s8 = sshll.u32 %s8165_s12, 4  ;;  %s8170_s8 = int_to_ptr.hbm [resolvable:$true] %s8169_s8 }
 0xde6   : > { %v5221_v42 = vmul.f32 1.442695, %v5211_v8  ;;  %v4755_v8 = vsel %vm1188_vm1, %v12262_v62, 0.0  ;;  %v4761_v62 = vsel %vm1188_vm1, %v12383_v5, 0.0 }
 0xde7   : > { %v12483_v52 = vpop.permute.xlu2 %5746 }
 0xde8   : > { %10008 = vpow2.f32 %v5221_v42  ;;  %v4749_v42 = vsel %vm1188_vm1, %v12303_v24, 0.0  ;;  %v4764_v24 = vsel %vm1188_vm1, %v12388_v41, 0.0 }
 0xdea   : > { %v12485_v26 = vpop.eup %10006 }
 0xdeb   : > { %v5268_v58 = vpack.c.bf16 %v12485_v26, %v12485_v26 }
 0xded   : > { %8940 = vmatmul.msk.bf16.vlgmr.msra.gmra.mxu0 %vm1188_vm1, %v5268_v58  ;;  %v5607_v58 = vpop.permute.xlu0 %5606 }
 0xdee   : > { %v12491_v2 = vpop.eup %10008  ;;  %5623 = vmatpush.bf16.xpose.msra.mxu0 %v5614_v50 }
 0xdef   : > { %v5267_v15 = vpack.c.bf16 %v12491_v2, %v12491_v2  ;;  %v5301_v17 = vpop.permute.xlu2 %5300 }
 0xdf0   : > { %v5306_v40 = vsel %vm1280_vm2, %v5301_v17, 0 }
 0xdf1   : > { %5315 = vmatpush.bf16.msra.mxu2 %v5306_v40  ;;  %8939 = vmatmul.msk.bf16.vlgmr.msra.gmra.mxu3 %vm1188_vm1, %v5267_v15 }
 0xdf2   : > { %5600 = vmatpush.bf16.xpose.msra.mxu3 %v5591_v20 }
 0xdf5   : > { %v5655_v59 = vpop.permute.xlu0 %5654 }
 0xdf6   : > { %4753 = vadd.xlane.f32.xlu1 %v4752_v45 }
 0xdfb   : > { %v12519_v50 = vpop.permute.xlu1 %5698 }
 0xdfd   : > { %v12527_v17 = vpop.permute.xlu0 %5721 }
 0xdfe   : > { %5201 = vmax.xlane.f32.xlu2 %v5200_v19 }
 0xe06   : > { %4756 = vadd.xlane.f32.xlu2 %v4755_v8 }
 0xe0c   : > { %4750 = vadd.xlane.f32.xlu0 %v4749_v42 }
 0xe0e   : > { %4759 = vadd.xlane.f32.xlu2 %v4758_v6 }
 0xe0f   : > { %5897 = vrot.lane.b32.xlu1 %v12247_v18, %s10565_s14 }
 0xe14   : > { %4771 = vadd.xlane.f32.xlu0 %v4770_v14 }
 0xe16   : > { %4762 = vadd.xlane.f32.xlu2 %v4761_v62 }
 0xe17   : > { %5918 = vrot.lane.b32.xlu1 %v12318_v60, %s10565_s14 }
 0xe1e   : > { %4765 = vadd.xlane.f32.xlu2 %v4764_v24 }
 0xe1f   : > { %6121 = vrot.lane.b32.xlu1 %v12219_v43, %s10566_s19 }
 0xe26   : > { %4768 = vadd.xlane.f32.xlu2 %v4767_v51  ;;  %v5187_v15 = vpop.xlane.xlu1 %5186 }
 0xe27   : > { %v5209_v40 = vsub.f32 %v12432_v54, %v5187_v15  ;;  %v5660_v54 = vsel %vm1035_vm0, %v5655_v59, 0 }
 0xe28   : > { %v5208_v5 = vpop.xlane.xlu2 %5207  ;;  %5981 = vrot.lane.b32.xlu0 %v12256_v1, %s10565_s14 }
 0xe29   : > { %v5216_v41 = vsub.f32 %v12413_v31, %v5208_v5  ;;  %v5217_v45 = vmul.f32 1.442695, %v5209_v40 }
 0xe2b   : > { %v5231_v20 = vmul.f32 1.442695, %v5216_v41 }
 0xe2d   : > { %10010 = vpow2.f32 %v5231_v20  ;;  %v5706_v20 = vsel %vm1035_vm0, %v12474_v13, 0  ;;  %v5637_v13 = vsel %vm1035_vm0, %v12448_v33, 0  ;;  %v5239_v33 = vsel %vm1188_vm1, %v12491_v2, 0.0 }
 0xe2e   : > { %10012 = vpow2.f32 %v5217_v45 }
 0xe30   : > { %v12531_v19 = vpop.permute.xlu2 %5744  ;;  %6098 = vrot.lane.b32.xlu0 %v12290_v3, %s10566_s19 }
 0xe31   : > { %v5190_v43 = vpop.xlane.xlu0 %5189 }
 0xe32   : > { %v5210_v48 = vsub.f32 %v12440_v27, %v5190_v43 }
 0xe33   : > { %v12536_v8 = vpop.eup %10010 }
 0xe34   : > { %v5272_v42 = vpack.c.bf16 %v12536_v8, %v12536_v8  ;;  %v5219_v31 = vmul.f32 1.442695, %v5210_v48  ;;  %v10013_v6 = vpop.eup %10012 }
 0xe35   : > { %v5265_v24 = vpack.c.bf16 %v10013_v6, %v10013_v6  ;;  %v5233_v2 = vsel %vm1188_vm1, %v10013_v6, 0.0 }
 0xe36   : > { %10014 = vpow2.f32 %v5219_v31  ;;  %8944 = vmatmul.msk.bf16.vlgmr.msrb.gmra.mxu0 %vm1188_vm1, %v5272_v42 }
 0xe37   : > { %5669 = vmatpush.bf16.xpose.msrb.mxu0 %v5660_v54  ;;  %v5752_v54 = vsel %vm1035_vm0, %v12483_v52, 0 }
 0xe38   : > { %v5277_v14 = vpop.permute.xlu2 %5276 }
 0xe39   : > { %v5282_v3 = vsel %vm1280_vm2, %v5277_v14, 0  ;;  %v5199_v62 = vpop.xlane.xlu0 %5198 }
 0xe3a   : > { %5291 = vmatpush.bf16.msra.mxu1 %v5282_v3  ;;  %v5213_v45 = vsub.f32 %v12446_v12, %v5199_v62  ;;  %v5683_v3 = vsel %vm1035_vm0, %v12453_v47, 0  ;;  %v9539_v62 = vld [vmem:[#allocation8 + $0x40] sm:$0xff]  ;;  %v5729_v47 = vsel %vm1035_vm0, %v12461_v11, 0 }
 0xe3c   : > { %v10015_v27 = vpop.eup %10014  ;;  %v5225_v48 = vmul.f32 1.442695, %v5213_v45 }
 0xe3d   : > { %v5266_v51 = vpack.c.bf16 %v10015_v27, %v10015_v27  ;;  %8937 = vmatmul.msk.bf16.vlgmr.msra.gmra.mxu1 %vm1188_vm1, %v5265_v24  ;;  %v5236_v43 = vsel %vm1188_vm1, %v10015_v27, 0.0 }
 0xe3e   : > { %v5397_v15 = vpop.permute.xlu1 %5396  ;;  %5876 = vrot.lane.b32.xlu2 %v12422_v49, %s10565_s14 }
 0xe3f   : > { %v5402_v59 = vsel %vm1280_vm2, %v5397_v15, 0  ;;  %8938 = vmatmul.msk.bf16.vlgmr.msra.gmra.mxu2 %vm1188_vm1, %v5266_v51 }
 0xe40   : > { %5411 = vmatpush.bf16.msrb.mxu2 %v5402_v59 }
 0xe41   : > { %v5205_v5 = vpop.xlane.xlu0 %5204 }
 0xe42   : > { %v5215_v41 = vsub.f32 %v12415_v23, %v5205_v5 }
 0xe44   : > { %v5229_v40 = vmul.f32 1.442695, %v5215_v41 }
 0xe46   : > { %10016 = vpow2.f32 %v5229_v40  ;;  %5960 = vrot.lane.b32.xlu2 %v12455_v21, %s10565_s14  ;;  %8970 = vmatmul.msk.bf16.vlgmr.msra.gmra.mxu0 %vm1035_vm0, %v5607_v58 }
 0xe47   : > { %5715 = vmatpush.bf16.xpose.msra.mxu0 %v5706_v20  ;;  %10018 = vpow2.f32 %v5225_v48 }
 0xe49   : > { %5237 = vadd.xlane.f32.xlu1 %v5236_v43 }
 0xe4c   : > { %v12556_v42 = vpop.eup %10016 }
 0xe4d   : > { %v5271_v23 = vpack.c.bf16 %v12556_v42, %v12556_v42  ;;  %v10019_v12 = vpop.eup %10018 }
 0xe4e   : > { %v5269_v14 = vpack.c.bf16 %v10019_v12, %v10019_v12  ;;  %v5245_v6 = vsel %vm1188_vm1, %v10019_v12, 0.0 }
 0xe4f   : > { %8943 = vmatmul.msk.bf16.vlgmr.msrb.gmra.mxu3 %vm1188_vm1, %v5271_v23 }
 0xe50   : > { %5646 = vmatpush.bf16.xpose.msrb.mxu3 %v5637_v13 }
 0xe54   : > { %v5373_v31 = vpop.permute.xlu0 %5372 }
 0xe55   : > { %v5378_v58 = vsel %vm1280_vm2, %v5373_v31, 0 }
 0xe56   : > { %5387 = vmatpush.bf16.msrb.mxu1 %v5378_v58  ;;  %8972 = vmatmul.msk.bf16.vlgmr.msrb.gmra.mxu0 %vm1035_vm0, %v12476_v4  ;;  %v9540_v4 = vld [vmem:[#allocation8 + $0x48] sm:$0xff] }
 0xe57   : > { %5761 = vmatpush.bf16.xpose.msrb.mxu0 %v5752_v54  ;;  %5560 = vmatpush.bf16.msra.mxu2 %v9540_v4 }
 0xe59   : > { %8941 = vmatmul.msk.bf16.vlgmr.msrb.gmra.mxu1 %vm1188_vm1, %v5269_v14 }
 0xe5a   : > { %5240 = vadd.xlane.f32.xlu0 %v5239_v33 }
 0xe5b   : > { %5561 = vmatpush.bf16.msra.mxu2 %v9539_v62 }
 0xe5f   : > { %8969 = vmatmul.msk.bf16.vlgmr.msra.gmra.mxu3 %vm1035_vm0, %v12436_v9 }
 0xe60   : > { %5692 = vmatpush.bf16.xpose.msra.mxu3 %v5683_v3 }
 0xe62   : > { %6119 = vrot.lane.b32.xlu1 %v12296_v22, %s10566_s19 }
 0xe66   : > { %8974 = vmatmul.msk.bf16.vlgmr.msra.gmra.mxu0 %vm1035_vm0, %v12519_v50 }
 0xe69   : > { %v4754_v11 = vpop.xlane.xlu1 %4753 }
 0xe6a   : > { %v12579_v52 = vpop.f32.mrf.mxu0 }
 0xe6f   : > { %5234 = vadd.xlane.f32.xlu2 %v5233_v2  ;;  %8971 = vmatmul.msk.bf16.vlgmr.msrb.gmra.mxu3 %vm1035_vm0, %v12442_v32 }
 0xe70   : > { %5738 = vmatpush.bf16.xpose.msrb.mxu3 %v5729_v47 }
 0xe71   : > { %v5202_v22 = vpop.xlane.xlu2 %5201 }
 0xe72   : > { %v5214_v9 = vsub.f32 %v12459_v16, %v5202_v22  ;;  %v5367_v50 = vpop.f32.mrf.mxu0  ;;  %v5242_v16 = vsel %vm1188_vm1, %v12485_v26, 0.0 }
 0xe74   : > { %v5227_v24 = vmul.f32 1.442695, %v5214_v9  ;;  %v12587_v27 = vpop.f32.mrf.mxu3 }
 0xe76   : > { %10020 = vpow2.f32 %v5227_v24  ;;  %8976 = vmatmul.msk.bf16.vlgmr.msrb.gmra.mxu0 %vm1035_vm0, %v12531_v19 }
 0xe77   : > { %5246 = vadd.xlane.f32.xlu2 %v5245_v6 }
 0xe79   : > { %v4757_v51 = vpop.xlane.xlu2 %4756 }
 0xe7c   : > { %v10021_v15 = vpop.eup %10020  ;;  %v5343_v59 = vpop.f32.mrf.mxu3 }
 0xe7d   : > { %v5270_v32 = vpack.c.bf16 %v10021_v15, %v10021_v15  ;;  %v5248_v5 = vsel %vm1188_vm1, %v10021_v15, 0.0 }
 0xe7e   : > { %5249 = vadd.xlane.f32.xlu0 %v5248_v5 }
 0xe7f   : > { %8942 = vmatmul.msk.bf16.vlgmr.msrb.gmra.mxu2 %vm1188_vm1, %v5270_v32  ;;  %5243 = vadd.xlane.f32.xlu2 %v5242_v16  ;;  %v4751_v41 = vpop.xlane.xlu0 %4750 }
 0xe80   : > { %8973 = vmatmul.msk.bf16.vlgmr.msra.gmra.mxu3 %vm1035_vm0, %v12468_v56  ;;  %10022 = vrcp.f32 %v4751_v41  ;;  %v5254_v56 = vsel %vm1188_vm1, %v12536_v8, 0.0  ;;  %v9542_v41 = vld [vmem:[#allocation8 + $0x58] sm:$0xff] }
 0xe81   : > { %v5898_v19 = vpop.permute.xlu1 %5897  ;;  %v4760_v40 = vpop.xlane.xlu2 %4759  ;;  %10024 = vrcp.f32 %v4754_v11  ;;  %5507 = vmatpush.bf16.msra.mxu1 %v9542_v41 }
 0xe82   : > { %v5903_v20 = vsel %vm1280_vm2, %v5898_v19, 0  ;;  %10026 = vrcp.f32 %v4760_v40  ;;  %v9541_v40 = vld [vmem:[#allocation8 + $0x50] sm:$0xff] }
 0xe83   : > { %5912 = vmatpush.bf16.msra.mxu3 %v5903_v20  ;;  %10028 = vrcp.f32 %v4757_v51 }
 0xe85   : > { %5508 = vmatpush.bf16.msra.mxu1 %v9541_v40 }
 0xe86   : > { %v10023_v45 = vpop.eup %10022 }
 0xe87   : > { %v10025_v43 = vpop.eup %10024  ;;  %v4941_v48 = vmul.f32 %v10023_v45, %v12400_v28  ;;  %v4772_v28 = vpop.xlane.xlu0 %4771 }
 0xe88   : > { %v4942_v12 = vmul.f32 %v10025_v43, %v12426_v35  ;;  %v10027_v54 = vpop.eup %10026 }
 0xe89   : > { %v5919_v23 = vpop.permute.xlu1 %5918  ;;  %v4763_v26 = vpop.xlane.xlu2 %4762  ;;  %v4944_v14 = vmul.f32 %v10027_v54, %v12370_v29 }
 0xe8a   : > { %v5924_v13 = vsel %vm1280_vm2, %v5919_v23, 0  ;;  %v4949_v31 = vpack.c.bf16 %v4942_v12, %v4941_v48  ;;  %v10029_v35 = vpop.eup %10028 }
 0xe8b   : > { %5933 = vmatpush.bf16.msra.mxu0 %v5924_v13  ;;  %v4943_v3 = vmul.f32 %v10029_v35, %v12372_v57 }
 0xe8c   : > { %5255 = vadd.xlane.f32.xlu1 %v5254_v56 }
 0xe8f   : > { %8965 = vmatmul.msk.bf16.vlgmr.msra.gmra.mxu2 %vm1035_vm0, %v4949_v31 }
 0xe90   : > { %8975 = vmatmul.msk.bf16.vlgmr.msrb.gmra.mxu3 %vm1035_vm0, %v12527_v17  ;;  %v4950_v17 = vpack.c.bf16 %v4944_v14, %v4943_v3 }
 0xe91   : > { %v4766_v58 = vpop.xlane.xlu2 %4765  ;;  %v12639_v48 = vpop.permute.xlu1 %6121 }
 0xe92   : > { %6002 = vrot.lane.b32.xlu0 %v12329_v61, %s10565_s14  ;;  %10030 = vrcp.f32 %v4766_v58 }
 0xe93   : > { %10032 = vrcp.f32 %v4763_v26 }
 0xe98   : > { %v10031_v29 = vpop.eup %10030 }
 0xe99   : > { %v4769_v33 = vpop.xlane.xlu2 %4768  ;;  %v4946_v47 = vmul.f32 %v10031_v29, %v12430_v63 }
 0xe9a   : > { %6096 = vrot.lane.b32.xlu0 %v12232_v38, %s10566_s19  ;;  %v5982_v8 = vpop.permute.xlu0 %5981  ;;  %v10033_v38 = vpop.eup %10032  ;;  %10034 = vrcp.f32 %v4769_v33 }
 0xe9b   : > { %v5987_v4 = vsel %vm1280_vm2, %v5982_v8, 0  ;;  %v4945_v9 = vmul.f32 %v10033_v38, %v12428_v46  ;;  %10036 = vrcp.f32 %v4772_v28 }
 0xe9c   : > { %5996 = vmatpush.bf16.msrb.mxu3 %v5987_v4 }
 0xe9d   : > { %v4951_v50 = vpack.c.bf16 %v4946_v47, %v4945_v9 }
 0xe9f   : > { %8966 = vmatmul.msk.bf16.gmra.mxu2 %vm1035_vm0, %v4950_v17 }
 0xea0   : > { %v10035_v6 = vpop.eup %10034 }
 0xea1   : > { %v5877_v62 = vpop.permute.xlu2 %5876  ;;  %v4947_v11 = vmul.f32 %v10035_v6, %v12409_v34 }
 0xea2   : > { %v5882_v2 = vsel %vm1280_vm2, %v5877_v62, 0  ;;  %6144 = vrot.lane.b32.xlu0 %v12099_v10, %s10566_s19  ;;  %v10037_v10 = vpop.eup %10036  ;;  %v12649_v35 = vpop.permute.xlu0 %6098 }
 0xea3   : > { %5891 = vmatpush.bf16.msrb.mxu2 %v5882_v2  ;;  %v4948_v63 = vmul.f32 %v10037_v10, %v12407_v37  ;;  %v5251_v37 = vsel %vm1188_vm1, %v12556_v42, 0.0 }
 0xea5   : > { %v4952_v59 = vpack.c.bf16 %v4948_v63, %v4947_v11 }
 0xea9   : > { %v5961_v57 = vpop.permute.xlu2 %5960 }
 0xeaa   : > { %v5966_v22 = vsel %vm1280_vm2, %v5961_v57, 0 }
 0xeab   : > { %5975 = vmatpush.bf16.msra.mxu2 %v5966_v22 }
 0xeaf   : > { %8967 = vmatmul.msk.bf16.gmra.mxu2 %vm1035_vm0, %v4951_v50 }
 0xeb3   : > { %v12622_v24 = vpop.f32.mrf.mxu0 }
 0xeba   : > { %v5293_v51 = vpop.f32.mrf.mxu1 }
 0xebb   : > { %v5463_v15 = vpop.f32.mrf.mxu0 }
 0xebc   : > { %v5238_v12 = vpop.xlane.xlu1 %5237 }
 0xebd   : > { %10038 = vrcp.f32 %v5238_v12 }
 0xebf   : > { %8968 = vmatmul.msk.bf16.gmra.mxu2 %vm1035_vm0, %v4952_v59 }
 0xec2   : > { %v5295_v46 = vpop.f32.mrf.mxu1  ;;  %v5317_v32 = vpop.f32.mrf.mxu2 }
 0xec3   : > { %v12627_v5 = vpop.f32.mrf.mxu0  ;;  %v10039_v14 = vpop.eup %10038 }
 0xec4   : > { %v5770_v16 = vsel %vm1188_vm1, %v12627_v5, -inf  ;;  %v5466_v8 = vmul.f32 %v10039_v14, %v5317_v32 }
 0xec5   : > { %5771 = vmax.xlane.f32.xlu2 %v5770_v16 }
 0xeca   : > { %v5319_v19 = vpop.f32.mrf.mxu2 }
 0xecb   : > { %v5627_v34 = vpop.f32.mrf.mxu0 }
 0xecd   : > { %5252 = vadd.xlane.f32.xlu2 %v5251_v37  ;;  %v5241_v29 = vpop.xlane.xlu0 %5240 }
 0xed2   : > { %v12633_v20 = vpop.f32.mrf.mxu3 }
 0xed3   : > { %v12635_v45 = vpop.f32.mrf.mxu0 }
 0xed4   : > { %v5776_v43 = vsel %vm1188_vm1, %v12635_v45, -inf }
 0xed5   : > { %5777 = vmax.xlane.f32.xlu0 %v5776_v43 }
 0xed6   : > { %v5389_v23 = vpop.f32.mrf.mxu1 }
 0xeda   : > { %v5439_v26 = vpop.f32.mrf.mxu3 }
 0xedb   : > { %v5673_v13 = vpop.f32.mrf.mxu0 }
 0xede   : > { %v5391_v56 = vpop.f32.mrf.mxu1 }
 0xee2   : > { %v5235_v31 = vpop.xlane.xlu2 %5234  ;;  %v12641_v42 = vpop.f32.mrf.mxu3 }
 0xee3   : > { %10040 = vrcp.f32 %v5235_v31  ;;  %v12643_v58 = vpop.f32.mrf.mxu0  ;;  %v5767_v28 = vsel %vm1188_vm1, %v12641_v42, -inf }
 0xee4   : > { %5768 = vmax.xlane.f32.xlu2 %v5767_v28  ;;  %v5782_v54 = vsel %vm1188_vm1, %v12643_v58, -inf  ;;  %10042 = vrcp.f32 %v5241_v29 }
 0xee5   : > { %5783 = vmax.xlane.f32.xlu1 %v5782_v54  ;;  %v13450_v54 = vld [vmem:[#allocation38_spill] sm:$0xff] }
 0xee9   : > { %v10041_v33 = vpop.eup %10040 }
 0xeea   : > { %v5465_v3 = vmul.f32 %v10041_v33, %v5293_v51  ;;  %v5247_v4 = vpop.xlane.xlu2 %5246  ;;  %v5604_v17 = vpop.f32.mrf.mxu3 }
 0xeeb   : > { %v5719_v62 = vpop.f32.mrf.mxu0  ;;  %v10043_v9 = vpop.eup %10042 }
 0xeec   : > { %v5473_v2 = vpack.c.bf16 %v5466_v8, %v5465_v3  ;;  %v5467_v6 = vmul.f32 %v10043_v9, %v12587_v27  ;;  %v13451_v62 = vld [vmem:[#allocation39_spill] sm:$0xff] }
 0xeee   : > { %8953 = vmatmul.msk.bf16.vlgmr.msra.gmra.mxu1 %vm1035_vm0, %v5473_v2 }
 0xef1   : > { %v5250_v15 = vpop.xlane.xlu0 %5249 }
 0xef2   : > { %v5244_v38 = vpop.xlane.xlu2 %5243  ;;  %v12652_v47 = vpop.f32.mrf.mxu3 }
 0xef3   : > { %10044 = vrcp.f32 %v5244_v38  ;;  %v12654_v57 = vpop.f32.mrf.mxu0  ;;  %v5773_v22 = vsel %vm1188_vm1, %v12652_v47, -inf }
 0xef4   : > { %5774 = vmax.xlane.f32.xlu0 %v5773_v22  ;;  %v5788_v63 = vsel %vm1188_vm1, %v12654_v57, -inf  ;;  %10046 = vrcp.f32 %v5247_v4 }
 0xef5   : > { %10048 = vrcp.f32 %v5250_v15 }
 0xef9   : > { %v10045_v50 = vpop.eup %10044 }
 0xefa   : > { %v5468_v10 = vmul.f32 %v10045_v50, %v12579_v52  ;;  %v5650_v11 = vpop.f32.mrf.mxu3  ;;  %v10047_v16 = vpop.eup %10046 }
 0xefb   : > { %v5765_v51 = vpop.f32.mrf.mxu0  ;;  %v10049_v41 = vpop.eup %10048  ;;  %v5469_v19 = vmul.f32 %v10047_v16, %v5389_v23 }
 0xefc   : > { %5789 = vmax.xlane.f32.xlu0 %v5788_v63  ;;  %5855 = vrot.lane.b32.xlu2 %v12470_v39, %s10565_s14  ;;  %v5474_v59 = vpack.c.bf16 %v5468_v10, %v5467_v6  ;;  %v13453_v6 = vld [vmem:[#allocation37_spill] sm:$0xff] }
 0xefe   : > { %6165 = vrot.lane.b32.xlu1 %v12245_v7, %s10566_s19  ;;  %8954 = vmatmul.msk.bf16.gmra.mxu1 %vm1035_vm0, %v5474_v59 }
 0xf02   : > { %v5413_v27 = vpop.f32.mrf.mxu2 }
 0xf03   : > { %v12667_v52 = vpop.f32.mrf.mxu3  ;;  %v5470_v7 = vmul.f32 %v10049_v41, %v5413_v27 }
 0xf04   : > { %6236 = vrot.lane.b32.xlu2 %v12175_v25, %s10566_s19  ;;  %v6003_v46 = vpop.permute.xlu0 %6002  ;;  %v5779_v23 = vsel %vm1188_vm1, %v12667_v52, -inf }
 0xf05   : > { %v6008_v32 = vsel %vm1280_vm2, %v6003_v46, 0  ;;  %v5475_v37 = vpack.c.bf16 %v5470_v7, %v5469_v19 }
 0xf06   : > { %6211 = vrot.lane.b32.xlu1 %v12306_v44, %s10566_s19  ;;  %6017 = vmatpush.bf16.msrb.mxu0 %v6008_v32 }
 0xf0a   : > { %v5415_v40 = vpop.f32.mrf.mxu2 }
 0xf0b   : > { %v5696_v34 = vpop.f32.mrf.mxu3 }
 0xf0c   : > { %6234 = vrot.lane.b32.xlu2 %v12187_v0, %s10566_s19  ;;  %v12689_v0 = vpop.permute.xlu1 %6119  ;;  %v12691_v26 = vpop.permute.xlu0 %6096  ;;  %v6127_v34 = vsel %vm1035_vm0, %v12639_v48, 0 }
 0xf0e   : > { %8955 = vmatmul.msk.bf16.gmra.mxu1 %vm1035_vm0, %v5475_v37 }
 0xf13   : > { %v12677_v25 = vpop.f32.mrf.mxu3 }
 0xf14   : > { %v5785_v43 = vsel %vm1188_vm1, %v12677_v25, -inf  ;;  %5939 = vrot.lane.b32.xlu2 %v12479_v53, %s10565_s14  ;;  %v5256_v31 = vpop.xlane.xlu1 %5255  ;;  %s8352_s14 = sshll.u32 %s10817_s21, 3 }
 0xf15   : > { %5786 = vmax.xlane.f32.xlu0 %v5785_v43  ;;  %s717_s23 = scalar_lea.vmem [#allocation19], %s8352_s14  ;;  %s10476_s14 = scalar_lea.hbm %s13477_s16, 16 }
 0xf16   : > { %s8167_s28 = sshll.u32 %s717_s23, 4  ;;  %s8168_s28 = int_to_ptr.vmem [resolvable:$true] %s8167_s28 }
 0xf1b   : > { %v5742_v44 = vpop.f32.mrf.mxu3 }
 0xf1c   : > { %v12739_v44 = vpop.f32.mrf.mxu2 }
 0xf29   : > { %6167 = vrot.lane.b32.xlu0 %v12114_v36, %s10566_s19  ;;  %v6145_v36 = vpop.permute.xlu0 %6144 }
 0xf2a   : > { %v6150_v22 = vsel %vm1035_vm0, %v6145_v36, 0 }
 0xf30   : > { %5780 = vmax.xlane.f32.xlu1 %v5779_v23 }
 0xf31   : > { %6142 = vrot.lane.b32.xlu0 %v12109_v30, %s10566_s19 }
 0xf38   : > { %v5772_v13 = vpop.xlane.xlu2 %5771 }
 0xf39   : > { %v5792_v12 = vsub.f32 %v12627_v5, %v5772_v13  ;;  %6190 = vrot.lane.b32.xlu0 %v12237_v55, %s10566_s19  ;;  %v6104_v5 = vsel %vm1035_vm0, %v12649_v35, 0  ;;  %v13452_v35 = vld [vmem:[#allocation36_spill] sm:$0xff] }
 0xf3b   : > { %v5801_v56 = vmul.f32 1.442695, %v5792_v12 }
 0xf3d   : > { %10050 = vpow2.f32 %v5801_v56 }
 0xf3e   : > { %10052 = vrcp.f32 %v5256_v31 }
 0xf40   : > { %v5253_v28 = vpop.xlane.xlu2 %5252 }
 0xf41   : > { %6213 = vrot.lane.b32.xlu0 %v13450_v54, %s10566_s19  ;;  %10054 = vrcp.f32 %v5253_v28 }
 0xf43   : > { %v10051_v30 = vpop.eup %10050 }
 0xf44   : > { %v5848_v14 = vpack.c.bf16 %v10051_v30, %v10051_v30  ;;  %v5818_v33 = vsel %vm1188_vm1, %v10051_v30, 0.0  ;;  %v10053_v8 = vpop.eup %10052 }
 0xf45   : > { %5819 = vadd.xlane.f32.xlu2 %v5818_v33  ;;  %v5472_v3 = vmul.f32 %v10053_v8, %v12622_v24 }
 0xf46   : > { %8978 = vmatmul.msk.bf16.vlgmr.msrb.gmra.mxu2 %vm1188_vm1, %v5848_v14 }
 0xf47   : > { %v10055_v55 = vpop.eup %10054  ;;  %6113 = vmatpush.bf16.xpose.msrb.mxu2 %v6104_v5 }
 0xf48   : > { %v5471_v4 = vmul.f32 %v10055_v55, %v12633_v20  ;;  %v5778_v17 = vpop.xlane.xlu0 %5777 }
 0xf49   : > { %6188 = vrot.lane.b32.xlu0 %v13451_v62, %s10566_s19  ;;  %v5794_v2 = vsub.f32 %v12635_v45, %v5778_v17  ;;  %6389 = vrot.lane.b32.xlu1 %v12422_v49, %s10566_s19 }
 0xf4a   : > { %v5476_v29 = vpack.c.bf16 %v5472_v3, %v5471_v4 }
 0xf4b   : > { %v5805_v38 = vmul.f32 1.442695, %v5794_v2 }
 0xf4c   : > { %8956 = vmatmul.msk.bf16.gmra.mxu1 %vm1035_vm0, %v5476_v29 }
 0xf4d   : > { %10056 = vpow2.f32 %v5805_v38 }
 0xf51   : > { %6259 = vrot.lane.b32.xlu0 %v13452_v35, %s10566_s19  ;;  %6410 = vrot.lane.b32.xlu1 %v12247_v18, %s10566_s19 }
 0xf53   : > { %v10057_v24 = vpop.eup %10056 }
 0xf54   : > { %v5850_v20 = vpack.c.bf16 %v10057_v24, %v10057_v24 }
 0xf56   : > { %8980 = vmatmul.msk.bf16.vlgmr.msra.gmra.mxu0 %vm1188_vm1, %v5850_v20 }
 0xf57   : > { %6159 = vmatpush.bf16.xpose.msra.mxu0 %v6150_v22  ;;  %v5769_v45 = vpop.xlane.xlu2 %5768 }
 0xf58   : > { %v5791_v49 = vsub.f32 %v12641_v42, %v5769_v45  ;;  %v5784_v9 = vpop.xlane.xlu1 %5783 }
 0xf59   : > { %v5796_v50 = vsub.f32 %v12643_v58, %v5784_v9  ;;  %6257 = vrot.lane.b32.xlu0 %v13453_v6, %s10566_s19 }
 0xf5a   : > { %v5799_v10 = vmul.f32 1.442695, %v5791_v49 }
 0xf5b   : > { %v5809_v11 = vmul.f32 1.442695, %v5796_v50 }
 0xf5c   : > { %10058 = vpow2.f32 %v5799_v10 }
 0xf5d   : > { %10060 = vpow2.f32 %v5809_v11  ;;  %6431 = vrot.lane.b32.xlu2 %v12318_v60, %s10566_s19 }
 0xf5f   : > { %v5856_v18 = vpop.permute.xlu2 %5855 }
 0xf60   : > { %v5861_v51 = vsel %vm1280_vm2, %v5856_v18, 0 }
 0xf61   : > { %5870 = vmatpush.bf16.msrb.mxu1 %v5861_v51 }
 0xf62   : > { %v10059_v63 = vpop.eup %10058 }
 0xf63   : > { %v12723_v15 = vpop.eup %10060  ;;  %v5847_v42 = vpack.c.bf16 %v10059_v63, %v10059_v63  ;;  %v5815_v48 = vsel %vm1188_vm1, %v10059_v63, 0.0 }
 0xf64   : > { %v5852_v58 = vpack.c.bf16 %v12723_v15, %v12723_v15  ;;  %v5830_v63 = vsel %vm1188_vm1, %v12723_v15, 0.0 }
 0xf65   : > { %8977 = vmatmul.msk.bf16.vlgmr.msrb.gmra.mxu1 %vm1188_vm1, %v5847_v42 }
 0xf66   : > { %8982 = vmatmul.msk.bf16.vlgmr.msra.gmra.mxu2 %vm1188_vm1, %v5852_v58 }
 0xf67   : > { %v6237_v59 = vpop.permute.xlu2 %6236  ;;  %v5775_v27 = vpop.xlane.xlu0 %5774 }
 0xf68   : > { %v5793_v46 = vsub.f32 %v12652_v47, %v5775_v27  ;;  %v6242_v55 = vsel %vm1035_vm0, %v6237_v59, 0 }
 0xf6a   : > { %v5803_v60 = vmul.f32 1.442695, %v5793_v46 }
 0xf6b   : > { %v12750_v14 = vpop.f32.mrf.mxu1 }
 0xf6c   : > { %10062 = vpow2.f32 %v5803_v60 }
 0xf6f   : > { %v12730_v32 = vpop.permute.xlu2 %6234  ;;  %v5790_v16 = vpop.xlane.xlu0 %5789 }
 0xf70   : > { %v5798_v41 = vsub.f32 %v12654_v57, %v5790_v16  ;;  %v5824_v57 = vsel %vm1188_vm1, %v10057_v24, 0.0  ;;  %v6166_v28 = vpop.permute.xlu1 %6165 }
 0xf72   : > { %v10063_v7 = vpop.eup %10062  ;;  %v5813_v19 = vmul.f32 1.442695, %v5798_v41 }
 0xf73   : > { %v5849_v40 = vpack.c.bf16 %v10063_v7, %v10063_v7  ;;  %v5821_v13 = vsel %vm1188_vm1, %v10063_v7, 0.0  ;;  %v12759_v3 = vpop.f32.mrf.mxu1 }
 0xf74   : > { %10064 = vpow2.f32 %v5813_v19  ;;  %v9544_v19 = vld [vmem:[#allocation8 + $0x68] sm:$0xff] }
 0xf75   : > { %8979 = vmatmul.msk.bf16.vlgmr.msra.gmra.mxu3 %vm1188_vm1, %v5849_v40 }
 0xf76   : > { %6136 = vmatpush.bf16.xpose.msra.mxu3 %v6127_v34  ;;  %8997 = vmatmul.msk.bf16.vlgmr.msrb.gmra.mxu2 %vm1035_vm0, %v12691_v26  ;;  %v12745_v26 = vpop.f32.mrf.mxu2 }
 0xf77   : > { %v5940_v47 = vpop.permute.xlu2 %5939 }
 0xf78   : > { %v5945_v37 = vsel %vm1280_vm2, %v5940_v47, 0  ;;  %v6212_v8 = vpop.permute.xlu1 %6211  ;;  %v9543_v47 = vld [vmem:[#allocation8 + $0x60] sm:$0xff] }
 0xf79   : > { %5954 = vmatpush.bf16.msra.mxu1 %v5945_v37 }
 0xf7a   : > { %v10065_v43 = vpop.eup %10064 }
 0xf7b   : > { %v5854_v23 = vpack.c.bf16 %v10065_v43, %v10065_v43  ;;  %5825 = vadd.xlane.f32.xlu1 %v5824_v57  ;;  %v12768_v29 = vpop.f32.mrf.mxu1  ;;  %v5836_v50 = vsel %vm1188_vm1, %v10065_v43, 0.0 }
 0xf7d   : > { %8984 = vmatmul.msk.bf16.vlgmr.msrb.gmra.mxu0 %vm1188_vm1, %v5854_v23  ;;  %6065 = vmatpush.bf16.msrb.mxu1 %v9544_v19 }
 0xf7e   : > { %v12748_v36 = vpop.f32.mrf.mxu2 }
 0xf81   : > { %6066 = vmatpush.bf16.msrb.mxu1 %v9543_v47 }
 0xf83   : > { %5816 = vadd.xlane.f32.xlu0 %v5815_v48  ;;  %5822 = vadd.xlane.f32.xlu1 %v5821_v13  ;;  %v12775_v49 = vpop.f32.mrf.mxu1 }
 0xf86   : > { %v12755_v33 = vpop.f32.mrf.mxu2 }
 0xf88   : > { %v5787_v12 = vpop.xlane.xlu0 %5786 }
 0xf89   : > { %v5797_v56 = vsub.f32 %v12677_v25, %v5787_v12 }
 0xf8b   : > { %v5811_v31 = vmul.f32 1.442695, %v5797_v56  ;;  %v12786_v18 = vpop.f32.mrf.mxu1 }
 0xf8d   : > { %10066 = vpow2.f32 %v5811_v31 }
 0xf8e   : > { %v12761_v4 = vpop.f32.mrf.mxu2 }
 0xf93   : > { %v10067_v54 = vpop.eup %10066  ;;  %v12795_v60 = vpop.f32.mrf.mxu1 }
 0xf94   : > { %v5853_v30 = vpack.c.bf16 %v10067_v54, %v10067_v54  ;;  %v5833_v51 = vsel %vm1188_vm1, %v10067_v54, 0.0 }
 0xf96   : > { %8983 = vmatmul.msk.bf16.vlgmr.msrb.gmra.mxu3 %vm1188_vm1, %v5853_v30  ;;  %v12771_v24 = vpop.f32.mrf.mxu2 }
 0xf97   : > { %6368 = vrot.lane.b32.xlu0 %v12470_v39, %s10566_s19 }
 0xf9b   : > { %v6168_v5 = vpop.permute.xlu0 %6167 }
 0xf9c   : > { %v6173_v25 = vsel %vm1035_vm0, %v6168_v5, 0 }
 0xf9d   : > { %6182 = vmatpush.bf16.xpose.msra.mxu2 %v6173_v25 }
 0xf9e   : > { %v12780_v9 = vpop.f32.mrf.mxu2 }
 0xfa3   : > { %v6143_v17 = vpop.permute.xlu0 %6142  ;;  %v5781_v62 = vpop.xlane.xlu1 %5780 }
 0xfa4   : > { %v5795_v2 = vsub.f32 %v12667_v52, %v5781_v62  ;;  %8999 = vmatmul.msk.bf16.vlgmr.msra.gmra.mxu0 %vm1035_vm0, %v6143_v17  ;;  %9000 = vmatmul.msk.bf16.vlgmr.msra.gmra.mxu2 %vm1035_vm0, %v6166_v28 }
 0xfa5   : > { %6251 = vmatpush.bf16.xpose.msrb.mxu2 %v6242_v55 }
 0xfa6   : > { %v5807_v39 = vmul.f32 1.442695, %v5795_v2  ;;  %8998 = vmatmul.msk.bf16.vlgmr.msra.gmra.mxu3 %vm1035_vm0, %v12689_v0  ;;  %v12791_v42 = vpop.f32.mrf.mxu2 }
 0xfa8   : > { %10068 = vpow2.f32 %v5807_v39 }
 0xfab   : > { %v6191_v38 = vpop.permute.xlu0 %6190 }
 0xfac   : > { %v6196_v35 = vsel %vm1035_vm0, %v6191_v38, 0 }
 0xfad   : > { %6205 = vmatpush.bf16.xpose.msrb.mxu3 %v6196_v35 }
 0xfae   : > { %v10069_v20 = vpop.eup %10068 }
 0xfaf   : > { %v5851_v22 = vpack.c.bf16 %v10069_v20, %v10069_v20  ;;  %v5827_v52 = vsel %vm1188_vm1, %v10069_v20, 0.0 }
 0xfb0   : > { %5828 = vadd.xlane.f32.xlu2 %v5827_v52 }
 0xfb1   : > { %8981 = vmatmul.msk.bf16.vlgmr.msra.gmra.mxu1 %vm1188_vm1, %v5851_v22 }
 0xfb3   : > { %v6214_v45 = vpop.permute.xlu0 %6213 }
 0xfb4   : > { %v6219_v0 = vsel %vm1035_vm0, %v6214_v45, 0  ;;  %9003 = vmatmul.msk.bf16.vlgmr.msrb.gmra.mxu2 %vm1035_vm0, %v12730_v32 }
 0xfb5   : > { %6228 = vmatpush.bf16.xpose.msrb.mxu0 %v6219_v0 }
 0xfb8   : > { %5837 = vadd.xlane.f32.xlu2 %v5836_v50  ;;  %v5820_v48 = vpop.xlane.xlu2 %5819 }
 0xfb9   : > { %10070 = vrcp.f32 %v5820_v48 }
 0xfbb   : > { %v6189_v6 = vpop.permute.xlu0 %6188  ;;  %v6390_v10 = vpop.permute.xlu1 %6389 }
 0xfbc   : > { %v6395_v11 = vsel %vm1280_vm2, %v6390_v10, 0  ;;  %9001 = vmatmul.msk.bf16.vlgmr.msrb.gmra.mxu3 %vm1035_vm0, %v6189_v6  ;;  %9002 = vmatmul.msk.bf16.vlgmr.msrb.gmra.mxu0 %vm1035_vm0, %v6212_v8 }
 0xfbd   : > { %6404 = vmatpush.bf16.msra.mxu2 %v6395_v11 }
 0xfbf   : > { %v10071_v30 = vpop.eup %10070 }
 0xfc0   : > { %5834 = vadd.xlane.f32.xlu2 %v5833_v51  ;;  %v6432_v38 = vpop.permute.xlu2 %6431 }
 0xfc1   : > { %5831 = vadd.xlane.f32.xlu0 %v5830_v63  ;;  %v6437_v45 = vsel %vm1280_vm2, %v6432_v38, 0 }
 0xfc3   : > { %v6260_v58 = vpop.permute.xlu0 %6259  ;;  %v6411_v59 = vpop.permute.xlu1 %6410 }
 0xfc4   : > { %v6265_v27 = vsel %vm1035_vm0, %v6260_v58, 0  ;;  %v6416_v46 = vsel %vm1280_vm2, %v6411_v59, 0 }
 0xfc5   : > { %6274 = vmatpush.bf16.xpose.msra.mxu3 %v6265_v27 }
 0xfc9   : > { %v5893_v32 = vpop.f32.mrf.mxu2  ;;  %v12798_v41 = vpop.f32.mrf.mxu1 }
 0xfca   : > { %v6024_v5 = vmul.f32 %v10071_v30, %v5893_v32 }
 0xfcb   : > { %v6258_v16 = vpop.permute.xlu0 %6257 }
 0xfcc   : > { %9004 = vmatmul.msk.bf16.vlgmr.msra.gmra.mxu3 %vm1035_vm0, %v6258_v16 }
 0xfcd   : > { %6425 = vmatpush.bf16.msrb.mxu3 %v6416_v46 }
 0xfd1   : > { %v5895_v15 = vpop.f32.mrf.mxu2  ;;  %v12800_v40 = vpop.f32.mrf.mxu1 }
 0xfd3   : > { %v5935_v7 = vpop.f32.mrf.mxu0 }
 0xfdb   : > { %v5937_v34 = vpop.f32.mrf.mxu0 }
 0xfe2   : > { %v5872_v37 = vpop.f32.mrf.mxu1 }
 0xfe9   : > { %v12802_v43 = vpop.f32.mrf.mxu2 }
 0xfea   : > { %v5874_v57 = vpop.f32.mrf.mxu1 }
 0xfee   : > { %v5826_v13 = vpop.xlane.xlu1 %5825 }
 0xff1   : > { %v5979_v23 = vpop.f32.mrf.mxu2 }
 0xff6   : > { %v5817_v12 = vpop.xlane.xlu0 %5816  ;;  %v5823_v17 = vpop.xlane.xlu1 %5822 }
 0xff7   : > { %10072 = vrcp.f32 %v5817_v12 }
 0xff8   : > { %v5914_v56 = vpop.f32.mrf.mxu3  ;;  %10074 = vrcp.f32 %v5823_v17 }
 0xff9   : > { %v12804_v31 = vpop.f32.mrf.mxu2  ;;  %10076 = vrcp.f32 %v5826_v13 }
 0xffa   : > { %v12806_v28 = vpop.f32.mrf.mxu0  ;;  %v6280_v54 = vsel %vm1188_vm1, %v12804_v31, -inf }
 0xffb   : > { %6281 = vmax.xlane.f32.xlu1 %v6280_v54 }
 0xffd   : > { %v10073_v8 = vpop.eup %10072 }
 0xffe   : > { %v6023_v25 = vmul.f32 %v10073_v8, %v5872_v37  ;;  %v10075_v35 = vpop.eup %10074 }
 0xfff   : > { %v10077_v52 = vpop.eup %10076  ;;  %v6025_v0 = vmul.f32 %v10075_v35, %v5914_v56 }
0x1000   : > { %v6031_v55 = vpack.c.bf16 %v6024_v5, %v6023_v25  ;;  %v5916_v62 = vpop.f32.mrf.mxu3  ;;  %v6026_v50 = vmul.f32 %v10077_v52, %v5935_v7 }
0x1001   : > { %v6117_v2 = vpop.f32.mrf.mxu2 }
0x1002   : > { %8993 = vmatmul.msk.bf16.vlgmr.msrb.gmra.mxu1 %vm1035_vm0, %v6031_v55  ;;  %v6021_v39 = vpop.f32.mrf.mxu0  ;;  %v6032_v6 = vpack.c.bf16 %v6026_v50, %v6025_v0 }
0x1009   : > { %v6369_v20 = vpop.permute.xlu0 %6368 }
0x100a   : > { %v6374_v22 = vsel %vm1280_vm2, %v6369_v20, 0 }
0x100b   : > { %6383 = vmatpush.bf16.msra.mxu0 %v6374_v22 }
0x100f   : > { %6446 = vmatpush.bf16.msrb.mxu0 %v6437_v45 }
0x1012   : > { %8994 = vmatmul.msk.bf16.gmra.mxu1 %vm1035_vm0, %v6032_v6 }
0x1019   : > { %v5998_v10 = vpop.f32.mrf.mxu3 }
0x1021   : > { %v6000_v11 = vpop.f32.mrf.mxu3  ;;  %v12814_v51 = vpop.f32.mrf.mxu0 }
0x1022   : > { %v6286_v63 = vsel %vm1188_vm1, %v12814_v51, -inf }
0x1023   : > { %6287 = vmax.xlane.f32.xlu2 %v6286_v63  ;;  %v5829_v46 = vpop.xlane.xlu2 %5828 }
0x1024   : > { %10078 = vrcp.f32 %v5829_v46 }
0x1027   : > { %v12818_v58 = vpop.f32.mrf.mxu2 }
0x1028   : > { %v6289_v16 = vsel %vm1188_vm1, %v12818_v58, -inf }
0x1029   : > { %v12820_v59 = vpop.f32.mrf.mxu3  ;;  %v6163_v27 = vpop.f32.mrf.mxu0 }
0x102a   : > { %v6283_v32 = vsel %vm1188_vm1, %v12820_v59, -inf  ;;  %v10079_v48 = vpop.eup %10078 }
0x102b   : > { %6284 = vmax.xlane.f32.xlu0 %v6283_v32  ;;  %6290 = vmax.xlane.f32.xlu2 %v6289_v16  ;;  %v5838_v34 = vpop.xlane.xlu2 %5837 }
0x102e   : > { %v5956_v15 = vpop.f32.mrf.mxu1 }
0x102f   : > { %v6186_v7 = vpop.f32.mrf.mxu2  ;;  %v6027_v56 = vmul.f32 %v10079_v48, %v5956_v15 }
0x1031   : > { %v6140_v19 = vpop.f32.mrf.mxu3 }
0x1033   : > { %v5835_v30 = vpop.xlane.xlu2 %5834 }
0x1034   : > { %v5832_v47 = vpop.xlane.xlu0 %5831 }
0x1035   : > { %10080 = vrcp.f32 %v5832_v47 }
0x1036   : > { %v5958_v37 = vpop.f32.mrf.mxu1  ;;  %10082 = vrcp.f32 %v5835_v30 }
0x1037   : > { %v12826_v57 = vpop.f32.mrf.mxu2  ;;  %10084 = vrcp.f32 %v5838_v34 }
0x1039   : > { %v12828_v23 = vpop.f32.mrf.mxu0 }
0x103a   : > { %v6295_v13 = vsel %vm1188_vm1, %v12828_v23, -inf }
0x103b   : > { %v10081_v12 = vpop.eup %10080  ;;  %6296 = vmax.xlane.f32.xlu0 %v6295_v13 }
0x103c   : > { %v6028_v54 = vmul.f32 %v10081_v12, %v12802_v43  ;;  %v10083_v62 = vpop.eup %10082 }
0x103d   : > { %v10085_v43 = vpop.eup %10084  ;;  %v6029_v39 = vmul.f32 %v10083_v62, %v5998_v10 }
0x103e   : > { %v6033_v8 = vpack.c.bf16 %v6028_v54, %v6027_v56  ;;  %v6030_v38 = vmul.f32 %v10085_v43, %v12806_v28  ;;  %v6298_v28 = vsel %vm1188_vm1, %v12826_v57, -inf }
0x103f   : > { %v12833_v5 = vpop.f32.mrf.mxu3  ;;  %v6255_v25 = vpop.f32.mrf.mxu2 }
0x1040   : > { %8995 = vmatmul.msk.bf16.gmra.mxu1 %vm1035_vm0, %v6033_v8  ;;  %v6292_v55 = vsel %vm1188_vm1, %v12833_v5, -inf  ;;  %v6034_v35 = vpack.c.bf16 %v6030_v38, %v6029_v39  ;;  %v5574_v39 = vadd.f32 %v12761_v4, %v12786_v18 }
0x1041   : > { %v6232_v17 = vpop.f32.mrf.mxu0  ;;  %6293 = vmax.xlane.f32.xlu1 %v6292_v55 }
0x1043   : > { %6473 = vrot.lane.b32.xlu2 %v12455_v21, %s10566_s19 }
0x1047   : > { %v6209_v2 = vpop.f32.mrf.mxu3 }
0x104f   : > { %6452 = vrot.lane.b32.xlu0 %v12479_v53, %s10566_s19  ;;  %v12843_v20 = vpop.f32.mrf.mxu3 }
0x1050   : > { %8996 = vmatmul.msk.bf16.gmra.mxu1 %vm1035_vm0, %v6034_v35  ;;  %v6301_v22 = vsel %vm1188_vm1, %v12843_v20, -inf }
0x1051   : > { %6302 = vmax.xlane.f32.xlu1 %v6301_v22 }
0x1057   : > { %6515 = vrot.lane.b32.xlu0 %v12329_v61, %s10566_s19  ;;  %v6278_v21 = vpop.f32.mrf.mxu3  ;;  %v5564_v61 = vadd.f32 %v12739_v44, %v12750_v14 }
0x106a   : > { %6494 = vrot.lane.b32.xlu1 %v12256_v1, %s10566_s19 }
0x106c   : > { %6299 = vmax.xlane.f32.xlu2 %v6298_v28 }
0x106e   : > { %v6282_v53 = vpop.xlane.xlu1 %6281 }
0x106f   : > { %v6304_v52 = vsub.f32 %v12804_v31, %v6282_v53  ;;  %v5569_v31 = vadd.f32 %v12748_v36, %v12768_v29 }
0x1071   : > { %v6312_v45 = vmul.f32 1.442695, %v6304_v52 }
0x1073   : > { %10086 = vpow2.f32 %v6312_v45 }
0x1079   : > { %v10087_v0 = vpop.eup %10086 }
0x107a   : > { %v6360_v50 = vpack.c.bf16 %v10087_v0, %v10087_v0  ;;  %v6328_v1 = vsel %vm1188_vm1, %v10087_v0, 0.0 }
0x107c   : > { %9005 = vmatmul.msk.bf16.vlgmr.msra.gmra.mxu0 %vm1188_vm1, %v6360_v50 }
0x107f   : > { %v6068_v6 = vpop.f32.mrf.mxu1 }
0x1080   : > { %v12858_v10 = vadd.f32 %v6068_v6, %v5564_v61  ;;  %v5579_v61 = vadd.f32 %v12780_v9, %v12798_v41 }
0x1081   : > { %6329 = vadd.xlane.f32.xlu0 %v6328_v1 }
0x1087   : > { %v12861_v11 = vpop.f32.mrf.mxu1 }
0x108f   : > { %v6073_v63 = vpop.f32.mrf.mxu1 }
0x1090   : > { %v12865_v27 = vadd.f32 %v6073_v63, %v5569_v31 }
0x1096   : > { %v6288_v46 = vpop.xlane.xlu2 %6287 }
0x1097   : > { %v6306_v32 = vsub.f32 %v12814_v51, %v6288_v46  ;;  %v12878_v55 = vpop.f32.mrf.mxu1 }
0x1099   : > { %v6316_v16 = vmul.f32 1.442695, %v6306_v32 }
0x109b   : > { %10088 = vpow2.f32 %v6316_v16 }
0x109e   : > { %v6291_v44 = vpop.xlane.xlu2 %6290  ;;  %v6285_v14 = vpop.xlane.xlu0 %6284 }
0x109f   : > { %v6307_v15 = vsub.f32 %v12818_v58, %v6291_v44  ;;  %v6305_v7 = vsub.f32 %v12820_v59, %v6285_v14 }
0x10a1   : > { %v10089_v19 = vpop.eup %10088  ;;  %v6318_v34 = vmul.f32 1.442695, %v6307_v15  ;;  %v6314_v47 = vmul.f32 1.442695, %v6305_v7 }
0x10a2   : > { %v6362_v37 = vpack.c.bf16 %v10089_v19, %v10089_v19  ;;  %v6334_v36 = vsel %vm1188_vm1, %v10089_v19, 0.0 }
0x10a3   : > { %10090 = vpow2.f32 %v6318_v34  ;;  %6335 = vadd.xlane.f32.xlu1 %v6334_v36  ;;  %v9546_v34 = vld [vmem:[#allocation8 + $0x78] sm:$0xff] }
0x10a4   : > { %10092 = vpow2.f32 %v6314_v47  ;;  %9007 = vmatmul.msk.bf16.vlgmr.msrb.gmra.mxu3 %vm1188_vm1, %v6362_v37  ;;  %v9545_v47 = vld [vmem:[#allocation8 + $0x70] sm:$0xff] }
0x10a6   : > { %v6474_v29 = vpop.permute.xlu2 %6473 }
0x10a7   : > { %v6479_v51 = vsel %vm1280_vm2, %v6474_v29, 0 }
0x10a8   : > { %6488 = vmatpush.bf16.msrb.mxu2 %v6479_v51 }
0x10a9   : > { %v10091_v48 = vpop.eup %10090 }
0x10aa   : > { %v10093_v13 = vpop.eup %10092  ;;  %v6363_v58 = vpack.c.bf16 %v10091_v48, %v10091_v48  ;;  %v6337_v8 = vsel %vm1188_vm1, %v10091_v48, 0.0 }
0x10ab   : > { %v6361_v12 = vpack.c.bf16 %v10093_v13, %v10093_v13  ;;  %v6331_v59 = vsel %vm1188_vm1, %v10093_v13, 0.0 }
0x10ac   : > { %6332 = vadd.xlane.f32.xlu2 %v6331_v59  ;;  %9008 = vmatmul.msk.bf16.vlgmr.msrb.gmra.mxu0 %vm1188_vm1, %v6363_v58 }
0x10ad   : > { %9006 = vmatmul.msk.bf16.vlgmr.msra.gmra.mxu2 %vm1188_vm1, %v6361_v12 }
0x10ae   : > { %v6297_v56 = vpop.xlane.xlu0 %6296 }
0x10af   : > { %v6309_v54 = vsub.f32 %v12828_v23, %v6297_v56 }
0x10b1   : > { %v6322_v30 = vmul.f32 1.442695, %v6309_v54 }
0x10b3   : > { %10094 = vpow2.f32 %v6322_v30 }
0x10b4   : > { %6338 = vadd.xlane.f32.xlu2 %v6337_v8  ;;  %v6294_v25 = vpop.xlane.xlu1 %6293 }
0x10b5   : > { %v6308_v17 = vsub.f32 %v12833_v5, %v6294_v25 }
0x10b7   : > { %v6320_v62 = vmul.f32 1.442695, %v6308_v17 }
0x10b9   : > { %v10095_v2 = vpop.eup %10094  ;;  %10096 = vpow2.f32 %v6320_v62 }
0x10ba   : > { %v6365_v43 = vpack.c.bf16 %v10095_v2, %v10095_v2  ;;  %v6343_v18 = vsel %vm1188_vm1, %v10095_v2, 0.0 }
0x10bd   : > { %9010 = vmatmul.msk.bf16.vlgmr.msrb.gmra.mxu2 %vm1188_vm1, %v6365_v43  ;;  %v6078_v23 = vpop.f32.mrf.mxu1 }
0x10be   : > { %v12884_v38 = vadd.f32 %v6078_v23, %v5574_v39 }
0x10bf   : > { %v10097_v35 = vpop.eup %10096 }
0x10c0   : > { %v6340_v22 = vsel %vm1188_vm1, %v10097_v35, 0.0  ;;  %v6364_v5 = vpack.c.bf16 %v10097_v35, %v10097_v35 }
0x10c1   : > { %6341 = vadd.xlane.f32.xlu2 %v6340_v22  ;;  %v6453_v21 = vpop.permute.xlu0 %6452 }
0x10c2   : > { %v6458_v28 = vsel %vm1280_vm2, %v6453_v21, 0 }
0x10c3   : > { %6467 = vmatpush.bf16.msra.mxu1 %v6458_v28 }
0x10c4   : > { %v6303_v53 = vpop.xlane.xlu1 %6302 }
0x10c5   : > { %v6311_v52 = vsub.f32 %v12843_v20, %v6303_v53  ;;  %v12889_v45 = vpop.f32.mrf.mxu1 }
0x10c6   : > { %9009 = vmatmul.msk.bf16.vlgmr.msra.gmra.mxu1 %vm1188_vm1, %v6364_v5 }
0x10c7   : > { %v6326_v4 = vmul.f32 1.442695, %v6311_v52  ;;  %6578 = vmatpush.bf16.msrb.mxu1 %v9546_v34 }
0x10c9   : > { %10098 = vpow2.f32 %v6326_v4  ;;  %6344 = vadd.xlane.f32.xlu2 %v6343_v18  ;;  %v6516_v0 = vpop.permute.xlu0 %6515 }
0x10ca   : > { %v6521_v50 = vsel %vm1280_vm2, %v6516_v0, 0 }
0x10cb   : > { %6530 = vmatpush.bf16.msra.mxu0 %v6521_v50  ;;  %6579 = vmatpush.bf16.msrb.mxu1 %v9545_v47  ;;  %v5566_v47 = vadd.f32 %v12745_v26, %v12759_v3 }
0x10cd   : > { %v6083_v6 = vpop.f32.mrf.mxu1 }
0x10ce   : > { %v12896_v1 = vadd.f32 %v6083_v6, %v5579_v61 }
0x10cf   : > { %v10099_v20 = vpop.eup %10098 }
0x10d0   : > { %v6367_v31 = vpack.c.bf16 %v10099_v20, %v10099_v20  ;;  %v6349_v63 = vsel %vm1188_vm1, %v10099_v20, 0.0 }
0x10d1   : > { %6350 = vadd.xlane.f32.xlu0 %v6349_v63 }
0x10d2   : > { %9012 = vmatmul.msk.bf16.vlgmr.msra.gmra.mxu0 %vm1188_vm1, %v6367_v31 }
0x10d5   : > { %v12905_v62 = vpop.f32.mrf.mxu1 }
0x10dc   : > { %v6495_v46 = vpop.permute.xlu1 %6494 }
0x10dd   : > { %v6500_v32 = vsel %vm1280_vm2, %v6495_v46, 0 }
0x10de   : > { %6509 = vmatpush.bf16.msra.mxu3 %v6500_v32 }
0x10df   : > { %v6300_v16 = vpop.xlane.xlu2 %6299 }
0x10e0   : > { %v6310_v44 = vsub.f32 %v12826_v57, %v6300_v16 }
0x10e2   : > { %v6324_v14 = vmul.f32 1.442695, %v6310_v44 }
0x10e4   : > { %10100 = vpow2.f32 %v6324_v14 }
0x10ea   : > { %v10101_v9 = vpop.eup %10100 }
0x10eb   : > { %v6366_v41 = vpack.c.bf16 %v10101_v9, %v10101_v9  ;;  %v6346_v15 = vsel %vm1188_vm1, %v10101_v9, 0.0 }
0x10ec   : > { %6347 = vadd.xlane.f32.xlu2 %v6346_v15 }
0x10ed   : > { %9011 = vmatmul.msk.bf16.vlgmr.msra.gmra.mxu3 %vm1188_vm1, %v6366_v41 }
0x10f4   : > { %v6330_v37 = vpop.xlane.xlu0 %6329 }
0x10f5   : > { %10102 = vrcp.f32 %v6330_v37 }
0x10f9   : > { %v6385_v7 = vpop.f32.mrf.mxu0 }
0x10fb   : > { %v10103_v51 = vpop.eup %10102 }
0x10fc   : > { %v6536_v12 = vmul.f32 %v10103_v51, %v6385_v7  ;;  %v9821_v7 = vld [vmem:[%s13352_s4 + $0x1] ss:$0 sm:$0xff] }
0x10fd   : > { %v13455_v51 = vld [vmem:[#allocation31_spill] sm:$0xff] }
0x1101   : > { %v6387_v19 = vpop.f32.mrf.mxu0 }
0x1102   : > { %v13454_v19 = vld [vmem:[#allocation29_spill] sm:$0xff] }
0x1116   : > { %v6336_v8 = vpop.xlane.xlu1 %6335 }
0x111f   : > { %v6333_v36 = vpop.xlane.xlu2 %6332 }
0x1120   : > { %10104 = vrcp.f32 %v6333_v36  ;;  %v6089_v36 = vadd.f32 %v12861_v11, %v5566_v47 }
0x1126   : > { %v10105_v13 = vpop.eup %10104 }
0x1127   : > { %v6427_v29 = vpop.f32.mrf.mxu3  ;;  %v6339_v59 = vpop.xlane.xlu2 %6338 }
0x1128   : > { %10106 = vrcp.f32 %v6339_v59 }
0x1129   : > { %v6448_v57 = vpop.f32.mrf.mxu0  ;;  %10108 = vrcp.f32 %v6336_v8 }
0x112e   : > { %v10107_v2 = vpop.eup %10106 }
0x112f   : > { %v6429_v48 = vpop.f32.mrf.mxu3  ;;  %v6539_v43 = vmul.f32 %v10107_v2, %v6448_v57  ;;  %v10109_v39 = vpop.eup %10108 }
0x1130   : > { %v6406_v58 = vpop.f32.mrf.mxu2  ;;  %v6538_v35 = vmul.f32 %v10109_v39, %v6427_v29  ;;  %v5576_v39 = vadd.f32 %v12771_v24, %v12795_v60  ;;  %v5581_v24 = vadd.f32 %v12791_v42, %v12800_v40  ;;  %v13461_v60 = vld [vmem:[#allocation30_spill] sm:$0xff] }
0x1131   : > { %v6537_v56 = vmul.f32 %v10105_v13, %v6406_v58  ;;  %v6450_v54 = vpop.f32.mrf.mxu0 }
0x1132   : > { %v6545_v22 = vpack.c.bf16 %v6539_v43, %v6538_v35  ;;  %v13458_v43 = vld [vmem:[#allocation32_spill] sm:$0xff]  ;;  %v13459_v35 = vld [vmem:[#allocation33_spill] sm:$0xff] }
0x1133   : > { %v6544_v30 = vpack.c.bf16 %v6537_v56, %v6536_v12  ;;  %v13456_v12 = vld [vmem:[#allocation27_spill] sm:$0xff]  ;;  %v5571_v56 = vadd.f32 %v12755_v33, %v12775_v49  ;;  %v6093_v33 = vadd.f32 %v12889_v45, %v5576_v39 }
0x1134   : > { %v6342_v17 = vpop.xlane.xlu2 %6341 }
0x1135   : > { %9021 = vmatmul.msk.bf16.vlgmr.msrb.gmra.mxu1 %vm1035_vm0, %v6544_v30  ;;  %v6091_v26 = vadd.f32 %v12878_v55, %v5571_v56  ;;  %v13457_v30 = vld [vmem:[#allocation28_spill] sm:$0xff] }
0x1138   : > { %v6408_v25 = vpop.f32.mrf.mxu2 }
0x113c   : > { %v6345_v21 = vpop.xlane.xlu2 %6344 }
0x113d   : > { %10110 = vrcp.f32 %v6345_v21 }
0x113e   : > { %10112 = vrcp.f32 %v6342_v17 }
0x1140   : > { %v6490_v23 = vpop.f32.mrf.mxu2 }
0x1143   : > { %v6469_v28 = vpop.f32.mrf.mxu1  ;;  %v10111_v52 = vpop.eup %10110 }
0x1144   : > { %v10113_v4 = vpop.eup %10112  ;;  %v6541_v18 = vmul.f32 %v10111_v52, %v6490_v23  ;;  %v6351_v20 = vpop.xlane.xlu0 %6350 }
0x1145   : > { %9022 = vmatmul.msk.bf16.gmra.mxu1 %vm1035_vm0, %v6545_v22  ;;  %v6540_v0 = vmul.f32 %v10113_v4, %v6469_v28  ;;  %10114 = vrcp.f32 %v6351_v20  ;;  %v13462_v20 = vld [vmem:[#allocation35_spill] sm:$0xff] }
0x1147   : > { %v6546_v61 = vpack.c.bf16 %v6541_v18, %v6540_v0  ;;  %v6095_v0 = vadd.f32 %v12905_v62, %v5581_v24  ;;  %v9117_v24 = vld [vmem:[#allocation11 + $0x1a8] sm:$0xf] }
0x1148   : > { %v6492_v5 = vpop.f32.mrf.mxu2 }
0x114b   : > { %v6471_v53 = vpop.f32.mrf.mxu1  ;;  %v10115_v63 = vpop.eup %10114 }
0x114c   : > { %v13460_v53 = vld [vmem:[#allocation34_spill] sm:$0xff] }
0x114f   : > { %v6532_v50 = vpop.f32.mrf.mxu0 }
0x1150   : > { %v6543_v16 = vmul.f32 %v10115_v63, %v6532_v50 }
0x1155   : > { %9023 = vmatmul.msk.bf16.gmra.mxu1 %vm1035_vm0, %v6546_v61 }
0x1157   : > { %v6534_v6 = vpop.f32.mrf.mxu0 }
0x115f   : > { %v6348_v31 = vpop.xlane.xlu2 %6347 }
0x1160   : > { %10116 = vrcp.f32 %v6348_v31 }
0x1166   : > { %v10117_v46 = vpop.eup %10116 }
0x1170   : > { %v6511_v32 = vpop.f32.mrf.mxu3 }
0x1171   : > { %v6542_v44 = vmul.f32 %v10117_v46, %v6511_v32 }
0x1173   : > { %v6547_v14 = vpack.c.bf16 %v6543_v16, %v6542_v44 }
0x1175   : > { %9024 = vmatmul.msk.bf16.gmra.mxu1 %vm1035_vm0, %v6547_v14 }
0x1178   : > { %v6513_v9 = vpop.f32.mrf.mxu3 }
0x11b2   : > { %v6581_v41 = vpop.f32.mrf.mxu1 }
0x11b3   : > { %v6601_v15 = vadd.f32 %v6581_v41, %v12858_v10 }
0x11b5   : > { %v6609_v34 = vadd.f32 %v6601_v15, %v13454_v19 }
0x11b7   : > { %v6622_v37 = vadd.f32 %v9821_v7, %v6609_v34 }
0x11b9   : > { %6634 = vadd.xlane.f32.xlu2 %v6622_v37 }
0x11ba   : > { %v6583_v29 = vpop.f32.mrf.mxu1 }
0x11bb   : > { %v6602_v57 = vadd.f32 %v6583_v29, %v6089_v36 }
0x11bd   : > { %v6610_v48 = vadd.f32 %v6602_v57, %v13455_v51 }
0x11bf   : > { %v6623_v13 = vadd.f32 %v9821_v7, %v6610_v48 }
0x11c1   : > { %6636 = vadd.xlane.f32.xlu0 %v6623_v13 }
0x11c2   : > { %v6586_v10 = vpop.f32.mrf.mxu1 }
0x11c3   : > { %v6603_v58 = vadd.f32 %v6586_v10, %v12865_v27 }
0x11c5   : > { %v6611_v59 = vadd.f32 %v6603_v58, %v13456_v12  ;;  %v9141_v58 = vld [vmem:[#allocation11 + $0x1e0] sm:$0xf]  ;;  %v9577_v12 = vld [vmem:[#allocation11 + $0x1ec] sm:$0xf0] }
0x11c6   : > { %v9142_v56 = vor.u32 %v9577_v12, %v9141_v58 }
0x11c7   : > { %v6624_v54 = vadd.f32 %v9821_v7, %v6611_v59  ;;  %v9575_v59 = vld [vmem:[#allocation11 + $0x1e4] sm:$0xf] }
0x11c8   : > { %7024 = vmatpush.bf16.msra.mxu2 %v9142_v56  ;;  %v9087_v56 = vld [vmem:[#allocation11 + $0x178] sm:$0xf0] }
0x11c9   : > { %6638 = vadd.xlane.f32.xlu1 %v6624_v54 }
0x11ca   : > { %v6588_v3 = vpop.f32.mrf.mxu1 }
0x11cb   : > { %v6604_v11 = vadd.f32 %v6588_v3, %v6091_v26  ;;  %v9149_v26 = vld [vmem:[#allocation11 + $0x1e8] sm:$0xf]  ;;  %v9578_v3 = vld [vmem:[#allocation11 + $0x1f4] sm:$0xf0] }
0x11cd   : > { %v6612_v8 = vadd.f32 %v6604_v11, %v13457_v30  ;;  %v9150_v30 = vor.u32 %v9578_v3, %v9149_v26  ;;  %v9061_v26 = vld [vmem:[#allocation11 + $0x140] sm:$0xf]  ;;  %v9557_v3 = vld [vmem:[#allocation11 + $0x14c] sm:$0xf0] }
0x11cf   : > { %v6625_v25 = vadd.f32 %v9821_v7, %v6612_v8  ;;  %v9576_v8 = vld [vmem:[#allocation11 + $0x1ec] sm:$0xf]  ;;  %7082 = vmatpush.bf16.msrb.mxu0 %v9150_v30  ;;  %v9062_v30 = vor.u32 %v9557_v3, %v9061_v26 }
0x11d1   : > { %6640 = vadd.xlane.f32.xlu2 %v6625_v25 }
0x11d2   : > { %v6591_v17 = vpop.f32.mrf.mxu1 }
0x11d3   : > { %v6605_v2 = vadd.f32 %v6591_v17, %v12884_v38 }
0x11d5   : > { %v6613_v27 = vadd.f32 %v6605_v2, %v13458_v43  ;;  %v9125_v2 = vld [vmem:[#allocation11 + $0x1c0] sm:$0xf]  ;;  %v9573_v43 = vld [vmem:[#allocation11 + $0x1cc] sm:$0xf0] }
0x11d6   : > { %v9126_v39 = vor.u32 %v9573_v43, %v9125_v2 }
0x11d7   : > { %v6626_v23 = vadd.f32 %v9821_v7, %v6613_v27  ;;  %v9571_v27 = vld [vmem:[#allocation11 + $0x1c4] sm:$0xf] }
0x11d8   : > { %7025 = vmatpush.bf16.msra.mxu2 %v9126_v39  ;;  %v9071_v39 = vld [vmem:[#allocation11 + $0x158] sm:$0xf0] }
0x11d9   : > { %6642 = vadd.xlane.f32.xlu0 %v6626_v23 }
0x11da   : > { %v6593_v49 = vpop.f32.mrf.mxu1 }
0x11db   : > { %v6606_v55 = vadd.f32 %v6593_v49, %v6093_v33  ;;  %v9133_v33 = vld [vmem:[#allocation11 + $0x1c8] sm:$0xf]  ;;  %v9574_v49 = vld [vmem:[#allocation11 + $0x1d4] sm:$0xf0] }
0x11dd   : > { %v6614_v22 = vadd.f32 %v6606_v55, %v13459_v35  ;;  %v9134_v35 = vor.u32 %v9574_v49, %v9133_v33  ;;  %v9045_v33 = vld [vmem:[#allocation11 + $0x120] sm:$0xf]  ;;  %v9553_v49 = vld [vmem:[#allocation11 + $0x12c] sm:$0xf0] }
0x11df   : > { %v6627_v21 = vadd.f32 %v9821_v7, %v6614_v22  ;;  %v9572_v22 = vld [vmem:[#allocation11 + $0x1cc] sm:$0xf]  ;;  %7083 = vmatpush.bf16.msrb.mxu0 %v9134_v35  ;;  %v9046_v35 = vor.u32 %v9553_v49, %v9045_v33 }
0x11e1   : > { %6644 = vadd.xlane.f32.xlu1 %v6627_v21 }
0x11f2   : > { %v6596_v28 = vpop.f32.mrf.mxu1 }
0x11f3   : > { %v6607_v5 = vadd.f32 %v6596_v28, %v12896_v1 }
0x11f5   : > { %v6615_v38 = vadd.f32 %v6607_v5, %v13460_v53  ;;  %v9109_v5 = vld [vmem:[#allocation11 + $0x1a0] sm:$0xf]  ;;  %v9569_v53 = vld [vmem:[#allocation11 + $0x1ac] sm:$0xf0] }
0x11f7   : > { %v6628_v52 = vadd.f32 %v9821_v7, %v6615_v38  ;;  %v9567_v38 = vld [vmem:[#allocation11 + $0x1a4] sm:$0xf] }
0x11f9   : > { %6646 = vadd.xlane.f32.xlu1 %v6628_v52 }
0x11fa   : > { %v6598_v18 = vpop.f32.mrf.mxu1 }
0x11fb   : > { %v6608_v61 = vadd.f32 %v6598_v18, %v6095_v0 }
0x11fd   : > { %v6616_v31 = vadd.f32 %v6608_v61, %v13462_v20  ;;  %v9568_v61 = vld [vmem:[#allocation11 + $0x1ac] sm:$0xf]  ;;  %v9093_v20 = vld [vmem:[#allocation11 + $0x180] sm:$0xf] }
0x11ff   : > { %v12945_v42 = vadd.f32 %v9821_v7, %v6616_v31  ;;  %v9565_v31 = vld [vmem:[#allocation11 + $0x18c] sm:$0xf0] }
0x122c   : > { %v6635_v4 = vpop.xlane.xlu2 %6634 }
0x122d   : > { %v6650_v45 = vmul.f32 %v6635_v4, %v13461_v60  ;;  %v9111_v4 = vld [vmem:[#allocation11 + $0x1b0] sm:$0xf0] }
0x122e   : > { %v9114_v18 = vor.u32 %v9567_v38, %v9111_v4  ;;  %v9552_v38 = vld [vmem:[#allocation11 + $0x12c] sm:$0xf] }
0x122f   : > { %v12937_v50 = vsub.f32 %v6622_v37, %v6650_v45  ;;  %v9570_v45 = vld [vmem:[#allocation11 + $0x1b4] sm:$0xf0] }
0x1230   : > { %v9118_v0 = vor.u32 %v9570_v45, %v9117_v24 }
0x1231   : > { %v6666_v6 = vmul.f32 %v12937_v50, %v12937_v50 }
0x1232   : > { %7084 = vmatpush.bf16.msrb.mxu0 %v9118_v0  ;;  %v9549_v0 = vld [vmem:[#allocation11 + $0x10c] sm:$0xf0] }
0x1233   : > { %6674 = vadd.xlane.f32.xlu2 %v6666_v6  ;;  %v9119_v6 = vld [vmem:[#allocation11 + $0x1b8] sm:$0xf0] }
0x1234   : > { %v6637_v1 = vpop.xlane.xlu0 %6636 }
0x1235   : > { %v6651_v63 = vmul.f32 %v6637_v1, %v13461_v60  ;;  %v9122_v1 = vor.u32 %v9568_v61, %v9119_v6  ;;  %v9547_v61 = vld [vmem:[#allocation11 + $0x104] sm:$0xf] }
0x1237   : > { %v12943_v46 = vsub.f32 %v6623_v13, %v6651_v63  ;;  %v9563_v63 = vld [vmem:[#allocation11 + $0x184] sm:$0xf] }
0x1239   : > { %v6667_v40 = vmul.f32 %v12943_v46, %v12943_v46 }
0x123b   : > { %6648 = vadd.xlane.f32.xlu2 %v12945_v42  ;;  %6676 = vadd.xlane.f32.xlu0 %v6667_v40  ;;  %v9094_v40 = vor.u32 %v9565_v31, %v9093_v20  ;;  %v9037_v20 = vld [vmem:[#allocation11 + $0x108] sm:$0xf]  ;;  %v9550_v31 = vld [vmem:[#allocation11 + $0x114] sm:$0xf0] }
0x123c   : > { %v6639_v62 = vpop.xlane.xlu1 %6638 }
0x123d   : > { %v6652_v32 = vmul.f32 %v6639_v62, %v13461_v60  ;;  %v9095_v62 = vld [vmem:[#allocation11 + $0x190] sm:$0xf0] }
0x123f   : > { %v12951_v16 = vsub.f32 %v6624_v54, %v6652_v32  ;;  %v9143_v54 = vld [vmem:[#allocation11 + $0x1f0] sm:$0xf0]  ;;  %v9101_v32 = vld [vmem:[#allocation11 + $0x188] sm:$0xf] }
0x1240   : > { %v9146_v11 = vor.u32 %v9575_v59, %v9143_v54  ;;  %v9560_v59 = vld [vmem:[#allocation11 + $0x16c] sm:$0xf] }
0x1241   : > { %v6668_v44 = vmul.f32 %v12951_v16, %v12951_v16  ;;  %v9090_v54 = vor.u32 %v9560_v59, %v9087_v56 }
0x1242   : > { %7053 = vmatpush.bf16.msrb.mxu3 %v9146_v11  ;;  %v9555_v11 = vld [vmem:[#allocation11 + $0x144] sm:$0xf] }
0x1243   : > { %6678 = vadd.xlane.f32.xlu0 %v6668_v44  ;;  %v9566_v44 = vld [vmem:[#allocation11 + $0x194] sm:$0xf0] }
0x1244   : > { %v6641_v14 = vpop.xlane.xlu2 %6640 }
0x1245   : > { %v6653_v9 = vmul.f32 %v6641_v14, %v13461_v60  ;;  %v9098_v14 = vor.u32 %v9563_v63, %v9095_v62  ;;  %v9038_v62 = vor.u32 %v9550_v31, %v9037_v20 }
0x1247   : > { %v12956_v41 = vsub.f32 %v6625_v25, %v6653_v9  ;;  %v9151_v25 = vld [vmem:[#allocation11 + $0x1f8] sm:$0xf0]  ;;  %v9102_v9 = vor.u32 %v9566_v44, %v9101_v32  ;;  %v9548_v32 = vld [vmem:[#allocation11 + $0x10c] sm:$0xf] }
0x1248   : > { %v9154_v17 = vor.u32 %v9576_v8, %v9151_v25  ;;  %v9063_v8 = vld [vmem:[#allocation11 + $0x150] sm:$0xf0]  ;;  %v9069_v25 = vld [vmem:[#allocation11 + $0x148] sm:$0xf]  ;;  %v9039_v44 = vld [vmem:[#allocation11 + $0x118] sm:$0xf0] }
0x1249   : > { %v6669_v15 = vmul.f32 %v12956_v41, %v12956_v41  ;;  %7085 = vmatpush.bf16.msrb.mxu0 %v9102_v9  ;;  %v9066_v2 = vor.u32 %v9555_v11, %v9063_v8 }
0x124a   : > { %7111 = vmatpush.bf16.msra.mxu1 %v9154_v17  ;;  %v9558_v17 = vld [vmem:[#allocation11 + $0x154] sm:$0xf0] }
0x124b   : > { %6680 = vadd.xlane.f32.xlu1 %v6669_v15  ;;  %v9564_v15 = vld [vmem:[#allocation11 + $0x18c] sm:$0xf]  ;;  %v9070_v43 = vor.u32 %v9558_v17, %v9069_v25 }
0x124c   : > { %v6643_v7 = vpop.xlane.xlu0 %6642 }
0x124d   : > { %v6654_v19 = vmul.f32 %v6643_v7, %v13461_v60  ;;  %v9103_v7 = vld [vmem:[#allocation11 + $0x198] sm:$0xf0] }
0x124f   : > { %v12961_v34 = vsub.f32 %v6626_v23, %v6654_v19  ;;  %v9127_v23 = vld [vmem:[#allocation11 + $0x1d0] sm:$0xf0]  ;;  %v9106_v19 = vor.u32 %v9564_v15, %v9103_v7 }
0x1250   : > { %v9130_v55 = vor.u32 %v9571_v27, %v9127_v23  ;;  %v9556_v27 = vld [vmem:[#allocation11 + $0x14c] sm:$0xf] }
0x1251   : > { %v6670_v47 = vmul.f32 %v12961_v34, %v12961_v34  ;;  %v9074_v23 = vor.u32 %v9556_v27, %v9071_v39 }
0x1252   : > { %7054 = vmatpush.bf16.msrb.mxu3 %v9130_v55  ;;  %v9551_v55 = vld [vmem:[#allocation11 + $0x124] sm:$0xf] }
0x1253   : > { %6682 = vadd.xlane.f32.xlu2 %v6670_v47  ;;  %v9077_v47 = vld [vmem:[#allocation11 + $0x160] sm:$0xf] }
0x1254   : > { %v6645_v37 = vpop.xlane.xlu1 %6644 }
0x1255   : > { %v6655_v36 = vmul.f32 %v6645_v37, %v13461_v60  ;;  %v9561_v37 = vld [vmem:[#allocation11 + $0x16c] sm:$0xf0] }
0x1256   : > { %7055 = vmatpush.bf16.msrb.mxu3 %v9114_v18  ;;  %v9029_v18 = vld [vmem:[#allocation11 + $0x100] sm:$0xf] }
0x1257   : > { %v12966_v29 = vsub.f32 %v6627_v21, %v6655_v36  ;;  %v9135_v21 = vld [vmem:[#allocation11 + $0x1d8] sm:$0xf0]  ;;  %v9559_v36 = vld [vmem:[#allocation11 + $0x164] sm:$0xf]  ;;  %v9030_v6 = vor.u32 %v9549_v0, %v9029_v18 }
0x1258   : > { %v9138_v28 = vor.u32 %v9572_v22, %v9135_v21  ;;  %v9047_v22 = vld [vmem:[#allocation11 + $0x130] sm:$0xf0]  ;;  %v9053_v21 = vld [vmem:[#allocation11 + $0x128] sm:$0xf] }
0x1259   : > { %v6671_v57 = vmul.f32 %v12966_v29, %v12966_v29 }
0x125a   : > { %7112 = vmatpush.bf16.msra.mxu1 %v9138_v28  ;;  %7056 = vmatpush.bf16.msrb.mxu3 %v9098_v14  ;;  %v9554_v28 = vld [vmem:[#allocation11 + $0x134] sm:$0xf0]  ;;  %v9042_v14 = vor.u32 %v9548_v32, %v9039_v44 }
0x125b   : > { %6684 = vadd.xlane.f32.xlu0 %v6671_v57  ;;  %v9078_v57 = vor.u32 %v9561_v37, %v9077_v47 }
0x125e   : > { %7113 = vmatpush.bf16.msra.mxu1 %v9122_v1  ;;  %v9031_v1 = vld [vmem:[#allocation11 + $0x110] sm:$0xf0] }
0x1262   : > { %7114 = vmatpush.bf16.msra.mxu1 %v9106_v19 }
0x1266   : > { %7115 = vmatpush.bf16.msra.mxu1 %v9090_v54 }
0x126a   : > { %7116 = vmatpush.bf16.msra.mxu1 %v9074_v23 }
0x126c   : > { %v6647_v51 = vpop.xlane.xlu1 %6646 }
0x126d   : > { %v6656_v48 = vmul.f32 %v6647_v51, %v13461_v60  ;;  %v9079_v51 = vld [vmem:[#allocation11 + $0x170] sm:$0xf0] }
0x126e   : > { %v9082_v58 = vor.u32 %v9559_v36, %v9079_v51 }
0x126f   : > { %v12971_v13 = vsub.f32 %v6628_v52, %v6656_v48  ;;  %v9110_v52 = vor.u32 %v9569_v53, %v9109_v5  ;;  %v9085_v48 = vld [vmem:[#allocation11 + $0x168] sm:$0xf]  ;;  %v9050_v5 = vor.u32 %v9551_v55, %v9047_v22  ;;  %v9054_v53 = vor.u32 %v9554_v28, %v9053_v21 }
0x1270   : > { %7057 = vmatpush.bf16.msrb.mxu3 %v9082_v58 }
0x1271   : > { %v6672_v10 = vmul.f32 %v12971_v13, %v12971_v13  ;;  %7026 = vmatpush.bf16.msra.mxu2 %v9110_v52  ;;  %v9055_v52 = vld [vmem:[#allocation11 + $0x138] sm:$0xf0] }
0x1272   : > { %v9058_v24 = vor.u32 %v9552_v38, %v9055_v52 }
0x1273   : > { %6686 = vadd.xlane.f32.xlu1 %v6672_v10  ;;  %v9562_v10 = vld [vmem:[#allocation11 + $0x174] sm:$0xf0] }
0x1274   : > { %v9086_v12 = vor.u32 %v9562_v10, %v9085_v48  ;;  %7058 = vmatpush.bf16.msrb.mxu3 %v9066_v2  ;;  %7117 = vmatpush.bf16.msra.mxu1 %v9058_v24 }
0x1275   : > { %7027 = vmatpush.bf16.msra.mxu2 %v9094_v40  ;;  %v9034_v40 = vor.u32 %v9547_v61, %v9031_v1 }
0x1276   : > { %7086 = vmatpush.bf16.msrb.mxu0 %v9086_v12 }
0x1278   : > { %7059 = vmatpush.bf16.msrb.mxu3 %v9050_v5  ;;  %7118 = vmatpush.bf16.msra.mxu1 %v9042_v14 }
0x1279   : > { %7028 = vmatpush.bf16.msra.mxu2 %v9078_v57 }
0x127a   : > { %7087 = vmatpush.bf16.msrb.mxu0 %v9070_v43  ;;  %v12988_v43 = vld [vmem:[%s13353_s5 + $0x1] ss:$0 sm:$0xff] }
0x127c   : > { %7060 = vmatpush.bf16.msrb.mxu3 %v9034_v40 }
0x127d   : > { %7029 = vmatpush.bf16.msra.mxu2 %v9062_v30 }
0x127e   : > { %7088 = vmatpush.bf16.msrb.mxu0 %v9054_v53 }
0x1281   : > { %7030 = vmatpush.bf16.msra.mxu2 %v9046_v35  ;;  %v12991_v35 = vld [vmem:[#allocation10 + $0x1] ss:$0 sm:$0xff] }
0x1282   : > { %7089 = vmatpush.bf16.msrb.mxu0 %v9038_v62 }
0x1285   : > { %7031 = vmatpush.bf16.msra.mxu2 %v9030_v6 }
0x12a6   : > { %v6675_v4 = vpop.xlane.xlu2 %6674 }
0x12a7   : > { %v6690_v45 = vmul.f32 %v6675_v4, %v13461_v60 }
0x12a9   : > { %v6698_v63 = vadd.f32 1e-05, %v6690_v45 }
0x12ab   : > { %10118 = vrsqrt.f32 %v6698_v63  ;;  %vm6712_vm1 = vweird.f32 %v6698_v63 }
0x12ae   : > { %v6649_v9 = vpop.xlane.xlu2 %6648  ;;  %v6677_v15 = vpop.xlane.xlu0 %6676 }
0x12af   : > { %v6657_v7 = vmul.f32 %v6649_v9, %v13461_v60  ;;  %v6691_v19 = vmul.f32 %v6677_v15, %v13461_v60 }
0x12b1   : > { %v10119_v47 = vpop.eup %10118  ;;  %v12979_v37 = vsub.f32 %v12945_v42, %v6657_v7  ;;  %v6699_v36 = vadd.f32 1e-05, %v6691_v19 }
0x12b2   : > { %v6707_v57 = vmul.f32 %v10119_v47, %v6698_v63  ;;  %vm6713_vm0 = vweird.f32 %v10119_v47 }
0x12b3   : > { %10120 = vrsqrt.f32 %v6699_v36  ;;  %v6673_v51 = vmul.f32 %v12979_v37, %v12979_v37  ;;  %vm6714_vm2 = vmor %vm6712_vm1, %vm6713_vm0  ;;  %vm6722_vm14 = vweird.f32 %v6699_v36 }
0x12b4   : > { %v6708_v48 = vmul.f32 %v10119_v47, %v6707_v57 }
0x12b5   : > { %6688 = vadd.xlane.f32.xlu2 %v6673_v51 }
0x12b6   : > { %v6709_v10 = vmul.f32 0.5, %v6708_v48  ;;  %v6679_v58 = vpop.xlane.xlu0 %6678 }
0x12b7   : > { %v6692_v12 = vmul.f32 %v6679_v58, %v13461_v60 }
0x12b8   : > { %v6710_v59 = vsub.f32 1.5, %v6709_v10 }
0x12b9   : > { %v10121_v56 = vpop.eup %10120  ;;  %v6700_v54 = vadd.f32 1e-05, %v6692_v12 }
0x12ba   : > { %v6711_v26 = vmul.f32 %v10119_v47, %v6710_v59  ;;  %v6717_v3 = vmul.f32 %v10121_v56, %v6699_v36  ;;  %vm6723_vm13 = vweird.f32 %v10121_v56 }
0x12bb   : > { %10122 = vrsqrt.f32 %v6700_v54  ;;  %vm6724_vm15 = vmor %vm6722_vm14, %vm6723_vm13  ;;  %vm6732_vm4 = vweird.f32 %v6700_v54 }
0x12bc   : > { %v6718_v42 = vmul.f32 %v10121_v56, %v6717_v3  ;;  %v6715_v11 = vsel %vm6714_vm2, %v10119_v47, %v6711_v26 }
0x12bd   : > { %v6786_v27 = vmul.f32 %v6715_v11, %v12937_v50 }
0x12be   : > { %v6719_v30 = vmul.f32 0.5, %v6718_v42  ;;  %v6681_v8 = vpop.xlane.xlu1 %6680 }
0x12bf   : > { %v6693_v25 = vmul.f32 %v6681_v8, %v13461_v60  ;;  %v6797_v22 = vmul.f32 %v12988_v43, %v6786_v27 }
0x12c0   : > { %v6720_v17 = vsub.f32 1.5, %v6719_v30 }
0x12c1   : > { %v10123_v2 = vpop.eup %10122  ;;  %v6701_v39 = vadd.f32 1e-05, %v6693_v25  ;;  %v12998_v4 = vadd.f32 %v12991_v35, %v6797_v22  ;;  %v9594_v22 = vld [vmem:[#allocation14 + $0x178] sm:$0xff] }
0x12c2   : > { %v6721_v23 = vmul.f32 %v10121_v56, %v6720_v17  ;;  %v6727_v33 = vmul.f32 %v10123_v2, %v6700_v54  ;;  %vm6733_vm3 = vweird.f32 %v10123_v2  ;;  %7479 = vmatpush.bf16.msra.mxu3 %v9594_v22 }
0x12c3   : > { %10124 = vrsqrt.f32 %v6701_v39  ;;  %vm6734_vm5 = vmor %vm6732_vm4, %vm6733_vm3  ;;  %vm6742_vm7 = vweird.f32 %v6701_v39 }
0x12c4   : > { %v6725_v49 = vsel %vm6724_vm15, %v10121_v56, %v6721_v23  ;;  %v6728_v55 = vmul.f32 %v10123_v2, %v6727_v33  ;;  %v9610_v23 = vld [vmem:[#allocation14 + $0x1f8] sm:$0xff]  ;;  %v9601_v33 = vld [vmem:[#allocation14 + $0x1b0] sm:$0xff] }
0x12c5   : > { %v6787_v21 = vmul.f32 %v6725_v49, %v12943_v46  ;;  %7537 = vmatpush.bf16.msrb.mxu1 %v9610_v23  ;;  %v9609_v49 = vld [vmem:[#allocation14 + $0x1f0] sm:$0xff] }
0x12c6   : > { %v6729_v28 = vmul.f32 0.5, %v6728_v55  ;;  %v6683_v5 = vpop.xlane.xlu2 %6682  ;;  %v9586_v55 = vld [vmem:[#allocation14 + $0x138] sm:$0xff] }
0x12c7   : > { %v6798_v53 = vmul.f32 %v12988_v43, %v6787_v21  ;;  %v6694_v50 = vmul.f32 %v6683_v5, %v13461_v60  ;;  %v9600_v21 = vld [vmem:[#allocation14 + $0x1a8] sm:$0xff]  ;;  %7450 = vmatpush.bf16.msrb.mxu2 %v9586_v55 }
0x12c8   : > { %v6730_v38 = vsub.f32 1.5, %v6729_v28  ;;  %v9608_v28 = vld [vmem:[#allocation14 + $0x1e8] sm:$0xff] }
0x12c9   : > { %v10125_v52 = vpop.eup %10124  ;;  %v13001_v24 = vadd.f32 %v12991_v35, %v6798_v53  ;;  %v6702_v45 = vadd.f32 1e-05, %v6694_v50  ;;  %7538 = vmatpush.bf16.msrb.mxu1 %v9609_v49  ;;  %v9585_v53 = vld [vmem:[#allocation14 + $0x130] sm:$0xff] }
0x12ca   : > { %v6731_v18 = vmul.f32 %v10123_v2, %v6730_v38  ;;  %v6737_v0 = vmul.f32 %v10125_v52, %v6701_v39  ;;  %vm6743_vm6 = vweird.f32 %v10125_v52  ;;  %v9602_v39 = vld [vmem:[#allocation14 + $0x1b8] sm:$0xff]  ;;  %v9593_v50 = vld [vmem:[#allocation14 + $0x170] sm:$0xff]  ;;  %v9599_v38 = vld [vmem:[#allocation14 + $0x1a0] sm:$0xff] }
0x12cb   : > { %10126 = vrsqrt.f32 %v6702_v45  ;;  %v6816_v46 = vpack.c.bf16 %v13001_v24, %v12998_v4  ;;  %vm6744_vm8 = vmor %vm6742_vm7, %vm6743_vm6  ;;  %vm6752_vm10 = vweird.f32 %v6702_v45  ;;  %7508 = vmatpush.bf16.msra.mxu0 %v9602_v39  ;;  %7451 = vmatpush.bf16.msrb.mxu2 %v9585_v53 }
0x12cc   : > { %v6738_v61 = vmul.f32 %v10125_v52, %v6737_v0  ;;  %v6735_v6 = vsel %vm6734_vm5, %v10123_v2, %v6731_v18  ;;  %7480 = vmatpush.bf16.msra.mxu3 %v9593_v50  ;;  %v9584_v18 = vld [vmem:[#allocation14 + $0x128] sm:$0xff] }
0x12cd   : > { %7032 = vmatmul.bf16.vlgmr.msra.gmra.mxu2 %v6816_v46  ;;  %7061 = vmatmul.bf16.vlgmr.msrb.gmra.mxu3 %v6816_v46  ;;  %v6788_v62 = vmul.f32 %v6735_v6, %v12951_v16  ;;  %v9592_v0 = vld [vmem:[#allocation14 + $0x168] sm:$0xff] }
0x12ce   : > { %v6739_v1 = vmul.f32 0.5, %v6738_v61  ;;  %7090 = vmatmul.bf16.vlgmr.msrb.gmra.mxu0 %v6816_v46  ;;  %7119 = vmatmul.bf16.vlgmr.msra.gmra.mxu1 %v6816_v46  ;;  %v6685_v20 = vpop.xlane.xlu0 %6684 }
0x12cf   : > { %v6695_v31 = vmul.f32 %v6685_v20, %v13461_v60  ;;  %v6799_v19 = vmul.f32 %v12988_v43, %v6788_v62  ;;  %7509 = vmatpush.bf16.msra.mxu0 %v9601_v33  ;;  %7539 = vmatpush.bf16.msrb.mxu1 %v9608_v28  ;;  %v9606_v20 = vld [vmem:[#allocation14 + $0x1d8] sm:$0xff] }
0x12d0   : > { %v6740_v63 = vsub.f32 1.5, %v6739_v1  ;;  %7452 = vmatpush.bf16.msrb.mxu2 %v9584_v18  ;;  %7481 = vmatpush.bf16.msra.mxu3 %v9592_v0  ;;  %v9598_v1 = vld [vmem:[#allocation14 + $0x198] sm:$0xff] }
0x12d1   : > { %v10127_v40 = vpop.eup %10126  ;;  %v6703_v32 = vadd.f32 1e-05, %v6695_v31  ;;  %v13011_v48 = vadd.f32 %v12991_v35, %v6799_v19  ;;  %v9604_v19 = vld [vmem:[#allocation14 + $0x1c8] sm:$0xff]  ;;  %v6854_v33 = vld [vmem:[#allocation13 + $0x4] sm:$0xf] }
0x12d2   : > { %v6741_v44 = vmul.f32 %v10125_v52, %v6740_v63  ;;  %v6747_v14 = vmul.f32 %v10127_v40, %v6702_v45  ;;  %vm6753_vm9 = vweird.f32 %v10127_v40  ;;  %v9583_v63 = vld [vmem:[#allocation14 + $0x120] sm:$0xff]  ;;  %v13056_v55 = vperm.slane %v6854_v33, 2 }
0x12d3   : > { %10128 = vrsqrt.f32 %v6703_v32  ;;  %vm6754_vm11 = vmor %vm6752_vm10, %vm6753_vm9  ;;  %vm6762_vm0 = vweird.f32 %v6703_v32  ;;  %7510 = vmatpush.bf16.msra.mxu0 %v9600_v21  ;;  %v13058_v22 = vperm.slane %v6854_v33, 3  ;;  %v13064_v53 = vperm.slane %v6854_v33, 1 }
0x12d4   : > { %v6745_v9 = vsel %vm6744_vm8, %v10125_v52, %v6741_v44  ;;  %v6748_v15 = vmul.f32 %v10127_v40, %v6747_v14  ;;  %v9607_v52 = vld [vmem:[#allocation14 + $0x1e0] sm:$0xff]  ;;  %7453 = vmatpush.bf16.msrb.mxu2 %v9583_v63  ;;  %v9605_v44 = vld [vmem:[#allocation14 + $0x1d0] sm:$0xff]  ;;  %v9582_v14 = vld [vmem:[#allocation14 + $0x118] sm:$0xff] }
0x12d5   : > { %v6789_v7 = vmul.f32 %v6745_v9, %v12956_v41  ;;  %7540 = vmatpush.bf16.msrb.mxu1 %v9607_v52  ;;  %v9590_v9 = vld [vmem:[#allocation14 + $0x158] sm:$0xff] }
0x12d6   : > { %v6749_v47 = vmul.f32 0.5, %v6748_v15 }
0x12d7   : > { %v6800_v36 = vmul.f32 %v12988_v43, %v6789_v7  ;;  %7511 = vmatpush.bf16.msra.mxu0 %v9599_v38  ;;  %v9596_v7 = vld [vmem:[#allocation14 + $0x188] sm:$0xff] }
0x12d8   : > { %v6750_v57 = vsub.f32 1.5, %v6749_v47  ;;  %7454 = vmatpush.bf16.msrb.mxu2 %v9582_v14 }
0x12d9   : > { %v10129_v51 = vpop.eup %10128  ;;  %v13014_v16 = vadd.f32 %v12991_v35, %v6800_v36  ;;  %7541 = vmatpush.bf16.msrb.mxu1 %v9606_v20  ;;  %v9581_v36 = vld [vmem:[#allocation14 + $0x110] sm:$0xff] }
0x12da   : > { %v6751_v10 = vmul.f32 %v10127_v40, %v6750_v57  ;;  %v6757_v58 = vmul.f32 %v10129_v51, %v6703_v32  ;;  %vm6763_vm12 = vweird.f32 %v10129_v51  ;;  %v9597_v32 = vld [vmem:[#allocation14 + $0x190] sm:$0xff] }
0x12db   : > { %v6817_v12 = vpack.c.bf16 %v13014_v16, %v13011_v48  ;;  %vm6764_vm1 = vmor %vm6762_vm0, %vm6763_vm12  ;;  %7512 = vmatpush.bf16.msra.mxu0 %v9598_v1  ;;  %v9589_v57 = vld [vmem:[#allocation14 + $0x150] sm:$0xff] }
0x12dc   : > { %v6758_v41 = vmul.f32 %v10129_v51, %v6757_v58  ;;  %v6755_v59 = vsel %vm6754_vm11, %v10127_v40, %v6751_v10  ;;  %v9591_v40 = vld [vmem:[#allocation14 + $0x160] sm:$0xff]  ;;  %7455 = vmatpush.bf16.msrb.mxu2 %v9581_v36 }
0x12dd   : > { %7037 = vmatmul.bf16.gmra.mxu2 %v6817_v12  ;;  %7066 = vmatmul.bf16.gmra.mxu3 %v6817_v12  ;;  %v6790_v26 = vmul.f32 %v6755_v59, %v12961_v34  ;;  %v9595_v58 = vld [vmem:[#allocation14 + $0x180] sm:$0xff]  ;;  %v9580_v59 = vld [vmem:[#allocation14 + $0x108] sm:$0xff] }
0x12de   : > { %v6759_v56 = vmul.f32 0.5, %v6758_v41  ;;  %7095 = vmatmul.bf16.gmra.mxu0 %v6817_v12  ;;  %7124 = vmatmul.bf16.gmra.mxu1 %v6817_v12  ;;  %v9603_v12 = vld [vmem:[#allocation14 + $0x1c0] sm:$0xff] }
0x12df   : > { %v6801_v30 = vmul.f32 %v12988_v43, %v6790_v26  ;;  %7482 = vmatpush.bf16.msra.mxu3 %v9591_v40  ;;  %7513 = vmatpush.bf16.msra.mxu0 %v9597_v32 }
0x12e0   : > { %v6760_v54 = vsub.f32 1.5, %v6759_v56  ;;  %7542 = vmatpush.bf16.msrb.mxu1 %v9605_v44  ;;  %v9588_v56 = vld [vmem:[#allocation14 + $0x148] sm:$0xff]  ;;  %7456 = vmatpush.bf16.msrb.mxu2 %v9580_v59 }
0x12e1   : > { %v13023_v25 = vadd.f32 %v12991_v35, %v6801_v30  ;;  %v9587_v30 = vld [vmem:[#allocation14 + $0x140] sm:$0xff] }
0x12e2   : > { %v6761_v3 = vmul.f32 %v10129_v51, %v6760_v54 }
0x12e3   : > { %7483 = vmatpush.bf16.msra.mxu3 %v9590_v9  ;;  %7514 = vmatpush.bf16.msra.mxu0 %v9596_v7 }
0x12e4   : > { %v6765_v42 = vsel %vm6764_vm1, %v10129_v51, %v6761_v3  ;;  %7543 = vmatpush.bf16.msrb.mxu1 %v9604_v19 }
0x12e5   : > { %v6791_v11 = vmul.f32 %v6765_v42, %v12966_v29 }
0x12e6   : > { %v6687_v34 = vpop.xlane.xlu1 %6686 }
0x12e7   : > { %v6802_v8 = vmul.f32 %v12988_v43, %v6791_v11  ;;  %v6696_v29 = vmul.f32 %v6687_v34, %v13461_v60  ;;  %7484 = vmatpush.bf16.msra.mxu3 %v9589_v57  ;;  %7515 = vmatpush.bf16.msra.mxu0 %v9595_v58  ;;  %v9579_v11 = vld [vmem:[#allocation14 + $0x100] sm:$0xff] }
0x12e8   : > { %7544 = vmatpush.bf16.msrb.mxu1 %v9603_v12  ;;  %7457 = vmatpush.bf16.msrb.mxu2 %v9579_v11 }
0x12e9   : > { %v13026_v17 = vadd.f32 %v12991_v35, %v6802_v8  ;;  %v13031_v27 = vadd.f32 1e-05, %v6696_v29 }
0x12eb   : > { %v6818_v2 = vpack.c.bf16 %v13026_v17, %v13023_v25  ;;  %10130 = vrsqrt.f32 %v13031_v27  ;;  %vm6772_vm13 = vweird.f32 %v13031_v27  ;;  %7485 = vmatpush.bf16.msra.mxu3 %v9588_v56 }
0x12ed   : > { %7042 = vmatmul.bf16.gmra.mxu2 %v6818_v2  ;;  %7071 = vmatmul.bf16.gmra.mxu3 %v6818_v2 }
0x12ee   : > { %7100 = vmatmul.bf16.gmra.mxu0 %v6818_v2  ;;  %7129 = vmatmul.bf16.gmra.mxu1 %v6818_v2 }
0x12ef   : > { %7486 = vmatpush.bf16.msra.mxu3 %v9587_v30 }
0x12f1   : > { %v13034_v5 = vpop.eup %10130 }
0x12f2   : > { %v6767_v45 = vmul.f32 %v13034_v5, %v13031_v27  ;;  %vm6773_vm2 = vweird.f32 %v13034_v5 }
0x12f3   : > { %vm6774_vm14 = vmor %vm6772_vm13, %vm6773_vm2 }
0x12f4   : > { %v6768_v46 = vmul.f32 %v13034_v5, %v6767_v45 }
0x12f6   : > { %v6769_v62 = vmul.f32 0.5, %v6768_v46 }
0x12f8   : > { %v6770_v15 = vsub.f32 1.5, %v6769_v62 }
0x12fa   : > { %v6771_v51 = vmul.f32 %v13034_v5, %v6770_v15 }
0x12fc   : > { %v6775_v54 = vsel %vm6774_vm14, %v13034_v5, %v6771_v51  ;;  %v13062_v5 = vperm.slane %v6854_v33, 0 }
0x12fd   : > { %v6792_v42 = vmul.f32 %v6775_v54, %v12971_v13 }
0x12ff   : > { %v6803_v29 = vmul.f32 %v12988_v43, %v6792_v42 }
0x1301   : > { %v13049_v39 = vadd.f32 %v12991_v35, %v6803_v29 }
0x1328   : > { %v6689_v61 = vpop.xlane.xlu2 %6688 }
0x1329   : > { %v6697_v6 = vmul.f32 %v6689_v61, %v13461_v60 }
0x132b   : > { %v6705_v31 = vadd.f32 1e-05, %v6697_v6 }
0x132d   : > { %10132 = vrsqrt.f32 %v6705_v31  ;;  %vm6782_vm3 = vweird.f32 %v6705_v31 }
0x1333   : > { %v10133_v47 = vpop.eup %10132 }
0x1334   : > { %v6777_v10 = vmul.f32 %v10133_v47, %v6705_v31  ;;  %vm6783_vm15 = vweird.f32 %v10133_v47 }
0x1335   : > { %vm6784_vm4 = vmor %vm6782_vm3, %vm6783_vm15 }
0x1336   : > { %v6778_v41 = vmul.f32 %v10133_v47, %v6777_v10 }
0x1338   : > { %v6779_v26 = vmul.f32 0.5, %v6778_v41 }
0x133a   : > { %v6780_v3 = vsub.f32 1.5, %v6779_v26 }
0x133c   : > { %v6781_v8 = vmul.f32 %v10133_v47, %v6780_v3 }
0x133e   : > { %v6785_v2 = vsel %vm6784_vm4, %v10133_v47, %v6781_v8 }
0x133f   : > { %v6793_v34 = vmul.f32 %v6785_v2, %v12979_v37 }
0x1341   : > { %v6804_v27 = vmul.f32 %v12988_v43, %v6793_v34 }
0x1343   : > { %v13052_v23 = vadd.f32 %v12991_v35, %v6804_v27 }
0x1345   : > { %v6819_v13 = vpack.c.bf16 %v13052_v23, %v13049_v39 }
0x1347   : > { %7047 = vmatmul.bf16.gmra.mxu2 %v6819_v13  ;;  %7076 = vmatmul.bf16.gmra.mxu3 %v6819_v13 }
0x1348   : > { %7105 = vmatmul.bf16.gmra.mxu0 %v6819_v13  ;;  %7134 = vmatmul.bf16.gmra.mxu1 %v6819_v13 }
0x134b   : > { %v7091_v49 = vpop.f32.mrf.mxu0  ;;  %v7120_v37 = vpop.f32.mrf.mxu1 }
0x134c   : > { %v7092_v28 = vadd.f32 %v7091_v49, %v13056_v55  ;;  %v7121_v35 = vadd.f32 %v7120_v37, %v13058_v22 }
0x134e   : > { %v7142_v18 = vmax.f32 %v7092_v28, 0.0  ;;  %v7143_v0 = vmax.f32 %v7121_v35, 0.0 }
0x1350   : > { %v7033_v43 = vpop.f32.mrf.mxu2  ;;  %v7062_v21 = vpop.f32.mrf.mxu3 }
0x1351   : > { %v7034_v6 = vadd.f32 %v7033_v43, %v13062_v5  ;;  %v7063_v1 = vadd.f32 %v7062_v21, %v13064_v53 }
0x1353   : > { %v7093_v50 = vpop.f32.mrf.mxu0  ;;  %v7122_v38 = vpop.f32.mrf.mxu1  ;;  %v7140_v44 = vmax.f32 %v7034_v6, 0.0  ;;  %v7141_v14 = vmax.f32 %v7063_v1, 0.0 }
0x1354   : > { %v7094_v52 = vadd.f32 %v7093_v50, %v13056_v55  ;;  %v7123_v45 = vadd.f32 %v7122_v38, %v13058_v22 }
0x1356   : > { %v7146_v46 = vmax.f32 %v7094_v52, 0.0  ;;  %v7147_v61 = vmax.f32 %v7123_v45, 0.0 }
0x1358   : > { %v7174_v20 = vpack.c.bf16 %v7146_v46, %v7142_v18  ;;  %v7175_v31 = vpack.c.bf16 %v7147_v61, %v7143_v0  ;;  %v7035_v63 = vpop.f32.mrf.mxu2  ;;  %v7064_v40 = vpop.f32.mrf.mxu3 }
0x1359   : > { %v7036_v62 = vadd.f32 %v7035_v63, %v13062_v5  ;;  %v7065_v32 = vadd.f32 %v7064_v40, %v13064_v53 }
0x135a   : > { %7516 = vmatmul.bf16.vlgmr.msra.gmra.mxu0 %v7174_v20  ;;  %7545 = vmatmul.bf16.vlgmr.msrb.gmra.mxu1 %v7175_v31 }
0x135b   : > { %v7144_v9 = vmax.f32 %v7036_v62, 0.0  ;;  %v7145_v15 = vmax.f32 %v7065_v32, 0.0  ;;  %v7096_v7 = vpop.f32.mrf.mxu0  ;;  %v7125_v19 = vpop.f32.mrf.mxu1 }
0x135c   : > { %v7097_v10 = vadd.f32 %v7096_v7, %v13056_v55  ;;  %v7126_v58 = vadd.f32 %v7125_v19, %v13058_v22 }
0x135d   : > { %v7172_v47 = vpack.c.bf16 %v7144_v9, %v7140_v44  ;;  %v7173_v36 = vpack.c.bf16 %v7145_v15, %v7141_v14 }
0x135e   : > { %v7150_v54 = vmax.f32 %v7097_v10, 0.0  ;;  %v7151_v26 = vmax.f32 %v7126_v58, 0.0 }
0x135f   : > { %7458 = vmatmul.bf16.vlgmr.msrb.gmra.mxu2 %v7172_v47  ;;  %7487 = vmatmul.bf16.vlgmr.msra.gmra.mxu3 %v7173_v36 }
0x1360   : > { %v7038_v57 = vpop.f32.mrf.mxu2  ;;  %v7067_v51 = vpop.f32.mrf.mxu3 }
0x1361   : > { %v7039_v11 = vadd.f32 %v7038_v57, %v13062_v5  ;;  %v7068_v30 = vadd.f32 %v7067_v51, %v13064_v53 }
0x1363   : > { %v7098_v12 = vpop.f32.mrf.mxu0  ;;  %v7127_v41 = vpop.f32.mrf.mxu1  ;;  %v7148_v33 = vmax.f32 %v7039_v11, 0.0  ;;  %v7149_v49 = vmax.f32 %v7068_v30, 0.0 }
0x1364   : > { %v7099_v59 = vadd.f32 %v7098_v12, %v13056_v55  ;;  %v7128_v56 = vadd.f32 %v7127_v41, %v13058_v22 }
0x1366   : > { %v7154_v3 = vmax.f32 %v7099_v59, 0.0  ;;  %v7155_v42 = vmax.f32 %v7128_v56, 0.0 }
0x1368   : > { %v7178_v8 = vpack.c.bf16 %v7154_v3, %v7150_v54  ;;  %v7179_v2 = vpack.c.bf16 %v7155_v42, %v7151_v26  ;;  %v7040_v34 = vpop.f32.mrf.mxu2  ;;  %v7069_v29 = vpop.f32.mrf.mxu3 }
0x1369   : > { %v7041_v27 = vadd.f32 %v7040_v34, %v13062_v5  ;;  %v7070_v13 = vadd.f32 %v7069_v29, %v13064_v53 }
0x136a   : > { %7521 = vmatmul.bf16.gmra.mxu0 %v7178_v8  ;;  %7550 = vmatmul.bf16.gmra.mxu1 %v7179_v2 }
0x136b   : > { %v7152_v37 = vmax.f32 %v7041_v27, 0.0  ;;  %v7153_v43 = vmax.f32 %v7070_v13, 0.0  ;;  %v7101_v21 = vpop.f32.mrf.mxu0  ;;  %v7130_v28 = vpop.f32.mrf.mxu1 }
0x136c   : > { %v7102_v45 = vadd.f32 %v7101_v21, %v13056_v55  ;;  %v7131_v18 = vadd.f32 %v7130_v28, %v13058_v22 }
0x136d   : > { %v7176_v35 = vpack.c.bf16 %v7152_v37, %v7148_v33  ;;  %v7177_v50 = vpack.c.bf16 %v7153_v43, %v7149_v49 }
0x136e   : > { %v7158_v1 = vmax.f32 %v7102_v45, 0.0  ;;  %v7159_v20 = vmax.f32 %v7131_v18, 0.0  ;;  %v13099_v18 = vld [vmem:[%s13435_s30 + $0x1] ss:$0 sm:$0xff] }
0x136f   : > { %7463 = vmatmul.bf16.gmra.mxu2 %v7176_v35  ;;  %7492 = vmatmul.bf16.gmra.mxu3 %v7177_v50 }
0x1370   : > { %v7043_v38 = vpop.f32.mrf.mxu2  ;;  %v7072_v52 = vpop.f32.mrf.mxu3 }
0x1371   : > { %v7044_v40 = vadd.f32 %v7043_v38, %v13062_v5  ;;  %v7073_v62 = vadd.f32 %v7072_v52, %v13064_v53 }
0x1373   : > { %v7103_v0 = vpop.f32.mrf.mxu0  ;;  %v7132_v46 = vpop.f32.mrf.mxu1  ;;  %v7156_v19 = vmax.f32 %v7044_v40, 0.0  ;;  %v7157_v47 = vmax.f32 %v7073_v62, 0.0 }
0x1374   : > { %v7104_v61 = vadd.f32 %v7103_v0, %v13056_v55  ;;  %v7133_v6 = vadd.f32 %v7132_v46, %v13058_v22 }
0x1376   : > { %v7162_v31 = vmax.f32 %v7104_v61, 0.0  ;;  %v7163_v63 = vmax.f32 %v7133_v6, 0.0 }
0x1378   : > { %v7182_v32 = vpack.c.bf16 %v7162_v31, %v7158_v1  ;;  %v7183_v44 = vpack.c.bf16 %v7163_v63, %v7159_v20  ;;  %v7045_v14 = vpop.f32.mrf.mxu2  ;;  %v7074_v9 = vpop.f32.mrf.mxu3 }
0x1379   : > { %v7046_v15 = vadd.f32 %v7045_v14, %v13062_v5  ;;  %v7075_v7 = vadd.f32 %v7074_v9, %v13064_v53 }
0x137a   : > { %7526 = vmatmul.bf16.gmra.mxu0 %v7182_v32  ;;  %7555 = vmatmul.bf16.gmra.mxu1 %v7183_v44 }
0x137b   : > { %v7160_v36 = vmax.f32 %v7046_v15, 0.0  ;;  %v7161_v57 = vmax.f32 %v7075_v7, 0.0 }
0x137d   : > { %v7180_v51 = vpack.c.bf16 %v7160_v36, %v7156_v19  ;;  %v7181_v10 = vpack.c.bf16 %v7161_v57, %v7157_v47 }
0x137f   : > { %7468 = vmatmul.bf16.gmra.mxu2 %v7180_v51  ;;  %7497 = vmatmul.bf16.gmra.mxu3 %v7181_v10 }
0x13c5   : > { %v7106_v58 = vpop.f32.mrf.mxu0  ;;  %v7135_v12 = vpop.f32.mrf.mxu1 }
0x13c6   : > { %v7107_v56 = vadd.f32 %v7106_v58, %v13056_v55  ;;  %v7136_v54 = vadd.f32 %v7135_v12, %v13058_v22 }
0x13c8   : > { %v7166_v30 = vmax.f32 %v7107_v56, 0.0  ;;  %v7167_v8 = vmax.f32 %v7136_v54, 0.0 }
0x13ca   : > { %v7048_v41 = vpop.f32.mrf.mxu2  ;;  %v7077_v59 = vpop.f32.mrf.mxu3 }
0x13cb   : > { %v7049_v29 = vadd.f32 %v7048_v41, %v13062_v5  ;;  %v7078_v27 = vadd.f32 %v7077_v59, %v13064_v53 }
0x13cd   : > { %v7108_v26 = vpop.f32.mrf.mxu0  ;;  %v7137_v3 = vpop.f32.mrf.mxu1 }
0x13ce   : > { %v7109_v42 = vadd.f32 %v7108_v26, %v13056_v55  ;;  %v7138_v11 = vadd.f32 %v7137_v3, %v13058_v22  ;;  %v7164_v55 = vmax.f32 %v7049_v29, 0.0  ;;  %v7165_v22 = vmax.f32 %v7078_v27, 0.0 }
0x13d0   : > { %v7170_v2 = vmax.f32 %v7109_v42, 0.0  ;;  %v7171_v34 = vmax.f32 %v7138_v11, 0.0 }
0x13d2   : > { %v7186_v13 = vpack.c.bf16 %v7170_v2, %v7166_v30  ;;  %v7187_v33 = vpack.c.bf16 %v7171_v34, %v7167_v8  ;;  %v7050_v49 = vpop.f32.mrf.mxu2  ;;  %v7079_v37 = vpop.f32.mrf.mxu3 }
0x13d3   : > { %v7051_v43 = vadd.f32 %v7050_v49, %v13062_v5  ;;  %v7080_v21 = vadd.f32 %v7079_v37, %v13064_v53 }
0x13d4   : > { %7531 = vmatmul.bf16.gmra.mxu0 %v7186_v13  ;;  %7560 = vmatmul.bf16.gmra.mxu1 %v7187_v33 }
0x13d5   : > { %v7168_v28 = vmax.f32 %v7051_v43, 0.0  ;;  %v7169_v35 = vmax.f32 %v7080_v21, 0.0 }
0x13d7   : > { %v7184_v50 = vpack.c.bf16 %v7168_v28, %v7164_v55  ;;  %v7185_v38 = vpack.c.bf16 %v7169_v35, %v7165_v22  ;;  %v7517_v52 = vpop.f32.mrf.mxu0  ;;  %v7546_v45 = vpop.f32.mrf.mxu1 }
0x13d9   : > { %7473 = vmatmul.bf16.gmra.mxu2 %v7184_v50  ;;  %7502 = vmatmul.bf16.gmra.mxu3 %v7185_v38 }
0x13df   : > { %v7519_v46 = vpop.f32.mrf.mxu0  ;;  %v7548_v6 = vpop.f32.mrf.mxu1 }
0x13e2   : > { %v7459_v5 = vpop.f32.mrf.mxu2  ;;  %v7488_v0 = vpop.f32.mrf.mxu3 }
0x13e3   : > { %v7460_v53 = vadd.f32 %v13099_v18, %v7459_v5 }
0x13e5   : > { %v7489_v61 = vadd.f32 %v7488_v0, %v7460_v53 }
0x13e7   : > { %v7518_v1 = vadd.f32 %v7517_v52, %v7489_v61  ;;  %v7522_v44 = vpop.f32.mrf.mxu0  ;;  %v7551_v9 = vpop.f32.mrf.mxu1 }
0x13e9   : > { %v7547_v20 = vadd.f32 %v7546_v45, %v7518_v1 }
0x13ea   : > { %v7461_v31 = vpop.f32.mrf.mxu2  ;;  %v7490_v63 = vpop.f32.mrf.mxu3 }
0x13eb   : > { %v7462_v40 = vadd.f32 %v13099_v18, %v7461_v31  ;;  %v7566_v62 = vadd.f32 %v7547_v20, %v12998_v4 }
0x13ed   : > { %v7491_v32 = vadd.f32 %v7490_v63, %v7462_v40  ;;  %7578 = vadd.xlane.f32.xlu0 %v7566_v62 }
0x13ef   : > { %v7520_v14 = vadd.f32 %v7519_v46, %v7491_v32  ;;  %v7524_v10 = vpop.f32.mrf.mxu0  ;;  %v7553_v56 = vpop.f32.mrf.mxu1 }
0x13f1   : > { %v7549_v15 = vadd.f32 %v7548_v6, %v7520_v14 }
0x13f2   : > { %v7464_v7 = vpop.f32.mrf.mxu2  ;;  %v7493_v19 = vpop.f32.mrf.mxu3 }
0x13f3   : > { %v7465_v47 = vadd.f32 %v13099_v18, %v7464_v7  ;;  %v7567_v36 = vadd.f32 %v7549_v15, %v13001_v24 }
0x13f5   : > { %v7494_v57 = vadd.f32 %v7493_v19, %v7465_v47  ;;  %7580 = vadd.xlane.f32.xlu1 %v7567_v36 }
0x13f7   : > { %v7523_v51 = vadd.f32 %v7522_v44, %v7494_v57  ;;  %v7527_v8 = vpop.f32.mrf.mxu0  ;;  %v7556_v34 = vpop.f32.mrf.mxu1 }
0x13f9   : > { %v7552_v58 = vadd.f32 %v7551_v9, %v7523_v51 }
0x13fa   : > { %v7466_v12 = vpop.f32.mrf.mxu2  ;;  %v7495_v41 = vpop.f32.mrf.mxu3 }
0x13fb   : > { %v7467_v4 = vadd.f32 %v13099_v18, %v7466_v12  ;;  %v7568_v59 = vadd.f32 %v7552_v58, %v13011_v48 }
0x13fd   : > { %v7496_v54 = vadd.f32 %v7495_v41, %v7467_v4  ;;  %7582 = vadd.xlane.f32.xlu2 %v7568_v59 }
0x13ff   : > { %v7525_v26 = vadd.f32 %v7524_v10, %v7496_v54  ;;  %v7529_v43 = vpop.f32.mrf.mxu0  ;;  %v7558_v55 = vpop.f32.mrf.mxu1 }
0x1401   : > { %v7554_v3 = vadd.f32 %v7553_v56, %v7525_v26 }
0x1402   : > { %v7469_v42 = vpop.f32.mrf.mxu2  ;;  %v7498_v11 = vpop.f32.mrf.mxu3 }
0x1403   : > { %v7470_v24 = vadd.f32 %v13099_v18, %v7469_v42  ;;  %v7569_v30 = vadd.f32 %v7554_v3, %v13014_v16 }
0x1405   : > { %v7499_v2 = vadd.f32 %v7498_v11, %v7470_v24  ;;  %7584 = vadd.xlane.f32.xlu0 %v7569_v30 }
0x1407   : > { %v7528_v29 = vadd.f32 %v7527_v8, %v7499_v2 }
0x1409   : > { %v7557_v27 = vadd.f32 %v7556_v34, %v7528_v29 }
0x140a   : > { %v7471_v13 = vpop.f32.mrf.mxu2  ;;  %v7500_v49 = vpop.f32.mrf.mxu3 }
0x140b   : > { %v7472_v48 = vadd.f32 %v13099_v18, %v7471_v13  ;;  %v7570_v33 = vadd.f32 %v7557_v27, %v13023_v25 }
0x140d   : > { %v7501_v37 = vadd.f32 %v7500_v49, %v7472_v48  ;;  %7586 = vadd.xlane.f32.xlu1 %v7570_v33 }
0x140f   : > { %v7530_v21 = vadd.f32 %v7529_v43, %v7501_v37 }
0x1411   : > { %v7559_v22 = vadd.f32 %v7558_v55, %v7530_v21 }
0x1413   : > { %v7571_v16 = vadd.f32 %v7559_v22, %v13026_v17 }
0x1415   : > { %7588 = vadd.xlane.f32.xlu2 %v7571_v16 }
0x1451   : > { %v7532_v38 = vpop.f32.mrf.mxu0  ;;  %v7561_v45 = vpop.f32.mrf.mxu1 }
0x1459   : > { %v7534_v63 = vpop.f32.mrf.mxu0  ;;  %v7563_v14 = vpop.f32.mrf.mxu1 }
0x145c   : > { %v7474_v28 = vpop.f32.mrf.mxu2  ;;  %v7503_v35 = vpop.f32.mrf.mxu3 }
0x145d   : > { %v7475_v50 = vadd.f32 %v13099_v18, %v7474_v28 }
0x145f   : > { %v7504_v52 = vadd.f32 %v7503_v35, %v7475_v50 }
0x1460   : > { %v7579_v5 = vpop.xlane.xlu0 %7578 }
0x1461   : > { %v7533_v0 = vadd.f32 %v7532_v38, %v7504_v52  ;;  %v7594_v25 = vmul.f32 %v7579_v5, %v13461_v60 }
0x1463   : > { %v7562_v53 = vadd.f32 %v7561_v45, %v7533_v0  ;;  %v13115_v46 = vsub.f32 %v7566_v62, %v7594_v25 }
0x1464   : > { %v7476_v61 = vpop.f32.mrf.mxu2  ;;  %v7505_v20 = vpop.f32.mrf.mxu3 }
0x1465   : > { %v7477_v6 = vadd.f32 %v13099_v18, %v7476_v61  ;;  %v7572_v17 = vadd.f32 %v7562_v53, %v13049_v39  ;;  %v7610_v1 = vmul.f32 %v13115_v46, %v13115_v46 }
0x1467   : > { %v7506_v31 = vadd.f32 %v7505_v20, %v7477_v6  ;;  %7590 = vadd.xlane.f32.xlu0 %v7572_v17  ;;  %7618 = vadd.xlane.f32.xlu2 %v7610_v1 }
0x1468   : > { %v7581_v40 = vpop.xlane.xlu1 %7580 }
0x1469   : > { %v7535_v32 = vadd.f32 %v7534_v63, %v7506_v31  ;;  %v7595_v44 = vmul.f32 %v7581_v40, %v13461_v60 }
0x146b   : > { %v7564_v62 = vadd.f32 %v7563_v14, %v7535_v32  ;;  %v13122_v9 = vsub.f32 %v7567_v36, %v7595_v44 }
0x146d   : > { %v7611_v18 = vmul.f32 %v13122_v9, %v13122_v9  ;;  %v7573_v39 = vadd.f32 %v7564_v62, %v13052_v23 }
0x146f   : > { %7620 = vadd.xlane.f32.xlu0 %v7611_v18  ;;  %7592 = vadd.xlane.f32.xlu1 %v7573_v39 }
0x1470   : > { %v7583_v15 = vpop.xlane.xlu2 %7582 }
0x1471   : > { %v7596_v7 = vmul.f32 %v7583_v15, %v13461_v60 }
0x1473   : > { %v13128_v19 = vsub.f32 %v7568_v59, %v7596_v7 }
0x1475   : > { %v7612_v47 = vmul.f32 %v13128_v19, %v13128_v19 }
0x1477   : > { %7622 = vadd.xlane.f32.xlu1 %v7612_v47 }
0x1478   : > { %v7585_v57 = vpop.xlane.xlu0 %7584 }
0x1479   : > { %v7597_v36 = vmul.f32 %v7585_v57, %v13461_v60 }
0x147b   : > { %v13133_v51 = vsub.f32 %v7569_v30, %v7597_v36 }
0x147d   : > { %v7613_v10 = vmul.f32 %v13133_v51, %v13133_v51 }
0x147f   : > { %7624 = vadd.xlane.f32.xlu2 %v7613_v10 }
0x1480   : > { %v7587_v23 = vpop.xlane.xlu1 %7586 }
0x1481   : > { %v7598_v58 = vmul.f32 %v7587_v23, %v13461_v60 }
0x1483   : > { %v13138_v12 = vsub.f32 %v7570_v33, %v7598_v58 }
0x1485   : > { %v7614_v41 = vmul.f32 %v13138_v12, %v13138_v12 }
0x1487   : > { %7626 = vadd.xlane.f32.xlu0 %v7614_v41 }
0x1488   : > { %v7589_v4 = vpop.xlane.xlu2 %7588 }
0x1489   : > { %v7599_v59 = vmul.f32 %v7589_v4, %v13461_v60 }
0x148b   : > { %v13143_v56 = vsub.f32 %v7571_v16, %v7599_v59 }
0x148d   : > { %v7615_v54 = vmul.f32 %v13143_v56, %v13143_v56 }
0x148f   : > { %7628 = vadd.xlane.f32.xlu1 %v7615_v54 }
0x14da   : > { %v7591_v26 = vpop.xlane.xlu0 %7590  ;;  %v7619_v34 = vpop.xlane.xlu2 %7618 }
0x14db   : > { %v7600_v3 = vmul.f32 %v7591_v26, %v13461_v60  ;;  %v7634_v13 = vmul.f32 %v7619_v34, %v13461_v60  ;;  %v9312_v34 = vld [vmem:[#allocation16 + $0x30] sm:$0xf] }
0x14dd   : > { %v13148_v42 = vsub.f32 %v7572_v17, %v7600_v3  ;;  %v7642_v21 = vadd.f32 1e-05, %v7634_v13 }
0x14df   : > { %v7616_v11 = vmul.f32 %v13148_v42, %v13148_v42  ;;  %10134 = vrsqrt.f32 %v7642_v21  ;;  %vm7656_vm7 = vweird.f32 %v7642_v21 }
0x14e1   : > { %7630 = vadd.xlane.f32.xlu2 %v7616_v11 }
0x14e2   : > { %v7593_v24 = vpop.xlane.xlu1 %7592  ;;  %v7621_v29 = vpop.xlane.xlu0 %7620 }
0x14e3   : > { %v7601_v30 = vmul.f32 %v7593_v24, %v13461_v60  ;;  %v7635_v33 = vmul.f32 %v7621_v29, %v13461_v60  ;;  %v9625_v24 = vld [vmem:[#allocation16 + $0x74] sm:$0xf] }
0x14e5   : > { %v13153_v8 = vsub.f32 %v7573_v39, %v7601_v30  ;;  %v7643_v22 = vadd.f32 1e-05, %v7635_v33  ;;  %v13168_v45 = vpop.eup %10134  ;;  %v9346_v30 = vld [vmem:[#allocation16 + $0x78] sm:$0xf0]  ;;  %v9626_v33 = vld [vmem:[#allocation16 + $0x74] sm:$0xf0] }
0x14e6   : > { %v7651_v61 = vmul.f32 %v13168_v45, %v7642_v21  ;;  %vm7657_vm5 = vweird.f32 %v13168_v45 }
0x14e7   : > { %v7617_v2 = vmul.f32 %v13153_v8, %v13153_v8  ;;  %10136 = vrsqrt.f32 %v7643_v22  ;;  %vm13197_vm8 = vmor %vm7656_vm7, %vm7657_vm5  ;;  %vm7666_vm9 = vweird.f32 %v7643_v22 }
0x14e8   : > { %v7652_v63 = vmul.f32 %v13168_v45, %v7651_v61  ;;  %v9624_v61 = vld [vmem:[#allocation16 + $0x64] sm:$0xf0] }
0x14e9   : > { %7632 = vadd.xlane.f32.xlu0 %v7617_v2  ;;  %v9344_v2 = vld [vmem:[#allocation16 + $0x70] sm:$0xf] }
0x14ea   : > { %v7623_v27 = vpop.xlane.xlu1 %7622  ;;  %v7653_v18 = vmul.f32 0.5, %v7652_v63 }
0x14eb   : > { %v7636_v37 = vmul.f32 %v7623_v27, %v13461_v60 }
0x14ec   : > { %v7654_v36 = vsub.f32 1.5, %v7653_v18 }
0x14ed   : > { %v7644_v28 = vadd.f32 1e-05, %v7636_v37  ;;  %v13170_v5 = vpop.eup %10136  ;;  %v9345_v37 = vor.u32 %v9626_v33, %v9344_v2  ;;  %v9314_v2 = vld [vmem:[#allocation16 + $0x38] sm:$0xf0] }
0x14ee   : > { %v7661_v6 = vmul.f32 %v13170_v5, %v7643_v22  ;;  %vm7667_vm6 = vweird.f32 %v13170_v5  ;;  %v7655_v54 = vmul.f32 %v13168_v45, %v7654_v36  ;;  %v9322_v36 = vld [vmem:[#allocation16 + $0x48] sm:$0xf0] }
0x14ef   : > { %10138 = vrsqrt.f32 %v7644_v28  ;;  %vm13203_vm11 = vmor %vm7666_vm9, %vm7667_vm6  ;;  %vm7676_vm12 = vweird.f32 %v7644_v28  ;;  %7965 = vmatpush.bf16.msra.mxu2 %v9345_v37 }
0x14f0   : > { %v7662_v40 = vmul.f32 %v13170_v5, %v7661_v6  ;;  %v7659_v21 = vsel %vm13197_vm8, %v13168_v45, %v7655_v54  ;;  %v13247_v6 = vld [vmem:[%s13436_s7 + $0x1] ss:$0 sm:$0xff] }
0x14f2   : > { %v7625_v48 = vpop.xlane.xlu2 %7624  ;;  %v7663_v39 = vmul.f32 0.5, %v7662_v40 }
0x14f3   : > { %v7637_v43 = vmul.f32 %v7625_v48, %v13461_v60  ;;  %v9349_v48 = vor.u32 %v9625_v24, %v9346_v30  ;;  %v9617_v30 = vld [vmem:[#allocation16 + $0x34] sm:$0xf] }
0x14f4   : > { %v7664_v10 = vsub.f32 1.5, %v7663_v39 }
0x14f5   : > { %v7645_v35 = vadd.f32 1e-05, %v7637_v43  ;;  %v13172_v0 = vpop.eup %10138  ;;  %7978 = vmatpush.bf16.msrb.mxu3 %v9349_v48 }
0x14f6   : > { %v7671_v17 = vmul.f32 %v13172_v0, %v7644_v28  ;;  %vm7677_vm10 = vweird.f32 %v13172_v0  ;;  %v7665_v3 = vmul.f32 %v13170_v5, %v7664_v10  ;;  %v9338_v28 = vld [vmem:[#allocation16 + $0x68] sm:$0xf0]  ;;  %v9320_v10 = vld [vmem:[#allocation16 + $0x40] sm:$0xf] }
0x14f7   : > { %10140 = vrsqrt.f32 %v7645_v35  ;;  %vm7686_vm1 = vweird.f32 %v7645_v35  ;;  %vm13211_vm13 = vmor %vm7676_vm12, %vm7677_vm10 }
0x14f8   : > { %v7672_v32 = vmul.f32 %v13172_v0, %v7671_v17  ;;  %v7730_v17 = vmul.f32 %v7659_v21, %v13115_v46  ;;  %v9621_v46 = vld [vmem:[#allocation16 + $0x54] sm:$0xf] }
0x14fa   : > { %v7627_v49 = vpop.xlane.xlu0 %7626  ;;  %v7673_v15 = vmul.f32 0.5, %v7672_v32  ;;  %v9330_v32 = vld [vmem:[#allocation16 + $0x58] sm:$0xf0] }
0x14fb   : > { %v7638_v55 = vmul.f32 %v7627_v49, %v13461_v60 }
0x14fc   : > { %v7674_v23 = vsub.f32 1.5, %v7673_v15 }
0x14fd   : > { %v13162_v50 = vadd.f32 1e-05, %v7638_v55  ;;  %v13175_v25 = vpop.eup %10140  ;;  %v7669_v55 = vsel %vm13203_vm11, %v13170_v5, %v7665_v3 }
0x14fe   : > { %v7681_v1 = vmul.f32 %v13175_v25, %v7645_v35  ;;  %vm7687_vm0 = vweird.f32 %v13175_v25  ;;  %v7675_v11 = vmul.f32 %v13172_v0, %v7674_v23  ;;  %v9336_v35 = vld [vmem:[#allocation16 + $0x60] sm:$0xf] }
0x14ff   : > { %10142 = vrsqrt.f32 %v13162_v50  ;;  %vm13217_vm14 = vmor %vm7686_vm1, %vm7687_vm0  ;;  %vm7696_vm15 = vweird.f32 %v13162_v50  ;;  %vm7869_vm1 = vcmask 1041409  }
0x1500   : > { %v7682_v44 = vmul.f32 %v13175_v25, %v7681_v1  ;;  %v7679_v22 = vsel %vm13211_vm13, %v13172_v0, %v7675_v11  ;;  %v9337_v0 = vor.u32 %v9624_v61, %v9336_v35  ;;  %v9306_v35 = vld [vmem:[#allocation16 + $0x28] sm:$0xf0]  ;;  %v9296_v61 = vld [vmem:[#allocation16 + $0x10] sm:$0xf]  ;;  %vm7873_vm13 = vcmask 1043459  }
0x1501   : > { %v7732_v1 = vmul.f32 %v7679_v22, %v13128_v19 }
0x1502   : > { %v7629_v16 = vpop.xlane.xlu1 %7628  ;;  %v7683_v7 = vmul.f32 0.5, %v7682_v44  ;;  %7966 = vmatpush.bf16.msra.mxu2 %v9337_v0  ;;  %v9333_v44 = vor.u32 %v9621_v46, %v9330_v32  ;;  %v9611_v32 = vld [vmem:[#allocation16 + $0x4] sm:$0xf] }
0x1503   : > { %v7639_v38 = vmul.f32 %v7629_v16, %v13461_v60  ;;  %v9623_v16 = vld [vmem:[#allocation16 + $0x64] sm:$0xf]  ;;  %v7743_v15 = vmul.f32 %v13247_v6, %v7732_v1  ;;  %v9298_v1 = vld [vmem:[#allocation16 + $0x18] sm:$0xf0] }
0x1504   : > { %v7684_v58 = vsub.f32 1.5, %v7683_v7  ;;  %v9341_v5 = vor.u32 %v9623_v16, %v9338_v28  ;;  %v9615_v28 = vld [vmem:[#allocation16 + $0x24] sm:$0xf] }
0x1505   : > { %v13166_v52 = vadd.f32 1e-05, %v7639_v38  ;;  %v13177_v53 = vpop.eup %10142 }
0x1506   : > { %v7691_v20 = vmul.f32 %v13177_v53, %v13162_v50  ;;  %vm7697_vm2 = vweird.f32 %v13177_v53  ;;  %v7685_v29 = vmul.f32 %v13175_v25, %v7684_v58  ;;  %7979 = vmatpush.bf16.msrb.mxu3 %v9341_v5  ;;  %v9620_v58 = vld [vmem:[#allocation16 + $0x44] sm:$0xf0] }
0x1507   : > { %10144 = vrsqrt.f32 %v13166_v52  ;;  %vm13222_vm3 = vmor %vm7696_vm15, %vm7697_vm2  ;;  %vm7706_vm5 = vweird.f32 %v13166_v52  ;;  %v9616_v5 = vld [vmem:[#allocation16 + $0x24] sm:$0xf0]  ;;  %vm7871_vm2 = vcmask 1042434   ;;  %vm7877_vm15 = vcmask 1045509  }
0x1508   : > { %v7692_v14 = vmul.f32 %v13177_v53, %v7691_v20  ;;  %v7689_v50 = vsel %vm13217_vm14, %v13175_v25, %v7685_v29  ;;  %v7731_v25 = vmul.f32 %v7669_v55, %v13122_v9  ;;  %v9328_v9 = vld [vmem:[#allocation16 + $0x50] sm:$0xf]  ;;  %v10568_v29 = vmov 8.0  }
0x1509   : > { %vm7875_vm14 = vcmask 1044484  }
0x150a   : > { %v7693_v47 = vmul.f32 0.5, %v7692_v14  ;;  %v9622_v14 = vld [vmem:[#allocation16 + $0x54] sm:$0xf0]  ;;  %v7742_v39 = vmul.f32 %v13247_v6, %v7731_v25  ;;  %7980 = vmatpush.bf16.msrb.mxu3 %v9333_v44  ;;  %v9613_v25 = vld [vmem:[#allocation16 + $0x14] sm:$0xf] }
0x150b   : > { %v9329_v18 = vor.u32 %v9622_v14, %v9328_v9  ;;  %v9290_v9 = vld [vmem:[#allocation16 + $0x8] sm:$0xf0]  ;;  %v9288_v14 = vld [vmem:[#allocation16] sm:$0xf] }
0x150c   : > { %v7694_v41 = vsub.f32 1.5, %v7693_v47 }
0x150d   : > { %v13185_v31 = vpop.eup %10144  ;;  %7967 = vmatpush.bf16.msra.mxu2 %v9329_v18  ;;  %v9612_v18 = vld [vmem:[#allocation16 + $0x4] sm:$0xf0] }
0x150e   : > { %v7701_v62 = vmul.f32 %v13185_v31, %v13166_v52  ;;  %v7695_v27 = vmul.f32 %v13177_v53, %v7694_v41  ;;  %vm7707_vm4 = vweird.f32 %v13185_v31  ;;  %v7733_v52 = vmul.f32 %v7689_v50, %v13133_v51  ;;  %v13269_v51 = vld [vmem:[%s13437_s10 + $0x1] ss:$0 sm:$0xff] }
0x150f   : > { %vm13254_vm6 = vmor %vm7706_vm5, %vm7707_vm4  ;;  %v9321_v41 = vor.u32 %v9620_v58, %v9320_v10  ;;  %v7753_v59 = vadd.f32 %v13269_v51, %v7742_v39  ;;  %v7754_v54 = vadd.f32 %v13269_v51, %v7743_v15  ;;  %v9289_v58 = vor.u32 %v9612_v18, %v9288_v14  ;;  %v9631_v14 = vld [vmem:[#allocation17 + $0x20] sm:$0xff] }
0x1510   : > { %v7702_v57 = vmul.f32 %v13185_v31, %v7701_v62  ;;  %v7699_v38 = vsel %vm13222_vm3, %v13177_v53, %v7695_v27  ;;  %v7744_v7 = vmul.f32 %v13247_v6, %v7733_v52  ;;  %v9317_v27 = vor.u32 %v9617_v30, %v9314_v2 }
0x1511   : > { %v7734_v63 = vmul.f32 %v7699_v38, %v13138_v12  ;;  %v7741_v12 = vmul.f32 %v13247_v6, %v7730_v17  ;;  %7968 = vmatpush.bf16.msra.mxu2 %v9321_v41  ;;  %v7766_v43 = vrot.slane %v7753_v59, 4  ;;  %v7772_v21 = vrot.slane %v7754_v54, 4  ;;  %v9614_v17 = vld [vmem:[#allocation16 + $0x14] sm:$0xf0] }
0x1512   : > { %v7703_v4 = vmul.f32 0.5, %v7702_v57  ;;  %v9619_v57 = vld [vmem:[#allocation16 + $0x44] sm:$0xf]  ;;  %v7755_v3 = vadd.f32 %v13269_v51, %v7744_v7  ;;  %v9309_v38 = vor.u32 %v9615_v28, %v9306_v35  ;;  %v9301_v52 = vor.u32 %v9613_v25, %v9298_v1  ;;  %v9641_v28 = vld [vmem:[#allocation17 + $0x70] sm:$0xff] }
0x1513   : > { %v9325_v23 = vor.u32 %v9619_v57, %v9322_v36  ;;  %v9297_v46 = vor.u32 %v9614_v17, %v9296_v61  ;;  %v9293_v36 = vor.u32 %v9611_v32, %v9290_v9  ;;  %v9632_v17 = vld [vmem:[#allocation17 + $0x28] sm:$0xff]  ;;  %vm7879_vm3 = vcmask 1046534  }
0x1514   : > { %v7704_v13 = vsub.f32 1.5, %v7703_v4  ;;  %v7752_v4 = vadd.f32 %v13269_v51, %v7741_v12  ;;  %v7778_v22 = vrot.slane %v7755_v3, 4  ;;  %vm7881_vm4 = vcmask 1047559  }
0x1515   : > { %7981 = vmatpush.bf16.msrb.mxu3 %v9325_v23 }
0x1516   : > { %v7705_v45 = vmul.f32 %v13185_v31, %v7704_v13  ;;  %v9618_v13 = vld [vmem:[#allocation16 + $0x34] sm:$0xf0]  ;;  %v7760_v37 = vrot.slane %v7752_v4, 4  ;;  %v7779_v7 = vadd.f32 %v7778_v22, %v7755_v3 }
0x1517   : > { %v9313_v49 = vor.u32 %v9618_v13, %v9312_v34 }
0x1518   : > { %v7709_v19 = vsel %vm13254_vm6, %v13185_v31, %v7705_v45  ;;  %v7745_v31 = vmul.f32 %v13247_v6, %v7734_v63  ;;  %v9304_v45 = vld [vmem:[#allocation16 + $0x20] sm:$0xf]  ;;  %v7767_v63 = vadd.f32 %v7766_v43, %v7753_v59  ;;  %v7761_v15 = vadd.f32 %v7760_v37, %v7752_v4  ;;  %v9642_v37 = vld [vmem:[#allocation17 + $0x78] sm:$0xff] }
0x1519   : > { %v7735_v47 = vmul.f32 %v7709_v19, %v13143_v56  ;;  %7982 = vmatpush.bf16.msrb.mxu3 %v9317_v27  ;;  %7969 = vmatpush.bf16.msra.mxu2 %v9313_v49  ;;  %v9305_v0 = vor.u32 %v9616_v5, %v9304_v45  ;;  %v7773_v19 = vadd.f32 %v7772_v21, %v7754_v54  ;;  %v7780_v4 = vrot.slane %v7779_v7, 2  ;;  %v9634_v27 = vld [vmem:[#allocation17 + $0x38] sm:$0xff] }
0x151a   : > { %v7756_v56 = vadd.f32 %v13269_v51, %v7745_v31  ;;  %v7768_v10 = vrot.slane %v7767_v63, 2  ;;  %8127 = vmatpush.bf16.msrb.mxu0 %v9634_v27 }
0x151b   : > { %v7746_v11 = vmul.f32 %v13247_v6, %v7735_v47  ;;  %v7774_v41 = vrot.slane %v7773_v19, 2 }
0x151d   : > { %v7757_v16 = vadd.f32 %v13269_v51, %v7746_v11  ;;  %7983 = vmatpush.bf16.msrb.mxu3 %v9309_v38  ;;  %7970 = vmatpush.bf16.msra.mxu2 %v9305_v0  ;;  %v7775_v34 = vadd.f32 %v7774_v41, %v7773_v19  ;;  %v9638_v41 = vld [vmem:[#allocation17 + $0x58] sm:$0xff] }
0x151f   : > { %v7776_v35 = vrot.slane %v7775_v34, 1 }
0x1521   : > { %7984 = vmatpush.bf16.msrb.mxu3 %v9301_v52  ;;  %7971 = vmatpush.bf16.msra.mxu2 %v9297_v46 }
0x1525   : > { %7985 = vmatpush.bf16.msrb.mxu3 %v9293_v36  ;;  %7972 = vmatpush.bf16.msra.mxu2 %v9289_v58 }
0x1529   : > { %8140 = vmatpush.bf16.msrb.mxu2 %v9642_v37 }
0x152d   : > { %8141 = vmatpush.bf16.msrb.mxu2 %v9641_v28 }
0x1554   : > { %v7631_v20 = vpop.xlane.xlu2 %7630 }
0x1555   : > { %v7640_v40 = vmul.f32 %v7631_v20, %v13461_v60 }
0x1557   : > { %v13264_v62 = vadd.f32 1e-05, %v7640_v40  ;;  %v7790_v40 = vrot.slane %v7757_v16, 4 }
0x1559   : > { %10146 = vrsqrt.f32 %v13264_v62  ;;  %vm7716_vm8 = vweird.f32 %v13264_v62  ;;  %v7791_v23 = vadd.f32 %v7790_v40, %v7757_v16  ;;  %v7777_v40 = vadd.f32 %v7776_v35, %v7775_v34 }
0x155a   : > { %10148 = vrcp.f32 %v10568_v29 }
0x155b   : > { %v7792_v30 = vrot.slane %v7791_v23, 2 }
0x155c   : > { %v7633_v26 = vpop.xlane.xlu0 %7632 }
0x155d   : > { %v7641_v24 = vmul.f32 %v7633_v26, %v13461_v60  ;;  %v7784_v60 = vrot.slane %v7756_v56, 4  ;;  %v7762_v26 = vrot.slane %v7761_v15, 2 }
0x155f   : > { %v10147_v48 = vpop.eup %10146  ;;  %v13285_v33 = vadd.f32 1e-05, %v7641_v24  ;;  %v7785_v31 = vadd.f32 %v7784_v60, %v7756_v56  ;;  %v7769_v24 = vadd.f32 %v7768_v10, %v7767_v63  ;;  %v7763_v13 = vadd.f32 %v7762_v26, %v7761_v15  ;;  %v9640_v63 = vld [vmem:[#allocation17 + $0x68] sm:$0xff] }
0x1560   : > { %v7711_v55 = vmul.f32 %v10147_v48, %v13264_v62  ;;  %v13290_v53 = vpop.eup %10148  ;;  %vm7717_vm7 = vweird.f32 %v10147_v48  ;;  %v7793_v60 = vadd.f32 %v7792_v30, %v7791_v23  ;;  %8142 = vmatpush.bf16.msrb.mxu2 %v9640_v63  ;;  %v9630_v23 = vld [vmem:[#allocation17 + $0x18] sm:$0xff] }
0x1561   : > { %10150 = vrsqrt.f32 %v13285_v33  ;;  %v7809_v39 = vmul.f32 8.0, %v13290_v53  ;;  %vm7718_vm9 = vmor %vm7716_vm8, %vm7717_vm7  ;;  %v7786_v11 = vrot.slane %v7785_v31, 2  ;;  %vm7726_vm11 = vweird.f32 %v13285_v33 }
0x1562   : > { %v7712_v50 = vmul.f32 %v10147_v48, %v7711_v55  ;;  %v9633_v55 = vld [vmem:[#allocation17 + $0x30] sm:$0xff]  ;;  %v7770_v22 = vrot.slane %v7769_v24, 1  ;;  %v7764_v38 = vrot.slane %v7763_v13, 1  ;;  %vm7813_vm0 = vweird.f32 %v13290_v53 }
0x1563   : > { %v7810_v56 = vsub.f32 1.0, %v7809_v39  ;;  %v7787_v43 = vadd.f32 %v7786_v11, %v7785_v31  ;;  %8128 = vmatpush.bf16.msrb.mxu0 %v9633_v55  ;;  %v7794_v1 = vrot.slane %v7793_v60, 1  ;;  %v9629_v11 = vld [vmem:[#allocation17 + $0x10] sm:$0xff] }
0x1564   : > { %v7713_v20 = vmul.f32 0.5, %v7712_v50  ;;  %v7771_v25 = vadd.f32 %v7770_v22, %v7769_v24  ;;  %v7765_v46 = vadd.f32 %v7764_v38, %v7763_v13 }
0x1566   : > { %v7714_v44 = vsub.f32 1.5, %v7713_v20 }
0x1567   : > { %v10151_v12 = vpop.eup %10150  ;;  %8129 = vmatpush.bf16.msrb.mxu0 %v9632_v17  ;;  %v7847_v17 = vld [vmem:[%s13475_s9] sm:$0x3]  ;;  %s10470_s9 = sshra.s32 %s8170_s8, 4  ;;  %s10471_s9 = int_to_ptr.hbm [resolvable:$true] %s10470_s9 }
0x1568   : > { %v7715_v47 = vmul.f32 %v10147_v48, %v7714_v44  ;;  %v7721_v57 = vmul.f32 %v10151_v12, %v13285_v33  ;;  %vm7727_vm10 = vweird.f32 %v10151_v12  ;;  %v7788_v33 = vrot.slane %v7787_v43, 1  ;;  %s10472_s19 = scalar_lea.hbm %s10471_s9, 8  ;;  %p10477_p12 = scmp.lt.s32.totalorder %s10471_s9, %s13477_s16 }
0x1569   : > { %vm7728_vm12 = vmor %vm7726_vm11, %vm7727_vm10  ;;  %p10473_p1 = scmp.ne.s32.totalorder %s10471_s9, %s10472_s19  ;;  %p10478_p7 = scmp.lt.s32.totalorder %s10476_s14, %s10472_s19 }
0x156a   : > { %v7719_v59 = vsel %vm7718_vm9, %v10147_v48, %v7715_v47  ;;  %v7722_v54 = vmul.f32 %v10151_v12, %v7721_v57  ;;  %v7781_v48 = vadd.f32 %v7780_v4, %v7779_v7  ;;  %v7789_v44 = vadd.f32 %v7788_v33, %v7787_v43  ;;  %v9639_v7 = vld [vmem:[#allocation17 + $0x60] sm:$0xff] }
0x156b   : > { %v7736_v3 = vmul.f32 %v7719_v59, %v13148_v42  ;;  %v7811_v42 = vmul.f32 %v13290_v53, %v7810_v56  ;;  %8130 = vmatpush.bf16.msrb.mxu0 %v9631_v14  ;;  %8143 = vmatpush.bf16.msrb.mxu2 %v9639_v7  ;;  %v9635_v33 = vld [vmem:[#allocation17 + $0x40] sm:$0xff]  ;;  %p10474_p3 = pnand %p10473_p1, %p10783_p4  ;;  %p10479_p8 = por %p10478_p7, %p10477_p12 }
0x156c   : > { %v7723_v62 = vmul.f32 0.5, %v7722_v54  ;;  %v7782_v45 = vrot.slane %v7781_v48, 1 }
0x156d   : > { %v7747_v2 = vmul.f32 %v13247_v6, %v7736_v3  ;;  %v7812_v0 = vadd.f32 %v13290_v53, %v7811_v42  ;;  %p10475_p5 = pneg %p10474_p3 }
0x156e   : > { %v7724_v29 = vsub.f32 1.5, %v7723_v62  ;;  %v7783_v32 = vadd.f32 %v7782_v45, %v7781_v48 }
0x156f   : > { %v7758_v49 = vadd.f32 %v13269_v51, %v7747_v2  ;;  %v7814_v19 = vsel %vm7813_vm0, %v13290_v53, %v7812_v0  ;;  %8131 = vmatpush.bf16.msrb.mxu0 %v9630_v23  ;;  %8144 = vmatpush.bf16.msrb.mxu2 %v9638_v41  ;;  %v9637_v2 = vld [vmem:[#allocation17 + $0x50] sm:$0xff]  ;;  %v9627_v0 = vld [vmem:[#allocation17] sm:$0xff]  ;;  %p10480_p9 = pnand %p10479_p8, %p10475_p5 }
0x1570   : > { %v7725_v21 = vmul.f32 %v10151_v12, %v7724_v29  ;;  %v7816_v18 = vmul.f32 %v7814_v19, %v7771_v25  ;;  %v7815_v31 = vmul.f32 %v7814_v19, %v7765_v46  ;;  %v7818_v47 = vmul.f32 %v7814_v19, %v7783_v32 }
0x1571   : > { %v7796_v16 = vrot.slane %v7758_v49, 4  ;;  %v7819_v10 = vmul.f32 %v7814_v19, %v7789_v44  ;;  %v7849_v25 = vperm.slane %v7847_v17, 0 }
0x1572   : > { %v7729_v50 = vsel %vm7728_vm12, %v10151_v12, %v7725_v21  ;;  %v7795_v12 = vadd.f32 %v7794_v1, %v7793_v60  ;;  %v7823_v26 = vpack.c.bf16 %v7815_v31, %v7815_v31  ;;  %v7826_v4 = vpack.c.bf16 %v7818_v47, %v7818_v47 }
0x1573   : > { %v7797_v5 = vadd.f32 %v7796_v16, %v7758_v49  ;;  %v7737_v61 = vmul.f32 %v7729_v50, %v13153_v8  ;;  %v7827_v56 = vpack.c.bf16 %v7819_v10, %v7819_v10  ;;  %8132 = vmatpush.bf16.msrb.mxu0 %v9629_v11  ;;  %8145 = vmatpush.bf16.msrb.mxu2 %v9637_v2  ;;  %v7850_v1 = vperm.slane %v7847_v17, 1 }
0x1574   : > { %v7820_v58 = vmul.f32 %v7814_v19, %v7795_v12  ;;  %v7861_v27 = vunpack.c.l.b16 %v7823_v26  ;;  %v7864_v13 = vunpack.c.l.b16 %v7826_v4 }
0x1575   : > { %v7798_v20 = vrot.slane %v7797_v5, 2  ;;  %v7748_v52 = vmul.f32 %v13247_v6, %v7737_v61  ;;  %v7817_v6 = vmul.f32 %v7814_v19, %v7777_v40  ;;  %v7865_v49 = vunpack.c.l.b16 %v7827_v56  ;;  %v9636_v61 = vld [vmem:[#allocation17 + $0x48] sm:$0xff] }
0x1576   : > { %v7828_v30 = vpack.c.bf16 %v7820_v58, %v7820_v58 }
0x1577   : > { %v7799_v9 = vadd.f32 %v7798_v20, %v7797_v5  ;;  %v7759_v8 = vadd.f32 %v13269_v51, %v7748_v52  ;;  %v7824_v51 = vpack.c.bf16 %v7816_v18, %v7816_v18  ;;  %v7825_v59 = vpack.c.bf16 %v7817_v6, %v7817_v6  ;;  %v9628_v5 = vld [vmem:[#allocation17 + $0x8] sm:$0xff]  ;;  %8146 = vmatpush.bf16.msrb.mxu2 %v9636_v61  ;;  %v9827_v18 = vld [vmem:[%s13476_s22] ss:$0 sm:$0xff] }
0x1578   : > { %v7866_v42 = vunpack.c.l.b16 %v7828_v30  ;;  %8133 = vmatpush.bf16.msrb.mxu0 %v9628_v5 }
0x1579   : > { %v7800_v39 = vrot.slane %v7799_v9, 1  ;;  %v7802_v15 = vrot.slane %v7759_v8, 4  ;;  %v7862_v62 = vunpack.c.l.b16 %v7824_v51  ;;  %v7863_v34 = vunpack.c.l.b16 %v7825_v59 }
0x157b   : > { %v7801_v57 = vadd.f32 %v7800_v39, %v7799_v9  ;;  %v7803_v36 = vadd.f32 %v7802_v15, %v7759_v8  ;;  %v7870_v43 = vsel %vm7869_vm1, %v7862_v62, %v7861_v27  ;;  %8147 = vmatpush.bf16.msrb.mxu2 %v9635_v33 }
0x157c   : > { %v7872_v55 = vsel %vm7871_vm2, %v7863_v34, %v7870_v43  ;;  %8134 = vmatpush.bf16.msrb.mxu0 %v9627_v0 }
0x157d   : > { %v7804_v53 = vrot.slane %v7803_v36, 2  ;;  %v7821_v54 = vmul.f32 %v7814_v19, %v7801_v57  ;;  %v7874_v60 = vsel %vm7873_vm13, %v7864_v13, %v7872_v55 }
0x157e   : > { %v7876_v16 = vsel %vm7875_vm14, %v7865_v49, %v7874_v60 }
0x157f   : > { %v7805_v3 = vadd.f32 %v7804_v53, %v7803_v36  ;;  %v7829_v29 = vpack.c.bf16 %v7821_v54, %v7821_v54  ;;  %v7878_v35 = vsel %vm7877_vm15, %v7866_v42, %v7876_v16 }
0x1581   : > { %v7806_v24 = vrot.slane %v7805_v3, 1  ;;  %v7867_v21 = vunpack.c.l.b16 %v7829_v29 }
0x1583   : > { %v7807_v48 = vadd.f32 %v7806_v24, %v7805_v3  ;;  %v7880_v50 = vsel %vm7879_vm3, %v7867_v21, %v7878_v35 }
0x1585   : > { %v7822_v37 = vmul.f32 %v7814_v19, %v7807_v48 }
0x1587   : > { %v7830_v22 = vpack.c.bf16 %v7822_v37, %v7822_v37 }
0x1589   : > { %v7868_v28 = vunpack.c.l.b16 %v7830_v22 }
0x158b   : > { %v7882_v38 = vsel %vm7881_vm4, %v7868_v28, %v7880_v50 }
0x158c   : > { %v7883_v45 = vpack.c.b16 %v7882_v38, %v7882_v38 }
0x158e   : > { %7973 = vmatmul.bf16.vlgmr.msra.gmra.mxu2 %v7883_v45  ;;  %7986 = vmatmul.bf16.vlgmr.msrb.gmra.mxu3 %v7883_v45 }
0x1611   : > { %v7974_v20 = vpop.f32.mrf.mxu2  ;;  %v7987_v52 = vpop.f32.mrf.mxu3 }
0x1612   : > { %v7975_v63 = vadd.f32 %v7974_v20, %v7849_v25  ;;  %v7988_v40 = vadd.f32 %v7987_v52, %v7850_v1 }
0x1614   : > { %v7991_v46 = vmax.f32 %v7975_v63, 0.0  ;;  %v7992_v32 = vmax.f32 %v7988_v40, 0.0 }
0x1616   : > { %v7993_v9 = vpack.c.bf16 %v7991_v46, %v7991_v46  ;;  %v7994_v8 = vpack.c.bf16 %v7992_v32, %v7992_v32 }
0x1618   : > { %8135 = vmatmul.bf16.vlgmr.msrb.gmra.mxu0 %v7993_v9  ;;  %8148 = vmatmul.bf16.vlgmr.msrb.gmra.mxu2 %v7994_v8 }
0x1619   : > { %v7976_v19 = vpop.f32.mrf.mxu2  ;;  %v7989_v44 = vpop.f32.mrf.mxu3 }
0x1695   : > { %v8136_v14 = vpop.f32.mrf.mxu0 }
0x1696   : > { %v8137_v12 = vadd.f32 %v9827_v18, %v8136_v14 }
0x169b   : > { %v8149_v39 = vpop.f32.mrf.mxu2 }
0x169c   : > { %v8150_v15 = vadd.f32 %v8149_v39, %v8137_v12 }
0x169d   : > { %v8138_v7 = vpop.f32.mrf.mxu0 }
0x169e   : > { %8153 = vst [vmem:[%s717_s23] sm:$0xff] %v8150_v15 }
0x169f   : > { %10483 = shalt.err (!%p10480_p9)
}
0x16a0   : > { %9700 = dma.vmem_to_hbm [thread:$0]  (%p10783_p4), %s8168_s28, 128, %s8170_s8, %s8155_s18  }
0x16a3   : > { %v8151_v6 = vpop.f32.mrf.mxu2 }
0x16a4 PF: > { %s8181_s21 = sand.u32 1, %s10530_s24   ;;  %p13478_p10 = scmp.ge.s32.totalorder %s10542_s27, 2 }
0x16a5   : > { %s8182_s17 = scalar_lea.sflag [#allocation4], %s8181_s21 }
0x16a6   : > { %p9735_p13 = pnand %p13478_p10, %p10787_p6 }
0x16a8   : > { %p9736_p11 = pneg %p9735_p13 }
0x16aa   : > { %10525 = dma.done.wait (%p9736_p11), %s8182_s17, 128  }
0x16ab   : > { %10527 = vsyncadd (%p9736_p11), %s8182_s17, 4294967168  ;;  %p35_p0 = scmp.ge.s32.totalorder %s10757_s0, 4   ;;  %s13479_s24 = smov %s10534_s25 }
0x16ac   : > { %s13480_s25 = smov %s10538_s26  ;;  %s13481_s26 = smov %s10768_s3 }
0x16ad   : > { %s13482_s27 = smov %s10757_s0  ;;  %37 = sbr.rel (!%p35_p0) target bundleno = 25 (0x19), region = 181 }
0x16b2   :  { %8188 = vsyncpa [#allocation3], 1 }
0x16b3   :  { %8190 = vsyncpa [#allocation3 + $0x1], 1 }
0x16b4   :  { %8191 = vsyncpa [#allocation6], 1 }
0x16b5   :  { %8192 = vsyncpa [#allocation9], 1 }
0x16b6   :  { %8193 = vsyncpa [#allocation12], 1 }
0x16b7   :  { %8194 = vsyncpa [#allocation15], 1 }
0x16b8   :  { %8195 = vsyncpa [#allocation18], 1 }
0x16b9   :  { %8196 = vsyncpa [#allocation4], 1 }
0x16ba   :  { %8198 = vsyncpa [#allocation4 + $0x1], 1 }

</bundles_post_ra>
